<compile_context>
chip_gen: v5e
topology: v5e:2x2
jax: 0.10.0
libtpu: 0.0.40
codegen_flags: <defaults>
</compile_context>

<pallas_src>
import functools

import jax
import jax.numpy as jnp
from jax import lax
from jax.experimental import pallas as pl
from jax.experimental.pallas import tpu as pltpu


# ---------------------------------------------------------------------------
# Fused Pallas kernel: Conv3d (tap-folded MXU GEMMs) + GroupNorm + ReLU (+res)
# ---------------------------------------------------------------------------
def _conv_gn_relu_kernel(*refs, n_inputs, cins, kT, kH, kW, pad, H, W,
                         cout, inv_n, eps, has_resid):
    # refs layout:
    #   x_0..x_{n-1}          (kT, H, W, C_i)         bf16
    #   [resid]               (R, Cout)               bf16
    #   w_0..w_{n-1}          (kW, kT*kH*C_i, Cout)   bf16
    #   gamma, beta           (1, Cout)               f32
    #   gcg (Cout, G), ggc (G, Cout)                  f32
    #   o_ref                 (R, Cout)               bf16
    #   acc_ref               (R, Cout)               f32 scratch (whole sample)
    idx = 0
    x_refs = refs[idx:idx + n_inputs]
    idx += n_inputs
    if has_resid:
        resid_ref = refs[idx]
        idx += 1
    else:
        resid_ref = None
    w_refs = refs[idx:idx + n_inputs]
    idx += n_inputs
    gamma_ref, beta_ref, gcg_ref, ggc_ref = refs[idx:idx + 4]
    o_ref = refs[idx + 4]
    acc_ref = refs[idx + 5]

    HW = H * W
    d = pl.program_id(1)

    # --- GEMM LHS per input: temporal + vertical taps folded into the
    # contraction dim via cheap outer-dim H-shifts and lane-dim concats.
    lhs = []
    for i in range(n_inputs):
        ci = cins[i]
        pieces = []
        for t in range(kT):
            xf = x_refs[i][t]                         # (H, W, ci) bf16
            for r in range(kH):
                dr = r - pad
                if dr == 0:
                    p = xf
                elif dr > 0:                          # needs x[h + dr], zero at bottom
                    p = jnp.concatenate(
                        [xf[dr:], jnp.zeros((dr, W, ci), xf.dtype)], axis=0)
                else:                                 # needs x[h + dr], zero at top
                    p = jnp.concatenate(
                        [jnp.zeros((-dr, W, ci), xf.dtype), xf[:H + dr]], axis=0)
                pieces.append(p)
        blk = pieces[0] if len(pieces) == 1 else jnp.concatenate(pieces, axis=-1)
        lhs.append(blk.reshape(HW, kT * kH * ci))

    # --- one deep-K MXU GEMM per horizontal tap s (summed over inputs)
    zs = []
    for s in range(kW):
        z = None
        for i in range(n_inputs):
            zi = jnp.dot(lhs[i], w_refs[i][s],
                         preferred_element_type=jnp.float32)  # (HW, Cout) f32
            z = zi if z is None else z + zi
        zs.append(z)

    # --- fold the kW horizontal taps as shifted adds on the conv output
    if kW == 1:
        y2d = zs[0]
    else:
        y3 = None
        for s in range(kW):
            z3 = zs[s].reshape(H, W, cout)
            ds = s - pad
            if ds == 0:
                contrib = z3
            elif ds > 0:                              # out[h,w] += z[h, w+ds]
                contrib = jnp.concatenate(
                    [z3[:, ds:, :], jnp.zeros((H, ds, cout), z3.dtype)], axis=1)
            else:                                     # out[h,w] += z[h, w+ds]
                contrib = jnp.concatenate(
                    [jnp.zeros((H, -ds, cout), z3.dtype), z3[:, :W + ds, :]],
                    axis=1)
            y3 = contrib if y3 is None else y3 + contrib
        y2d = y3.reshape(HW, cout)

    row0 = pl.multiple_of(d * HW, 8)
    acc_ref[pl.ds(row0, HW), :] = y2d

    # --- last frame of the sample: exact two-pass GroupNorm + affine + ReLU
    @pl.when(d == pl.num_programs(1) - 1)
    def _():
        a = acc_ref[...]                                      # (R, Cout) f32
        ssum = jnp.sum(a, axis=0, keepdims=True)              # (1, Cout)
        mean_c = jnp.dot(
            jnp.dot(ssum, gcg_ref[...], preferred_element_type=jnp.float32) * inv_n,
            ggc_ref[...], preferred_element_type=jnp.float32)
        cen = a - mean_c
        ssq = jnp.sum(cen * cen, axis=0, keepdims=True)       # exact variance
        var_c = jnp.dot(
            jnp.dot(ssq, gcg_ref[...], preferred_element_type=jnp.float32) * inv_n,
            ggc_ref[...], preferred_element_type=jnp.float32)
        scale_c = lax.rsqrt(var_c + eps) * gamma_ref[...]     # folded affine
        out = jnp.maximum(cen * scale_c + beta_ref[...], 0.0)
        if has_resid:
            out = out + resid_ref[...].astype(jnp.float32)    # post-ReLU "+ x"
        o_ref[...] = out.astype(o_ref.dtype)


# ---------------------------------------------------------------------------
# BasicConv3d wrapper: multi-input fused conv + GroupNorm + ReLU (+ residual)
# ---------------------------------------------------------------------------
def basic_conv3d_fused(inputs, gamma, beta, *, k, pad, residual=None,
                       num_groups=32, eps=1e-5):
    """inputs: list of (NDHWC bf16 activation, (Cout, C_i, kT, kH, kW) weight).
    The conv input is the channel-concatenation of the activations (weights are
    pre-expanded/zero-padded by the caller so this equals the reference conv).
    residual: optional NDHWC tensor added AFTER GroupNorm+ReLU."""
    kT, kH, kW = k
    arrs = [a for a, _ in inputs]
    ws = [w for _, w in inputs]
    N, D_in, H, W, _ = arrs[0].shape
    D_out = D_in // kT
    Cout = int(ws[0].shape[0])
    cins = tuple(int(a.shape[-1]) for a in arrs)
    R = D_out * H * W
    gs = Cout // num_groups

    # Per-input GEMM weights: (kW, kT*kH*C_i, Cout); rows ordered (t, r, ci).
    wmats = []
    for w in ws:
        ci = int(w.shape[1])
        wt = jnp.transpose(w, (4, 2, 3, 1, 0)).reshape(kW, kT * kH * ci, Cout)
        wmats.append(wt.astype(jnp.bfloat16))

    # One-hot channel<->group matrices for the GroupNorm reductions (MXU).
    gcg = (jnp.arange(Cout)[:, None] // gs ==
           jnp.arange(num_groups)[None, :]).astype(jnp.float32)
    ggc = gcg.T

    kern = functools.partial(
        _conv_gn_relu_kernel, n_inputs=len(arrs), cins=cins, kT=kT, kH=kH,
        kW=kW, pad=pad, H=H, W=W, cout=Cout,
        inv_n=1.0 / float(R * gs), eps=eps, has_resid=residual is not None)

    in_specs = []
    args = []
    for a, ci in zip(arrs, cins):
        args.append(a)
        in_specs.append(
            pl.BlockSpec((None, kT, H, W, ci), lambda n, d: (n, d, 0, 0, 0)))
    if residual is not None:
        args.append(residual.reshape(N, R, Cout))
        in_specs.append(pl.BlockSpec((None, R, Cout), lambda n, d: (n, 0, 0)))
    for ci, wm in zip(cins, wmats):
        args.append(wm)
        in_specs.append(
            pl.BlockSpec((kW, kT * kH * ci, Cout), lambda n, d: (0, 0, 0)))
    args += [gamma.reshape(1, Cout).astype(jnp.float32),
             beta.reshape(1, Cout).astype(jnp.float32), gcg, ggc]
    in_specs += [
        pl.BlockSpec((1, Cout), lambda n, d: (0, 0)),
        pl.BlockSpec((1, Cout), lambda n, d: (0, 0)),
        pl.BlockSpec((Cout, num_groups), lambda n, d: (0, 0)),
        pl.BlockSpec((num_groups, Cout), lambda n, d: (0, 0)),
    ]

    # VMEM budget (double-buffered pipeline blocks + scratch + working set).
    blk_bytes = (2 * sum(kT * H * W * ci * 2 for ci in cins)
                 + 2 * sum(kW * kT * kH * ci * Cout * 2 for ci in cins)
                 + 2 * R * Cout * 2
                 + (2 * R * Cout * 2 if residual is not None else 0)
                 + R * Cout * 4
                 + H * W * sum(kT * kH * ci for ci in cins) * 2
                 + 6 * H * W * Cout * 4
                 + 16 * Cout * 4)
    vmem_limit = int(min(64 * 2 ** 20, max(32 * 2 ** 20, 2 * blk_bytes)))
    Ksum = kT * kH * kW * sum(cins)
    cost = pl.CostEstimate(
        flops=int(2 * N * D_out * H * W * Ksum * Cout + 10 * N * R * Cout),
        transcendentals=int(N * Cout),
        bytes_accessed=int(sum(a.size * 2 for a in arrs)
                           + sum(w.size * 2 for w in wmats)
                           + N * R * Cout * 2
                           + (N * R * Cout * 2 if residual is not None else 0)))

    out2d = pl.pallas_call(
        kern,
        out_shape=jax.ShapeDtypeStruct((N, R, Cout), jnp.bfloat16),
        grid=(N, D_out),
        in_specs=in_specs,
        out_specs=pl.BlockSpec((None, R, Cout), lambda n, d: (n, 0, 0)),
        scratch_shapes=[pltpu.VMEM((R, Cout), jnp.float32)],
        compiler_params=pltpu.CompilerParams(
            dimension_semantics=("parallel", "arbitrary"),
            vmem_limit_bytes=vmem_limit),
        cost_estimate=cost,
    )(*args)

    return out2d.reshape(N, D_out, H, W, Cout)


# ---------------------------------------------------------------------------
# nn.Upsample(scale=(1,2,2), trilinear, align_corners=False): depth scale is 1
# -> exact 2x bilinear over H, W, as gather-free shift-and-blend + interleave.
# ---------------------------------------------------------------------------
def upsample2x_hw(x):
    def up_axis(a, axis):
        n = a.shape[axis]
        first = lax.slice_in_dim(a, 0, 1, axis=axis)
        last = lax.slice_in_dim(a, n - 1, n, axis=axis)
        prev = jnp.concatenate([first, lax.slice_in_dim(a, 0, n - 1, axis=axis)], axis=axis)
        nxt = jnp.concatenate([lax.slice_in_dim(a, 1, n, axis=axis), last], axis=axis)
        even = 0.25 * prev + 0.75 * a        # out[2i]   = .25*a[i-1] + .75*a[i]
        odd = 0.75 * a + 0.25 * nxt          # out[2i+1] = .75*a[i]   + .25*a[i+1]
        out = jnp.stack([even, odd], axis=axis + 1)
        shape = list(a.shape)
        shape[axis] = 2 * n
        return out.reshape(shape)

    x = up_axis(x, 2)   # H
    x = up_axis(x, 3)   # W
    return x


# ---------------------------------------------------------------------------
# SFE forward
# ---------------------------------------------------------------------------
def sfe_forward(x_ncdhw, params, m_channel):
    x_in = jnp.transpose(x_ncdhw, (0, 2, 3, 4, 1)).astype(jnp.bfloat16)  # NDHWC
    M = m_channel
    C = m_channel // 4
    P = params

    def zero_expand(w, cin_total, offset):
        z = jnp.zeros((w.shape[0], cin_total) + tuple(w.shape[2:]), w.dtype)
        return z.at[:, offset:offset + w.shape[1]].set(w)

    def bc(inputs, name, k, pad, residual=None):
        p = P[name]
        return basic_conv3d_fused(inputs, p['gamma'], p['beta'], k=k, pad=pad,
                                  residual=residual)

    x1 = bc([(x_in, P['conv1']['w'])], 'conv1', (2, 3, 3), 1)
    y = bc([(x1, P['conv2']['w'])], 'conv2', (1, 1, 1), 0)

    # Branch convs: conv(a + b) == conv(a) + conv(b); the 32-channel slices of
    # y are selected via zero-expanded weight blocks so every kernel input
    # stays a full lane-dense array (no sub-lane channel BlockSpecs, no extra
    # HBM slice/add passes).
    w3, w4, w5, w6 = (P[n]['w'] for n in ('conv3', 'conv4', 'conv5', 'conv6'))
    t2 = bc([(y, zero_expand(w3, M, 0) + zero_expand(w3, M, C))],
            'conv3', (1, 3, 3), 1)
    t3 = bc([(y, zero_expand(w4, M, 2 * C)), (t2, w4)], 'conv4', (1, 3, 3), 1)
    t4 = bc([(y, zero_expand(w5, M, 3 * C)), (t3, w5)], 'conv5', (1, 3, 3), 1)

    # conv6(cat(t1,t2,t3,t4)) + x1 with t1 = y[..., :C]; the concat and the
    # residual add are fused into the kernel (multi-input GEMM + post-ReLU add).
    t = bc([(y, zero_expand(w6[:, 0:C], M, 0)),
            (t2, w6[:, C:2 * C]), (t3, w6[:, 2 * C:3 * C]), (t4, w6[:, 3 * C:4 * C])],
           'conv6', (1, 1, 1), 0, residual=x1)

    z = upsample2x_hw(bc([(t, P['conv7']['w'])], 'conv7', (1, 3, 3), 1))
    # TODO(synk): fuse the 2x bilinear upsample into the conv7/conv8 epilogues
    # to save two full HBM passes over the largest activations.
    out = upsample2x_hw(bc([(z, P['conv8']['w'])], 'conv8', (2, 3, 3), 1))

    return jnp.transpose(out, (0, 4, 1, 2, 3)).astype(jnp.float32)  # NCDHW


# ---------------------------------------------------------------------------
# Deterministic parameter init (shapes from SFE.__init__; no checkpoints)
# ---------------------------------------------------------------------------
def init_params(key, channels, m_channel):
    C = m_channel // 4
    specs = {
        'conv1': (m_channel, channels, 2, 3, 3),
        'conv2': (m_channel, m_channel, 1, 1, 1),
        'conv3': (C, C, 1, 3, 3),
        'conv4': (C, C, 1, 3, 3),
        'conv5': (C, C, 1, 3, 3),
        'conv6': (m_channel, m_channel, 1, 1, 1),
        'conv7': (m_channel, m_channel, 1, 3, 3),
        'conv8': (m_channel, m_channel, 2, 3, 3),
    }
    params = {}
    for name, shape in specs.items():
        key, kw_, kg_, kb_ = jax.random.split(key, 4)
        fan_in = shape[1] * shape[2] * shape[3] * shape[4]
        params[name] = {
            'w': jax.random.normal(kw_, shape, jnp.float32) * (1.0 / fan_in) ** 0.5,
            'gamma': 1.0 + 0.1 * jax.random.normal(kg_, (shape[0],), jnp.float32),
            'beta': 0.1 * jax.random.normal(kb_, (shape[0],), jnp.float32),
        }
    return params


if __name__ == "__main__":
    # m_channel must be a multiple of 128 so GroupNorm(32, m_channel//4) is valid.
    N, channels, m_channel, T, H, W = 2, 4, 128, 4, 8, 8

    key = jax.random.PRNGKey(0)
    kx, kp = jax.random.split(key)
    x = jax.random.normal(kx, (N, channels, T, H, W), jnp.float32)   # NCDHW
    params = init_params(kp, channels, m_channel)

    fwd = jax.jit(functools.partial(sfe_forward, m_channel=m_channel))
    out = jax.block_until_ready(fwd(x, params))

    # x -> conv1 (T/2) -> ... -> conv7+up2 (HxW *2) -> conv8 (T/2) + up2
    expected = (N, m_channel, T // 4, 4 * H, 4 * W)
    assert out.shape == expected, (out.shape, expected)
    assert bool(jnp.all(jnp.isfinite(out)))
    print("KERNEL_OK")
</pallas_src>

<mosaic_0001>
module attributes {stable_mosaic.version = 11 : i64} {
  func.func @_conv_gn_relu_kernel(%arg0: i32, %arg1: i32, %arg2: memref<1x2x8x8x4xbf16, #tpu.memory_space<vmem>>, %arg3: memref<3x24x128xbf16, #tpu.memory_space<vmem>>, %arg4: memref<1x128xf32, #tpu.memory_space<vmem>>, %arg5: memref<1x128xf32, #tpu.memory_space<vmem>>, %arg6: memref<128x32xf32, #tpu.memory_space<vmem>>, %arg7: memref<32x128xf32, #tpu.memory_space<vmem>>, %arg8: memref<1x128x128xbf16, #tpu.memory_space<vmem>>, %arg9: memref<128x128xf32, #tpu.memory_space<vmem>>) attributes {dimension_semantics = [#tpu.dimension_semantics<parallel>, #tpu.dimension_semantics<arbitrary>], iteration_bounds = array<i64: 2, 2>, scalar_prefetch = 0 : i64, scratch_operands = 1 : i64, tpu.core_type = #tpu.core_type<tc>, window_params = [{transform_indices = @transform_0, window_bounds = array<i64: 1, 2, 8, 8, 4>}, {pipeline_mode = #tpu.pipeline_mode<synchronous>, transform_indices = @transform_1, window_bounds = array<i64: 3, 24, 128>}, {pipeline_mode = #tpu.pipeline_mode<synchronous>, transform_indices = @transform_2, window_bounds = array<i64: 1, 128>}, {pipeline_mode = #tpu.pipeline_mode<synchronous>, transform_indices = @transform_3, window_bounds = array<i64: 1, 128>}, {pipeline_mode = #tpu.pipeline_mode<synchronous>, transform_indices = @transform_4, window_bounds = array<i64: 128, 32>}, {pipeline_mode = #tpu.pipeline_mode<synchronous>, transform_indices = @transform_5, window_bounds = array<i64: 32, 128>}, {transform_indices = @transform_6, window_bounds = array<i64: 1, 128, 128>}]} {
    %c0 = arith.constant 0 : index
    %c0_0 = arith.constant 0 : index
    %c0_1 = arith.constant 0 : index
    %c0_2 = arith.constant 0 : index
    %c0_3 = arith.constant 0 : index
    %0 = vector.load %arg2[%c0, %c0_0, %c0_1, %c0_2, %c0_3] : memref<1x2x8x8x4xbf16, #tpu.memory_space<vmem>>, vector<1x1x8x8x4xbf16>
    %1 = vector.shape_cast %0 : vector<1x1x8x8x4xbf16> to vector<8x8x4xbf16>
    %cst = arith.constant 0.000000e+00 : bf16
    %2 = vector.broadcast %cst : bf16 to vector<1x8x4xbf16>
    %3 = vector.extract_strided_slice %1 {offsets = [0, 0, 0], sizes = [7, 8, 4], strides = [1, 1, 1]} : vector<8x8x4xbf16> to vector<7x8x4xbf16>
    %4 = tpu.concatenate %2, %3 in 0 : vector<1x8x4xbf16>, vector<7x8x4xbf16> -> vector<8x8x4xbf16>
    %5 = vector.extract_strided_slice %1 {offsets = [1, 0, 0], sizes = [7, 8, 4], strides = [1, 1, 1]} : vector<8x8x4xbf16> to vector<7x8x4xbf16>
    %cst_4 = arith.constant 0.000000e+00 : bf16
    %6 = vector.broadcast %cst_4 : bf16 to vector<1x8x4xbf16>
    %7 = tpu.concatenate %5, %6 in 0 : vector<7x8x4xbf16>, vector<1x8x4xbf16> -> vector<8x8x4xbf16>
    %c0_5 = arith.constant 0 : index
    %c1 = arith.constant 1 : index
    %c0_6 = arith.constant 0 : index
    %c0_7 = arith.constant 0 : index
    %c0_8 = arith.constant 0 : index
    %8 = vector.load %arg2[%c0_5, %c1, %c0_6, %c0_7, %c0_8] : memref<1x2x8x8x4xbf16, #tpu.memory_space<vmem>>, vector<1x1x8x8x4xbf16>
    %9 = vector.shape_cast %8 : vector<1x1x8x8x4xbf16> to vector<8x8x4xbf16>
    %cst_9 = arith.constant 0.000000e+00 : bf16
    %10 = vector.broadcast %cst_9 : bf16 to vector<1x8x4xbf16>
    %11 = vector.extract_strided_slice %9 {offsets = [0, 0, 0], sizes = [7, 8, 4], strides = [1, 1, 1]} : vector<8x8x4xbf16> to vector<7x8x4xbf16>
    %12 = tpu.concatenate %10, %11 in 0 : vector<1x8x4xbf16>, vector<7x8x4xbf16> -> vector<8x8x4xbf16>
    %13 = vector.extract_strided_slice %9 {offsets = [1, 0, 0], sizes = [7, 8, 4], strides = [1, 1, 1]} : vector<8x8x4xbf16> to vector<7x8x4xbf16>
    %cst_10 = arith.constant 0.000000e+00 : bf16
    %14 = vector.broadcast %cst_10 : bf16 to vector<1x8x4xbf16>
    %15 = tpu.concatenate %13, %14 in 0 : vector<7x8x4xbf16>, vector<1x8x4xbf16> -> vector<8x8x4xbf16>
    %16 = tpu.concatenate %4, %1, %7, %12, %9, %15 in 2 : vector<8x8x4xbf16>, vector<8x8x4xbf16>, vector<8x8x4xbf16>, vector<8x8x4xbf16>, vector<8x8x4xbf16>, vector<8x8x4xbf16> -> vector<8x8x24xbf16>
    %17 = vector.shape_cast %16 : vector<8x8x24xbf16> to vector<64x24xbf16>
    %c0_11 = arith.constant 0 : index
    %c0_12 = arith.constant 0 : index
    %c0_13 = arith.constant 0 : index
    %18 = vector.load %arg3[%c0_11, %c0_12, %c0_13] : memref<3x24x128xbf16, #tpu.memory_space<vmem>>, vector<1x24x128xbf16>
    %19 = vector.shape_cast %18 : vector<1x24x128xbf16> to vector<24x128xbf16>
    %cst_14 = arith.constant dense<0.000000e+00> : vector<64x128xf32>
    %20 = tpu.matmul %17, %19, %cst_14 {dimension_numbers = #tpu.dot_dimension_numbers<[1], [0], [0], [1], [0, 0, 1, 1], [], []>} : vector<64x24xbf16>, vector<24x128xbf16>, vector<64x128xf32> -> vector<64x128xf32>
    %c1_15 = arith.constant 1 : index
    %c0_16 = arith.constant 0 : index
    %c0_17 = arith.constant 0 : index
    %21 = vector.load %arg3[%c1_15, %c0_16, %c0_17] : memref<3x24x128xbf16, #tpu.memory_space<vmem>>, vector<1x24x128xbf16>
    %22 = vector.shape_cast %21 : vector<1x24x128xbf16> to vector<24x128xbf16>
    %cst_18 = arith.constant dense<0.000000e+00> : vector<64x128xf32>
    %23 = tpu.matmul %17, %22, %cst_18 {dimension_numbers = #tpu.dot_dimension_numbers<[1], [0], [0], [1], [0, 0, 1, 1], [], []>} : vector<64x24xbf16>, vector<24x128xbf16>, vector<64x128xf32> -> vector<64x128xf32>
    %c2 = arith.constant 2 : index
    %c0_19 = arith.constant 0 : index
    %c0_20 = arith.constant 0 : index
    %24 = vector.load %arg3[%c2, %c0_19, %c0_20] : memref<3x24x128xbf16, #tpu.memory_space<vmem>>, vector<1x24x128xbf16>
    %25 = vector.shape_cast %24 : vector<1x24x128xbf16> to vector<24x128xbf16>
    %cst_21 = arith.constant dense<0.000000e+00> : vector<64x128xf32>
    %26 = tpu.matmul %17, %25, %cst_21 {dimension_numbers = #tpu.dot_dimension_numbers<[1], [0], [0], [1], [0, 0, 1, 1], [], []>} : vector<64x24xbf16>, vector<24x128xbf16>, vector<64x128xf32> -> vector<64x128xf32>
    %27 = vector.shape_cast %20 : vector<64x128xf32> to vector<8x8x128xf32>
    %cst_22 = arith.constant 0.000000e+00 : f32
    %28 = vector.broadcast %cst_22 : f32 to vector<8x1x128xf32>
    %29 = vector.extract_strided_slice %27 {offsets = [0, 0, 0], sizes = [8, 7, 128], strides = [1, 1, 1]} : vector<8x8x128xf32> to vector<8x7x128xf32>
    %30 = tpu.concatenate %28, %29 in 1 : vector<8x1x128xf32>, vector<8x7x128xf32> -> vector<8x8x128xf32>
    %31 = vector.shape_cast %23 : vector<64x128xf32> to vector<8x8x128xf32>
    %32 = arith.addf %30, %31 : vector<8x8x128xf32>
    %33 = vector.shape_cast %26 : vector<64x128xf32> to vector<8x8x128xf32>
    %34 = vector.extract_strided_slice %33 {offsets = [0, 1, 0], sizes = [8, 7, 128], strides = [1, 1, 1]} : vector<8x8x128xf32> to vector<8x7x128xf32>
    %cst_23 = arith.constant 0.000000e+00 : f32
    %35 = vector.broadcast %cst_23 : f32 to vector<8x1x128xf32>
    %36 = tpu.concatenate %34, %35 in 1 : vector<8x7x128xf32>, vector<8x1x128xf32> -> vector<8x8x128xf32>
    %37 = arith.addf %32, %36 : vector<8x8x128xf32>
    %38 = vector.shape_cast %37 : vector<8x8x128xf32> to vector<64x128xf32>
    %c64_i32 = arith.constant 64 : i32
    %39 = arith.muli %arg1, %c64_i32 : i32
    %40 = tpu.assume_multiple %39, 8 : i32
    %41 = arith.index_cast %40 : i32 to index
    %c0_24 = arith.constant 0 : index
    %42 = vector.load %arg9[%41, %c0_24] : memref<128x128xf32, #tpu.memory_space<vmem>>, vector<64x128xf32>
    tpu.vector_store %arg9[%41, %c0_24], %38 {strides = array<i32>} : memref<128x128xf32, #tpu.memory_space<vmem>>, vector<64x128xf32>,
    %c1_i32 = arith.constant 1 : i32
    %43 = arith.cmpi eq, %arg1, %c1_i32 : i32
    %44 = arith.extui %43 : i1 to i32
    %c0_i32 = arith.constant 0 : i32
    %45 = arith.cmpi ne, %44, %c0_i32 : i32
    scf.if %45 {
      %c0_25 = arith.constant 0 : index
      %c0_26 = arith.constant 0 : index
      %46 = vector.load %arg9[%c0_25, %c0_26] : memref<128x128xf32, #tpu.memory_space<vmem>>, vector<128x128xf32>
      %cst_27 = arith.constant dense<0.000000e+00> : vector<128xf32>
      %47 = vector.multi_reduction <add>, %46, %cst_27 [0] : vector<128x128xf32> to vector<128xf32>
      %48 = vector.shape_cast %47 : vector<128xf32> to vector<1x128xf32>
      %c0_28 = arith.constant 0 : index
      %c0_29 = arith.constant 0 : index
      %49 = vector.load %arg6[%c0_28, %c0_29] : memref<128x32xf32, #tpu.memory_space<vmem>>, vector<128x32xf32>
      %cst_30 = arith.constant dense<0.000000e+00> : vector<1x32xf32>
      %50 = tpu.matmul %48, %49, %cst_30 {dimension_numbers = #tpu.dot_dimension_numbers<[1], [0], [0], [1], [0, 0, 1, 1], [], []>} : vector<1x128xf32>, vector<128x32xf32>, vector<1x32xf32> -> vector<1x32xf32>
      %cst_31 = arith.constant 0.001953125 : f32
      %51 = vector.broadcast %cst_31 : f32 to vector<1x32xf32>
      %52 = arith.mulf %50, %51 : vector<1x32xf32>
      %c0_32 = arith.constant 0 : index
      %c0_33 = arith.constant 0 : index
      %53 = vector.load %arg7[%c0_32, %c0_33] : memref<32x128xf32, #tpu.memory_space<vmem>>, vector<32x128xf32>
      %cst_34 = arith.constant dense<0.000000e+00> : vector<1x128xf32>
      %54 = tpu.matmul %52, %53, %cst_34 {dimension_numbers = #tpu.dot_dimension_numbers<[1], [0], [0], [1], [0, 0, 1, 1], [], []>} : vector<1x32xf32>, vector<32x128xf32>, vector<1x128xf32> -> vector<1x128xf32>
      %55 = vector.broadcast %54 : vector<1x128xf32> to vector<128x128xf32>
      %56 = arith.subf %46, %55 : vector<128x128xf32>
      %57 = arith.mulf %56, %56 : vector<128x128xf32>
      %cst_35 = arith.constant dense<0.000000e+00> : vector<128xf32>
      %58 = vector.multi_reduction <add>, %57, %cst_35 [0] : vector<128x128xf32> to vector<128xf32>
      %59 = vector.shape_cast %58 : vector<128xf32> to vector<1x128xf32>
      %c0_36 = arith.constant 0 : index
      %c0_37 = arith.constant 0 : index
      %60 = vector.load %arg6[%c0_36, %c0_37] : memref<128x32xf32, #tpu.memory_space<vmem>>, vector<128x32xf32>
      %cst_38 = arith.constant dense<0.000000e+00> : vector<1x32xf32>
      %61 = tpu.matmul %59, %60, %cst_38 {dimension_numbers = #tpu.dot_dimension_numbers<[1], [0], [0], [1], [0, 0, 1, 1], [], []>} : vector<1x128xf32>, vector<128x32xf32>, vector<1x32xf32> -> vector<1x32xf32>
      %cst_39 = arith.constant 0.001953125 : f32
      %62 = vector.broadcast %cst_39 : f32 to vector<1x32xf32>
      %63 = arith.mulf %61, %62 : vector<1x32xf32>
      %c0_40 = arith.constant 0 : index
      %c0_41 = arith.constant 0 : index
      %64 = vector.load %arg7[%c0_40, %c0_41] : memref<32x128xf32, #tpu.memory_space<vmem>>, vector<32x128xf32>
      %cst_42 = arith.constant dense<0.000000e+00> : vector<1x128xf32>
      %65 = tpu.matmul %63, %64, %cst_42 {dimension_numbers = #tpu.dot_dimension_numbers<[1], [0], [0], [1], [0, 0, 1, 1], [], []>} : vector<1x32xf32>, vector<32x128xf32>, vector<1x128xf32> -> vector<1x128xf32>
      %cst_43 = arith.constant 9.99999974E-6 : f32
      %66 = vector.broadcast %cst_43 : f32 to vector<1x128xf32>
      %67 = arith.addf %65, %66 : vector<1x128xf32>
      %68 = math.rsqrt %67 : vector<1x128xf32>
      %c0_44 = arith.constant 0 : index
      %c0_45 = arith.constant 0 : index
      %69 = vector.load %arg4[%c0_44, %c0_45] : memref<1x128xf32, #tpu.memory_space<vmem>>, vector<1x128xf32>
      %70 = arith.mulf %68, %69 : vector<1x128xf32>
      %71 = vector.broadcast %70 : vector<1x128xf32> to vector<128x128xf32>
      %72 = arith.mulf %56, %71 : vector<128x128xf32>
      %c0_46 = arith.constant 0 : index
      %c0_47 = arith.constant 0 : index
      %73 = vector.load %arg5[%c0_46, %c0_47] : memref<1x128xf32, #tpu.memory_space<vmem>>, vector<1x128xf32>
      %74 = vector.broadcast %73 : vector<1x128xf32> to vector<128x128xf32>
      %75 = arith.addf %72, %74 : vector<128x128xf32>
      %cst_48 = arith.constant 0.000000e+00 : f32
      %76 = vector.broadcast %cst_48 : f32 to vector<128x128xf32>
      %77 = arith.maximumf %75, %76 : vector<128x128xf32>
      %78 = arith.truncf %77 : vector<128x128xf32> to vector<128x128xbf16>
      %c0_49 = arith.constant 0 : index
      %c0_50 = arith.constant 0 : index
      %c0_51 = arith.constant 0 : index
      %79 = vector.load %arg8[%c0_49, %c0_50, %c0_51] : memref<1x128x128xbf16, #tpu.memory_space<vmem>>, vector<1x128x128xbf16>
      %80 = vector.shape_cast %79 : vector<1x128x128xbf16> to vector<128x128xbf16>
      %81 = vector.shape_cast %78 : vector<128x128xbf16> to vector<1x128x128xbf16>
      tpu.vector_store %arg8[%c0_49, %c0_50, %c0_51], %81 {strides = array<i32>} : memref<1x128x128xbf16, #tpu.memory_space<vmem>>, vector<1x128x128xbf16>,
    } else {
    }
    return
  }
  func.func @transform_0(%arg0: i32, %arg1: i32) -> (i32, i32, i32, i32, i32) {
    %c0_i32 = arith.constant 0 : i32
    %c0_i32_0 = arith.constant 0 : i32
    %c0_i32_1 = arith.constant 0 : i32
    %c0_i32_2 = arith.constant 0 : i32
    return %arg0, %arg1, %c0_i32, %c0_i32_0, %c0_i32_1 : i32, i32, i32, i32, i32
  }
  func.func @transform_1(%arg0: i32, %arg1: i32) -> (i32, i32, i32) {
    %c0_i32 = arith.constant 0 : i32
    %c0_i32_0 = arith.constant 0 : i32
    %c0_i32_1 = arith.constant 0 : i32
    %c0_i32_2 = arith.constant 0 : i32
    return %c0_i32, %c0_i32_0, %c0_i32_1 : i32, i32, i32
  }
  func.func @transform_2(%arg0: i32, %arg1: i32) -> (i32, i32) {
    %c0_i32 = arith.constant 0 : i32
    %c0_i32_0 = arith.constant 0 : i32
    %c0_i32_1 = arith.constant 0 : i32
    return %c0_i32, %c0_i32_0 : i32, i32
  }
  func.func @transform_3(%arg0: i32, %arg1: i32) -> (i32, i32) {
    %c0_i32 = arith.constant 0 : i32
    %c0_i32_0 = arith.constant 0 : i32
    %c0_i32_1 = arith.constant 0 : i32
    return %c0_i32, %c0_i32_0 : i32, i32
  }
  func.func @transform_4(%arg0: i32, %arg1: i32) -> (i32, i32) {
    %c0_i32 = arith.constant 0 : i32
    %c0_i32_0 = arith.constant 0 : i32
    %c0_i32_1 = arith.constant 0 : i32
    return %c0_i32, %c0_i32_0 : i32, i32
  }
  func.func @transform_5(%arg0: i32, %arg1: i32) -> (i32, i32) {
    %c0_i32 = arith.constant 0 : i32
    %c0_i32_0 = arith.constant 0 : i32
    %c0_i32_1 = arith.constant 0 : i32
    return %c0_i32, %c0_i32_0 : i32, i32
  }
  func.func @transform_6(%arg0: i32, %arg1: i32) -> (i32, i32, i32) {
    %c0_i32 = arith.constant 0 : i32
    %c0_i32_0 = arith.constant 0 : i32
    %c0_i32_1 = arith.constant 0 : i32
    return %arg0, %c0_i32, %c0_i32_0 : i32, i32, i32
  }
}

module attributes {stable_mosaic.version = 11 : i64} {
  func.func @_conv_gn_relu_kernel(%arg0: i32, %arg1: i32, %arg2: memref<1x1x8x8x128xbf16, #tpu.memory_space<vmem>>, %arg3: memref<1x128x128xbf16, #tpu.memory_space<vmem>>, %arg4: memref<1x128xf32, #tpu.memory_space<vmem>>, %arg5: memref<1x128xf32, #tpu.memory_space<vmem>>, %arg6: memref<128x32xf32, #tpu.memory_space<vmem>>, %arg7: memref<32x128xf32, #tpu.memory_space<vmem>>, %arg8: memref<1x128x128xbf16, #tpu.memory_space<vmem>>, %arg9: memref<128x128xf32, #tpu.memory_space<vmem>>) attributes {dimension_semantics = [#tpu.dimension_semantics<parallel>, #tpu.dimension_semantics<arbitrary>], iteration_bounds = array<i64: 2, 2>, scalar_prefetch = 0 : i64, scratch_operands = 1 : i64, tpu.core_type = #tpu.core_type<tc>, window_params = [{transform_indices = @transform_0, window_bounds = array<i64: 1, 1, 8, 8, 128>}, {pipeline_mode = #tpu.pipeline_mode<synchronous>, transform_indices = @transform_1, window_bounds = array<i64: 1, 128, 128>}, {pipeline_mode = #tpu.pipeline_mode<synchronous>, transform_indices = @transform_2, window_bounds = array<i64: 1, 128>}, {pipeline_mode = #tpu.pipeline_mode<synchronous>, transform_indices = @transform_3, window_bounds = array<i64: 1, 128>}, {pipeline_mode = #tpu.pipeline_mode<synchronous>, transform_indices = @transform_4, window_bounds = array<i64: 128, 32>}, {pipeline_mode = #tpu.pipeline_mode<synchronous>, transform_indices = @transform_5, window_bounds = array<i64: 32, 128>}, {transform_indices = @transform_6, window_bounds = array<i64: 1, 128, 128>}]} {
    %c0 = arith.constant 0 : index
    %c0_0 = arith.constant 0 : index
    %c0_1 = arith.constant 0 : index
    %c0_2 = arith.constant 0 : index
    %c0_3 = arith.constant 0 : index
    %0 = vector.load %arg2[%c0, %c0_0, %c0_1, %c0_2, %c0_3] : memref<1x1x8x8x128xbf16, #tpu.memory_space<vmem>>, vector<1x1x8x8x128xbf16>
    %1 = vector.shape_cast %0 : vector<1x1x8x8x128xbf16> to vector<8x8x128xbf16>
    %2 = vector.shape_cast %1 : vector<8x8x128xbf16> to vector<64x128xbf16>
    %c0_4 = arith.constant 0 : index
    %c0_5 = arith.constant 0 : index
    %c0_6 = arith.constant 0 : index
    %3 = vector.load %arg3[%c0_4, %c0_5, %c0_6] : memref<1x128x128xbf16, #tpu.memory_space<vmem>>, vector<1x128x128xbf16>
    %4 = vector.shape_cast %3 : vector<1x128x128xbf16> to vector<128x128xbf16>
    %cst = arith.constant dense<0.000000e+00> : vector<64x128xf32>
    %5 = tpu.matmul %2, %4, %cst {dimension_numbers = #tpu.dot_dimension_numbers<[1], [0], [0], [1], [0, 0, 1, 1], [], []>} : vector<64x128xbf16>, vector<128x128xbf16>, vector<64x128xf32> -> vector<64x128xf32>
    %c64_i32 = arith.constant 64 : i32
    %6 = arith.muli %arg1, %c64_i32 : i32
    %7 = tpu.assume_multiple %6, 8 : i32
    %8 = arith.index_cast %7 : i32 to index
    %c0_7 = arith.constant 0 : index
    %9 = vector.load %arg9[%8, %c0_7] : memref<128x128xf32, #tpu.memory_space<vmem>>, vector<64x128xf32>
    tpu.vector_store %arg9[%8, %c0_7], %5 {strides = array<i32>} : memref<128x128xf32, #tpu.memory_space<vmem>>, vector<64x128xf32>,
    %c1_i32 = arith.constant 1 : i32
    %10 = arith.cmpi eq, %arg1, %c1_i32 : i32
    %11 = arith.extui %10 : i1 to i32
    %c0_i32 = arith.constant 0 : i32
    %12 = arith.cmpi ne, %11, %c0_i32 : i32
    scf.if %12 {
      %c0_8 = arith.constant 0 : index
      %c0_9 = arith.constant 0 : index
      %13 = vector.load %arg9[%c0_8, %c0_9] : memref<128x128xf32, #tpu.memory_space<vmem>>, vector<128x128xf32>
      %cst_10 = arith.constant dense<0.000000e+00> : vector<128xf32>
      %14 = vector.multi_reduction <add>, %13, %cst_10 [0] : vector<128x128xf32> to vector<128xf32>
      %15 = vector.shape_cast %14 : vector<128xf32> to vector<1x128xf32>
      %c0_11 = arith.constant 0 : index
      %c0_12 = arith.constant 0 : index
      %16 = vector.load %arg6[%c0_11, %c0_12] : memref<128x32xf32, #tpu.memory_space<vmem>>, vector<128x32xf32>
      %cst_13 = arith.constant dense<0.000000e+00> : vector<1x32xf32>
      %17 = tpu.matmul %15, %16, %cst_13 {dimension_numbers = #tpu.dot_dimension_numbers<[1], [0], [0], [1], [0, 0, 1, 1], [], []>} : vector<1x128xf32>, vector<128x32xf32>, vector<1x32xf32> -> vector<1x32xf32>
      %cst_14 = arith.constant 0.001953125 : f32
      %18 = vector.broadcast %cst_14 : f32 to vector<1x32xf32>
      %19 = arith.mulf %17, %18 : vector<1x32xf32>
      %c0_15 = arith.constant 0 : index
      %c0_16 = arith.constant 0 : index
      %20 = vector.load %arg7[%c0_15, %c0_16] : memref<32x128xf32, #tpu.memory_space<vmem>>, vector<32x128xf32>
      %cst_17 = arith.constant dense<0.000000e+00> : vector<1x128xf32>
      %21 = tpu.matmul %19, %20, %cst_17 {dimension_numbers = #tpu.dot_dimension_numbers<[1], [0], [0], [1], [0, 0, 1, 1], [], []>} : vector<1x32xf32>, vector<32x128xf32>, vector<1x128xf32> -> vector<1x128xf32>
      %22 = vector.broadcast %21 : vector<1x128xf32> to vector<128x128xf32>
      %23 = arith.subf %13, %22 : vector<128x128xf32>
      %24 = arith.mulf %23, %23 : vector<128x128xf32>
      %cst_18 = arith.constant dense<0.000000e+00> : vector<128xf32>
      %25 = vector.multi_reduction <add>, %24, %cst_18 [0] : vector<128x128xf32> to vector<128xf32>
      %26 = vector.shape_cast %25 : vector<128xf32> to vector<1x128xf32>
      %c0_19 = arith.constant 0 : index
      %c0_20 = arith.constant 0 : index
      %27 = vector.load %arg6[%c0_19, %c0_20] : memref<128x32xf32, #tpu.memory_space<vmem>>, vector<128x32xf32>
      %cst_21 = arith.constant dense<0.000000e+00> : vector<1x32xf32>
      %28 = tpu.matmul %26, %27, %cst_21 {dimension_numbers = #tpu.dot_dimension_numbers<[1], [0], [0], [1], [0, 0, 1, 1], [], []>} : vector<1x128xf32>, vector<128x32xf32>, vector<1x32xf32> -> vector<1x32xf32>
      %cst_22 = arith.constant 0.001953125 : f32
      %29 = vector.broadcast %cst_22 : f32 to vector<1x32xf32>
      %30 = arith.mulf %28, %29 : vector<1x32xf32>
      %c0_23 = arith.constant 0 : index
      %c0_24 = arith.constant 0 : index
      %31 = vector.load %arg7[%c0_23, %c0_24] : memref<32x128xf32, #tpu.memory_space<vmem>>, vector<32x128xf32>
      %cst_25 = arith.constant dense<0.000000e+00> : vector<1x128xf32>
      %32 = tpu.matmul %30, %31, %cst_25 {dimension_numbers = #tpu.dot_dimension_numbers<[1], [0], [0], [1], [0, 0, 1, 1], [], []>} : vector<1x32xf32>, vector<32x128xf32>, vector<1x128xf32> -> vector<1x128xf32>
      %cst_26 = arith.constant 9.99999974E-6 : f32
      %33 = vector.broadcast %cst_26 : f32 to vector<1x128xf32>
      %34 = arith.addf %32, %33 : vector<1x128xf32>
      %35 = math.rsqrt %34 : vector<1x128xf32>
      %c0_27 = arith.constant 0 : index
      %c0_28 = arith.constant 0 : index
      %36 = vector.load %arg4[%c0_27, %c0_28] : memref<1x128xf32, #tpu.memory_space<vmem>>, vector<1x128xf32>
      %37 = arith.mulf %35, %36 : vector<1x128xf32>
      %38 = vector.broadcast %37 : vector<1x128xf32> to vector<128x128xf32>
      %39 = arith.mulf %23, %38 : vector<128x128xf32>
      %c0_29 = arith.constant 0 : index
      %c0_30 = arith.constant 0 : index
      %40 = vector.load %arg5[%c0_29, %c0_30] : memref<1x128xf32, #tpu.memory_space<vmem>>, vector<1x128xf32>
      %41 = vector.broadcast %40 : vector<1x128xf32> to vector<128x128xf32>
      %42 = arith.addf %39, %41 : vector<128x128xf32>
      %cst_31 = arith.constant 0.000000e+00 : f32
      %43 = vector.broadcast %cst_31 : f32 to vector<128x128xf32>
      %44 = arith.maximumf %42, %43 : vector<128x128xf32>
      %45 = arith.truncf %44 : vector<128x128xf32> to vector<128x128xbf16>
      %c0_32 = arith.constant 0 : index
      %c0_33 = arith.constant 0 : index
      %c0_34 = arith.constant 0 : index
      %46 = vector.load %arg8[%c0_32, %c0_33, %c0_34] : memref<1x128x128xbf16, #tpu.memory_space<vmem>>, vector<1x128x128xbf16>
      %47 = vector.shape_cast %46 : vector<1x128x128xbf16> to vector<128x128xbf16>
      %48 = vector.shape_cast %45 : vector<128x128xbf16> to vector<1x128x128xbf16>
      tpu.vector_store %arg8[%c0_32, %c0_33, %c0_34], %48 {strides = array<i32>} : memref<1x128x128xbf16, #tpu.memory_space<vmem>>, vector<1x128x128xbf16>,
    } else {
    }
    return
  }
  func.func @transform_0(%arg0: i32, %arg1: i32) -> (i32, i32, i32, i32, i32) {
    %c0_i32 = arith.constant 0 : i32
    %c0_i32_0 = arith.constant 0 : i32
    %c0_i32_1 = arith.constant 0 : i32
    %c0_i32_2 = arith.constant 0 : i32
    return %arg0, %arg1, %c0_i32, %c0_i32_0, %c0_i32_1 : i32, i32, i32, i32, i32
  }
  func.func @transform_1(%arg0: i32, %arg1: i32) -> (i32, i32, i32) {
    %c0_i32 = arith.constant 0 : i32
    %c0_i32_0 = arith.constant 0 : i32
    %c0_i32_1 = arith.constant 0 : i32
    %c0_i32_2 = arith.constant 0 : i32
    return %c0_i32, %c0_i32_0, %c0_i32_1 : i32, i32, i32
  }
  func.func @transform_2(%arg0: i32, %arg1: i32) -> (i32, i32) {
    %c0_i32 = arith.constant 0 : i32
    %c0_i32_0 = arith.constant 0 : i32
    %c0_i32_1 = arith.constant 0 : i32
    return %c0_i32, %c0_i32_0 : i32, i32
  }
  func.func @transform_3(%arg0: i32, %arg1: i32) -> (i32, i32) {
    %c0_i32 = arith.constant 0 : i32
    %c0_i32_0 = arith.constant 0 : i32
    %c0_i32_1 = arith.constant 0 : i32
    return %c0_i32, %c0_i32_0 : i32, i32
  }
  func.func @transform_4(%arg0: i32, %arg1: i32) -> (i32, i32) {
    %c0_i32 = arith.constant 0 : i32
    %c0_i32_0 = arith.constant 0 : i32
    %c0_i32_1 = arith.constant 0 : i32
    return %c0_i32, %c0_i32_0 : i32, i32
  }
  func.func @transform_5(%arg0: i32, %arg1: i32) -> (i32, i32) {
    %c0_i32 = arith.constant 0 : i32
    %c0_i32_0 = arith.constant 0 : i32
    %c0_i32_1 = arith.constant 0 : i32
    return %c0_i32, %c0_i32_0 : i32, i32
  }
  func.func @transform_6(%arg0: i32, %arg1: i32) -> (i32, i32, i32) {
    %c0_i32 = arith.constant 0 : i32
    %c0_i32_0 = arith.constant 0 : i32
    %c0_i32_1 = arith.constant 0 : i32
    return %arg0, %c0_i32, %c0_i32_0 : i32, i32, i32
  }
}

module attributes {stable_mosaic.version = 11 : i64} {
  func.func @_conv_gn_relu_kernel(%arg0: i32, %arg1: i32, %arg2: memref<1x1x8x8x128xbf16, #tpu.memory_space<vmem>>, %arg3: memref<3x384x32xbf16, #tpu.memory_space<vmem>>, %arg4: memref<1x32xf32, #tpu.memory_space<vmem>>, %arg5: memref<1x32xf32, #tpu.memory_space<vmem>>, %arg6: memref<32x32xf32, #tpu.memory_space<vmem>>, %arg7: memref<32x32xf32, #tpu.memory_space<vmem>>, %arg8: memref<1x128x32xbf16, #tpu.memory_space<vmem>>, %arg9: memref<128x32xf32, #tpu.memory_space<vmem>>) attributes {dimension_semantics = [#tpu.dimension_semantics<parallel>, #tpu.dimension_semantics<arbitrary>], iteration_bounds = array<i64: 2, 2>, scalar_prefetch = 0 : i64, scratch_operands = 1 : i64, tpu.core_type = #tpu.core_type<tc>, window_params = [{transform_indices = @transform_0, window_bounds = array<i64: 1, 1, 8, 8, 128>}, {pipeline_mode = #tpu.pipeline_mode<synchronous>, transform_indices = @transform_1, window_bounds = array<i64: 3, 384, 32>}, {pipeline_mode = #tpu.pipeline_mode<synchronous>, transform_indices = @transform_2, window_bounds = array<i64: 1, 32>}, {pipeline_mode = #tpu.pipeline_mode<synchronous>, transform_indices = @transform_3, window_bounds = array<i64: 1, 32>}, {pipeline_mode = #tpu.pipeline_mode<synchronous>, transform_indices = @transform_4, window_bounds = array<i64: 32, 32>}, {pipeline_mode = #tpu.pipeline_mode<synchronous>, transform_indices = @transform_5, window_bounds = array<i64: 32, 32>}, {transform_indices = @transform_6, window_bounds = array<i64: 1, 128, 32>}]} {
    %c0 = arith.constant 0 : index
    %c0_0 = arith.constant 0 : index
    %c0_1 = arith.constant 0 : index
    %c0_2 = arith.constant 0 : index
    %c0_3 = arith.constant 0 : index
    %0 = vector.load %arg2[%c0, %c0_0, %c0_1, %c0_2, %c0_3] : memref<1x1x8x8x128xbf16, #tpu.memory_space<vmem>>, vector<1x1x8x8x128xbf16>
    %1 = vector.shape_cast %0 : vector<1x1x8x8x128xbf16> to vector<8x8x128xbf16>
    %cst = arith.constant 0.000000e+00 : bf16
    %2 = vector.broadcast %cst : bf16 to vector<1x8x128xbf16>
    %3 = vector.extract_strided_slice %1 {offsets = [0, 0, 0], sizes = [7, 8, 128], strides = [1, 1, 1]} : vector<8x8x128xbf16> to vector<7x8x128xbf16>
    %4 = tpu.concatenate %2, %3 in 0 : vector<1x8x128xbf16>, vector<7x8x128xbf16> -> vector<8x8x128xbf16>
    %5 = vector.extract_strided_slice %1 {offsets = [1, 0, 0], sizes = [7, 8, 128], strides = [1, 1, 1]} : vector<8x8x128xbf16> to vector<7x8x128xbf16>
    %cst_4 = arith.constant 0.000000e+00 : bf16
    %6 = vector.broadcast %cst_4 : bf16 to vector<1x8x128xbf16>
    %7 = tpu.concatenate %5, %6 in 0 : vector<7x8x128xbf16>, vector<1x8x128xbf16> -> vector<8x8x128xbf16>
    %8 = tpu.concatenate %4, %1, %7 in 2 : vector<8x8x128xbf16>, vector<8x8x128xbf16>, vector<8x8x128xbf16> -> vector<8x8x384xbf16>
    %9 = vector.shape_cast %8 : vector<8x8x384xbf16> to vector<64x384xbf16>
    %c0_5 = arith.constant 0 : index
    %c0_6 = arith.constant 0 : index
    %c0_7 = arith.constant 0 : index
    %10 = vector.load %arg3[%c0_5, %c0_6, %c0_7] : memref<3x384x32xbf16, #tpu.memory_space<vmem>>, vector<1x384x32xbf16>
    %11 = vector.shape_cast %10 : vector<1x384x32xbf16> to vector<384x32xbf16>
    %cst_8 = arith.constant dense<0.000000e+00> : vector<64x32xf32>
    %12 = tpu.matmul %9, %11, %cst_8 {dimension_numbers = #tpu.dot_dimension_numbers<[1], [0], [0], [1], [0, 0, 1, 1], [], []>} : vector<64x384xbf16>, vector<384x32xbf16>, vector<64x32xf32> -> vector<64x32xf32>
    %c1 = arith.constant 1 : index
    %c0_9 = arith.constant 0 : index
    %c0_10 = arith.constant 0 : index
    %13 = vector.load %arg3[%c1, %c0_9, %c0_10] : memref<3x384x32xbf16, #tpu.memory_space<vmem>>, vector<1x384x32xbf16>
    %14 = vector.shape_cast %13 : vector<1x384x32xbf16> to vector<384x32xbf16>
    %cst_11 = arith.constant dense<0.000000e+00> : vector<64x32xf32>
    %15 = tpu.matmul %9, %14, %cst_11 {dimension_numbers = #tpu.dot_dimension_numbers<[1], [0], [0], [1], [0, 0, 1, 1], [], []>} : vector<64x384xbf16>, vector<384x32xbf16>, vector<64x32xf32> -> vector<64x32xf32>
    %c2 = arith.constant 2 : index
    %c0_12 = arith.constant 0 : index
    %c0_13 = arith.constant 0 : index
    %16 = vector.load %arg3[%c2, %c0_12, %c0_13] : memref<3x384x32xbf16, #tpu.memory_space<vmem>>, vector<1x384x32xbf16>
    %17 = vector.shape_cast %16 : vector<1x384x32xbf16> to vector<384x32xbf16>
    %cst_14 = arith.constant dense<0.000000e+00> : vector<64x32xf32>
    %18 = tpu.matmul %9, %17, %cst_14 {dimension_numbers = #tpu.dot_dimension_numbers<[1], [0], [0], [1], [0, 0, 1, 1], [], []>} : vector<64x384xbf16>, vector<384x32xbf16>, vector<64x32xf32> -> vector<64x32xf32>
    %19 = vector.shape_cast %12 : vector<64x32xf32> to vector<8x8x32xf32>
    %cst_15 = arith.constant 0.000000e+00 : f32
    %20 = vector.broadcast %cst_15 : f32 to vector<8x1x32xf32>
    %21 = vector.extract_strided_slice %19 {offsets = [0, 0, 0], sizes = [8, 7, 32], strides = [1, 1, 1]} : vector<8x8x32xf32> to vector<8x7x32xf32>
    %22 = tpu.concatenate %20, %21 in 1 : vector<8x1x32xf32>, vector<8x7x32xf32> -> vector<8x8x32xf32>
    %23 = vector.shape_cast %15 : vector<64x32xf32> to vector<8x8x32xf32>
    %24 = arith.addf %22, %23 : vector<8x8x32xf32>
    %25 = vector.shape_cast %18 : vector<64x32xf32> to vector<8x8x32xf32>
    %26 = vector.extract_strided_slice %25 {offsets = [0, 1, 0], sizes = [8, 7, 32], strides = [1, 1, 1]} : vector<8x8x32xf32> to vector<8x7x32xf32>
    %cst_16 = arith.constant 0.000000e+00 : f32
    %27 = vector.broadcast %cst_16 : f32 to vector<8x1x32xf32>
    %28 = tpu.concatenate %26, %27 in 1 : vector<8x7x32xf32>, vector<8x1x32xf32> -> vector<8x8x32xf32>
    %29 = arith.addf %24, %28 : vector<8x8x32xf32>
    %30 = vector.shape_cast %29 : vector<8x8x32xf32> to vector<64x32xf32>
    %c64_i32 = arith.constant 64 : i32
    %31 = arith.muli %arg1, %c64_i32 : i32
    %32 = tpu.assume_multiple %31, 8 : i32
    %33 = arith.index_cast %32 : i32 to index
    %c0_17 = arith.constant 0 : index
    %34 = vector.load %arg9[%33, %c0_17] : memref<128x32xf32, #tpu.memory_space<vmem>>, vector<64x32xf32>
    tpu.vector_store %arg9[%33, %c0_17], %30 {strides = array<i32>} : memref<128x32xf32, #tpu.memory_space<vmem>>, vector<64x32xf32>,
    %c1_i32 = arith.constant 1 : i32
    %35 = arith.cmpi eq, %arg1, %c1_i32 : i32
    %36 = arith.extui %35 : i1 to i32
    %c0_i32 = arith.constant 0 : i32
    %37 = arith.cmpi ne, %36, %c0_i32 : i32
    scf.if %37 {
      %c0_18 = arith.constant 0 : index
      %c0_19 = arith.constant 0 : index
      %38 = vector.load %arg9[%c0_18, %c0_19] : memref<128x32xf32, #tpu.memory_space<vmem>>, vector<128x32xf32>
      %cst_20 = arith.constant dense<0.000000e+00> : vector<32xf32>
      %39 = vector.multi_reduction <add>, %38, %cst_20 [0] : vector<128x32xf32> to vector<32xf32>
      %40 = vector.shape_cast %39 : vector<32xf32> to vector<1x32xf32>
      %c0_21 = arith.constant 0 : index
      %c0_22 = arith.constant 0 : index
      %41 = vector.load %arg6[%c0_21, %c0_22] : memref<32x32xf32, #tpu.memory_space<vmem>>, vector<32x32xf32>
      %cst_23 = arith.constant dense<0.000000e+00> : vector<1x32xf32>
      %42 = tpu.matmul %40, %41, %cst_23 {dimension_numbers = #tpu.dot_dimension_numbers<[1], [0], [0], [1], [0, 0, 1, 1], [], []>} : vector<1x32xf32>, vector<32x32xf32>, vector<1x32xf32> -> vector<1x32xf32>
      %cst_24 = arith.constant 7.812500e-03 : f32
      %43 = vector.broadcast %cst_24 : f32 to vector<1x32xf32>
      %44 = arith.mulf %42, %43 : vector<1x32xf32>
      %c0_25 = arith.constant 0 : index
      %c0_26 = arith.constant 0 : index
      %45 = vector.load %arg7[%c0_25, %c0_26] : memref<32x32xf32, #tpu.memory_space<vmem>>, vector<32x32xf32>
      %cst_27 = arith.constant dense<0.000000e+00> : vector<1x32xf32>
      %46 = tpu.matmul %44, %45, %cst_27 {dimension_numbers = #tpu.dot_dimension_numbers<[1], [0], [0], [1], [0, 0, 1, 1], [], []>} : vector<1x32xf32>, vector<32x32xf32>, vector<1x32xf32> -> vector<1x32xf32>
      %47 = vector.broadcast %46 : vector<1x32xf32> to vector<128x32xf32>
      %48 = arith.subf %38, %47 : vector<128x32xf32>
      %49 = arith.mulf %48, %48 : vector<128x32xf32>
      %cst_28 = arith.constant dense<0.000000e+00> : vector<32xf32>
      %50 = vector.multi_reduction <add>, %49, %cst_28 [0] : vector<128x32xf32> to vector<32xf32>
      %51 = vector.shape_cast %50 : vector<32xf32> to vector<1x32xf32>
      %c0_29 = arith.constant 0 : index
      %c0_30 = arith.constant 0 : index
      %52 = vector.load %arg6[%c0_29, %c0_30] : memref<32x32xf32, #tpu.memory_space<vmem>>, vector<32x32xf32>
      %cst_31 = arith.constant dense<0.000000e+00> : vector<1x32xf32>
      %53 = tpu.matmul %51, %52, %cst_31 {dimension_numbers = #tpu.dot_dimension_numbers<[1], [0], [0], [1], [0, 0, 1, 1], [], []>} : vector<1x32xf32>, vector<32x32xf32>, vector<1x32xf32> -> vector<1x32xf32>
      %cst_32 = arith.constant 7.812500e-03 : f32
      %54 = vector.broadcast %cst_32 : f32 to vector<1x32xf32>
      %55 = arith.mulf %53, %54 : vector<1x32xf32>
      %c0_33 = arith.constant 0 : index
      %c0_34 = arith.constant 0 : index
      %56 = vector.load %arg7[%c0_33, %c0_34] : memref<32x32xf32, #tpu.memory_space<vmem>>, vector<32x32xf32>
      %cst_35 = arith.constant dense<0.000000e+00> : vector<1x32xf32>
      %57 = tpu.matmul %55, %56, %cst_35 {dimension_numbers = #tpu.dot_dimension_numbers<[1], [0], [0], [1], [0, 0, 1, 1], [], []>} : vector<1x32xf32>, vector<32x32xf32>, vector<1x32xf32> -> vector<1x32xf32>
      %cst_36 = arith.constant 9.99999974E-6 : f32
      %58 = vector.broadcast %cst_36 : f32 to vector<1x32xf32>
      %59 = arith.addf %57, %58 : vector<1x32xf32>
      %60 = math.rsqrt %59 : vector<1x32xf32>
      %c0_37 = arith.constant 0 : index
      %c0_38 = arith.constant 0 : index
      %61 = vector.load %arg4[%c0_37, %c0_38] : memref<1x32xf32, #tpu.memory_space<vmem>>, vector<1x32xf32>
      %62 = arith.mulf %60, %61 : vector<1x32xf32>
      %63 = vector.broadcast %62 : vector<1x32xf32> to vector<128x32xf32>
      %64 = arith.mulf %48, %63 : vector<128x32xf32>
      %c0_39 = arith.constant 0 : index
      %c0_40 = arith.constant 0 : index
      %65 = vector.load %arg5[%c0_39, %c0_40] : memref<1x32xf32, #tpu.memory_space<vmem>>, vector<1x32xf32>
      %66 = vector.broadcast %65 : vector<1x32xf32> to vector<128x32xf32>
      %67 = arith.addf %64, %66 : vector<128x32xf32>
      %cst_41 = arith.constant 0.000000e+00 : f32
      %68 = vector.broadcast %cst_41 : f32 to vector<128x32xf32>
      %69 = arith.maximumf %67, %68 : vector<128x32xf32>
      %70 = arith.truncf %69 : vector<128x32xf32> to vector<128x32xbf16>
      %c0_42 = arith.constant 0 : index
      %c0_43 = arith.constant 0 : index
      %c0_44 = arith.constant 0 : index
      %71 = vector.load %arg8[%c0_42, %c0_43, %c0_44] : memref<1x128x32xbf16, #tpu.memory_space<vmem>>, vector<1x128x32xbf16>
      %72 = vector.shape_cast %71 : vector<1x128x32xbf16> to vector<128x32xbf16>
      %73 = vector.shape_cast %70 : vector<128x32xbf16> to vector<1x128x32xbf16>
      tpu.vector_store %arg8[%c0_42, %c0_43, %c0_44], %73 {strides = array<i32>} : memref<1x128x32xbf16, #tpu.memory_space<vmem>>, vector<1x128x32xbf16>,
    } else {
    }
    return
  }
  func.func @transform_0(%arg0: i32, %arg1: i32) -> (i32, i32, i32, i32, i32) {
    %c0_i32 = arith.constant 0 : i32
    %c0_i32_0 = arith.constant 0 : i32
    %c0_i32_1 = arith.constant 0 : i32
    %c0_i32_2 = arith.constant 0 : i32
    return %arg0, %arg1, %c0_i32, %c0_i32_0, %c0_i32_1 : i32, i32, i32, i32, i32
  }
  func.func @transform_1(%arg0: i32, %arg1: i32) -> (i32, i32, i32) {
    %c0_i32 = arith.constant 0 : i32
    %c0_i32_0 = arith.constant 0 : i32
    %c0_i32_1 = arith.constant 0 : i32
    %c0_i32_2 = arith.constant 0 : i32
    return %c0_i32, %c0_i32_0, %c0_i32_1 : i32, i32, i32
  }
  func.func @transform_2(%arg0: i32, %arg1: i32) -> (i32, i32) {
    %c0_i32 = arith.constant 0 : i32
    %c0_i32_0 = arith.constant 0 : i32
    %c0_i32_1 = arith.constant 0 : i32
    return %c0_i32, %c0_i32_0 : i32, i32
  }
  func.func @transform_3(%arg0: i32, %arg1: i32) -> (i32, i32) {
    %c0_i32 = arith.constant 0 : i32
    %c0_i32_0 = arith.constant 0 : i32
    %c0_i32_1 = arith.constant 0 : i32
    return %c0_i32, %c0_i32_0 : i32, i32
  }
  func.func @transform_4(%arg0: i32, %arg1: i32) -> (i32, i32) {
    %c0_i32 = arith.constant 0 : i32
    %c0_i32_0 = arith.constant 0 : i32
    %c0_i32_1 = arith.constant 0 : i32
    return %c0_i32, %c0_i32_0 : i32, i32
  }
  func.func @transform_5(%arg0: i32, %arg1: i32) -> (i32, i32) {
    %c0_i32 = arith.constant 0 : i32
    %c0_i32_0 = arith.constant 0 : i32
    %c0_i32_1 = arith.constant 0 : i32
    return %c0_i32, %c0_i32_0 : i32, i32
  }
  func.func @transform_6(%arg0: i32, %arg1: i32) -> (i32, i32, i32) {
    %c0_i32 = arith.constant 0 : i32
    %c0_i32_0 = arith.constant 0 : i32
    %c0_i32_1 = arith.constant 0 : i32
    return %arg0, %c0_i32, %c0_i32_0 : i32, i32, i32
  }
}

module attributes {stable_mosaic.version = 11 : i64} {
  func.func @_conv_gn_relu_kernel(%arg0: i32, %arg1: i32, %arg2: memref<1x1x8x8x128xbf16, #tpu.memory_space<vmem>>, %arg3: memref<1x1x8x8x32xbf16, #tpu.memory_space<vmem>>, %arg4: memref<3x384x32xbf16, #tpu.memory_space<vmem>>, %arg5: memref<3x96x32xbf16, #tpu.memory_space<vmem>>, %arg6: memref<1x32xf32, #tpu.memory_space<vmem>>, %arg7: memref<1x32xf32, #tpu.memory_space<vmem>>, %arg8: memref<32x32xf32, #tpu.memory_space<vmem>>, %arg9: memref<32x32xf32, #tpu.memory_space<vmem>>, %arg10: memref<1x128x32xbf16, #tpu.memory_space<vmem>>, %arg11: memref<128x32xf32, #tpu.memory_space<vmem>>) attributes {dimension_semantics = [#tpu.dimension_semantics<parallel>, #tpu.dimension_semantics<arbitrary>], iteration_bounds = array<i64: 2, 2>, scalar_prefetch = 0 : i64, scratch_operands = 1 : i64, tpu.core_type = #tpu.core_type<tc>, window_params = [{transform_indices = @transform_0, window_bounds = array<i64: 1, 1, 8, 8, 128>}, {transform_indices = @transform_1, window_bounds = array<i64: 1, 1, 8, 8, 32>}, {pipeline_mode = #tpu.pipeline_mode<synchronous>, transform_indices = @transform_2, window_bounds = array<i64: 3, 384, 32>}, {pipeline_mode = #tpu.pipeline_mode<synchronous>, transform_indices = @transform_3, window_bounds = array<i64: 3, 96, 32>}, {pipeline_mode = #tpu.pipeline_mode<synchronous>, transform_indices = @transform_4, window_bounds = array<i64: 1, 32>}, {pipeline_mode = #tpu.pipeline_mode<synchronous>, transform_indices = @transform_5, window_bounds = array<i64: 1, 32>}, {pipeline_mode = #tpu.pipeline_mode<synchronous>, transform_indices = @transform_6, window_bounds = array<i64: 32, 32>}, {pipeline_mode = #tpu.pipeline_mode<synchronous>, transform_indices = @transform_7, window_bounds = array<i64: 32, 32>}, {transform_indices = @transform_8, window_bounds = array<i64: 1, 128, 32>}]} {
    %c0 = arith.constant 0 : index
    %c0_0 = arith.constant 0 : index
    %c0_1 = arith.constant 0 : index
    %c0_2 = arith.constant 0 : index
    %c0_3 = arith.constant 0 : index
    %0 = vector.load %arg2[%c0, %c0_0, %c0_1, %c0_2, %c0_3] : memref<1x1x8x8x128xbf16, #tpu.memory_space<vmem>>, vector<1x1x8x8x128xbf16>
    %1 = vector.shape_cast %0 : vector<1x1x8x8x128xbf16> to vector<8x8x128xbf16>
    %cst = arith.constant 0.000000e+00 : bf16
    %2 = vector.broadcast %cst : bf16 to vector<1x8x128xbf16>
    %3 = vector.extract_strided_slice %1 {offsets = [0, 0, 0], sizes = [7, 8, 128], strides = [1, 1, 1]} : vector<8x8x128xbf16> to vector<7x8x128xbf16>
    %4 = tpu.concatenate %2, %3 in 0 : vector<1x8x128xbf16>, vector<7x8x128xbf16> -> vector<8x8x128xbf16>
    %5 = vector.extract_strided_slice %1 {offsets = [1, 0, 0], sizes = [7, 8, 128], strides = [1, 1, 1]} : vector<8x8x128xbf16> to vector<7x8x128xbf16>
    %cst_4 = arith.constant 0.000000e+00 : bf16
    %6 = vector.broadcast %cst_4 : bf16 to vector<1x8x128xbf16>
    %7 = tpu.concatenate %5, %6 in 0 : vector<7x8x128xbf16>, vector<1x8x128xbf16> -> vector<8x8x128xbf16>
    %8 = tpu.concatenate %4, %1, %7 in 2 : vector<8x8x128xbf16>, vector<8x8x128xbf16>, vector<8x8x128xbf16> -> vector<8x8x384xbf16>
    %9 = vector.shape_cast %8 : vector<8x8x384xbf16> to vector<64x384xbf16>
    %c0_5 = arith.constant 0 : index
    %c0_6 = arith.constant 0 : index
    %c0_7 = arith.constant 0 : index
    %c0_8 = arith.constant 0 : index
    %c0_9 = arith.constant 0 : index
    %10 = vector.load %arg3[%c0_5, %c0_6, %c0_7, %c0_8, %c0_9] : memref<1x1x8x8x32xbf16, #tpu.memory_space<vmem>>, vector<1x1x8x8x32xbf16>
    %11 = vector.shape_cast %10 : vector<1x1x8x8x32xbf16> to vector<8x8x32xbf16>
    %cst_10 = arith.constant 0.000000e+00 : bf16
    %12 = vector.broadcast %cst_10 : bf16 to vector<1x8x32xbf16>
    %13 = vector.extract_strided_slice %11 {offsets = [0, 0, 0], sizes = [7, 8, 32], strides = [1, 1, 1]} : vector<8x8x32xbf16> to vector<7x8x32xbf16>
    %14 = tpu.concatenate %12, %13 in 0 : vector<1x8x32xbf16>, vector<7x8x32xbf16> -> vector<8x8x32xbf16>
    %15 = vector.extract_strided_slice %11 {offsets = [1, 0, 0], sizes = [7, 8, 32], strides = [1, 1, 1]} : vector<8x8x32xbf16> to vector<7x8x32xbf16>
    %cst_11 = arith.constant 0.000000e+00 : bf16
    %16 = vector.broadcast %cst_11 : bf16 to vector<1x8x32xbf16>
    %17 = tpu.concatenate %15, %16 in 0 : vector<7x8x32xbf16>, vector<1x8x32xbf16> -> vector<8x8x32xbf16>
    %18 = tpu.concatenate %14, %11, %17 in 2 : vector<8x8x32xbf16>, vector<8x8x32xbf16>, vector<8x8x32xbf16> -> vector<8x8x96xbf16>
    %19 = vector.shape_cast %18 : vector<8x8x96xbf16> to vector<64x96xbf16>
    %c0_12 = arith.constant 0 : index
    %c0_13 = arith.constant 0 : index
    %c0_14 = arith.constant 0 : index
    %20 = vector.load %arg4[%c0_12, %c0_13, %c0_14] : memref<3x384x32xbf16, #tpu.memory_space<vmem>>, vector<1x384x32xbf16>
    %21 = vector.shape_cast %20 : vector<1x384x32xbf16> to vector<384x32xbf16>
    %cst_15 = arith.constant dense<0.000000e+00> : vector<64x32xf32>
    %22 = tpu.matmul %9, %21, %cst_15 {dimension_numbers = #tpu.dot_dimension_numbers<[1], [0], [0], [1], [0, 0, 1, 1], [], []>} : vector<64x384xbf16>, vector<384x32xbf16>, vector<64x32xf32> -> vector<64x32xf32>
    %c0_16 = arith.constant 0 : index
    %c0_17 = arith.constant 0 : index
    %c0_18 = arith.constant 0 : index
    %23 = vector.load %arg5[%c0_16, %c0_17, %c0_18] : memref<3x96x32xbf16, #tpu.memory_space<vmem>>, vector<1x96x32xbf16>
    %24 = vector.shape_cast %23 : vector<1x96x32xbf16> to vector<96x32xbf16>
    %cst_19 = arith.constant dense<0.000000e+00> : vector<64x32xf32>
    %25 = tpu.matmul %19, %24, %cst_19 {dimension_numbers = #tpu.dot_dimension_numbers<[1], [0], [0], [1], [0, 0, 1, 1], [], []>} : vector<64x96xbf16>, vector<96x32xbf16>, vector<64x32xf32> -> vector<64x32xf32>
    %26 = arith.addf %22, %25 : vector<64x32xf32>
    %c1 = arith.constant 1 : index
    %c0_20 = arith.constant 0 : index
    %c0_21 = arith.constant 0 : index
    %27 = vector.load %arg4[%c1, %c0_20, %c0_21] : memref<3x384x32xbf16, #tpu.memory_space<vmem>>, vector<1x384x32xbf16>
    %28 = vector.shape_cast %27 : vector<1x384x32xbf16> to vector<384x32xbf16>
    %cst_22 = arith.constant dense<0.000000e+00> : vector<64x32xf32>
    %29 = tpu.matmul %9, %28, %cst_22 {dimension_numbers = #tpu.dot_dimension_numbers<[1], [0], [0], [1], [0, 0, 1, 1], [], []>} : vector<64x384xbf16>, vector<384x32xbf16>, vector<64x32xf32> -> vector<64x32xf32>
    %c1_23 = arith.constant 1 : index
    %c0_24 = arith.constant 0 : index
    %c0_25 = arith.constant 0 : index
    %30 = vector.load %arg5[%c1_23, %c0_24, %c0_25] : memref<3x96x32xbf16, #tpu.memory_space<vmem>>, vector<1x96x32xbf16>
    %31 = vector.shape_cast %30 : vector<1x96x32xbf16> to vector<96x32xbf16>
    %cst_26 = arith.constant dense<0.000000e+00> : vector<64x32xf32>
    %32 = tpu.matmul %19, %31, %cst_26 {dimension_numbers = #tpu.dot_dimension_numbers<[1], [0], [0], [1], [0, 0, 1, 1], [], []>} : vector<64x96xbf16>, vector<96x32xbf16>, vector<64x32xf32> -> vector<64x32xf32>
    %33 = arith.addf %29, %32 : vector<64x32xf32>
    %c2 = arith.constant 2 : index
    %c0_27 = arith.constant 0 : index
    %c0_28 = arith.constant 0 : index
    %34 = vector.load %arg4[%c2, %c0_27, %c0_28] : memref<3x384x32xbf16, #tpu.memory_space<vmem>>, vector<1x384x32xbf16>
    %35 = vector.shape_cast %34 : vector<1x384x32xbf16> to vector<384x32xbf16>
    %cst_29 = arith.constant dense<0.000000e+00> : vector<64x32xf32>
    %36 = tpu.matmul %9, %35, %cst_29 {dimension_numbers = #tpu.dot_dimension_numbers<[1], [0], [0], [1], [0, 0, 1, 1], [], []>} : vector<64x384xbf16>, vector<384x32xbf16>, vector<64x32xf32> -> vector<64x32xf32>
    %c2_30 = arith.constant 2 : index
    %c0_31 = arith.constant 0 : index
    %c0_32 = arith.constant 0 : index
    %37 = vector.load %arg5[%c2_30, %c0_31, %c0_32] : memref<3x96x32xbf16, #tpu.memory_space<vmem>>, vector<1x96x32xbf16>
    %38 = vector.shape_cast %37 : vector<1x96x32xbf16> to vector<96x32xbf16>
    %cst_33 = arith.constant dense<0.000000e+00> : vector<64x32xf32>
    %39 = tpu.matmul %19, %38, %cst_33 {dimension_numbers = #tpu.dot_dimension_numbers<[1], [0], [0], [1], [0, 0, 1, 1], [], []>} : vector<64x96xbf16>, vector<96x32xbf16>, vector<64x32xf32> -> vector<64x32xf32>
    %40 = arith.addf %36, %39 : vector<64x32xf32>
    %41 = vector.shape_cast %26 : vector<64x32xf32> to vector<8x8x32xf32>
    %cst_34 = arith.constant 0.000000e+00 : f32
    %42 = vector.broadcast %cst_34 : f32 to vector<8x1x32xf32>
    %43 = vector.extract_strided_slice %41 {offsets = [0, 0, 0], sizes = [8, 7, 32], strides = [1, 1, 1]} : vector<8x8x32xf32> to vector<8x7x32xf32>
    %44 = tpu.concatenate %42, %43 in 1 : vector<8x1x32xf32>, vector<8x7x32xf32> -> vector<8x8x32xf32>
    %45 = vector.shape_cast %33 : vector<64x32xf32> to vector<8x8x32xf32>
    %46 = arith.addf %44, %45 : vector<8x8x32xf32>
    %47 = vector.shape_cast %40 : vector<64x32xf32> to vector<8x8x32xf32>
    %48 = vector.extract_strided_slice %47 {offsets = [0, 1, 0], sizes = [8, 7, 32], strides = [1, 1, 1]} : vector<8x8x32xf32> to vector<8x7x32xf32>
    %cst_35 = arith.constant 0.000000e+00 : f32
    %49 = vector.broadcast %cst_35 : f32 to vector<8x1x32xf32>
    %50 = tpu.concatenate %48, %49 in 1 : vector<8x7x32xf32>, vector<8x1x32xf32> -> vector<8x8x32xf32>
    %51 = arith.addf %46, %50 : vector<8x8x32xf32>
    %52 = vector.shape_cast %51 : vector<8x8x32xf32> to vector<64x32xf32>
    %c64_i32 = arith.constant 64 : i32
    %53 = arith.muli %arg1, %c64_i32 : i32
    %54 = tpu.assume_multiple %53, 8 : i32
    %55 = arith.index_cast %54 : i32 to index
    %c0_36 = arith.constant 0 : index
    %56 = vector.load %arg11[%55, %c0_36] : memref<128x32xf32, #tpu.memory_space<vmem>>, vector<64x32xf32>
    tpu.vector_store %arg11[%55, %c0_36], %52 {strides = array<i32>} : memref<128x32xf32, #tpu.memory_space<vmem>>, vector<64x32xf32>,
    %c1_i32 = arith.constant 1 : i32
    %57 = arith.cmpi eq, %arg1, %c1_i32 : i32
    %58 = arith.extui %57 : i1 to i32
    %c0_i32 = arith.constant 0 : i32
    %59 = arith.cmpi ne, %58, %c0_i32 : i32
    scf.if %59 {
      %c0_37 = arith.constant 0 : index
      %c0_38 = arith.constant 0 : index
      %60 = vector.load %arg11[%c0_37, %c0_38] : memref<128x32xf32, #tpu.memory_space<vmem>>, vector<128x32xf32>
      %cst_39 = arith.constant dense<0.000000e+00> : vector<32xf32>
      %61 = vector.multi_reduction <add>, %60, %cst_39 [0] : vector<128x32xf32> to vector<32xf32>
      %62 = vector.shape_cast %61 : vector<32xf32> to vector<1x32xf32>
      %c0_40 = arith.constant 0 : index
      %c0_41 = arith.constant 0 : index
      %63 = vector.load %arg8[%c0_40, %c0_41] : memref<32x32xf32, #tpu.memory_space<vmem>>, vector<32x32xf32>
      %cst_42 = arith.constant dense<0.000000e+00> : vector<1x32xf32>
      %64 = tpu.matmul %62, %63, %cst_42 {dimension_numbers = #tpu.dot_dimension_numbers<[1], [0], [0], [1], [0, 0, 1, 1], [], []>} : vector<1x32xf32>, vector<32x32xf32>, vector<1x32xf32> -> vector<1x32xf32>
      %cst_43 = arith.constant 7.812500e-03 : f32
      %65 = vector.broadcast %cst_43 : f32 to vector<1x32xf32>
      %66 = arith.mulf %64, %65 : vector<1x32xf32>
      %c0_44 = arith.constant 0 : index
      %c0_45 = arith.constant 0 : index
      %67 = vector.load %arg9[%c0_44, %c0_45] : memref<32x32xf32, #tpu.memory_space<vmem>>, vector<32x32xf32>
      %cst_46 = arith.constant dense<0.000000e+00> : vector<1x32xf32>
      %68 = tpu.matmul %66, %67, %cst_46 {dimension_numbers = #tpu.dot_dimension_numbers<[1], [0], [0], [1], [0, 0, 1, 1], [], []>} : vector<1x32xf32>, vector<32x32xf32>, vector<1x32xf32> -> vector<1x32xf32>
      %69 = vector.broadcast %68 : vector<1x32xf32> to vector<128x32xf32>
      %70 = arith.subf %60, %69 : vector<128x32xf32>
      %71 = arith.mulf %70, %70 : vector<128x32xf32>
      %cst_47 = arith.constant dense<0.000000e+00> : vector<32xf32>
      %72 = vector.multi_reduction <add>, %71, %cst_47 [0] : vector<128x32xf32> to vector<32xf32>
      %73 = vector.shape_cast %72 : vector<32xf32> to vector<1x32xf32>
      %c0_48 = arith.constant 0 : index
      %c0_49 = arith.constant 0 : index
      %74 = vector.load %arg8[%c0_48, %c0_49] : memref<32x32xf32, #tpu.memory_space<vmem>>, vector<32x32xf32>
      %cst_50 = arith.constant dense<0.000000e+00> : vector<1x32xf32>
      %75 = tpu.matmul %73, %74, %cst_50 {dimension_numbers = #tpu.dot_dimension_numbers<[1], [0], [0], [1], [0, 0, 1, 1], [], []>} : vector<1x32xf32>, vector<32x32xf32>, vector<1x32xf32> -> vector<1x32xf32>
      %cst_51 = arith.constant 7.812500e-03 : f32
      %76 = vector.broadcast %cst_51 : f32 to vector<1x32xf32>
      %77 = arith.mulf %75, %76 : vector<1x32xf32>
      %c0_52 = arith.constant 0 : index
      %c0_53 = arith.constant 0 : index
      %78 = vector.load %arg9[%c0_52, %c0_53] : memref<32x32xf32, #tpu.memory_space<vmem>>, vector<32x32xf32>
      %cst_54 = arith.constant dense<0.000000e+00> : vector<1x32xf32>
      %79 = tpu.matmul %77, %78, %cst_54 {dimension_numbers = #tpu.dot_dimension_numbers<[1], [0], [0], [1], [0, 0, 1, 1], [], []>} : vector<1x32xf32>, vector<32x32xf32>, vector<1x32xf32> -> vector<1x32xf32>
      %cst_55 = arith.constant 9.99999974E-6 : f32
      %80 = vector.broadcast %cst_55 : f32 to vector<1x32xf32>
      %81 = arith.addf %79, %80 : vector<1x32xf32>
      %82 = math.rsqrt %81 : vector<1x32xf32>
      %c0_56 = arith.constant 0 : index
      %c0_57 = arith.constant 0 : index
      %83 = vector.load %arg6[%c0_56, %c0_57] : memref<1x32xf32, #tpu.memory_space<vmem>>, vector<1x32xf32>
      %84 = arith.mulf %82, %83 : vector<1x32xf32>
      %85 = vector.broadcast %84 : vector<1x32xf32> to vector<128x32xf32>
      %86 = arith.mulf %70, %85 : vector<128x32xf32>
      %c0_58 = arith.constant 0 : index
      %c0_59 = arith.constant 0 : index
      %87 = vector.load %arg7[%c0_58, %c0_59] : memref<1x32xf32, #tpu.memory_space<vmem>>, vector<1x32xf32>
      %88 = vector.broadcast %87 : vector<1x32xf32> to vector<128x32xf32>
      %89 = arith.addf %86, %88 : vector<128x32xf32>
      %cst_60 = arith.constant 0.000000e+00 : f32
      %90 = vector.broadcast %cst_60 : f32 to vector<128x32xf32>
      %91 = arith.maximumf %89, %90 : vector<128x32xf32>
      %92 = arith.truncf %91 : vector<128x32xf32> to vector<128x32xbf16>
      %c0_61 = arith.constant 0 : index
      %c0_62 = arith.constant 0 : index
      %c0_63 = arith.constant 0 : index
      %93 = vector.load %arg10[%c0_61, %c0_62, %c0_63] : memref<1x128x32xbf16, #tpu.memory_space<vmem>>, vector<1x128x32xbf16>
      %94 = vector.shape_cast %93 : vector<1x128x32xbf16> to vector<128x32xbf16>
      %95 = vector.shape_cast %92 : vector<128x32xbf16> to vector<1x128x32xbf16>
      tpu.vector_store %arg10[%c0_61, %c0_62, %c0_63], %95 {strides = array<i32>} : memref<1x128x32xbf16, #tpu.memory_space<vmem>>, vector<1x128x32xbf16>,
    } else {
    }
    return
  }
  func.func @transform_0(%arg0: i32, %arg1: i32) -> (i32, i32, i32, i32, i32) {
    %c0_i32 = arith.constant 0 : i32
    %c0_i32_0 = arith.constant 0 : i32
    %c0_i32_1 = arith.constant 0 : i32
    %c0_i32_2 = arith.constant 0 : i32
    return %arg0, %arg1, %c0_i32, %c0_i32_0, %c0_i32_1 : i32, i32, i32, i32, i32
  }
  func.func @transform_1(%arg0: i32, %arg1: i32) -> (i32, i32, i32, i32, i32) {
    %c0_i32 = arith.constant 0 : i32
    %c0_i32_0 = arith.constant 0 : i32
    %c0_i32_1 = arith.constant 0 : i32
    %c0_i32_2 = arith.constant 0 : i32
    return %arg0, %arg1, %c0_i32, %c0_i32_0, %c0_i32_1 : i32, i32, i32, i32, i32
  }
  func.func @transform_2(%arg0: i32, %arg1: i32) -> (i32, i32, i32) {
    %c0_i32 = arith.constant 0 : i32
    %c0_i32_0 = arith.constant 0 : i32
    %c0_i32_1 = arith.constant 0 : i32
    %c0_i32_2 = arith.constant 0 : i32
    return %c0_i32, %c0_i32_0, %c0_i32_1 : i32, i32, i32
  }
  func.func @transform_3(%arg0: i32, %arg1: i32) -> (i32, i32, i32) {
    %c0_i32 = arith.constant 0 : i32
    %c0_i32_0 = arith.constant 0 : i32
    %c0_i32_1 = arith.constant 0 : i32
    %c0_i32_2 = arith.constant 0 : i32
    return %c0_i32, %c0_i32_0, %c0_i32_1 : i32, i32, i32
  }
  func.func @transform_4(%arg0: i32, %arg1: i32) -> (i32, i32) {
    %c0_i32 = arith.constant 0 : i32
    %c0_i32_0 = arith.constant 0 : i32
    %c0_i32_1 = arith.constant 0 : i32
    return %c0_i32, %c0_i32_0 : i32, i32
  }
  func.func @transform_5(%arg0: i32, %arg1: i32) -> (i32, i32) {
    %c0_i32 = arith.constant 0 : i32
    %c0_i32_0 = arith.constant 0 : i32
    %c0_i32_1 = arith.constant 0 : i32
    return %c0_i32, %c0_i32_0 : i32, i32
  }
  func.func @transform_6(%arg0: i32, %arg1: i32) -> (i32, i32) {
    %c0_i32 = arith.constant 0 : i32
    %c0_i32_0 = arith.constant 0 : i32
    %c0_i32_1 = arith.constant 0 : i32
    return %c0_i32, %c0_i32_0 : i32, i32
  }
  func.func @transform_7(%arg0: i32, %arg1: i32) -> (i32, i32) {
    %c0_i32 = arith.constant 0 : i32
    %c0_i32_0 = arith.constant 0 : i32
    %c0_i32_1 = arith.constant 0 : i32
    return %c0_i32, %c0_i32_0 : i32, i32
  }
  func.func @transform_8(%arg0: i32, %arg1: i32) -> (i32, i32, i32) {
    %c0_i32 = arith.constant 0 : i32
    %c0_i32_0 = arith.constant 0 : i32
    %c0_i32_1 = arith.constant 0 : i32
    return %arg0, %c0_i32, %c0_i32_0 : i32, i32, i32
  }
}

module attributes {stable_mosaic.version = 11 : i64} {
  func.func @_conv_gn_relu_kernel(%arg0: i32, %arg1: i32, %arg2: memref<1x1x8x8x128xbf16, #tpu.memory_space<vmem>>, %arg3: memref<1x1x8x8x32xbf16, #tpu.memory_space<vmem>>, %arg4: memref<1x1x8x8x32xbf16, #tpu.memory_space<vmem>>, %arg5: memref<1x1x8x8x32xbf16, #tpu.memory_space<vmem>>, %arg6: memref<1x128x128xbf16, #tpu.memory_space<vmem>>, %arg7: memref<1x128x128xbf16, #tpu.memory_space<vmem>>, %arg8: memref<1x32x128xbf16, #tpu.memory_space<vmem>>, %arg9: memref<1x32x128xbf16, #tpu.memory_space<vmem>>, %arg10: memref<1x32x128xbf16, #tpu.memory_space<vmem>>, %arg11: memref<1x128xf32, #tpu.memory_space<vmem>>, %arg12: memref<1x128xf32, #tpu.memory_space<vmem>>, %arg13: memref<128x32xf32, #tpu.memory_space<vmem>>, %arg14: memref<32x128xf32, #tpu.memory_space<vmem>>, %arg15: memref<1x128x128xbf16, #tpu.memory_space<vmem>>, %arg16: memref<128x128xf32, #tpu.memory_space<vmem>>) attributes {dimension_semantics = [#tpu.dimension_semantics<parallel>, #tpu.dimension_semantics<arbitrary>], iteration_bounds = array<i64: 2, 2>, scalar_prefetch = 0 : i64, scratch_operands = 1 : i64, tpu.core_type = #tpu.core_type<tc>, window_params = [{transform_indices = @transform_0, window_bounds = array<i64: 1, 1, 8, 8, 128>}, {transform_indices = @transform_1, window_bounds = array<i64: 1, 1, 8, 8, 32>}, {transform_indices = @transform_2, window_bounds = array<i64: 1, 1, 8, 8, 32>}, {transform_indices = @transform_3, window_bounds = array<i64: 1, 1, 8, 8, 32>}, {transform_indices = @transform_4, window_bounds = array<i64: 1, 128, 128>}, {pipeline_mode = #tpu.pipeline_mode<synchronous>, transform_indices = @transform_5, window_bounds = array<i64: 1, 128, 128>}, {pipeline_mode = #tpu.pipeline_mode<synchronous>, transform_indices = @transform_6, window_bounds = array<i64: 1, 32, 128>}, {pipeline_mode = #tpu.pipeline_mode<synchronous>, transform_indices = @transform_7, window_bounds = array<i64: 1, 32, 128>}, {pipeline_mode = #tpu.pipeline_mode<synchronous>, transform_indices = @transform_8, window_bounds = array<i64: 1, 32, 128>}, {pipeline_mode = #tpu.pipeline_mode<synchronous>, transform_indices = @transform_9, window_bounds = array<i64: 1, 128>}, {pipeline_mode = #tpu.pipeline_mode<synchronous>, transform_indices = @transform_10, window_bounds = array<i64: 1, 128>}, {pipeline_mode = #tpu.pipeline_mode<synchronous>, transform_indices = @transform_11, window_bounds = array<i64: 128, 32>}, {pipeline_mode = #tpu.pipeline_mode<synchronous>, transform_indices = @transform_12, window_bounds = array<i64: 32, 128>}, {transform_indices = @transform_13, window_bounds = array<i64: 1, 128, 128>}]} {
    %c0 = arith.constant 0 : index
    %c0_0 = arith.constant 0 : index
    %c0_1 = arith.constant 0 : index
    %c0_2 = arith.constant 0 : index
    %c0_3 = arith.constant 0 : index
    %0 = vector.load %arg2[%c0, %c0_0, %c0_1, %c0_2, %c0_3] : memref<1x1x8x8x128xbf16, #tpu.memory_space<vmem>>, vector<1x1x8x8x128xbf16>
    %1 = vector.shape_cast %0 : vector<1x1x8x8x128xbf16> to vector<8x8x128xbf16>
    %2 = vector.shape_cast %1 : vector<8x8x128xbf16> to vector<64x128xbf16>
    %c0_4 = arith.constant 0 : index
    %c0_5 = arith.constant 0 : index
    %c0_6 = arith.constant 0 : index
    %c0_7 = arith.constant 0 : index
    %c0_8 = arith.constant 0 : index
    %3 = vector.load %arg3[%c0_4, %c0_5, %c0_6, %c0_7, %c0_8] : memref<1x1x8x8x32xbf16, #tpu.memory_space<vmem>>, vector<1x1x8x8x32xbf16>
    %4 = vector.shape_cast %3 : vector<1x1x8x8x32xbf16> to vector<8x8x32xbf16>
    %5 = vector.shape_cast %4 : vector<8x8x32xbf16> to vector<64x32xbf16>
    %c0_9 = arith.constant 0 : index
    %c0_10 = arith.constant 0 : index
    %c0_11 = arith.constant 0 : index
    %c0_12 = arith.constant 0 : index
    %c0_13 = arith.constant 0 : index
    %6 = vector.load %arg4[%c0_9, %c0_10, %c0_11, %c0_12, %c0_13] : memref<1x1x8x8x32xbf16, #tpu.memory_space<vmem>>, vector<1x1x8x8x32xbf16>
    %7 = vector.shape_cast %6 : vector<1x1x8x8x32xbf16> to vector<8x8x32xbf16>
    %8 = vector.shape_cast %7 : vector<8x8x32xbf16> to vector<64x32xbf16>
    %c0_14 = arith.constant 0 : index
    %c0_15 = arith.constant 0 : index
    %c0_16 = arith.constant 0 : index
    %c0_17 = arith.constant 0 : index
    %c0_18 = arith.constant 0 : index
    %9 = vector.load %arg5[%c0_14, %c0_15, %c0_16, %c0_17, %c0_18] : memref<1x1x8x8x32xbf16, #tpu.memory_space<vmem>>, vector<1x1x8x8x32xbf16>
    %10 = vector.shape_cast %9 : vector<1x1x8x8x32xbf16> to vector<8x8x32xbf16>
    %11 = vector.shape_cast %10 : vector<8x8x32xbf16> to vector<64x32xbf16>
    %c0_19 = arith.constant 0 : index
    %c0_20 = arith.constant 0 : index
    %c0_21 = arith.constant 0 : index
    %12 = vector.load %arg7[%c0_19, %c0_20, %c0_21] : memref<1x128x128xbf16, #tpu.memory_space<vmem>>, vector<1x128x128xbf16>
    %13 = vector.shape_cast %12 : vector<1x128x128xbf16> to vector<128x128xbf16>
    %cst = arith.constant dense<0.000000e+00> : vector<64x128xf32>
    %14 = tpu.matmul %2, %13, %cst {dimension_numbers = #tpu.dot_dimension_numbers<[1], [0], [0], [1], [0, 0, 1, 1], [], []>} : vector<64x128xbf16>, vector<128x128xbf16>, vector<64x128xf32> -> vector<64x128xf32>
    %c0_22 = arith.constant 0 : index
    %c0_23 = arith.constant 0 : index
    %c0_24 = arith.constant 0 : index
    %15 = vector.load %arg8[%c0_22, %c0_23, %c0_24] : memref<1x32x128xbf16, #tpu.memory_space<vmem>>, vector<1x32x128xbf16>
    %16 = vector.shape_cast %15 : vector<1x32x128xbf16> to vector<32x128xbf16>
    %cst_25 = arith.constant dense<0.000000e+00> : vector<64x128xf32>
    %17 = tpu.matmul %5, %16, %cst_25 {dimension_numbers = #tpu.dot_dimension_numbers<[1], [0], [0], [1], [0, 0, 1, 1], [], []>} : vector<64x32xbf16>, vector<32x128xbf16>, vector<64x128xf32> -> vector<64x128xf32>
    %18 = arith.addf %14, %17 : vector<64x128xf32>
    %c0_26 = arith.constant 0 : index
    %c0_27 = arith.constant 0 : index
    %c0_28 = arith.constant 0 : index
    %19 = vector.load %arg9[%c0_26, %c0_27, %c0_28] : memref<1x32x128xbf16, #tpu.memory_space<vmem>>, vector<1x32x128xbf16>
    %20 = vector.shape_cast %19 : vector<1x32x128xbf16> to vector<32x128xbf16>
    %cst_29 = arith.constant dense<0.000000e+00> : vector<64x128xf32>
    %21 = tpu.matmul %8, %20, %cst_29 {dimension_numbers = #tpu.dot_dimension_numbers<[1], [0], [0], [1], [0, 0, 1, 1], [], []>} : vector<64x32xbf16>, vector<32x128xbf16>, vector<64x128xf32> -> vector<64x128xf32>
    %22 = arith.addf %18, %21 : vector<64x128xf32>
    %c0_30 = arith.constant 0 : index
    %c0_31 = arith.constant 0 : index
    %c0_32 = arith.constant 0 : index
    %23 = vector.load %arg10[%c0_30, %c0_31, %c0_32] : memref<1x32x128xbf16, #tpu.memory_space<vmem>>, vector<1x32x128xbf16>
    %24 = vector.shape_cast %23 : vector<1x32x128xbf16> to vector<32x128xbf16>
    %cst_33 = arith.constant dense<0.000000e+00> : vector<64x128xf32>
    %25 = tpu.matmul %11, %24, %cst_33 {dimension_numbers = #tpu.dot_dimension_numbers<[1], [0], [0], [1], [0, 0, 1, 1], [], []>} : vector<64x32xbf16>, vector<32x128xbf16>, vector<64x128xf32> -> vector<64x128xf32>
    %26 = arith.addf %22, %25 : vector<64x128xf32>
    %c64_i32 = arith.constant 64 : i32
    %27 = arith.muli %arg1, %c64_i32 : i32
    %28 = tpu.assume_multiple %27, 8 : i32
    %29 = arith.index_cast %28 : i32 to index
    %c0_34 = arith.constant 0 : index
    %30 = vector.load %arg16[%29, %c0_34] : memref<128x128xf32, #tpu.memory_space<vmem>>, vector<64x128xf32>
    tpu.vector_store %arg16[%29, %c0_34], %26 {strides = array<i32>} : memref<128x128xf32, #tpu.memory_space<vmem>>, vector<64x128xf32>,
    %c1_i32 = arith.constant 1 : i32
    %31 = arith.cmpi eq, %arg1, %c1_i32 : i32
    %32 = arith.extui %31 : i1 to i32
    %c0_i32 = arith.constant 0 : i32
    %33 = arith.cmpi ne, %32, %c0_i32 : i32
    scf.if %33 {
      %c0_35 = arith.constant 0 : index
      %c0_36 = arith.constant 0 : index
      %34 = vector.load %arg16[%c0_35, %c0_36] : memref<128x128xf32, #tpu.memory_space<vmem>>, vector<128x128xf32>
      %cst_37 = arith.constant dense<0.000000e+00> : vector<128xf32>
      %35 = vector.multi_reduction <add>, %34, %cst_37 [0] : vector<128x128xf32> to vector<128xf32>
      %36 = vector.shape_cast %35 : vector<128xf32> to vector<1x128xf32>
      %c0_38 = arith.constant 0 : index
      %c0_39 = arith.constant 0 : index
      %37 = vector.load %arg13[%c0_38, %c0_39] : memref<128x32xf32, #tpu.memory_space<vmem>>, vector<128x32xf32>
      %cst_40 = arith.constant dense<0.000000e+00> : vector<1x32xf32>
      %38 = tpu.matmul %36, %37, %cst_40 {dimension_numbers = #tpu.dot_dimension_numbers<[1], [0], [0], [1], [0, 0, 1, 1], [], []>} : vector<1x128xf32>, vector<128x32xf32>, vector<1x32xf32> -> vector<1x32xf32>
      %cst_41 = arith.constant 0.001953125 : f32
      %39 = vector.broadcast %cst_41 : f32 to vector<1x32xf32>
      %40 = arith.mulf %38, %39 : vector<1x32xf32>
      %c0_42 = arith.constant 0 : index
      %c0_43 = arith.constant 0 : index
      %41 = vector.load %arg14[%c0_42, %c0_43] : memref<32x128xf32, #tpu.memory_space<vmem>>, vector<32x128xf32>
      %cst_44 = arith.constant dense<0.000000e+00> : vector<1x128xf32>
      %42 = tpu.matmul %40, %41, %cst_44 {dimension_numbers = #tpu.dot_dimension_numbers<[1], [0], [0], [1], [0, 0, 1, 1], [], []>} : vector<1x32xf32>, vector<32x128xf32>, vector<1x128xf32> -> vector<1x128xf32>
      %43 = vector.broadcast %42 : vector<1x128xf32> to vector<128x128xf32>
      %44 = arith.subf %34, %43 : vector<128x128xf32>
      %45 = arith.mulf %44, %44 : vector<128x128xf32>
      %cst_45 = arith.constant dense<0.000000e+00> : vector<128xf32>
      %46 = vector.multi_reduction <add>, %45, %cst_45 [0] : vector<128x128xf32> to vector<128xf32>
      %47 = vector.shape_cast %46 : vector<128xf32> to vector<1x128xf32>
      %c0_46 = arith.constant 0 : index
      %c0_47 = arith.constant 0 : index
      %48 = vector.load %arg13[%c0_46, %c0_47] : memref<128x32xf32, #tpu.memory_space<vmem>>, vector<128x32xf32>
      %cst_48 = arith.constant dense<0.000000e+00> : vector<1x32xf32>
      %49 = tpu.matmul %47, %48, %cst_48 {dimension_numbers = #tpu.dot_dimension_numbers<[1], [0], [0], [1], [0, 0, 1, 1], [], []>} : vector<1x128xf32>, vector<128x32xf32>, vector<1x32xf32> -> vector<1x32xf32>
      %cst_49 = arith.constant 0.001953125 : f32
      %50 = vector.broadcast %cst_49 : f32 to vector<1x32xf32>
      %51 = arith.mulf %49, %50 : vector<1x32xf32>
      %c0_50 = arith.constant 0 : index
      %c0_51 = arith.constant 0 : index
      %52 = vector.load %arg14[%c0_50, %c0_51] : memref<32x128xf32, #tpu.memory_space<vmem>>, vector<32x128xf32>
      %cst_52 = arith.constant dense<0.000000e+00> : vector<1x128xf32>
      %53 = tpu.matmul %51, %52, %cst_52 {dimension_numbers = #tpu.dot_dimension_numbers<[1], [0], [0], [1], [0, 0, 1, 1], [], []>} : vector<1x32xf32>, vector<32x128xf32>, vector<1x128xf32> -> vector<1x128xf32>
      %cst_53 = arith.constant 9.99999974E-6 : f32
      %54 = vector.broadcast %cst_53 : f32 to vector<1x128xf32>
      %55 = arith.addf %53, %54 : vector<1x128xf32>
      %56 = math.rsqrt %55 : vector<1x128xf32>
      %c0_54 = arith.constant 0 : index
      %c0_55 = arith.constant 0 : index
      %57 = vector.load %arg11[%c0_54, %c0_55] : memref<1x128xf32, #tpu.memory_space<vmem>>, vector<1x128xf32>
      %58 = arith.mulf %56, %57 : vector<1x128xf32>
      %59 = vector.broadcast %58 : vector<1x128xf32> to vector<128x128xf32>
      %60 = arith.mulf %44, %59 : vector<128x128xf32>
      %c0_56 = arith.constant 0 : index
      %c0_57 = arith.constant 0 : index
      %61 = vector.load %arg12[%c0_56, %c0_57] : memref<1x128xf32, #tpu.memory_space<vmem>>, vector<1x128xf32>
      %62 = vector.broadcast %61 : vector<1x128xf32> to vector<128x128xf32>
      %63 = arith.addf %60, %62 : vector<128x128xf32>
      %cst_58 = arith.constant 0.000000e+00 : f32
      %64 = vector.broadcast %cst_58 : f32 to vector<128x128xf32>
      %65 = arith.maximumf %63, %64 : vector<128x128xf32>
      %c0_59 = arith.constant 0 : index
      %c0_60 = arith.constant 0 : index
      %c0_61 = arith.constant 0 : index
      %66 = vector.load %arg6[%c0_59, %c0_60, %c0_61] : memref<1x128x128xbf16, #tpu.memory_space<vmem>>, vector<1x128x128xbf16>
      %67 = vector.shape_cast %66 : vector<1x128x128xbf16> to vector<128x128xbf16>
      %68 = arith.extf %67 : vector<128x128xbf16> to vector<128x128xf32>
      %69 = arith.addf %65, %68 : vector<128x128xf32>
      %70 = arith.truncf %69 : vector<128x128xf32> to vector<128x128xbf16>
      %c0_62 = arith.constant 0 : index
      %c0_63 = arith.constant 0 : index
      %c0_64 = arith.constant 0 : index
      %71 = vector.load %arg15[%c0_62, %c0_63, %c0_64] : memref<1x128x128xbf16, #tpu.memory_space<vmem>>, vector<1x128x128xbf16>
      %72 = vector.shape_cast %71 : vector<1x128x128xbf16> to vector<128x128xbf16>
      %73 = vector.shape_cast %70 : vector<128x128xbf16> to vector<1x128x128xbf16>
      tpu.vector_store %arg15[%c0_62, %c0_63, %c0_64], %73 {strides = array<i32>} : memref<1x128x128xbf16, #tpu.memory_space<vmem>>, vector<1x128x128xbf16>,
    } else {
    }
    return
  }
  func.func @transform_0(%arg0: i32, %arg1: i32) -> (i32, i32, i32, i32, i32) {
    %c0_i32 = arith.constant 0 : i32
    %c0_i32_0 = arith.constant 0 : i32
    %c0_i32_1 = arith.constant 0 : i32
    %c0_i32_2 = arith.constant 0 : i32
    return %arg0, %arg1, %c0_i32, %c0_i32_0, %c0_i32_1 : i32, i32, i32, i32, i32
  }
  func.func @transform_1(%arg0: i32, %arg1: i32) -> (i32, i32, i32, i32, i32) {
    %c0_i32 = arith.constant 0 : i32
    %c0_i32_0 = arith.constant 0 : i32
    %c0_i32_1 = arith.constant 0 : i32
    %c0_i32_2 = arith.constant 0 : i32
    return %arg0, %arg1, %c0_i32, %c0_i32_0, %c0_i32_1 : i32, i32, i32, i32, i32
  }
  func.func @transform_2(%arg0: i32, %arg1: i32) -> (i32, i32, i32, i32, i32) {
    %c0_i32 = arith.constant 0 : i32
    %c0_i32_0 = arith.constant 0 : i32
    %c0_i32_1 = arith.constant 0 : i32
    %c0_i32_2 = arith.constant 0 : i32
    return %arg0, %arg1, %c0_i32, %c0_i32_0, %c0_i32_1 : i32, i32, i32, i32, i32
  }
  func.func @transform_3(%arg0: i32, %arg1: i32) -> (i32, i32, i32, i32, i32) {
    %c0_i32 = arith.constant 0 : i32
    %c0_i32_0 = arith.constant 0 : i32
    %c0_i32_1 = arith.constant 0 : i32
    %c0_i32_2 = arith.constant 0 : i32
    return %arg0, %arg1, %c0_i32, %c0_i32_0, %c0_i32_1 : i32, i32, i32, i32, i32
  }
  func.func @transform_4(%arg0: i32, %arg1: i32) -> (i32, i32, i32) {
    %c0_i32 = arith.constant 0 : i32
    %c0_i32_0 = arith.constant 0 : i32
    %c0_i32_1 = arith.constant 0 : i32
    return %arg0, %c0_i32, %c0_i32_0 : i32, i32, i32
  }
  func.func @transform_5(%arg0: i32, %arg1: i32) -> (i32, i32, i32) {
    %c0_i32 = arith.constant 0 : i32
    %c0_i32_0 = arith.constant 0 : i32
    %c0_i32_1 = arith.constant 0 : i32
    %c0_i32_2 = arith.constant 0 : i32
    return %c0_i32, %c0_i32_0, %c0_i32_1 : i32, i32, i32
  }
  func.func @transform_6(%arg0: i32, %arg1: i32) -> (i32, i32, i32) {
    %c0_i32 = arith.constant 0 : i32
    %c0_i32_0 = arith.constant 0 : i32
    %c0_i32_1 = arith.constant 0 : i32
    %c0_i32_2 = arith.constant 0 : i32
    return %c0_i32, %c0_i32_0, %c0_i32_1 : i32, i32, i32
  }
  func.func @transform_7(%arg0: i32, %arg1: i32) -> (i32, i32, i32) {
    %c0_i32 = arith.constant 0 : i32
    %c0_i32_0 = arith.constant 0 : i32
    %c0_i32_1 = arith.constant 0 : i32
    %c0_i32_2 = arith.constant 0 : i32
    return %c0_i32, %c0_i32_0, %c0_i32_1 : i32, i32, i32
  }
  func.func @transform_8(%arg0: i32, %arg1: i32) -> (i32, i32, i32) {
    %c0_i32 = arith.constant 0 : i32
    %c0_i32_0 = arith.constant 0 : i32
    %c0_i32_1 = arith.constant 0 : i32
    %c0_i32_2 = arith.constant 0 : i32
    return %c0_i32, %c0_i32_0, %c0_i32_1 : i32, i32, i32
  }
  func.func @transform_9(%arg0: i32, %arg1: i32) -> (i32, i32) {
    %c0_i32 = arith.constant 0 : i32
    %c0_i32_0 = arith.constant 0 : i32
    %c0_i32_1 = arith.constant 0 : i32
    return %c0_i32, %c0_i32_0 : i32, i32
  }
  func.func @transform_10(%arg0: i32, %arg1: i32) -> (i32, i32) {
    %c0_i32 = arith.constant 0 : i32
    %c0_i32_0 = arith.constant 0 : i32
    %c0_i32_1 = arith.constant 0 : i32
    return %c0_i32, %c0_i32_0 : i32, i32
  }
  func.func @transform_11(%arg0: i32, %arg1: i32) -> (i32, i32) {
    %c0_i32 = arith.constant 0 : i32
    %c0_i32_0 = arith.constant 0 : i32
    %c0_i32_1 = arith.constant 0 : i32
    return %c0_i32, %c0_i32_0 : i32, i32
  }
  func.func @transform_12(%arg0: i32, %arg1: i32) -> (i32, i32) {
    %c0_i32 = arith.constant 0 : i32
    %c0_i32_0 = arith.constant 0 : i32
    %c0_i32_1 = arith.constant 0 : i32
    return %c0_i32, %c0_i32_0 : i32, i32
  }
  func.func @transform_13(%arg0: i32, %arg1: i32) -> (i32, i32, i32) {
    %c0_i32 = arith.constant 0 : i32
    %c0_i32_0 = arith.constant 0 : i32
    %c0_i32_1 = arith.constant 0 : i32
    return %arg0, %c0_i32, %c0_i32_0 : i32, i32, i32
  }
}

module attributes {stable_mosaic.version = 11 : i64} {
  func.func @_conv_gn_relu_kernel(%arg0: i32, %arg1: i32, %arg2: memref<1x1x8x8x128xbf16, #tpu.memory_space<vmem>>, %arg3: memref<3x384x128xbf16, #tpu.memory_space<vmem>>, %arg4: memref<1x128xf32, #tpu.memory_space<vmem>>, %arg5: memref<1x128xf32, #tpu.memory_space<vmem>>, %arg6: memref<128x32xf32, #tpu.memory_space<vmem>>, %arg7: memref<32x128xf32, #tpu.memory_space<vmem>>, %arg8: memref<1x128x128xbf16, #tpu.memory_space<vmem>>, %arg9: memref<128x128xf32, #tpu.memory_space<vmem>>) attributes {dimension_semantics = [#tpu.dimension_semantics<parallel>, #tpu.dimension_semantics<arbitrary>], iteration_bounds = array<i64: 2, 2>, scalar_prefetch = 0 : i64, scratch_operands = 1 : i64, tpu.core_type = #tpu.core_type<tc>, window_params = [{transform_indices = @transform_0, window_bounds = array<i64: 1, 1, 8, 8, 128>}, {pipeline_mode = #tpu.pipeline_mode<synchronous>, transform_indices = @transform_1, window_bounds = array<i64: 3, 384, 128>}, {pipeline_mode = #tpu.pipeline_mode<synchronous>, transform_indices = @transform_2, window_bounds = array<i64: 1, 128>}, {pipeline_mode = #tpu.pipeline_mode<synchronous>, transform_indices = @transform_3, window_bounds = array<i64: 1, 128>}, {pipeline_mode = #tpu.pipeline_mode<synchronous>, transform_indices = @transform_4, window_bounds = array<i64: 128, 32>}, {pipeline_mode = #tpu.pipeline_mode<synchronous>, transform_indices = @transform_5, window_bounds = array<i64: 32, 128>}, {transform_indices = @transform_6, window_bounds = array<i64: 1, 128, 128>}]} {
    %c0 = arith.constant 0 : index
    %c0_0 = arith.constant 0 : index
    %c0_1 = arith.constant 0 : index
    %c0_2 = arith.constant 0 : index
    %c0_3 = arith.constant 0 : index
    %0 = vector.load %arg2[%c0, %c0_0, %c0_1, %c0_2, %c0_3] : memref<1x1x8x8x128xbf16, #tpu.memory_space<vmem>>, vector<1x1x8x8x128xbf16>
    %1 = vector.shape_cast %0 : vector<1x1x8x8x128xbf16> to vector<8x8x128xbf16>
    %cst = arith.constant 0.000000e+00 : bf16
    %2 = vector.broadcast %cst : bf16 to vector<1x8x128xbf16>
    %3 = vector.extract_strided_slice %1 {offsets = [0, 0, 0], sizes = [7, 8, 128], strides = [1, 1, 1]} : vector<8x8x128xbf16> to vector<7x8x128xbf16>
    %4 = tpu.concatenate %2, %3 in 0 : vector<1x8x128xbf16>, vector<7x8x128xbf16> -> vector<8x8x128xbf16>
    %5 = vector.extract_strided_slice %1 {offsets = [1, 0, 0], sizes = [7, 8, 128], strides = [1, 1, 1]} : vector<8x8x128xbf16> to vector<7x8x128xbf16>
    %cst_4 = arith.constant 0.000000e+00 : bf16
    %6 = vector.broadcast %cst_4 : bf16 to vector<1x8x128xbf16>
    %7 = tpu.concatenate %5, %6 in 0 : vector<7x8x128xbf16>, vector<1x8x128xbf16> -> vector<8x8x128xbf16>
    %8 = tpu.concatenate %4, %1, %7 in 2 : vector<8x8x128xbf16>, vector<8x8x128xbf16>, vector<8x8x128xbf16> -> vector<8x8x384xbf16>
    %9 = vector.shape_cast %8 : vector<8x8x384xbf16> to vector<64x384xbf16>
    %c0_5 = arith.constant 0 : index
    %c0_6 = arith.constant 0 : index
    %c0_7 = arith.constant 0 : index
    %10 = vector.load %arg3[%c0_5, %c0_6, %c0_7] : memref<3x384x128xbf16, #tpu.memory_space<vmem>>, vector<1x384x128xbf16>
    %11 = vector.shape_cast %10 : vector<1x384x128xbf16> to vector<384x128xbf16>
    %cst_8 = arith.constant dense<0.000000e+00> : vector<64x128xf32>
    %12 = tpu.matmul %9, %11, %cst_8 {dimension_numbers = #tpu.dot_dimension_numbers<[1], [0], [0], [1], [0, 0, 1, 1], [], []>} : vector<64x384xbf16>, vector<384x128xbf16>, vector<64x128xf32> -> vector<64x128xf32>
    %c1 = arith.constant 1 : index
    %c0_9 = arith.constant 0 : index
    %c0_10 = arith.constant 0 : index
    %13 = vector.load %arg3[%c1, %c0_9, %c0_10] : memref<3x384x128xbf16, #tpu.memory_space<vmem>>, vector<1x384x128xbf16>
    %14 = vector.shape_cast %13 : vector<1x384x128xbf16> to vector<384x128xbf16>
    %cst_11 = arith.constant dense<0.000000e+00> : vector<64x128xf32>
    %15 = tpu.matmul %9, %14, %cst_11 {dimension_numbers = #tpu.dot_dimension_numbers<[1], [0], [0], [1], [0, 0, 1, 1], [], []>} : vector<64x384xbf16>, vector<384x128xbf16>, vector<64x128xf32> -> vector<64x128xf32>
    %c2 = arith.constant 2 : index
    %c0_12 = arith.constant 0 : index
    %c0_13 = arith.constant 0 : index
    %16 = vector.load %arg3[%c2, %c0_12, %c0_13] : memref<3x384x128xbf16, #tpu.memory_space<vmem>>, vector<1x384x128xbf16>
    %17 = vector.shape_cast %16 : vector<1x384x128xbf16> to vector<384x128xbf16>
    %cst_14 = arith.constant dense<0.000000e+00> : vector<64x128xf32>
    %18 = tpu.matmul %9, %17, %cst_14 {dimension_numbers = #tpu.dot_dimension_numbers<[1], [0], [0], [1], [0, 0, 1, 1], [], []>} : vector<64x384xbf16>, vector<384x128xbf16>, vector<64x128xf32> -> vector<64x128xf32>
    %19 = vector.shape_cast %12 : vector<64x128xf32> to vector<8x8x128xf32>
    %cst_15 = arith.constant 0.000000e+00 : f32
    %20 = vector.broadcast %cst_15 : f32 to vector<8x1x128xf32>
    %21 = vector.extract_strided_slice %19 {offsets = [0, 0, 0], sizes = [8, 7, 128], strides = [1, 1, 1]} : vector<8x8x128xf32> to vector<8x7x128xf32>
    %22 = tpu.concatenate %20, %21 in 1 : vector<8x1x128xf32>, vector<8x7x128xf32> -> vector<8x8x128xf32>
    %23 = vector.shape_cast %15 : vector<64x128xf32> to vector<8x8x128xf32>
    %24 = arith.addf %22, %23 : vector<8x8x128xf32>
    %25 = vector.shape_cast %18 : vector<64x128xf32> to vector<8x8x128xf32>
    %26 = vector.extract_strided_slice %25 {offsets = [0, 1, 0], sizes = [8, 7, 128], strides = [1, 1, 1]} : vector<8x8x128xf32> to vector<8x7x128xf32>
    %cst_16 = arith.constant 0.000000e+00 : f32
    %27 = vector.broadcast %cst_16 : f32 to vector<8x1x128xf32>
    %28 = tpu.concatenate %26, %27 in 1 : vector<8x7x128xf32>, vector<8x1x128xf32> -> vector<8x8x128xf32>
    %29 = arith.addf %24, %28 : vector<8x8x128xf32>
    %30 = vector.shape_cast %29 : vector<8x8x128xf32> to vector<64x128xf32>
    %c64_i32 = arith.constant 64 : i32
    %31 = arith.muli %arg1, %c64_i32 : i32
    %32 = tpu.assume_multiple %31, 8 : i32
    %33 = arith.index_cast %32 : i32 to index
    %c0_17 = arith.constant 0 : index
    %34 = vector.load %arg9[%33, %c0_17] : memref<128x128xf32, #tpu.memory_space<vmem>>, vector<64x128xf32>
    tpu.vector_store %arg9[%33, %c0_17], %30 {strides = array<i32>} : memref<128x128xf32, #tpu.memory_space<vmem>>, vector<64x128xf32>,
    %c1_i32 = arith.constant 1 : i32
    %35 = arith.cmpi eq, %arg1, %c1_i32 : i32
    %36 = arith.extui %35 : i1 to i32
    %c0_i32 = arith.constant 0 : i32
    %37 = arith.cmpi ne, %36, %c0_i32 : i32
    scf.if %37 {
      %c0_18 = arith.constant 0 : index
      %c0_19 = arith.constant 0 : index
      %38 = vector.load %arg9[%c0_18, %c0_19] : memref<128x128xf32, #tpu.memory_space<vmem>>, vector<128x128xf32>
      %cst_20 = arith.constant dense<0.000000e+00> : vector<128xf32>
      %39 = vector.multi_reduction <add>, %38, %cst_20 [0] : vector<128x128xf32> to vector<128xf32>
      %40 = vector.shape_cast %39 : vector<128xf32> to vector<1x128xf32>
      %c0_21 = arith.constant 0 : index
      %c0_22 = arith.constant 0 : index
      %41 = vector.load %arg6[%c0_21, %c0_22] : memref<128x32xf32, #tpu.memory_space<vmem>>, vector<128x32xf32>
      %cst_23 = arith.constant dense<0.000000e+00> : vector<1x32xf32>
      %42 = tpu.matmul %40, %41, %cst_23 {dimension_numbers = #tpu.dot_dimension_numbers<[1], [0], [0], [1], [0, 0, 1, 1], [], []>} : vector<1x128xf32>, vector<128x32xf32>, vector<1x32xf32> -> vector<1x32xf32>
      %cst_24 = arith.constant 0.001953125 : f32
      %43 = vector.broadcast %cst_24 : f32 to vector<1x32xf32>
      %44 = arith.mulf %42, %43 : vector<1x32xf32>
      %c0_25 = arith.constant 0 : index
      %c0_26 = arith.constant 0 : index
      %45 = vector.load %arg7[%c0_25, %c0_26] : memref<32x128xf32, #tpu.memory_space<vmem>>, vector<32x128xf32>
      %cst_27 = arith.constant dense<0.000000e+00> : vector<1x128xf32>
      %46 = tpu.matmul %44, %45, %cst_27 {dimension_numbers = #tpu.dot_dimension_numbers<[1], [0], [0], [1], [0, 0, 1, 1], [], []>} : vector<1x32xf32>, vector<32x128xf32>, vector<1x128xf32> -> vector<1x128xf32>
      %47 = vector.broadcast %46 : vector<1x128xf32> to vector<128x128xf32>
      %48 = arith.subf %38, %47 : vector<128x128xf32>
      %49 = arith.mulf %48, %48 : vector<128x128xf32>
      %cst_28 = arith.constant dense<0.000000e+00> : vector<128xf32>
      %50 = vector.multi_reduction <add>, %49, %cst_28 [0] : vector<128x128xf32> to vector<128xf32>
      %51 = vector.shape_cast %50 : vector<128xf32> to vector<1x128xf32>
      %c0_29 = arith.constant 0 : index
      %c0_30 = arith.constant 0 : index
      %52 = vector.load %arg6[%c0_29, %c0_30] : memref<128x32xf32, #tpu.memory_space<vmem>>, vector<128x32xf32>
      %cst_31 = arith.constant dense<0.000000e+00> : vector<1x32xf32>
      %53 = tpu.matmul %51, %52, %cst_31 {dimension_numbers = #tpu.dot_dimension_numbers<[1], [0], [0], [1], [0, 0, 1, 1], [], []>} : vector<1x128xf32>, vector<128x32xf32>, vector<1x32xf32> -> vector<1x32xf32>
      %cst_32 = arith.constant 0.001953125 : f32
      %54 = vector.broadcast %cst_32 : f32 to vector<1x32xf32>
      %55 = arith.mulf %53, %54 : vector<1x32xf32>
      %c0_33 = arith.constant 0 : index
      %c0_34 = arith.constant 0 : index
      %56 = vector.load %arg7[%c0_33, %c0_34] : memref<32x128xf32, #tpu.memory_space<vmem>>, vector<32x128xf32>
      %cst_35 = arith.constant dense<0.000000e+00> : vector<1x128xf32>
      %57 = tpu.matmul %55, %56, %cst_35 {dimension_numbers = #tpu.dot_dimension_numbers<[1], [0], [0], [1], [0, 0, 1, 1], [], []>} : vector<1x32xf32>, vector<32x128xf32>, vector<1x128xf32> -> vector<1x128xf32>
      %cst_36 = arith.constant 9.99999974E-6 : f32
      %58 = vector.broadcast %cst_36 : f32 to vector<1x128xf32>
      %59 = arith.addf %57, %58 : vector<1x128xf32>
      %60 = math.rsqrt %59 : vector<1x128xf32>
      %c0_37 = arith.constant 0 : index
      %c0_38 = arith.constant 0 : index
      %61 = vector.load %arg4[%c0_37, %c0_38] : memref<1x128xf32, #tpu.memory_space<vmem>>, vector<1x128xf32>
      %62 = arith.mulf %60, %61 : vector<1x128xf32>
      %63 = vector.broadcast %62 : vector<1x128xf32> to vector<128x128xf32>
      %64 = arith.mulf %48, %63 : vector<128x128xf32>
      %c0_39 = arith.constant 0 : index
      %c0_40 = arith.constant 0 : index
      %65 = vector.load %arg5[%c0_39, %c0_40] : memref<1x128xf32, #tpu.memory_space<vmem>>, vector<1x128xf32>
      %66 = vector.broadcast %65 : vector<1x128xf32> to vector<128x128xf32>
      %67 = arith.addf %64, %66 : vector<128x128xf32>
      %cst_41 = arith.constant 0.000000e+00 : f32
      %68 = vector.broadcast %cst_41 : f32 to vector<128x128xf32>
      %69 = arith.maximumf %67, %68 : vector<128x128xf32>
      %70 = arith.truncf %69 : vector<128x128xf32> to vector<128x128xbf16>
      %c0_42 = arith.constant 0 : index
      %c0_43 = arith.constant 0 : index
      %c0_44 = arith.constant 0 : index
      %71 = vector.load %arg8[%c0_42, %c0_43, %c0_44] : memref<1x128x128xbf16, #tpu.memory_space<vmem>>, vector<1x128x128xbf16>
      %72 = vector.shape_cast %71 : vector<1x128x128xbf16> to vector<128x128xbf16>
      %73 = vector.shape_cast %70 : vector<128x128xbf16> to vector<1x128x128xbf16>
      tpu.vector_store %arg8[%c0_42, %c0_43, %c0_44], %73 {strides = array<i32>} : memref<1x128x128xbf16, #tpu.memory_space<vmem>>, vector<1x128x128xbf16>,
    } else {
    }
    return
  }
  func.func @transform_0(%arg0: i32, %arg1: i32) -> (i32, i32, i32, i32, i32) {
    %c0_i32 = arith.constant 0 : i32
    %c0_i32_0 = arith.constant 0 : i32
    %c0_i32_1 = arith.constant 0 : i32
    %c0_i32_2 = arith.constant 0 : i32
    return %arg0, %arg1, %c0_i32, %c0_i32_0, %c0_i32_1 : i32, i32, i32, i32, i32
  }
  func.func @transform_1(%arg0: i32, %arg1: i32) -> (i32, i32, i32) {
    %c0_i32 = arith.constant 0 : i32
    %c0_i32_0 = arith.constant 0 : i32
    %c0_i32_1 = arith.constant 0 : i32
    %c0_i32_2 = arith.constant 0 : i32
    return %c0_i32, %c0_i32_0, %c0_i32_1 : i32, i32, i32
  }
  func.func @transform_2(%arg0: i32, %arg1: i32) -> (i32, i32) {
    %c0_i32 = arith.constant 0 : i32
    %c0_i32_0 = arith.constant 0 : i32
    %c0_i32_1 = arith.constant 0 : i32
    return %c0_i32, %c0_i32_0 : i32, i32
  }
  func.func @transform_3(%arg0: i32, %arg1: i32) -> (i32, i32) {
    %c0_i32 = arith.constant 0 : i32
    %c0_i32_0 = arith.constant 0 : i32
    %c0_i32_1 = arith.constant 0 : i32
    return %c0_i32, %c0_i32_0 : i32, i32
  }
  func.func @transform_4(%arg0: i32, %arg1: i32) -> (i32, i32) {
    %c0_i32 = arith.constant 0 : i32
    %c0_i32_0 = arith.constant 0 : i32
    %c0_i32_1 = arith.constant 0 : i32
    return %c0_i32, %c0_i32_0 : i32, i32
  }
  func.func @transform_5(%arg0: i32, %arg1: i32) -> (i32, i32) {
    %c0_i32 = arith.constant 0 : i32
    %c0_i32_0 = arith.constant 0 : i32
    %c0_i32_1 = arith.constant 0 : i32
    return %c0_i32, %c0_i32_0 : i32, i32
  }
  func.func @transform_6(%arg0: i32, %arg1: i32) -> (i32, i32, i32) {
    %c0_i32 = arith.constant 0 : i32
    %c0_i32_0 = arith.constant 0 : i32
    %c0_i32_1 = arith.constant 0 : i32
    return %arg0, %c0_i32, %c0_i32_0 : i32, i32, i32
  }
}

module attributes {stable_mosaic.version = 11 : i64} {
  func.func @_conv_gn_relu_kernel(%arg0: i32, %arg1: i32, %arg2: memref<1x2x16x16x128xbf16, #tpu.memory_space<vmem>>, %arg3: memref<3x768x128xbf16, #tpu.memory_space<vmem>>, %arg4: memref<1x128xf32, #tpu.memory_space<vmem>>, %arg5: memref<1x128xf32, #tpu.memory_space<vmem>>, %arg6: memref<128x32xf32, #tpu.memory_space<vmem>>, %arg7: memref<32x128xf32, #tpu.memory_space<vmem>>, %arg8: memref<1x256x128xbf16, #tpu.memory_space<vmem>>, %arg9: memref<256x128xf32, #tpu.memory_space<vmem>>) attributes {dimension_semantics = [#tpu.dimension_semantics<parallel>, #tpu.dimension_semantics<arbitrary>], iteration_bounds = array<i64: 2, 1>, scalar_prefetch = 0 : i64, scratch_operands = 1 : i64, tpu.core_type = #tpu.core_type<tc>, window_params = [{transform_indices = @transform_0, window_bounds = array<i64: 1, 2, 16, 16, 128>}, {pipeline_mode = #tpu.pipeline_mode<synchronous>, transform_indices = @transform_1, window_bounds = array<i64: 3, 768, 128>}, {pipeline_mode = #tpu.pipeline_mode<synchronous>, transform_indices = @transform_2, window_bounds = array<i64: 1, 128>}, {pipeline_mode = #tpu.pipeline_mode<synchronous>, transform_indices = @transform_3, window_bounds = array<i64: 1, 128>}, {pipeline_mode = #tpu.pipeline_mode<synchronous>, transform_indices = @transform_4, window_bounds = array<i64: 128, 32>}, {pipeline_mode = #tpu.pipeline_mode<synchronous>, transform_indices = @transform_5, window_bounds = array<i64: 32, 128>}, {transform_indices = @transform_6, window_bounds = array<i64: 1, 256, 128>}]} {
    %c0 = arith.constant 0 : index
    %c0_0 = arith.constant 0 : index
    %c0_1 = arith.constant 0 : index
    %c0_2 = arith.constant 0 : index
    %c0_3 = arith.constant 0 : index
    %0 = vector.load %arg2[%c0, %c0_0, %c0_1, %c0_2, %c0_3] : memref<1x2x16x16x128xbf16, #tpu.memory_space<vmem>>, vector<1x1x16x16x128xbf16>
    %1 = vector.shape_cast %0 : vector<1x1x16x16x128xbf16> to vector<16x16x128xbf16>
    %cst = arith.constant 0.000000e+00 : bf16
    %2 = vector.broadcast %cst : bf16 to vector<1x16x128xbf16>
    %3 = vector.extract_strided_slice %1 {offsets = [0, 0, 0], sizes = [15, 16, 128], strides = [1, 1, 1]} : vector<16x16x128xbf16> to vector<15x16x128xbf16>
    %4 = tpu.concatenate %2, %3 in 0 : vector<1x16x128xbf16>, vector<15x16x128xbf16> -> vector<16x16x128xbf16>
    %5 = vector.extract_strided_slice %1 {offsets = [1, 0, 0], sizes = [15, 16, 128], strides = [1, 1, 1]} : vector<16x16x128xbf16> to vector<15x16x128xbf16>
    %cst_4 = arith.constant 0.000000e+00 : bf16
    %6 = vector.broadcast %cst_4 : bf16 to vector<1x16x128xbf16>
    %7 = tpu.concatenate %5, %6 in 0 : vector<15x16x128xbf16>, vector<1x16x128xbf16> -> vector<16x16x128xbf16>
    %c0_5 = arith.constant 0 : index
    %c1 = arith.constant 1 : index
    %c0_6 = arith.constant 0 : index
    %c0_7 = arith.constant 0 : index
    %c0_8 = arith.constant 0 : index
    %8 = vector.load %arg2[%c0_5, %c1, %c0_6, %c0_7, %c0_8] : memref<1x2x16x16x128xbf16, #tpu.memory_space<vmem>>, vector<1x1x16x16x128xbf16>
    %9 = vector.shape_cast %8 : vector<1x1x16x16x128xbf16> to vector<16x16x128xbf16>
    %cst_9 = arith.constant 0.000000e+00 : bf16
    %10 = vector.broadcast %cst_9 : bf16 to vector<1x16x128xbf16>
    %11 = vector.extract_strided_slice %9 {offsets = [0, 0, 0], sizes = [15, 16, 128], strides = [1, 1, 1]} : vector<16x16x128xbf16> to vector<15x16x128xbf16>
    %12 = tpu.concatenate %10, %11 in 0 : vector<1x16x128xbf16>, vector<15x16x128xbf16> -> vector<16x16x128xbf16>
    %13 = vector.extract_strided_slice %9 {offsets = [1, 0, 0], sizes = [15, 16, 128], strides = [1, 1, 1]} : vector<16x16x128xbf16> to vector<15x16x128xbf16>
    %cst_10 = arith.constant 0.000000e+00 : bf16
    %14 = vector.broadcast %cst_10 : bf16 to vector<1x16x128xbf16>
    %15 = tpu.concatenate %13, %14 in 0 : vector<15x16x128xbf16>, vector<1x16x128xbf16> -> vector<16x16x128xbf16>
    %16 = tpu.concatenate %4, %1, %7, %12, %9, %15 in 2 : vector<16x16x128xbf16>, vector<16x16x128xbf16>, vector<16x16x128xbf16>, vector<16x16x128xbf16>, vector<16x16x128xbf16>, vector<16x16x128xbf16> -> vector<16x16x768xbf16>
    %17 = vector.shape_cast %16 : vector<16x16x768xbf16> to vector<256x768xbf16>
    %c0_11 = arith.constant 0 : index
    %c0_12 = arith.constant 0 : index
    %c0_13 = arith.constant 0 : index
    %18 = vector.load %arg3[%c0_11, %c0_12, %c0_13] : memref<3x768x128xbf16, #tpu.memory_space<vmem>>, vector<1x768x128xbf16>
    %19 = vector.shape_cast %18 : vector<1x768x128xbf16> to vector<768x128xbf16>
    %cst_14 = arith.constant dense<0.000000e+00> : vector<256x128xf32>
    %20 = tpu.matmul %17, %19, %cst_14 {dimension_numbers = #tpu.dot_dimension_numbers<[1], [0], [0], [1], [0, 0, 1, 1], [], []>} : vector<256x768xbf16>, vector<768x128xbf16>, vector<256x128xf32> -> vector<256x128xf32>
    %c1_15 = arith.constant 1 : index
    %c0_16 = arith.constant 0 : index
    %c0_17 = arith.constant 0 : index
    %21 = vector.load %arg3[%c1_15, %c0_16, %c0_17] : memref<3x768x128xbf16, #tpu.memory_space<vmem>>, vector<1x768x128xbf16>
    %22 = vector.shape_cast %21 : vector<1x768x128xbf16> to vector<768x128xbf16>
    %cst_18 = arith.constant dense<0.000000e+00> : vector<256x128xf32>
    %23 = tpu.matmul %17, %22, %cst_18 {dimension_numbers = #tpu.dot_dimension_numbers<[1], [0], [0], [1], [0, 0, 1, 1], [], []>} : vector<256x768xbf16>, vector<768x128xbf16>, vector<256x128xf32> -> vector<256x128xf32>
    %c2 = arith.constant 2 : index
    %c0_19 = arith.constant 0 : index
    %c0_20 = arith.constant 0 : index
    %24 = vector.load %arg3[%c2, %c0_19, %c0_20] : memref<3x768x128xbf16, #tpu.memory_space<vmem>>, vector<1x768x128xbf16>
    %25 = vector.shape_cast %24 : vector<1x768x128xbf16> to vector<768x128xbf16>
    %cst_21 = arith.constant dense<0.000000e+00> : vector<256x128xf32>
    %26 = tpu.matmul %17, %25, %cst_21 {dimension_numbers = #tpu.dot_dimension_numbers<[1], [0], [0], [1], [0, 0, 1, 1], [], []>} : vector<256x768xbf16>, vector<768x128xbf16>, vector<256x128xf32> -> vector<256x128xf32>
    %27 = vector.shape_cast %20 : vector<256x128xf32> to vector<16x16x128xf32>
    %cst_22 = arith.constant 0.000000e+00 : f32
    %28 = vector.broadcast %cst_22 : f32 to vector<16x1x128xf32>
    %29 = vector.extract_strided_slice %27 {offsets = [0, 0, 0], sizes = [16, 15, 128], strides = [1, 1, 1]} : vector<16x16x128xf32> to vector<16x15x128xf32>
    %30 = tpu.concatenate %28, %29 in 1 : vector<16x1x128xf32>, vector<16x15x128xf32> -> vector<16x16x128xf32>
    %31 = vector.shape_cast %23 : vector<256x128xf32> to vector<16x16x128xf32>
    %32 = arith.addf %30, %31 : vector<16x16x128xf32>
    %33 = vector.shape_cast %26 : vector<256x128xf32> to vector<16x16x128xf32>
    %34 = vector.extract_strided_slice %33 {offsets = [0, 1, 0], sizes = [16, 15, 128], strides = [1, 1, 1]} : vector<16x16x128xf32> to vector<16x15x128xf32>
    %cst_23 = arith.constant 0.000000e+00 : f32
    %35 = vector.broadcast %cst_23 : f32 to vector<16x1x128xf32>
    %36 = tpu.concatenate %34, %35 in 1 : vector<16x15x128xf32>, vector<16x1x128xf32> -> vector<16x16x128xf32>
    %37 = arith.addf %32, %36 : vector<16x16x128xf32>
    %38 = vector.shape_cast %37 : vector<16x16x128xf32> to vector<256x128xf32>
    %c256_i32 = arith.constant 256 : i32
    %39 = arith.muli %arg1, %c256_i32 : i32
    %40 = tpu.assume_multiple %39, 8 : i32
    %41 = arith.index_cast %40 : i32 to index
    %c0_24 = arith.constant 0 : index
    %42 = vector.load %arg9[%41, %c0_24] : memref<256x128xf32, #tpu.memory_space<vmem>>, vector<256x128xf32>
    tpu.vector_store %arg9[%41, %c0_24], %38 {strides = array<i32>} : memref<256x128xf32, #tpu.memory_space<vmem>>, vector<256x128xf32>,
    %c0_i32 = arith.constant 0 : i32
    %43 = arith.cmpi eq, %arg1, %c0_i32 : i32
    %44 = arith.extui %43 : i1 to i32
    %c0_i32_25 = arith.constant 0 : i32
    %45 = arith.cmpi ne, %44, %c0_i32_25 : i32
    scf.if %45 {
      %c0_26 = arith.constant 0 : index
      %c0_27 = arith.constant 0 : index
      %46 = vector.load %arg9[%c0_26, %c0_27] : memref<256x128xf32, #tpu.memory_space<vmem>>, vector<256x128xf32>
      %cst_28 = arith.constant dense<0.000000e+00> : vector<128xf32>
      %47 = vector.multi_reduction <add>, %46, %cst_28 [0] : vector<256x128xf32> to vector<128xf32>
      %48 = vector.shape_cast %47 : vector<128xf32> to vector<1x128xf32>
      %c0_29 = arith.constant 0 : index
      %c0_30 = arith.constant 0 : index
      %49 = vector.load %arg6[%c0_29, %c0_30] : memref<128x32xf32, #tpu.memory_space<vmem>>, vector<128x32xf32>
      %cst_31 = arith.constant dense<0.000000e+00> : vector<1x32xf32>
      %50 = tpu.matmul %48, %49, %cst_31 {dimension_numbers = #tpu.dot_dimension_numbers<[1], [0], [0], [1], [0, 0, 1, 1], [], []>} : vector<1x128xf32>, vector<128x32xf32>, vector<1x32xf32> -> vector<1x32xf32>
      %cst_32 = arith.constant 9.765625E-4 : f32
      %51 = vector.broadcast %cst_32 : f32 to vector<1x32xf32>
      %52 = arith.mulf %50, %51 : vector<1x32xf32>
      %c0_33 = arith.constant 0 : index
      %c0_34 = arith.constant 0 : index
      %53 = vector.load %arg7[%c0_33, %c0_34] : memref<32x128xf32, #tpu.memory_space<vmem>>, vector<32x128xf32>
      %cst_35 = arith.constant dense<0.000000e+00> : vector<1x128xf32>
      %54 = tpu.matmul %52, %53, %cst_35 {dimension_numbers = #tpu.dot_dimension_numbers<[1], [0], [0], [1], [0, 0, 1, 1], [], []>} : vector<1x32xf32>, vector<32x128xf32>, vector<1x128xf32> -> vector<1x128xf32>
      %55 = vector.broadcast %54 : vector<1x128xf32> to vector<256x128xf32>
      %56 = arith.subf %46, %55 : vector<256x128xf32>
      %57 = arith.mulf %56, %56 : vector<256x128xf32>
      %cst_36 = arith.constant dense<0.000000e+00> : vector<128xf32>
      %58 = vector.multi_reduction <add>, %57, %cst_36 [0] : vector<256x128xf32> to vector<128xf32>
      %59 = vector.shape_cast %58 : vector<128xf32> to vector<1x128xf32>
      %c0_37 = arith.constant 0 : index
      %c0_38 = arith.constant 0 : index
      %60 = vector.load %arg6[%c0_37, %c0_38] : memref<128x32xf32, #tpu.memory_space<vmem>>, vector<128x32xf32>
      %cst_39 = arith.constant dense<0.000000e+00> : vector<1x32xf32>
      %61 = tpu.matmul %59, %60, %cst_39 {dimension_numbers = #tpu.dot_dimension_numbers<[1], [0], [0], [1], [0, 0, 1, 1], [], []>} : vector<1x128xf32>, vector<128x32xf32>, vector<1x32xf32> -> vector<1x32xf32>
      %cst_40 = arith.constant 9.765625E-4 : f32
      %62 = vector.broadcast %cst_40 : f32 to vector<1x32xf32>
      %63 = arith.mulf %61, %62 : vector<1x32xf32>
      %c0_41 = arith.constant 0 : index
      %c0_42 = arith.constant 0 : index
      %64 = vector.load %arg7[%c0_41, %c0_42] : memref<32x128xf32, #tpu.memory_space<vmem>>, vector<32x128xf32>
      %cst_43 = arith.constant dense<0.000000e+00> : vector<1x128xf32>
      %65 = tpu.matmul %63, %64, %cst_43 {dimension_numbers = #tpu.dot_dimension_numbers<[1], [0], [0], [1], [0, 0, 1, 1], [], []>} : vector<1x32xf32>, vector<32x128xf32>, vector<1x128xf32> -> vector<1x128xf32>
      %cst_44 = arith.constant 9.99999974E-6 : f32
      %66 = vector.broadcast %cst_44 : f32 to vector<1x128xf32>
      %67 = arith.addf %65, %66 : vector<1x128xf32>
      %68 = math.rsqrt %67 : vector<1x128xf32>
      %c0_45 = arith.constant 0 : index
      %c0_46 = arith.constant 0 : index
      %69 = vector.load %arg4[%c0_45, %c0_46] : memref<1x128xf32, #tpu.memory_space<vmem>>, vector<1x128xf32>
      %70 = arith.mulf %68, %69 : vector<1x128xf32>
      %71 = vector.broadcast %70 : vector<1x128xf32> to vector<256x128xf32>
      %72 = arith.mulf %56, %71 : vector<256x128xf32>
      %c0_47 = arith.constant 0 : index
      %c0_48 = arith.constant 0 : index
      %73 = vector.load %arg5[%c0_47, %c0_48] : memref<1x128xf32, #tpu.memory_space<vmem>>, vector<1x128xf32>
      %74 = vector.broadcast %73 : vector<1x128xf32> to vector<256x128xf32>
      %75 = arith.addf %72, %74 : vector<256x128xf32>
      %cst_49 = arith.constant 0.000000e+00 : f32
      %76 = vector.broadcast %cst_49 : f32 to vector<256x128xf32>
      %77 = arith.maximumf %75, %76 : vector<256x128xf32>
      %78 = arith.truncf %77 : vector<256x128xf32> to vector<256x128xbf16>
      %c0_50 = arith.constant 0 : index
      %c0_51 = arith.constant 0 : index
      %c0_52 = arith.constant 0 : index
      %79 = vector.load %arg8[%c0_50, %c0_51, %c0_52] : memref<1x256x128xbf16, #tpu.memory_space<vmem>>, vector<1x256x128xbf16>
      %80 = vector.shape_cast %79 : vector<1x256x128xbf16> to vector<256x128xbf16>
      %81 = vector.shape_cast %78 : vector<256x128xbf16> to vector<1x256x128xbf16>
      tpu.vector_store %arg8[%c0_50, %c0_51, %c0_52], %81 {strides = array<i32>} : memref<1x256x128xbf16, #tpu.memory_space<vmem>>, vector<1x256x128xbf16>,
    } else {
    }
    return
  }
  func.func @transform_0(%arg0: i32, %arg1: i32) -> (i32, i32, i32, i32, i32) {
    %c0_i32 = arith.constant 0 : i32
    %c0_i32_0 = arith.constant 0 : i32
    %c0_i32_1 = arith.constant 0 : i32
    %c0_i32_2 = arith.constant 0 : i32
    return %arg0, %arg1, %c0_i32, %c0_i32_0, %c0_i32_1 : i32, i32, i32, i32, i32
  }
  func.func @transform_1(%arg0: i32, %arg1: i32) -> (i32, i32, i32) {
    %c0_i32 = arith.constant 0 : i32
    %c0_i32_0 = arith.constant 0 : i32
    %c0_i32_1 = arith.constant 0 : i32
    %c0_i32_2 = arith.constant 0 : i32
    return %c0_i32, %c0_i32_0, %c0_i32_1 : i32, i32, i32
  }
  func.func @transform_2(%arg0: i32, %arg1: i32) -> (i32, i32) {
    %c0_i32 = arith.constant 0 : i32
    %c0_i32_0 = arith.constant 0 : i32
    %c0_i32_1 = arith.constant 0 : i32
    return %c0_i32, %c0_i32_0 : i32, i32
  }
  func.func @transform_3(%arg0: i32, %arg1: i32) -> (i32, i32) {
    %c0_i32 = arith.constant 0 : i32
    %c0_i32_0 = arith.constant 0 : i32
    %c0_i32_1 = arith.constant 0 : i32
    return %c0_i32, %c0_i32_0 : i32, i32
  }
  func.func @transform_4(%arg0: i32, %arg1: i32) -> (i32, i32) {
    %c0_i32 = arith.constant 0 : i32
    %c0_i32_0 = arith.constant 0 : i32
    %c0_i32_1 = arith.constant 0 : i32
    return %c0_i32, %c0_i32_0 : i32, i32
  }
  func.func @transform_5(%arg0: i32, %arg1: i32) -> (i32, i32) {
    %c0_i32 = arith.constant 0 : i32
    %c0_i32_0 = arith.constant 0 : i32
    %c0_i32_1 = arith.constant 0 : i32
    return %c0_i32, %c0_i32_0 : i32, i32
  }
  func.func @transform_6(%arg0: i32, %arg1: i32) -> (i32, i32, i32) {
    %c0_i32 = arith.constant 0 : i32
    %c0_i32_0 = arith.constant 0 : i32
    %c0_i32_1 = arith.constant 0 : i32
    return %arg0, %c0_i32, %c0_i32_0 : i32, i32, i32
  }
}

</mosaic_0001>

<bundles_post_ra>
// kernel: sfe_forward.9
= control target key start
LH: loop header
LB: loop body
LE: loop exit
PB: predicated region body
PF: predicated region fallthrough
CT: control target
= control target key end

     0   :  { %11 = vsyncpa [#allocation4], 0  ;;  %s1500_s0 = inlined_call_operand.vmem [shape: bf16[2,2,8,8,128], index: 0, kind: input, shape index: {}]   ;;  %s1501_s1 = inlined_call_operand.vmem [shape: bf16[1,128,128], index: 1, kind: input, shape index: {}]   ;;  %s1502_s2 = inlined_call_operand.hbm [shape: f32[1,128], index: 2, kind: input, shape index: {}]   ;;  %s1503_s3 = inlined_call_operand.hbm [shape: f32[1,128], index: 3, kind: input, shape index: {}]   ;;  %s1504_s4 = inlined_call_operand.vmem [shape: f32[128,32], index: 4, kind: input, shape index: {}]   ;;  %s1505_s5 = inlined_call_operand.vmem [shape: f32[32,128], index: 5, kind: input, shape index: {}]   ;;  %s1506_s6 = inlined_call_operand.vmem [shape: bf16[2,128,128], index: 6, kind: output, shape index: {}]  }
   0x1   :  { %12 = vsyncpa [#allocation6], 0  ;;  %s1205_s21 = smov 0   ;;  %s1207_s22 = smov 0  }
   0x2   :  { %s1209_s23 = smov 0   ;;  %s1211_s24 = smov 0  }
   0x3   :  { %s1213_s25 = smov 0  }
   0x4 LB: > { %s844_s26 = sadd.s32 4294967295, %s1166_s25   ;;  %s27_s27 = sadd.s32 1, %s1158_s23  ;;  %s1166_s25 = sphi %s1213_s25, %s18_s25   ;;  %s1162_s24 = sphi %s1211_s24, %s1512_s24   ;;  %s1158_s23 = sphi %s1209_s23, %s1511_s23   ;;  %s1154_s22 = sphi %s1207_s22, %s1510_s22   ;;  %s1150_s21 = sphi %s1205_s21, %s1509_s21  }
   0x5   : > { %p28_p0 = scmp.ge.s32.totalorder %s27_s27, 2  ;;  %s30_s28 = sadd.s32 1, %s1162_s24 }
   0x6   : > { %p846_p1 = scmp.ge.s32.totalorder %s1166_s25, 1  ;;  %p194_p2 = scmp.lt.s32.totalorder %s1166_s25, 5 }
   0x7   : > { %s1514_s27 = smov (%p28_p0, %s27_s27), 0  ;;  %s1516_s28 = smov (!%p28_p0, %s30_s28), %s1162_s24 }
   0x8   : > { %p1238_p3 = pnand %p846_p1, %p194_p2  ;;  %p32_p4 = scmp.ge.s32.totalorder %s1516_s28, 2 }
   0x9   : > { %p1242_p5 = scmp.eq.s32.totalorder %s844_s26, 0  ;;  %s209_s9 = sshll.u32 %s1502_s2, 4  ;;  %s210_s9 = int_to_ptr.hbm [resolvable:$true] %s209_s9 }
   0xa   : > { %p1004_p6 = pneg %p1238_p3  ;;  %s1518_s28 = smov (%p32_p4, %s1516_s28), 0 }
   0xb   : > { %s1168_s10 = smov [#allocation3]   ;;  %s221_s14 = sshll.u32 %s1503_s3, 4  ;;  %s222_s14 = int_to_ptr.hbm [resolvable:$true] %s221_s14 }
   0xc   : > { %s211_s11 = sshll.u32 %s1168_s10, 4  ;;  %p1005_p7 = pnand %p1242_p5, %p1004_p6  ;;  %s212_s11 = int_to_ptr.vmem [resolvable:$true] %s211_s11 }
   0xd   : > { %s1169_s15 = smov [#allocation5]   ;;  %254 = sbr.rel (%p1238_p3) target bundleno = 858 (0x35a), region = 44 }
   0xe   : > { %1007 = dma.hbm_to_vmem [thread:$0]  (!%p1005_p7), %s210_s9, 16, %s212_s11, [#allocation4]  }
   0xf   : > { %s223_s16 = sshll.u32 %s1169_s15, 4  ;;  %s224_s16 = int_to_ptr.vmem [resolvable:$true] %s223_s16 }
  0x10   : > { %1010 = dma.hbm_to_vmem [thread:$0]  (!%p1005_p7), %s222_s14, 16, %s224_s16, [#allocation6]  }
  0x12   : > { %1141 = dma.done.wait (%p1242_p5), [#allocation4], 16  }
  0x13   : > { %1143 = vsyncadd (%p1242_p5), [#allocation4], 4294967280 }
  0x14   : > { %1145 = dma.done.wait (%p1242_p5), [#allocation6], 16  }
  0x15   : > { %1147 = vsyncadd (%p1242_p5), [#allocation6], 4294967280  ;;  %p294_p8 = scmp.lt.s32.totalorder %s1154_s22, 1  ;;  %v924_v0 = vld [vmem:[%s1501_s1 + $0x38] sm:$0xff]  ;;  %v923_v1 = vld [vmem:[%s1501_s1 + $0x30] sm:$0xff]  ;;  %p296_p9 = scmp.lt.s32.totalorder %s1150_s21, 1 }
  0x16   : > { %404 = vmatpush.bf16.msra.mxu0 %v924_v0  ;;  %972 = vmatpush.bf16.msra.mxu1 %v924_v0  ;;  %v922_v2 = vld [vmem:[%s1501_s1 + $0x28] sm:$0xff]  ;;  %v921_v3 = vld [vmem:[%s1501_s1 + $0x20] sm:$0xff]  ;;  %v920_v4 = vld [vmem:[%s1501_s1 + $0x18] sm:$0xff]  ;;  %s906_s11 = sshll.u32 %s1150_s21, 6  ;;  %p907_p10 = scmp.ne.s32.totalorder %s1150_s21, 1 }
  0x17   : > { %s1520_s22 = smov (!%p294_p8, %s1154_s22), 1  ;;  %973 = vmatpush.bf16.msra.mxu2 %v924_v0  ;;  %974 = vmatpush.bf16.msra.mxu3 %v924_v0  ;;  %v919_v5 = vld [vmem:[%s1501_s1 + $0x10] sm:$0xff]  ;;  %v918_v6 = vld [vmem:[%s1501_s1 + $0x8] sm:$0xff]  ;;  %v917_v7 = vld [vmem:[%s1501_s1] sm:$0xff] }
  0x18   : > { %s912_s17 = sshll.u32 %s1520_s22, 6  ;;  %s854_s16 = sshll.u32 %s1520_s22, 4 }
  0x19   : > { %s1276_s20 = scalar_lea.vmem %s1506_s6, %s912_s17 }
  0x1a   : > { %405 = vmatpush.bf16.msra.mxu0 %v923_v1  ;;  %975 = vmatpush.bf16.msra.mxu1 %v923_v1  ;;  %s297_s12 = scalar_select %p296_p9, %s1150_s21, 1 }
  0x1b   : > { %976 = vmatpush.bf16.msra.mxu2 %v923_v1  ;;  %977 = vmatpush.bf16.msra.mxu3 %v923_v1 }
  0x1c   : > { %s853_s15 = sshll.u32 %s297_s12, 3  ;;  %s434_s12 = scalar_lea.vmem [#allocation2], %s906_s11 }
  0x1d   : > { %s300_s19 = sadd.s32 %s854_s16, %s853_s15 }
  0x1e   : > { %406 = vmatpush.bf16.msra.mxu0 %v922_v2  ;;  %978 = vmatpush.bf16.msra.mxu1 %v922_v2  ;;  %s855_s30 = sshll.u32 %s300_s19, 2 }
  0x1f   : > { %979 = vmatpush.bf16.msra.mxu2 %v922_v2  ;;  %980 = vmatpush.bf16.msra.mxu3 %v922_v2  ;;  %s302_s10 = scalar_lea.vmem %s1500_s0, %s855_s30 }
  0x20   : > { %v913_v8 = vld [vmem:[%s302_s10] sm:$0xff]  ;;  %v914_v9 = vld [vmem:[%s302_s10 + $0x8] sm:$0xff]  ;;  %v915_v10 = vld [vmem:[%s302_s10 + $0x10] sm:$0xff] }
  0x21   : > { %v916_v11 = vld [vmem:[%s302_s10 + $0x18] sm:$0xff] }
  0x22   : > { %407 = vmatpush.bf16.msra.mxu0 %v921_v3  ;;  %981 = vmatpush.bf16.msra.mxu1 %v921_v3 }
  0x23   : > { %982 = vmatpush.bf16.msra.mxu2 %v921_v3  ;;  %983 = vmatpush.bf16.msra.mxu3 %v921_v3 }
  0x26   : > { %408 = vmatpush.bf16.msra.mxu0 %v920_v4  ;;  %984 = vmatpush.bf16.msra.mxu1 %v920_v4 }
  0x27   : > { %985 = vmatpush.bf16.msra.mxu2 %v920_v4  ;;  %986 = vmatpush.bf16.msra.mxu3 %v920_v4 }
  0x2a   : > { %409 = vmatpush.bf16.msra.mxu0 %v919_v5  ;;  %987 = vmatpush.bf16.msra.mxu1 %v919_v5 }
  0x2b   : > { %988 = vmatpush.bf16.msra.mxu2 %v919_v5  ;;  %989 = vmatpush.bf16.msra.mxu3 %v919_v5 }
  0x2e   : > { %410 = vmatpush.bf16.msra.mxu0 %v918_v6  ;;  %990 = vmatpush.bf16.msra.mxu1 %v918_v6 }
  0x2f   : > { %991 = vmatpush.bf16.msra.mxu2 %v918_v6  ;;  %992 = vmatpush.bf16.msra.mxu3 %v918_v6 }
  0x32   : > { %411 = vmatpush.bf16.msra.mxu0 %v917_v7  ;;  %993 = vmatpush.bf16.msra.mxu1 %v917_v7 }
  0x33   : > { %994 = vmatpush.bf16.msra.mxu2 %v917_v7  ;;  %995 = vmatpush.bf16.msra.mxu3 %v917_v7 }
  0x35   : > { %412 = vmatmul.bf16.vlgmr.msra.gmra.mxu0 %v913_v8  ;;  %417 = vmatmul.bf16.vlgmr.msra.gmra.mxu1 %v914_v9 }
  0x36   : > { %422 = vmatmul.bf16.vlgmr.msra.gmra.mxu2 %v915_v10  ;;  %427 = vmatmul.bf16.vlgmr.msra.gmra.mxu3 %v916_v11 }
  0xb2   : > { %v413_v12 = vpop.f32.mrf.mxu0  ;;  %v418_v13 = vpop.f32.mrf.mxu1 }
  0xb3   : > { %435 = vst [vmem:[%s434_s12] sm:$0xff] %v413_v12 }
  0xb4   : > { %437 = vst [vmem:[%s434_s12 + $0x10] sm:$0xff] %v418_v13 }
  0xb9   : > { %v423_v14 = vpop.f32.mrf.mxu2  ;;  %v428_v15 = vpop.f32.mrf.mxu3 }
  0xba   : > { %439 = vst [vmem:[%s434_s12 + $0x20] sm:$0xff] %v423_v14  ;;  %v415_v16 = vpop.f32.mrf.mxu0  ;;  %v420_v17 = vpop.f32.mrf.mxu1 }
  0xbb   : > { %441 = vst [vmem:[%s434_s12 + $0x30] sm:$0xff] %v428_v15 }
  0xbc   : > { %436 = vst [vmem:[%s434_s12 + $0x8] sm:$0xff] %v415_v16 }
  0xbd   : > { %438 = vst [vmem:[%s434_s12 + $0x18] sm:$0xff] %v420_v17 }
  0xbf   : > { %446 = sbr.rel (%p907_p10) target bundleno = 858 (0x35a), region = 56 }
  0xc1   : > { %v425_v18 = vpop.f32.mrf.mxu2  ;;  %v430_v19 = vpop.f32.mrf.mxu3 }
  0xc2   : > { %440 = vst [vmem:[%s434_s12 + $0x28] sm:$0xff] %v425_v18 }
  0xc3   : > { %442 = vst [vmem:[%s434_s12 + $0x38] sm:$0xff] %v430_v19 }
  0xc4   : > { %v499_v20 = vld [vmem:[%s1504_s4 + $0x78] sm:$0xff]  ;;  %v498_v21 = vld [vmem:[%s1504_s4 + $0x70] sm:$0xff]  ;;  %v497_v22 = vld [vmem:[%s1504_s4 + $0x68] sm:$0xff]  ;;  %vm525_vm0 = vcmask 261120  }
  0xc5   : > { %500 = vmatpush.msra.mxu0 %v499_v20  ;;  %603 = vmatpush.msra.mxu2 %v499_v20  ;;  %v496_v23 = vld [vmem:[%s1504_s4 + $0x60] sm:$0xff]  ;;  %v495_v26 = vld [vmem:[%s1504_s4 + $0x58] sm:$0xff]  ;;  %v494_v30 = vld [vmem:[%s1504_s4 + $0x50] sm:$0xff] }
  0xc6   : > { %v493_v33 = vld [vmem:[%s1504_s4 + $0x48] sm:$0xff]  ;;  %v492_v36 = vld [vmem:[%s1504_s4 + $0x40] sm:$0xff]  ;;  %v491_v39 = vld [vmem:[%s1504_s4 + $0x38] sm:$0xff] }
  0xc7   : > { %501 = vmatpush.msra.mxu0 %v498_v21  ;;  %604 = vmatpush.msra.mxu2 %v498_v21  ;;  %v490_v42 = vld [vmem:[%s1504_s4 + $0x30] sm:$0xff]  ;;  %v524_v44 = vld [vmem:[%s1505_s5 + $0x18] sm:$0xff]  ;;  %v489_v47 = vld [vmem:[%s1504_s4 + $0x28] sm:$0xff] }
  0xc8   : > { %v523_v45 = vld [vmem:[%s1505_s5 + $0x10] sm:$0xff]  ;;  %541 = vmatpush.msra.mxu1 %v524_v44  ;;  %639 = vmatpush.msra.mxu3 %v524_v44  ;;  %v488_v50 = vld [vmem:[%s1504_s4 + $0x20] sm:$0xff]  ;;  %v487_v53 = vld [vmem:[%s1504_s4 + $0x18] sm:$0xff] }
  0xc9   : > { %502 = vmatpush.msra.mxu0 %v497_v22  ;;  %605 = vmatpush.msra.mxu2 %v497_v22  ;;  %v486_v56 = vld [vmem:[%s1504_s4 + $0x10] sm:$0xff]  ;;  %v485_v59 = vld [vmem:[%s1504_s4 + $0x8] sm:$0xff]  ;;  %v484_v62 = vld [vmem:[%s1504_s4] sm:$0xff] }
  0xca   : > { %v1322_v24 = vld [vmem:[#allocation2] sm:$0xff]  ;;  %v1324_v25 = vld [vmem:[#allocation2 + $0x8] sm:$0xff]  ;;  %v1329_v27 = vld [vmem:[#allocation2 + $0x10] sm:$0xff]  ;;  %542 = vmatpush.msra.mxu1 %v523_v45  ;;  %640 = vmatpush.msra.mxu3 %v523_v45 }
  0xcb   : > { %v463_v28 = vadd.f32 %v1324_v25, %v1322_v24  ;;  %503 = vmatpush.msra.mxu0 %v496_v23  ;;  %v1333_v29 = vld [vmem:[#allocation2 + $0x18] sm:$0xff]  ;;  %606 = vmatpush.msra.mxu2 %v496_v23  ;;  %v1339_v32 = vld [vmem:[#allocation2 + $0x20] sm:$0xff]  ;;  %v1345_v35 = vld [vmem:[#allocation2 + $0x28] sm:$0xff] }
  0xcc   : > { %v1351_v38 = vld [vmem:[#allocation2 + $0x30] sm:$0xff]  ;;  %v1357_v41 = vld [vmem:[#allocation2 + $0x38] sm:$0xff]  ;;  %v1369_v46 = vld [vmem:[#allocation2 + $0x40] sm:$0xff] }
  0xcd   : > { %v464_v31 = vadd.f32 %v463_v28, %v1329_v27  ;;  %504 = vmatpush.msra.mxu0 %v495_v26  ;;  %607 = vmatpush.msra.mxu2 %v495_v26  ;;  %v1375_v49 = vld [vmem:[#allocation2 + $0x48] sm:$0xff]  ;;  %v1381_v52 = vld [vmem:[#allocation2 + $0x50] sm:$0xff]  ;;  %v1387_v55 = vld [vmem:[#allocation2 + $0x58] sm:$0xff] }
  0xce   : > { %v1393_v58 = vld [vmem:[#allocation2 + $0x60] sm:$0xff]  ;;  %v1399_v61 = vld [vmem:[#allocation2 + $0x68] sm:$0xff]  ;;  %v1405_v0 = vld [vmem:[#allocation2 + $0x70] sm:$0xff] }
  0xcf   : > { %v465_v34 = vadd.f32 %v464_v31, %v1333_v29  ;;  %505 = vmatpush.msra.mxu0 %v494_v30  ;;  %608 = vmatpush.msra.mxu2 %v494_v30  ;;  %v462_v2 = vld [vmem:[#allocation2 + $0x78] sm:$0xff]  ;;  %v522_v11 = vld [vmem:[%s1505_s5 + $0x8] sm:$0xff]  ;;  %v521_v12 = vld [vmem:[%s1505_s5] sm:$0xff] }
  0xd0   : > { %543 = vmatpush.msra.mxu1 %v522_v11  ;;  %641 = vmatpush.msra.mxu3 %v522_v11 }
  0xd1   : > { %v466_v37 = vadd.f32 %v465_v34, %v1339_v32  ;;  %506 = vmatpush.msra.mxu0 %v493_v33  ;;  %609 = vmatpush.msra.mxu2 %v493_v33 }
  0xd2   : > { %544 = vmatpush.msra.mxu1 %v521_v12  ;;  %642 = vmatpush.msra.mxu3 %v521_v12 }
  0xd3   : > { %v467_v40 = vadd.f32 %v466_v37, %v1345_v35  ;;  %507 = vmatpush.msra.mxu0 %v492_v36  ;;  %610 = vmatpush.msra.mxu2 %v492_v36 }
  0xd5   : > { %v468_v43 = vadd.f32 %v467_v40, %v1351_v38  ;;  %508 = vmatpush.msra.mxu0 %v491_v39  ;;  %611 = vmatpush.msra.mxu2 %v491_v39 }
  0xd7   : > { %v469_v48 = vadd.f32 %v468_v43, %v1357_v41  ;;  %509 = vmatpush.msra.mxu0 %v490_v42  ;;  %612 = vmatpush.msra.mxu2 %v490_v42 }
  0xd9   : > { %v470_v51 = vadd.f32 %v469_v48, %v1369_v46  ;;  %510 = vmatpush.msra.mxu0 %v489_v47  ;;  %613 = vmatpush.msra.mxu2 %v489_v47 }
  0xdb   : > { %v471_v54 = vadd.f32 %v470_v51, %v1375_v49  ;;  %511 = vmatpush.msra.mxu0 %v488_v50  ;;  %614 = vmatpush.msra.mxu2 %v488_v50 }
  0xdd   : > { %v472_v57 = vadd.f32 %v471_v54, %v1381_v52  ;;  %512 = vmatpush.msra.mxu0 %v487_v53  ;;  %615 = vmatpush.msra.mxu2 %v487_v53 }
  0xdf   : > { %v473_v60 = vadd.f32 %v472_v57, %v1387_v55  ;;  %513 = vmatpush.msra.mxu0 %v486_v56  ;;  %616 = vmatpush.msra.mxu2 %v486_v56 }
  0xe1   : > { %v474_v63 = vadd.f32 %v473_v60, %v1393_v58  ;;  %514 = vmatpush.msra.mxu0 %v485_v59  ;;  %617 = vmatpush.msra.mxu2 %v485_v59 }
  0xe3   : > { %v475_v1 = vadd.f32 %v474_v63, %v1399_v61  ;;  %515 = vmatpush.msra.mxu0 %v484_v62  ;;  %618 = vmatpush.msra.mxu2 %v484_v62 }
  0xe5   : > { %v476_v3 = vadd.f32 %v475_v1, %v1405_v0 }
  0xe7   : > { %v477_v4 = vadd.f32 %v476_v3, %v462_v2 }
  0xe9   : > { %v478_v5 = vrot.slane %v477_v4, 4 }
  0xeb   : > { %v479_v6 = vadd.f32 %v478_v5, %v477_v4 }
  0xed   : > { %v480_v7 = vrot.slane %v479_v6, 2 }
  0xef   : > { %v481_v8 = vadd.f32 %v480_v7, %v479_v6 }
  0xf1   : > { %v482_v9 = vrot.slane %v481_v8, 1 }
  0xf3   : > { %v483_v10 = vadd.f32 %v482_v9, %v481_v8 }
  0xf5   : > { %516 = vmatmul.f32.vlgmr.msra.gmra.mxu0 %v483_v10 }
 0x172   : > { %v517_v13 = vpop.f32.mrf.mxu0 }
 0x173   : > { %v520_v14 = vmul.f32 0.001953125, %v517_v13 }
 0x175   : > { %908 = vmatmul.msk.f32.vlgmr.msra.gmra.mxu1 %vm525_vm0, %v520_v14 }
 0x1f2   : > { %v546_v15 = vpop.f32.mrf.mxu1 }
 0x1f3   : > { %v549_v16 = vperm.slane %v546_v15, 0 }
 0x1f5   : > { %v1417_v17 = vsub.f32 %v1322_v24, %v549_v16  ;;  %v1420_v18 = vsub.f32 %v1324_v25, %v549_v16  ;;  %v1423_v19 = vsub.f32 %v1329_v27, %v549_v16  ;;  %v1430_v22 = vsub.f32 %v1333_v29, %v549_v16 }
 0x1f6   : > { %v1433_v23 = vsub.f32 %v1339_v32, %v549_v16  ;;  %v1438_v26 = vsub.f32 %v1345_v35, %v549_v16  ;;  %v1443_v30 = vsub.f32 %v1351_v38, %v549_v16  ;;  %v1448_v32 = vsub.f32 %v1357_v41, %v549_v16 }
 0x1f7   : > { %v566_v20 = vmul.f32 %v1417_v17, %v1417_v17  ;;  %v567_v21 = vmul.f32 %v1420_v18, %v1420_v18  ;;  %v568_v24 = vmul.f32 %v1423_v19, %v1423_v19  ;;  %v569_v27 = vmul.f32 %v1430_v22, %v1430_v22 }
 0x1f8   : > { %v570_v29 = vmul.f32 %v1433_v23, %v1433_v23  ;;  %v571_v33 = vmul.f32 %v1438_v26, %v1438_v26  ;;  %v1453_v35 = vsub.f32 %v1369_v46, %v549_v16  ;;  %v572_v36 = vmul.f32 %v1443_v30, %v1443_v30 }
 0x1f9   : > { %v582_v25 = vadd.f32 %v567_v21, %v566_v20  ;;  %v559_v38 = vsub.f32 %v1375_v49, %v549_v16  ;;  %v573_v39 = vmul.f32 %v1448_v32, %v1448_v32  ;;  %v560_v41 = vsub.f32 %v1381_v52, %v549_v16 }
 0x1fa   : > { %v574_v42 = vmul.f32 %v1453_v35, %v1453_v35  ;;  %v561_v44 = vsub.f32 %v1387_v55, %v549_v16  ;;  %v562_v47 = vsub.f32 %v1393_v58, %v549_v16  ;;  %v563_v49 = vsub.f32 %v1399_v61, %v549_v16 }
 0x1fb   : > { %v583_v28 = vadd.f32 %v582_v25, %v568_v24  ;;  %v575_v45 = vmul.f32 %v559_v38, %v559_v38  ;;  %v576_v48 = vmul.f32 %v560_v41, %v560_v41  ;;  %v564_v54 = vsub.f32 %v1405_v0, %v549_v16 }
 0x1fc   : > { %v577_v51 = vmul.f32 %v561_v44, %v561_v44  ;;  %v578_v56 = vmul.f32 %v562_v47, %v562_v47  ;;  %v565_v57 = vsub.f32 %v462_v2, %v549_v16  ;;  %v579_v59 = vmul.f32 %v563_v49, %v563_v49  ;;  %v657_v16 = vld [vmem:[#allocation3] sm:$0x1] }
 0x1fd   : > { %v584_v31 = vadd.f32 %v583_v28, %v569_v27  ;;  %v580_v62 = vmul.f32 %v564_v54, %v564_v54 }
 0x1fe   : > { %v581_v55 = vmul.f32 %v565_v57, %v565_v57 }
 0x1ff   : > { %v585_v34 = vadd.f32 %v584_v31, %v570_v29  ;;  %v1057_v31 = vld [vmem:[#allocation5] ss:$0 sm:$0xff] }
 0x201   : > { %v586_v37 = vadd.f32 %v585_v34, %v571_v33 }
 0x203   : > { %v587_v40 = vadd.f32 %v586_v37, %v572_v36 }
 0x205   : > { %v588_v43 = vadd.f32 %v587_v40, %v573_v39 }
 0x207   : > { %v589_v46 = vadd.f32 %v588_v43, %v574_v42 }
 0x209   : > { %v590_v50 = vadd.f32 %v589_v46, %v575_v45 }
 0x20b   : > { %v591_v53 = vadd.f32 %v590_v50, %v576_v48 }
 0x20d   : > { %v592_v52 = vadd.f32 %v591_v53, %v577_v51 }
 0x20f   : > { %v593_v60 = vadd.f32 %v592_v52, %v578_v56 }
 0x211   : > { %v594_v63 = vadd.f32 %v593_v60, %v579_v59 }
 0x213   : > { %v595_v1 = vadd.f32 %v594_v63, %v580_v62 }
 0x215   : > { %v596_v3 = vadd.f32 %v595_v1, %v581_v55 }
 0x217   : > { %v597_v4 = vrot.slane %v596_v3, 4 }
 0x219   : > { %v598_v58 = vadd.f32 %v597_v4, %v596_v3 }
 0x21b   : > { %v599_v5 = vrot.slane %v598_v58, 2 }
 0x21d   : > { %v600_v6 = vadd.f32 %v599_v5, %v598_v58 }
 0x21f   : > { %v601_v7 = vrot.slane %v600_v6, 1 }
 0x221   : > { %v602_v61 = vadd.f32 %v601_v7, %v600_v6 }
 0x223   : > { %619 = vmatmul.f32.vlgmr.msra.gmra.mxu2 %v602_v61 }
 0x2a6   : > { %v620_v8 = vpop.f32.mrf.mxu2 }
 0x2a7   : > { %v623_v9 = vmul.f32 0.001953125, %v620_v8 }
 0x2a9   : > { %909 = vmatmul.msk.f32.vlgmr.msra.gmra.mxu3 %vm525_vm0, %v623_v9 }
 0x32c   : > { %v644_v0 = vpop.f32.mrf.mxu3 }
 0x32d   : > { %v645_v2 = vadd.f32 1e-05, %v644_v0 }
 0x32f   : > { %1058 = vrsqrt.f32 %v645_v2  ;;  %vm653_vm2 = vweird.f32 %v645_v2 }
 0x335   : > { %v1059_v10 = vpop.eup %1058 }
 0x336   : > { %v648_v11 = vmul.f32 %v1059_v10, %v645_v2  ;;  %vm654_vm1 = vweird.f32 %v1059_v10 }
 0x337   : > { %vm655_vm3 = vmor %vm653_vm2, %vm654_vm1 }
 0x338   : > { %v649_v12 = vmul.f32 %v1059_v10, %v648_v11 }
 0x33a   : > { %v650_v13 = vmul.f32 0.5, %v649_v12 }
 0x33c   : > { %v651_v14 = vsub.f32 1.5, %v650_v13 }
 0x33e   : > { %v652_v15 = vmul.f32 %v1059_v10, %v651_v14 }
 0x340   : > { %v656_v20 = vsel %vm655_vm3, %v1059_v10, %v652_v15 }
 0x341   : > { %v658_v21 = vmul.f32 %v657_v16, %v656_v20 }
 0x343   : > { %v659_v24 = vperm.slane %v658_v21, 0 }
 0x345   : > { %v660_v25 = vmul.f32 %v659_v24, %v1417_v17  ;;  %v661_v27 = vmul.f32 %v659_v24, %v1420_v18  ;;  %v662_v28 = vmul.f32 %v659_v24, %v1423_v19  ;;  %v663_v29 = vmul.f32 %v659_v24, %v1430_v22 }
 0x346   : > { %v664_v33 = vmul.f32 %v659_v24, %v1433_v23  ;;  %v665_v34 = vmul.f32 %v659_v24, %v1438_v26  ;;  %v666_v36 = vmul.f32 %v659_v24, %v1443_v30  ;;  %v667_v37 = vmul.f32 %v659_v24, %v1448_v32 }
 0x347   : > { %v668_v39 = vmul.f32 %v659_v24, %v1453_v35  ;;  %v669_v40 = vmul.f32 %v659_v24, %v559_v38  ;;  %v670_v42 = vmul.f32 %v659_v24, %v560_v41  ;;  %v671_v17 = vmul.f32 %v659_v24, %v561_v44 }
 0x348   : > { %v672_v43 = vmul.f32 %v659_v24, %v562_v47  ;;  %v673_v18 = vmul.f32 %v659_v24, %v563_v49  ;;  %v674_v45 = vmul.f32 %v659_v24, %v564_v54  ;;  %v675_v19 = vmul.f32 %v659_v24, %v565_v57 }
 0x349   : > { %v680_v46 = vadd.f32 %v1057_v31, %v660_v25  ;;  %v681_v22 = vadd.f32 %v1057_v31, %v661_v27  ;;  %v682_v48 = vadd.f32 %v1057_v31, %v662_v28  ;;  %v683_v50 = vadd.f32 %v1057_v31, %v663_v29 }
 0x34a   : > { %v684_v23 = vadd.f32 %v1057_v31, %v664_v33  ;;  %v685_v51 = vadd.f32 %v1057_v31, %v665_v34  ;;  %v686_v26 = vadd.f32 %v1057_v31, %v666_v36  ;;  %v687_v53 = vadd.f32 %v1057_v31, %v667_v37 }
 0x34b   : > { %v688_v30 = vadd.f32 %v1057_v31, %v668_v39  ;;  %v689_v56 = vadd.f32 %v1057_v31, %v669_v40  ;;  %v690_v32 = vadd.f32 %v1057_v31, %v670_v42  ;;  %v691_v52 = vadd.f32 %v1057_v31, %v671_v17 }
 0x34c   : > { %v692_v35 = vadd.f32 %v1057_v31, %v672_v43  ;;  %v693_v38 = vadd.f32 %v1057_v31, %v673_v18  ;;  %v694_v41 = vadd.f32 %v1057_v31, %v674_v45  ;;  %v695_v44 = vadd.f32 %v1057_v31, %v675_v19 }
 0x34d   : > { %v696_v47 = vmax.f32 %v680_v46, 0.0  ;;  %v697_v49 = vmax.f32 %v681_v22, 0.0  ;;  %v698_v54 = vmax.f32 %v682_v48, 0.0  ;;  %v699_v57 = vmax.f32 %v683_v50, 0.0 }
 0x34e   : > { %v700_v59 = vmax.f32 %v684_v23, 0.0  ;;  %v701_v60 = vmax.f32 %v685_v51, 0.0  ;;  %v702_v62 = vmax.f32 %v686_v26, 0.0  ;;  %v703_v63 = vmax.f32 %v687_v53, 0.0 }
 0x34f   : > { %v704_v55 = vmax.f32 %v688_v30, 0.0  ;;  %v705_v1 = vmax.f32 %v689_v56, 0.0  ;;  %v706_v3 = vmax.f32 %v690_v32, 0.0  ;;  %v707_v4 = vmax.f32 %v691_v52, 0.0 }
 0x350   : > { %v708_v58 = vmax.f32 %v692_v35, 0.0  ;;  %v709_v5 = vmax.f32 %v693_v38, 0.0  ;;  %v928_v6 = vpack.c.bf16 %v697_v49, %v696_v47  ;;  %v933_v7 = vpack.c.bf16 %v699_v57, %v698_v54 }
 0x351   : > { %v938_v61 = vpack.c.bf16 %v701_v60, %v700_v59  ;;  %v710_v8 = vmax.f32 %v694_v41, 0.0  ;;  %v711_v9 = vmax.f32 %v695_v44, 0.0  ;;  %v943_v0 = vpack.c.bf16 %v703_v63, %v702_v62 }
 0x352   : > { %929 = vst [vmem:[%s1276_s20] sm:$0xff] %v928_v6   ;;  %v948_v2 = vpack.c.bf16 %v705_v1, %v704_v55  ;;  %v953_v10 = vpack.c.bf16 %v707_v4, %v706_v3  ;;  %v958_v11 = vpack.c.bf16 %v709_v5, %v708_v58 }
 0x353   : > { %965 = vst [vmem:[%s1276_s20 + $0x8] sm:$0xff] %v933_v7   ;;  %v963_v12 = vpack.c.bf16 %v711_v9, %v710_v8 }
 0x354   : > { %966 = vst [vmem:[%s1276_s20 + $0x10] sm:$0xff] %v938_v61  }
 0x355   : > { %967 = vst [vmem:[%s1276_s20 + $0x18] sm:$0xff] %v943_v0  }
 0x356   : > { %968 = vst [vmem:[%s1276_s20 + $0x20] sm:$0xff] %v948_v2  }
 0x357   : > { %969 = vst [vmem:[%s1276_s20 + $0x28] sm:$0xff] %v953_v10  }
 0x358   : > { %970 = vst [vmem:[%s1276_s20 + $0x30] sm:$0xff] %v958_v11  }
 0x359   : > { %971 = vst [vmem:[%s1276_s20 + $0x38] sm:$0xff] %v963_v12  }
 0x35a PF: > { %s18_s25 = sadd.s32 1, %s1166_s25   ;;  %s1509_s21 = smov %s1158_s23 }
 0x35b   : > { %p15_p11 = scmp.ge.s32.totalorder %s18_s25, 6   ;;  %s1510_s22 = smov %s1162_s24 }
 0x35c   : > { %s1511_s23 = smov %s1514_s27  ;;  %s1512_s24 = smov %s1518_s28 }
 0x35d   :  { %17 = sbr.rel (!%p15_p11) target bundleno = 4 (0x4), region = 88 }
 0x362   :  { %765 = vsyncpa [#allocation4], 1 }
 0x363   :  { %767 = vsyncpa [#allocation4 + $0x1], 1 }
 0x364   :  { %768 = vsyncpa [#allocation6], 1 }

// kernel: sfe_forward.8
= control target key start
LH: loop header
LB: loop body
LE: loop exit
PB: predicated region body
PF: predicated region fallthrough
CT: control target
= control target key end

     0   :  { %11 = vsyncpa [#allocation4], 0  ;;  %s2009_s0 = inlined_call_operand.vmem [shape: bf16[2,4,8,8,4], index: 0, kind: input, shape index: {}]   ;;  %s2010_s1 = inlined_call_operand.vmem [shape: bf16[3,24,128], index: 1, kind: input, shape index: {}]   ;;  %s2011_s2 = inlined_call_operand.hbm [shape: f32[1,128], index: 2, kind: input, shape index: {}]   ;;  %s2012_s3 = inlined_call_operand.hbm [shape: f32[1,128], index: 3, kind: input, shape index: {}]   ;;  %s2013_s4 = inlined_call_operand.vmem [shape: f32[128,32], index: 4, kind: input, shape index: {}]   ;;  %s2014_s5 = inlined_call_operand.vmem [shape: f32[32,128], index: 5, kind: input, shape index: {}]   ;;  %s2015_s6 = inlined_call_operand.vmem [shape: bf16[2,128,128], index: 6, kind: output, shape index: {}]  }
   0x1   :  { %12 = vsyncpa [#allocation6], 0  ;;  %s1553_s21 = smov 0   ;;  %s1555_s22 = smov 0  }
   0x2   :  { %s1557_s23 = smov 0   ;;  %s1559_s24 = smov 0  }
   0x3   :  { %s1561_s25 = smov 0  }
   0x4 LB: > { %s1216_s26 = sadd.s32 4294967295, %s1508_s25   ;;  %s27_s27 = sadd.s32 1, %s1500_s23  ;;  %s1508_s25 = sphi %s1561_s25, %s18_s25   ;;  %s1504_s24 = sphi %s1559_s24, %s2021_s24   ;;  %s1500_s23 = sphi %s1557_s23, %s2020_s23   ;;  %s1496_s22 = sphi %s1555_s22, %s2019_s22   ;;  %s1492_s21 = sphi %s1553_s21, %s2018_s21  }
   0x5   : > { %p28_p0 = scmp.ge.s32.totalorder %s27_s27, 2  ;;  %s30_s28 = sadd.s32 1, %s1504_s24 }
   0x6   : > { %p1218_p1 = scmp.ge.s32.totalorder %s1508_s25, 1  ;;  %p194_p2 = scmp.lt.s32.totalorder %s1508_s25, 5 }
   0x7   : > { %s2023_s27 = smov (%p28_p0, %s27_s27), 0  ;;  %s2025_s28 = smov (!%p28_p0, %s30_s28), %s1504_s24 }
   0x8   : > { %p1586_p3 = pnand %p1218_p1, %p194_p2  ;;  %p32_p4 = scmp.ge.s32.totalorder %s2025_s28, 2 }
   0x9   : > { %p1590_p5 = scmp.eq.s32.totalorder %s1216_s26, 0  ;;  %s209_s9 = sshll.u32 %s2011_s2, 4  ;;  %s210_s9 = int_to_ptr.hbm [resolvable:$true] %s209_s9 }
   0xa   : > { %p1340_p6 = pneg %p1586_p3  ;;  %s2027_s28 = smov (%p32_p4, %s2025_s28), 0 }
   0xb   : > { %s1510_s10 = smov [#allocation3]   ;;  %s221_s14 = sshll.u32 %s2012_s3, 4  ;;  %s222_s14 = int_to_ptr.hbm [resolvable:$true] %s221_s14 }
   0xc   : > { %s211_s11 = sshll.u32 %s1510_s10, 4  ;;  %p1341_p7 = pnand %p1590_p5, %p1340_p6  ;;  %s212_s11 = int_to_ptr.vmem [resolvable:$true] %s211_s11 }
   0xd   : > { %s1511_s15 = smov [#allocation5]   ;;  %256 = sbr.rel (%p1586_p3) target bundleno = 1068 (0x42c), region = 44 }
   0xe   : > { %1343 = dma.hbm_to_vmem [thread:$0]  (!%p1341_p7), %s210_s9, 16, %s212_s11, [#allocation4]  }
   0xf   : > { %s223_s16 = sshll.u32 %s1511_s15, 4  ;;  %s224_s16 = int_to_ptr.vmem [resolvable:$true] %s223_s16 }
  0x10   : > { %1346 = dma.hbm_to_vmem [thread:$0]  (!%p1341_p7), %s222_s14, 16, %s224_s16, [#allocation6]  }
  0x12   : > { %1483 = dma.done.wait (%p1590_p5), [#allocation4], 16  }
  0x13   : > { %1485 = vsyncadd (%p1590_p5), [#allocation4], 4294967280 }
  0x14   : > { %1487 = dma.done.wait (%p1590_p5), [#allocation6], 16  }
  0x15   : > { %1489 = vsyncadd (%p1590_p5), [#allocation6], 4294967280  ;;  %s1225_s17 = sshll.u32 %s1492_s21, 1  ;;  %p298_p8 = scmp.lt.s32.totalorder %s1496_s22, 1  ;;  %v1517_v26 = vmov 0   ;;  %vm600_vm0 = vcmask 1043456  }
  0x16   : > { %p300_p9 = scmp.lt.s32.totalorder %s1225_s17, 3  ;;  %s1513_s12 = smov 8   ;;  %v372_v46 = vunpack.c.l.b16 %v1517_v26  ;;  %v557_v52 = vld [vmem:[%s2010_s1 + $0x8] sm:$0xf]  ;;  %v1249_v53 = vld [vmem:[%s2010_s1 + $0x14] sm:$0xf] }
  0x17   : > { %s2029_s22 = smov (!%p298_p8, %s1496_s22), 1  ;;  %s1514_s13 = smov 4   ;;  %v583_v54 = vunpack.c.l.b16 %v557_v52  ;;  %v642_v55 = vunpack.c.l.b16 %v1249_v53  ;;  %v1260_v56 = vld [vmem:[%s2010_s1 + $0x20] sm:$0xf]  ;;  %vm462_vm1 = vcmask 31744   ;;  %vm487_vm2 = vcmask 64512  }
  0x18   : > { %s2031_s17 = smov (!%p300_p9, %s1225_s17), 3  ;;  %s1227_s18 = sshll.u32 %s2029_s22, 5  ;;  %v373_v47 = vpack.c.b16 %v372_v46, %v372_v46  ;;  %v687_v57 = vunpack.c.l.b16 %v1260_v56  ;;  %vm504_vm3 = vcmask 97280   ;;  %vm521_vm4 = vcmask 130048  }
  0x19   : > { %s1275_s19 = sshll.u32 %s2029_s22, 6  ;;  %s1226_s20 = sshll.u32 %s2031_s17, 3  ;;  %v585_v58 = vpack.c.b16 %v583_v54, %v583_v54  ;;  %v644_v59 = vpack.c.b16 %v642_v55, %v642_v55  ;;  %vm538_vm5 = vcmask 162816   ;;  %vm587_vm6 = vcmask 195584  }
  0x1a   : > { %s1622_s7 = scalar_lea.vmem %s2015_s6, %s1275_s19  ;;  %s304_s8 = sadd.s32 %s1227_s18, %s1226_s20  ;;  %v689_v61 = vpack.c.b16 %v687_v57, %v687_v57  ;;  %vm747_vm7 = vcmask 1040384   ;;  %vm788_vm8 = vcmask 1046528  }
  0x1b   : > { %s1228_s9 = sshll.u32 %s304_s8, 2  ;;  %s1512_s22 = smov 12   ;;  %v602_v62 = vsel %vm600_vm0, %v585_v58, 0  ;;  %v647_v63 = vsel %vm600_vm0, %v644_v59, 0 }
  0x1c   : > { %s1627_s11 = scalar_lea.vmem %s2009_s0, %s1228_s9  ;;  %s1515_s14 = smov 20   ;;  %1326 = vmatpush.bf16.msra.mxu3 %v602_v62  ;;  %1328 = vmatpush.bf16.msra.mxu1 %v647_v63 }
  0x1d   : > { %v1630_v0 = vld [vmem:[%s1627_s11 + $0xc] sm:$0xf]  ;;  %v1633_v1 = vld [vmem:[%s1627_s11 + $0x8] sm:$0xf]  ;;  %v1638_v4 = vld [vmem:[%s1627_s11 + $0x10] sm:$0xf]  ;;  %610 = vmatpush.bf16.msra.mxu0 %v602_v62 }
  0x1e   : > { %v342_v2 = vunpack.c.l.b16 %v1630_v0  ;;  %v341_v3 = vunpack.c.l.b16 %v1633_v1  ;;  %v1232_v5 = vld [vmem:[%s1627_s11 + $0x24] sm:$0xf]  ;;  %v343_v8 = vunpack.c.l.b16 %v1638_v4  ;;  %v1234_v10 = vld [vmem:[%s1627_s11 + $0x2c] sm:$0xf]  ;;  %v1233_v11 = vld [vmem:[%s1627_s11 + $0x28] sm:$0xf] }
  0x1f   : > { %401 = vrot.lane.b32.xlu2 %v1232_v5, %s1512_s22  ;;  %v417_v12 = vunpack.c.l.b16 %v1234_v10  ;;  %v416_v13 = vunpack.c.l.b16 %v1233_v11  ;;  %v1235_v16 = vld [vmem:[%s1627_s11 + $0x30] sm:$0xf]  ;;  %v1652_v17 = vld [vmem:[%s1627_s11] sm:$0xf]  ;;  %v1655_v18 = vld [vmem:[%s1627_s11 + $0x4] sm:$0xf]  ;;  %v415_v27 = vunpack.c.l.b16 %v1232_v5 }
  0x20   : > { %v350_v6 = vpack.c.b16 %v342_v2, %v342_v2  ;;  %v349_v7 = vpack.c.b16 %v341_v3, %v341_v3  ;;  %v351_v9 = vpack.c.b16 %v343_v8, %v343_v8  ;;  %s1516_s15 = smov 16   ;;  %v418_v19 = vunpack.c.l.b16 %v1235_v16  ;;  %v1231_v25 = vld [vmem:[%s1627_s11 + $0x20] sm:$0xf]  ;;  %v1673_v31 = vld [vmem:[%s1627_s11 + $0x18] sm:$0xf]  ;;  %v1277_v5 = vld [vmem:[%s2010_s1 + $0xc] sm:$0xff] }
  0x21   : > { %v425_v14 = vpack.c.b16 %v417_v12, %v417_v12  ;;  %v424_v15 = vpack.c.b16 %v416_v13, %v416_v13  ;;  %v339_v20 = vunpack.c.l.b16 %v1652_v17  ;;  %v340_v21 = vunpack.c.l.b16 %v1655_v18  ;;  %v1676_v32 = vld [vmem:[%s1627_s11 + $0x14] sm:$0xf]  ;;  %v1237_v37 = vld [vmem:[%s1627_s11 + $0x38] sm:$0xf]  ;;  %v321_v43 = vld [vmem:[%s1627_s11 + $0x1c] sm:$0xf]  ;;  %1329 = vmatpush.bf16.msra.mxu1 %v1277_v5 }
  0x22   : > { %378 = vrot.lane.b32.xlu1 %v350_v6, %s1513_s12  ;;  %359 = vrot.lane.b32.xlu0 %v349_v7, %s1514_s13  ;;  %v426_v22 = vpack.c.b16 %v418_v19, %v418_v19  ;;  %v414_v28 = vunpack.c.l.b16 %v1231_v25  ;;  %v423_v29 = vpack.c.b16 %v415_v27, %v415_v27  ;;  %v345_v33 = vunpack.c.l.b16 %v1673_v31  ;;  %v1236_v38 = vld [vmem:[%s1627_s11 + $0x34] sm:$0xf]  ;;  %v1238_v48 = vld [vmem:[%s1627_s11 + $0x3c] sm:$0xf]  ;;  %p1270_p10 = scmp.ne.s32.totalorder %s1492_s21, 1 }
  0x23   : > { %v347_v23 = vpack.c.b16 %v339_v20, %v339_v20  ;;  %v348_v24 = vpack.c.b16 %v340_v21, %v340_v21  ;;  %v344_v34 = vunpack.c.l.b16 %v1676_v32  ;;  %v420_v39 = vunpack.c.l.b16 %v1237_v37  ;;  %v1276_v3 = vld [vmem:[%s2010_s1] sm:$0xff] }
  0x24   : > { %v422_v30 = vpack.c.b16 %v414_v28, %v414_v28  ;;  %v353_v35 = vpack.c.b16 %v345_v33, %v345_v33  ;;  %v419_v40 = vunpack.c.l.b16 %v1236_v38  ;;  %v346_v44 = vunpack.c.l.b16 %v321_v43  ;;  %1327 = vmatpush.bf16.msra.mxu3 %v1276_v3  ;;  %611 = vmatpush.bf16.msra.mxu0 %v1276_v3 }
  0x25   : > { %v352_v36 = vpack.c.b16 %v344_v34, %v344_v34  ;;  %v428_v41 = vpack.c.b16 %v420_v39, %v420_v39  ;;  %v421_v49 = vunpack.c.l.b16 %v1238_v48  ;;  %v1715_v2 = vsel %vm600_vm0, %v689_v61, 0 }
  0x26   : > { %v427_v42 = vpack.c.b16 %v419_v40, %v419_v40  ;;  %v354_v45 = vpack.c.b16 %v346_v44, %v346_v44  ;;  %1330 = vmatpush.bf16.msra.mxu2 %v1715_v2 }
  0x27   : > { %403 = vrot.lane.b32.xlu2 %v1233_v11, %s1512_s22  ;;  %v429_v50 = vpack.c.b16 %v421_v49, %v421_v49 }
  0x28   : > { %655 = vmatpush.bf16.msrb.mxu0 %v647_v63 }
  0x2a   : > { %380 = vrot.lane.b32.xlu1 %v351_v9, %s1513_s12  ;;  %361 = vrot.lane.b32.xlu0 %v350_v6, %s1514_s13  ;;  %v1727_v6 = vld [vmem:[%s2010_s1 + $0x18] sm:$0xff] }
  0x2b   : > { %1331 = vmatpush.bf16.msra.mxu2 %v1727_v6 }
  0x2c   : > { %656 = vmatpush.bf16.msrb.mxu0 %v1277_v5 }
  0x2f   : > { %450 = vrot.lane.b32.xlu2 %v425_v14, %s1515_s14 }
  0x32   : > { %436 = vrot.lane.b32.xlu1 %v425_v14, %s1516_s15  ;;  %434 = vrot.lane.b32.xlu0 %v424_v15, %s1516_s15 }
  0x37   : > { %357 = vrot.lane.b32.xlu2 %v348_v24, %s1514_s13 }
  0x3a   : > { %452 = vrot.lane.b32.xlu0 %v426_v22, %s1515_s14  ;;  %355 = vrot.lane.b32.xlu1 %v347_v23, %s1514_s13 }
  0x3f   : > { %397 = vrot.lane.b32.xlu2 %v1517_v26, %s1512_s22 }
  0x42   : > { %374 = vrot.lane.b32.xlu0 %v348_v24, %s1513_s12  ;;  %376 = vrot.lane.b32.xlu1 %v349_v7, %s1513_s12 }
  0x47   : > { %432 = vrot.lane.b32.xlu2 %v423_v29, %s1516_s15 }
  0x4a   : > { %399 = vrot.lane.b32.xlu0 %v1231_v25, %s1512_s22  ;;  %430 = vrot.lane.b32.xlu1 %v422_v30, %s1516_s15 }
  0x4f   : > { %363 = vrot.lane.b32.xlu2 %v351_v9, %s1514_s13 }
  0x52   : > { %446 = vrot.lane.b32.xlu0 %v423_v29, %s1515_s14  ;;  %448 = vrot.lane.b32.xlu1 %v424_v15, %s1515_s14 }
  0x57   : > { %384 = vrot.lane.b32.xlu2 %v353_v35, %s1513_s12 }
  0x5a   : > { %365 = vrot.lane.b32.xlu0 %v352_v36, %s1514_s13  ;;  %382 = vrot.lane.b32.xlu1 %v352_v36, %s1513_s12 }
  0x5f   : > { %438 = vrot.lane.b32.xlu2 %v426_v22, %s1516_s15 }
  0x62   : > { %405 = vrot.lane.b32.xlu0 %v1234_v10, %s1512_s22  ;;  %407 = vrot.lane.b32.xlu1 %v1235_v16, %s1512_s22 }
  0x67   : > { %456 = vrot.lane.b32.xlu2 %v428_v41, %s1515_s14 }
  0x6a   : > { %440 = vrot.lane.b32.xlu0 %v427_v42, %s1516_s15  ;;  %454 = vrot.lane.b32.xlu1 %v427_v42, %s1515_s14 }
  0x6f   : > { %386 = vrot.lane.b32.xlu2 %v354_v45, %s1513_s12 }
  0x72   : > { %367 = vrot.lane.b32.xlu0 %v353_v35, %s1514_s13  ;;  %369 = vrot.lane.b32.xlu1 %v354_v45, %s1514_s13 }
  0x77   : > { %411 = vrot.lane.b32.xlu2 %v1237_v37, %s1512_s22 }
  0x79   : > { %v402_v51 = vpop.permute.xlu2 %401 }
  0x7a   : > { %388 = vrot.lane.b32.xlu0 %v373_v47, %s1513_s12  ;;  %409 = vrot.lane.b32.xlu1 %v1236_v38, %s1512_s22  ;;  %s1269_s22 = sshll.u32 %s1492_s21, 6 }
  0x7b   : > { %s1794_s12 = scalar_lea.vmem [#allocation2], %s1269_s22 }
  0x7f   : > { %458 = vrot.lane.b32.xlu2 %v429_v50, %s1515_s14 }
  0x81   : > { %v404_v60 = vpop.permute.xlu2 %403 }
  0x82   : > { %442 = vrot.lane.b32.xlu0 %v428_v41, %s1516_s15  ;;  %444 = vrot.lane.b32.xlu1 %v429_v50, %s1516_s15 }
  0x89   : > { %v451_v7 = vpop.permute.xlu2 %450 }
  0x8a   : > { %460 = vrot.lane.b32.xlu0 %v373_v47, %s1515_s14 }
  0x91   : > { %v358_v12 = vpop.permute.xlu2 %357 }
  0x92   : > { %v468_v40 = vsel %vm462_vm1, %v1652_v17, %v358_v12 }
  0x94   : > { %v379_v8 = vpop.permute.xlu1 %378  ;;  %v360_v9 = vpop.permute.xlu0 %359 }
  0x95   : > { %v471_v13 = vsel %vm462_vm1, %v1655_v18, %v360_v9 }
  0x96   : > { %v493_v14 = vsel %vm487_vm2, %v471_v13, %v379_v8 }
  0x97   : > { %v510_v20 = vsel %vm504_vm3, %v493_v14, %v402_v51 }
  0x99   : > { %v398_v21 = vpop.permute.xlu2 %397 }
  0x9c   : > { %v381_v10 = vpop.permute.xlu1 %380  ;;  %v362_v11 = vpop.permute.xlu0 %361 }
  0x9d   : > { %v474_v19 = vsel %vm462_vm1, %v1633_v1, %v362_v11 }
  0x9e   : > { %v495_v22 = vsel %vm487_vm2, %v474_v19, %v381_v10 }
  0x9f   : > { %v512_v18 = vsel %vm504_vm3, %v495_v22, %v404_v60 }
  0xa1   : > { %v433_v33 = vpop.permute.xlu2 %432 }
  0xa4   : > { %v437_v15 = vpop.permute.xlu1 %436  ;;  %v435_v16 = vpop.permute.xlu0 %434 }
  0xa5   : > { %v527_v23 = vsel %vm521_vm4, %v510_v20, %v435_v16  ;;  %v529_v25 = vsel %vm521_vm4, %v512_v18, %v437_v15 }
  0xa6   : > { %v544_v24 = vsel %vm538_vm5, %v527_v23, %v451_v7 }
  0xa7   : > { %v568_v1 = vunpack.c.l.b16 %v544_v24 }
  0xa9   : > { %v364_v36 = vpop.permute.xlu2 %363 }
  0xaa   : > { %v477_v59 = vsel %vm462_vm1, %v1630_v0, %v364_v36 }
  0xac   : > { %v453_v26 = vpop.permute.xlu0 %452  ;;  %v356_v27 = vpop.permute.xlu1 %355 }
  0xad   : > { %v546_v28 = vsel %vm538_vm5, %v529_v25, %v453_v26  ;;  %v465_v39 = vsel %vm462_vm1, 0, %v356_v27 }
  0xae   : > { %v569_v29 = vunpack.c.l.b16 %v546_v28 }
  0xb0   : > { %v575_v30 = vpack.c.b16 %v569_v29, %v568_v1 }
  0xb1   : > { %v385_v52 = vpop.permute.xlu2 %384 }
  0xb2   : > { %1244 = vmatmul.msk.bf16.vlgmr.msra.gmra.mxu3 %vm587_vm6, %v575_v30  ;;  %1255 = vmatmul.msk.bf16.vlgmr.msra.gmra.mxu1 %vm587_vm6, %v575_v30 }
  0xb3   : > { %1266 = vmatmul.msk.bf16.vlgmr.msra.gmra.mxu2 %vm587_vm6, %v575_v30 }
  0xb4   : > { %v375_v34 = vpop.permute.xlu0 %374  ;;  %v377_v35 = vpop.permute.xlu1 %376 }
  0xb5   : > { %v489_v41 = vsel %vm487_vm2, %v465_v39, %v375_v34  ;;  %v491_v42 = vsel %vm487_vm2, %v468_v40, %v377_v35 }
  0xb6   : > { %v506_v44 = vsel %vm504_vm3, %v489_v41, %v398_v21 }
  0xb9   : > { %v439_v56 = vpop.permute.xlu2 %438 }
  0xbc   : > { %v400_v37 = vpop.permute.xlu0 %399  ;;  %v431_v38 = vpop.permute.xlu1 %430 }
  0xbd   : > { %v508_v43 = vsel %vm504_vm3, %v491_v42, %v400_v37  ;;  %v523_v45 = vsel %vm521_vm4, %v506_v44, %v431_v38 }
  0xbe   : > { %v525_v46 = vsel %vm521_vm4, %v508_v43, %v433_v33 }
  0xc1   : > { %v457_v63 = vpop.permute.xlu2 %456 }
  0xc4   : > { %v447_v47 = vpop.permute.xlu0 %446  ;;  %v449_v48 = vpop.permute.xlu1 %448 }
  0xc5   : > { %v540_v49 = vsel %vm538_vm5, %v523_v45, %v447_v47  ;;  %v542_v50 = vsel %vm538_vm5, %v525_v46, %v449_v48 }
  0xc6   : > { %v566_v51 = vunpack.c.l.b16 %v540_v49  ;;  %v567_v17 = vunpack.c.l.b16 %v542_v50 }
  0xc8   : > { %v574_v53 = vpack.c.b16 %v567_v17, %v566_v51 }
  0xc9   : > { %v387_v13 = vpop.permute.xlu2 %386 }
  0xca   : > { %1243 = vmatmul.msk.bf16.vlgmr.msra.gmra.mxu0 %vm587_vm6, %v574_v53 }
  0xcb   : > { %700 = vmatpush.bf16.msra.mxu0 %v1715_v2 }
  0xcc   : > { %v366_v54 = vpop.permute.xlu0 %365  ;;  %v383_v55 = vpop.permute.xlu1 %382 }
  0xcd   : > { %v480_v60 = vsel %vm462_vm1, %v1638_v4, %v366_v54  ;;  %v497_v61 = vsel %vm487_vm2, %v477_v59, %v383_v55 }
  0xce   : > { %v499_v2 = vsel %vm487_vm2, %v480_v60, %v385_v52 }
  0xcf   : > { %701 = vmatpush.bf16.msra.mxu0 %v1727_v6 }
  0xd1   : > { %v412_v16 = vpop.permute.xlu2 %411 }
  0xd4   : > { %v406_v57 = vpop.permute.xlu0 %405  ;;  %v408_v58 = vpop.permute.xlu1 %407 }
  0xd5   : > { %v514_v62 = vsel %vm504_vm3, %v497_v61, %v406_v57  ;;  %v516_v3 = vsel %vm504_vm3, %v499_v2, %v408_v58 }
  0xd6   : > { %v531_v5 = vsel %vm521_vm4, %v514_v62, %v439_v56 }
  0xd9   : > { %v459_v26 = vpop.permute.xlu2 %458 }
  0xda   : > { %1254 = vmatmul.msk.bf16.vlgmr.msrb.gmra.mxu0 %vm587_vm6, %v574_v53 }
  0xdc   : > { %v441_v6 = vpop.permute.xlu0 %440  ;;  %v455_v7 = vpop.permute.xlu1 %454 }
  0xdd   : > { %v533_v0 = vsel %vm521_vm4, %v516_v3, %v441_v6  ;;  %v548_v8 = vsel %vm538_vm5, %v531_v5, %v455_v7 }
  0xde   : > { %v570_v4 = vunpack.c.l.b16 %v548_v8  ;;  %v550_v9 = vsel %vm538_vm5, %v533_v0, %v457_v63 }
  0xdf   : > { %v571_v10 = vunpack.c.l.b16 %v550_v9 }
  0xe1   : > { %v576_v11 = vpack.c.b16 %v571_v10, %v570_v4 }
  0xe3   : > { %1245 = vmatmul.msk.bf16.gmra.mxu3 %vm587_vm6, %v576_v11  ;;  %1256 = vmatmul.msk.bf16.gmra.mxu1 %vm587_vm6, %v576_v11 }
  0xe4   : > { %1267 = vmatmul.msk.bf16.gmra.mxu2 %vm587_vm6, %v576_v11  ;;  %v368_v12 = vpop.permute.xlu0 %367  ;;  %v370_v14 = vpop.permute.xlu1 %369 }
  0xe5   : > { %v483_v20 = vsel %vm462_vm1, %v1676_v32, %v368_v12  ;;  %v486_v22 = vsel %vm462_vm1, %v1673_v31, %v370_v14 }
  0xe6   : > { %v501_v23 = vsel %vm487_vm2, %v483_v20, %v387_v13 }
  0xea   : > { %1265 = vmatmul.msk.bf16.vlgmr.msra.gmra.mxu0 %vm587_vm6, %v574_v53 }
  0xec   : > { %v389_v15 = vpop.permute.xlu0 %388  ;;  %v410_v19 = vpop.permute.xlu1 %409 }
  0xed   : > { %v518_v18 = vsel %vm504_vm3, %v501_v23, %v410_v19  ;;  %v503_v24 = vsel %vm487_vm2, %v486_v22, %v389_v15 }
  0xee   : > { %v520_v28 = vsel %vm504_vm3, %v503_v24, %v412_v16 }
  0xf4   : > { %v443_v21 = vpop.permute.xlu0 %442  ;;  %v445_v27 = vpop.permute.xlu1 %444 }
  0xf5   : > { %v535_v25 = vsel %vm521_vm4, %v518_v18, %v443_v21  ;;  %v537_v32 = vsel %vm521_vm4, %v520_v28, %v445_v27 }
  0xf6   : > { %v552_v1 = vsel %vm538_vm5, %v535_v25, %v459_v26 }
  0xf7   : > { %v572_v30 = vunpack.c.l.b16 %v552_v1 }
  0xfc   : > { %v461_v29 = vpop.permute.xlu0 %460 }
  0xfd   : > { %v554_v31 = vsel %vm538_vm5, %v537_v32, %v461_v29 }
  0xfe   : > { %v573_v33 = vunpack.c.l.b16 %v554_v31 }
 0x100   : > { %v577_v34 = vpack.c.b16 %v573_v33, %v572_v30 }
 0x102   : > { %1246 = vmatmul.msk.bf16.gmra.mxu3 %vm587_vm6, %v577_v34  ;;  %1257 = vmatmul.msk.bf16.gmra.mxu1 %vm587_vm6, %v577_v34 }
 0x103   : > { %1268 = vmatmul.msk.bf16.gmra.mxu2 %vm587_vm6, %v577_v34 }
 0x12f   : > { %v663_v36 = vpop.f32.mrf.mxu1 }
 0x135   : > { %v618_v35 = vpop.f32.mrf.mxu3 }
 0x136   : > { %v733_v37 = vrot.slane %v618_v35, 7  ;;  %v708_v38 = vpop.f32.mrf.mxu2 }
 0x137   : > { %v774_v39 = vrot.slane %v708_v38, 1  ;;  %v665_v48 = vpop.f32.mrf.mxu1 }
 0x138   : > { %v750_v40 = vsel %vm747_vm7, 0.0, %v733_v37 }
 0x139   : > { %v758_v41 = vadd.f32 %v750_v40, %v663_v36  ;;  %v791_v42 = vsel %vm788_vm8, %v774_v39, 0.0 }
 0x13b   : > { %v799_v43 = vadd.f32 %v791_v42, %v758_v41 }
 0x13d   : > { %809 = vst [vmem:[%s1794_s12 + $0x10] sm:$0xff] %v799_v43  ;;  %v620_v44 = vpop.f32.mrf.mxu3 }
 0x13e   : > { %v734_v45 = vrot.slane %v620_v44, 7  ;;  %v710_v46 = vpop.f32.mrf.mxu2 }
 0x13f   : > { %v775_v47 = vrot.slane %v710_v46, 1 }
 0x140   : > { %v751_v49 = vsel %vm747_vm7, 0.0, %v734_v45 }
 0x141   : > { %v759_v50 = vadd.f32 %v751_v49, %v665_v48  ;;  %v792_v51 = vsel %vm788_vm8, %v775_v47, 0.0 }
 0x143   : > { %v800_v17 = vadd.f32 %v792_v51, %v759_v50 }
 0x145   : > { %810 = vst [vmem:[%s1794_s12 + $0x18] sm:$0xff] %v800_v17 }
 0x147   : > { %v613_v52 = vpop.f32.mrf.mxu0 }
 0x148   : > { %v731_v56 = vrot.slane %v613_v52, 7 }
 0x14a   : > { %v748_v62 = vsel %vm747_vm7, 0.0, %v731_v56 }
 0x14f   : > { %v615_v53 = vpop.f32.mrf.mxu0 }
 0x150   : > { %v732_v4 = vrot.slane %v615_v53, 7 }
 0x152   : > { %v749_v14 = vsel %vm747_vm7, 0.0, %v732_v4 }
 0x157   : > { %v658_v54 = vpop.f32.mrf.mxu0 }
 0x158   : > { %v756_v3 = vadd.f32 %v748_v62, %v658_v54 }
 0x15f   : > { %v660_v55 = vpop.f32.mrf.mxu0 }
 0x160   : > { %v668_v57 = vpop.f32.mrf.mxu1  ;;  %v757_v19 = vadd.f32 %v749_v14, %v660_v55 }
 0x166   : > { %v623_v58 = vpop.f32.mrf.mxu3 }
 0x167   : > { %v735_v59 = vrot.slane %v623_v58, 7  ;;  %v713_v60 = vpop.f32.mrf.mxu2  ;;  %v703_v61 = vpop.f32.mrf.mxu0 }
 0x168   : > { %v776_v63 = vrot.slane %v713_v60, 1  ;;  %v772_v2 = vrot.slane %v703_v61, 1  ;;  %v670_v20 = vpop.f32.mrf.mxu1 }
 0x169   : > { %v752_v5 = vsel %vm747_vm7, 0.0, %v735_v59 }
 0x16a   : > { %v760_v6 = vadd.f32 %v752_v5, %v668_v57  ;;  %v789_v7 = vsel %vm788_vm8, %v772_v2, 0.0  ;;  %v793_v0 = vsel %vm788_vm8, %v776_v63, 0.0 }
 0x16b   : > { %v797_v8 = vadd.f32 %v789_v7, %v756_v3 }
 0x16c   : > { %v801_v9 = vadd.f32 %v793_v0, %v760_v6 }
 0x16d   : > { %807 = vst [vmem:[%s1794_s12] sm:$0xff] %v797_v8 }
 0x16e   : > { %811 = vst [vmem:[%s1794_s12 + $0x20] sm:$0xff] %v801_v9  ;;  %v625_v10 = vpop.f32.mrf.mxu3 }
 0x16f   : > { %v736_v11 = vrot.slane %v625_v10, 7  ;;  %v715_v12 = vpop.f32.mrf.mxu2  ;;  %v705_v13 = vpop.f32.mrf.mxu0 }
 0x170   : > { %v777_v15 = vrot.slane %v715_v12, 1  ;;  %v773_v16 = vrot.slane %v705_v13, 1 }
 0x171   : > { %v753_v21 = vsel %vm747_vm7, 0.0, %v736_v11 }
 0x172   : > { %v761_v22 = vadd.f32 %v753_v21, %v670_v20  ;;  %v790_v23 = vsel %vm788_vm8, %v773_v16, 0.0  ;;  %v794_v18 = vsel %vm788_vm8, %v777_v15, 0.0 }
 0x173   : > { %v798_v24 = vadd.f32 %v790_v23, %v757_v19 }
 0x174   : > { %v802_v25 = vadd.f32 %v794_v18, %v761_v22 }
 0x175   : > { %808 = vst [vmem:[%s1794_s12 + $0x8] sm:$0xff] %v798_v24 }
 0x176   : > { %812 = vst [vmem:[%s1794_s12 + $0x28] sm:$0xff] %v802_v25 }
 0x17f   : > { %v673_v27 = vpop.f32.mrf.mxu1 }
 0x185   : > { %v628_v26 = vpop.f32.mrf.mxu3 }
 0x186   : > { %v737_v28 = vrot.slane %v628_v26, 7  ;;  %v718_v1 = vpop.f32.mrf.mxu2 }
 0x187   : > { %v778_v32 = vrot.slane %v718_v1, 1  ;;  %v675_v38 = vpop.f32.mrf.mxu1 }
 0x188   : > { %v754_v29 = vsel %vm747_vm7, 0.0, %v737_v28 }
 0x189   : > { %v762_v31 = vadd.f32 %v754_v29, %v673_v27  ;;  %v795_v30 = vsel %vm788_vm8, %v778_v32, 0.0 }
 0x18b   : > { %v803_v33 = vadd.f32 %v795_v30, %v762_v31 }
 0x18d   : > { %813 = vst [vmem:[%s1794_s12 + $0x30] sm:$0xff] %v803_v33  ;;  %v630_v34 = vpop.f32.mrf.mxu3 }
 0x18e   : > { %v738_v35 = vrot.slane %v630_v34, 7  ;;  %v720_v36 = vpop.f32.mrf.mxu2 }
 0x18f   : > { %v779_v37 = vrot.slane %v720_v36, 1 }
 0x190   : > { %v755_v39 = vsel %vm747_vm7, 0.0, %v738_v35 }
 0x191   : > { %v763_v40 = vadd.f32 %v755_v39, %v675_v38  ;;  %v796_v41 = vsel %vm788_vm8, %v779_v37, 0.0  ;;  %818 = sbr.rel (%p1270_p10) target bundleno = 1068 (0x42c), region = 56 }
 0x193   : > { %v804_v42 = vadd.f32 %v796_v41, %v763_v40 }
 0x195   : > { %814 = vst [vmem:[%s1794_s12 + $0x38] sm:$0xff] %v804_v42 }
 0x196   : > { %v871_v43 = vld [vmem:[%s2013_s4 + $0x78] sm:$0xff]  ;;  %v870_v44 = vld [vmem:[%s2013_s4 + $0x70] sm:$0xff]  ;;  %v869_v45 = vld [vmem:[%s2013_s4 + $0x68] sm:$0xff]  ;;  %vm897_vm9 = vcmask 261120  }
 0x197   : > { %872 = vmatpush.msra.mxu0 %v871_v43  ;;  %975 = vmatpush.msra.mxu2 %v871_v43  ;;  %v868_v46 = vld [vmem:[%s2013_s4 + $0x60] sm:$0xff]  ;;  %v867_v49 = vld [vmem:[%s2013_s4 + $0x58] sm:$0xff]  ;;  %v866_v52 = vld [vmem:[%s2013_s4 + $0x50] sm:$0xff] }
 0x198   : > { %v865_v55 = vld [vmem:[%s2013_s4 + $0x48] sm:$0xff]  ;;  %v864_v58 = vld [vmem:[%s2013_s4 + $0x40] sm:$0xff]  ;;  %v863_v61 = vld [vmem:[%s2013_s4 + $0x38] sm:$0xff] }
 0x199   : > { %873 = vmatpush.msra.mxu0 %v870_v44  ;;  %976 = vmatpush.msra.mxu2 %v870_v44  ;;  %v862_v2 = vld [vmem:[%s2013_s4 + $0x30] sm:$0xff]  ;;  %v896_v5 = vld [vmem:[%s2014_s5 + $0x18] sm:$0xff]  ;;  %v861_v0 = vld [vmem:[%s2013_s4 + $0x28] sm:$0xff] }
 0x19a   : > { %v895_v6 = vld [vmem:[%s2014_s5 + $0x10] sm:$0xff]  ;;  %913 = vmatpush.msra.mxu1 %v896_v5  ;;  %1011 = vmatpush.msra.mxu3 %v896_v5  ;;  %v860_v9 = vld [vmem:[%s2013_s4 + $0x20] sm:$0xff]  ;;  %v859_v12 = vld [vmem:[%s2013_s4 + $0x18] sm:$0xff] }
 0x19b   : > { %874 = vmatpush.msra.mxu0 %v869_v45  ;;  %977 = vmatpush.msra.mxu2 %v869_v45  ;;  %v858_v15 = vld [vmem:[%s2013_s4 + $0x10] sm:$0xff]  ;;  %v857_v20 = vld [vmem:[%s2013_s4 + $0x8] sm:$0xff]  ;;  %v856_v23 = vld [vmem:[%s2013_s4] sm:$0xff] }
 0x19c   : > { %v1831_v47 = vld [vmem:[#allocation2] sm:$0xff]  ;;  %v1833_v48 = vld [vmem:[#allocation2 + $0x8] sm:$0xff]  ;;  %v1838_v50 = vld [vmem:[#allocation2 + $0x10] sm:$0xff]  ;;  %914 = vmatpush.msra.mxu1 %v895_v6  ;;  %1012 = vmatpush.msra.mxu3 %v895_v6 }
 0x19d   : > { %v835_v51 = vadd.f32 %v1833_v48, %v1831_v47  ;;  %875 = vmatpush.msra.mxu0 %v868_v46  ;;  %v1842_v17 = vld [vmem:[#allocation2 + $0x18] sm:$0xff]  ;;  %978 = vmatpush.msra.mxu2 %v868_v46  ;;  %v1848_v54 = vld [vmem:[#allocation2 + $0x20] sm:$0xff]  ;;  %v1854_v57 = vld [vmem:[#allocation2 + $0x28] sm:$0xff] }
 0x19e   : > { %v1860_v60 = vld [vmem:[#allocation2 + $0x30] sm:$0xff]  ;;  %v1866_v63 = vld [vmem:[#allocation2 + $0x38] sm:$0xff]  ;;  %v1878_v7 = vld [vmem:[#allocation2 + $0x40] sm:$0xff] }
 0x19f   : > { %v836_v53 = vadd.f32 %v835_v51, %v1838_v50  ;;  %876 = vmatpush.msra.mxu0 %v867_v49  ;;  %979 = vmatpush.msra.mxu2 %v867_v49  ;;  %v1884_v4 = vld [vmem:[#allocation2 + $0x48] sm:$0xff]  ;;  %v1890_v11 = vld [vmem:[#allocation2 + $0x50] sm:$0xff]  ;;  %v1896_v14 = vld [vmem:[#allocation2 + $0x58] sm:$0xff] }
 0x1a0   : > { %v1902_v19 = vld [vmem:[#allocation2 + $0x60] sm:$0xff]  ;;  %v1908_v22 = vld [vmem:[#allocation2 + $0x68] sm:$0xff]  ;;  %v1914_v24 = vld [vmem:[#allocation2 + $0x70] sm:$0xff] }
 0x1a1   : > { %v837_v56 = vadd.f32 %v836_v53, %v1842_v17  ;;  %877 = vmatpush.msra.mxu0 %v866_v52  ;;  %980 = vmatpush.msra.mxu2 %v866_v52  ;;  %v834_v26 = vld [vmem:[#allocation2 + $0x78] sm:$0xff]  ;;  %v894_v34 = vld [vmem:[%s2014_s5 + $0x8] sm:$0xff]  ;;  %v893_v35 = vld [vmem:[%s2014_s5] sm:$0xff] }
 0x1a2   : > { %915 = vmatpush.msra.mxu1 %v894_v34  ;;  %1013 = vmatpush.msra.mxu3 %v894_v34 }
 0x1a3   : > { %v838_v59 = vadd.f32 %v837_v56, %v1848_v54  ;;  %878 = vmatpush.msra.mxu0 %v865_v55  ;;  %981 = vmatpush.msra.mxu2 %v865_v55 }
 0x1a4   : > { %916 = vmatpush.msra.mxu1 %v893_v35  ;;  %1014 = vmatpush.msra.mxu3 %v893_v35 }
 0x1a5   : > { %v839_v62 = vadd.f32 %v838_v59, %v1854_v57  ;;  %879 = vmatpush.msra.mxu0 %v864_v58  ;;  %982 = vmatpush.msra.mxu2 %v864_v58 }
 0x1a7   : > { %v840_v3 = vadd.f32 %v839_v62, %v1860_v60  ;;  %880 = vmatpush.msra.mxu0 %v863_v61  ;;  %983 = vmatpush.msra.mxu2 %v863_v61 }
 0x1a9   : > { %v841_v8 = vadd.f32 %v840_v3, %v1866_v63  ;;  %881 = vmatpush.msra.mxu0 %v862_v2  ;;  %984 = vmatpush.msra.mxu2 %v862_v2 }
 0x1ab   : > { %v842_v10 = vadd.f32 %v841_v8, %v1878_v7  ;;  %882 = vmatpush.msra.mxu0 %v861_v0  ;;  %985 = vmatpush.msra.mxu2 %v861_v0 }
 0x1ad   : > { %v843_v13 = vadd.f32 %v842_v10, %v1884_v4  ;;  %883 = vmatpush.msra.mxu0 %v860_v9  ;;  %986 = vmatpush.msra.mxu2 %v860_v9 }
 0x1af   : > { %v844_v16 = vadd.f32 %v843_v13, %v1890_v11  ;;  %884 = vmatpush.msra.mxu0 %v859_v12  ;;  %987 = vmatpush.msra.mxu2 %v859_v12 }
 0x1b1   : > { %v845_v21 = vadd.f32 %v844_v16, %v1896_v14  ;;  %885 = vmatpush.msra.mxu0 %v858_v15  ;;  %988 = vmatpush.msra.mxu2 %v858_v15 }
 0x1b3   : > { %v846_v18 = vadd.f32 %v845_v21, %v1902_v19  ;;  %886 = vmatpush.msra.mxu0 %v857_v20  ;;  %989 = vmatpush.msra.mxu2 %v857_v20 }
 0x1b5   : > { %v847_v25 = vadd.f32 %v846_v18, %v1908_v22  ;;  %887 = vmatpush.msra.mxu0 %v856_v23  ;;  %990 = vmatpush.msra.mxu2 %v856_v23 }
 0x1b7   : > { %v848_v27 = vadd.f32 %v847_v25, %v1914_v24 }
 0x1b9   : > { %v849_v28 = vadd.f32 %v848_v27, %v834_v26 }
 0x1bb   : > { %v850_v1 = vrot.slane %v849_v28, 4 }
 0x1bd   : > { %v851_v32 = vadd.f32 %v850_v1, %v849_v28 }
 0x1bf   : > { %v852_v29 = vrot.slane %v851_v32, 2 }
 0x1c1   : > { %v853_v31 = vadd.f32 %v852_v29, %v851_v32 }
 0x1c3   : > { %v854_v30 = vrot.slane %v853_v31, 1 }
 0x1c5   : > { %v855_v33 = vadd.f32 %v854_v30, %v853_v31 }
 0x1c7   : > { %888 = vmatmul.f32.vlgmr.msra.gmra.mxu0 %v855_v33 }
 0x244   : > { %v889_v36 = vpop.f32.mrf.mxu0 }
 0x245   : > { %v892_v37 = vmul.f32 0.001953125, %v889_v36 }
 0x247   : > { %1271 = vmatmul.msk.f32.vlgmr.msra.gmra.mxu1 %vm897_vm9, %v892_v37 }
 0x2c4   : > { %v918_v38 = vpop.f32.mrf.mxu1 }
 0x2c5   : > { %v921_v39 = vperm.slane %v918_v38, 0 }
 0x2c7   : > { %v1926_v40 = vsub.f32 %v1831_v47, %v921_v39  ;;  %v1929_v41 = vsub.f32 %v1833_v48, %v921_v39  ;;  %v1932_v42 = vsub.f32 %v1838_v50, %v921_v39  ;;  %v1939_v45 = vsub.f32 %v1842_v17, %v921_v39 }
 0x2c8   : > { %v1942_v46 = vsub.f32 %v1848_v54, %v921_v39  ;;  %v1947_v49 = vsub.f32 %v1854_v57, %v921_v39  ;;  %v1952_v52 = vsub.f32 %v1860_v60, %v921_v39  ;;  %v1957_v54 = vsub.f32 %v1866_v63, %v921_v39 }
 0x2c9   : > { %v938_v43 = vmul.f32 %v1926_v40, %v1926_v40  ;;  %v939_v44 = vmul.f32 %v1929_v41, %v1929_v41  ;;  %v940_v47 = vmul.f32 %v1932_v42, %v1932_v42  ;;  %v941_v50 = vmul.f32 %v1939_v45, %v1939_v45 }
 0x2ca   : > { %v942_v17 = vmul.f32 %v1942_v46, %v1942_v46  ;;  %v943_v55 = vmul.f32 %v1947_v49, %v1947_v49  ;;  %v1962_v57 = vsub.f32 %v1878_v7, %v921_v39  ;;  %v944_v58 = vmul.f32 %v1952_v52, %v1952_v52 }
 0x2cb   : > { %v954_v48 = vadd.f32 %v939_v44, %v938_v43  ;;  %v931_v60 = vsub.f32 %v1884_v4, %v921_v39  ;;  %v945_v61 = vmul.f32 %v1957_v54, %v1957_v54  ;;  %v932_v63 = vsub.f32 %v1890_v11, %v921_v39 }
 0x2cc   : > { %v946_v2 = vmul.f32 %v1962_v57, %v1962_v57  ;;  %v933_v5 = vsub.f32 %v1896_v14, %v921_v39  ;;  %v934_v0 = vsub.f32 %v1902_v19, %v921_v39  ;;  %v935_v4 = vsub.f32 %v1908_v22, %v921_v39 }
 0x2cd   : > { %v955_v51 = vadd.f32 %v954_v48, %v940_v47  ;;  %v947_v6 = vmul.f32 %v931_v60, %v931_v60  ;;  %v948_v8 = vmul.f32 %v932_v63, %v932_v63  ;;  %v936_v13 = vsub.f32 %v1914_v24, %v921_v39 }
 0x2ce   : > { %v949_v10 = vmul.f32 %v933_v5, %v933_v5  ;;  %v950_v15 = vmul.f32 %v934_v0, %v934_v0  ;;  %v937_v16 = vsub.f32 %v834_v26, %v921_v39  ;;  %v951_v20 = vmul.f32 %v935_v4, %v935_v4  ;;  %v1029_v39 = vld [vmem:[#allocation3] sm:$0x1] }
 0x2cf   : > { %v956_v53 = vadd.f32 %v955_v51, %v941_v50  ;;  %v952_v23 = vmul.f32 %v936_v13, %v936_v13 }
 0x2d0   : > { %v953_v14 = vmul.f32 %v937_v16, %v937_v16 }
 0x2d1   : > { %v957_v56 = vadd.f32 %v956_v53, %v942_v17  ;;  %v1399_v53 = vld [vmem:[#allocation5] ss:$0 sm:$0xff] }
 0x2d3   : > { %v958_v59 = vadd.f32 %v957_v56, %v943_v55 }
 0x2d5   : > { %v959_v62 = vadd.f32 %v958_v59, %v944_v58 }
 0x2d7   : > { %v960_v3 = vadd.f32 %v959_v62, %v945_v61 }
 0x2d9   : > { %v961_v7 = vadd.f32 %v960_v3, %v946_v2 }
 0x2db   : > { %v962_v9 = vadd.f32 %v961_v7, %v947_v6 }
 0x2dd   : > { %v963_v12 = vadd.f32 %v962_v9, %v948_v8 }
 0x2df   : > { %v964_v11 = vadd.f32 %v963_v12, %v949_v10 }
 0x2e1   : > { %v965_v21 = vadd.f32 %v964_v11, %v950_v15 }
 0x2e3   : > { %v966_v18 = vadd.f32 %v965_v21, %v951_v20 }
 0x2e5   : > { %v967_v25 = vadd.f32 %v966_v18, %v952_v23 }
 0x2e7   : > { %v968_v27 = vadd.f32 %v967_v25, %v953_v14 }
 0x2e9   : > { %v969_v28 = vrot.slane %v968_v27, 4 }
 0x2eb   : > { %v970_v19 = vadd.f32 %v969_v28, %v968_v27 }
 0x2ed   : > { %v971_v1 = vrot.slane %v970_v19, 2 }
 0x2ef   : > { %v972_v32 = vadd.f32 %v971_v1, %v970_v19 }
 0x2f1   : > { %v973_v29 = vrot.slane %v972_v32, 1 }
 0x2f3   : > { %v974_v22 = vadd.f32 %v973_v29, %v972_v32 }
 0x2f5   : > { %991 = vmatmul.f32.vlgmr.msra.gmra.mxu2 %v974_v22 }
 0x378   : > { %v992_v31 = vpop.f32.mrf.mxu2 }
 0x379   : > { %v995_v30 = vmul.f32 0.001953125, %v992_v31 }
 0x37b   : > { %1272 = vmatmul.msk.f32.vlgmr.msra.gmra.mxu3 %vm897_vm9, %v995_v30 }
 0x3fe   : > { %v1016_v24 = vpop.f32.mrf.mxu3 }
 0x3ff   : > { %v1017_v26 = vadd.f32 1e-05, %v1016_v24 }
 0x401   : > { %1400 = vrsqrt.f32 %v1017_v26  ;;  %vm1025_vm11 = vweird.f32 %v1017_v26 }
 0x407   : > { %v1401_v33 = vpop.eup %1400 }
 0x408   : > { %v1020_v34 = vmul.f32 %v1401_v33, %v1017_v26  ;;  %vm1026_vm10 = vweird.f32 %v1401_v33 }
 0x409   : > { %vm1027_vm12 = vmor %vm1025_vm11, %vm1026_vm10 }
 0x40a   : > { %v1021_v35 = vmul.f32 %v1401_v33, %v1020_v34 }
 0x40c   : > { %v1022_v36 = vmul.f32 0.5, %v1021_v35 }
 0x40e   : > { %v1023_v37 = vsub.f32 1.5, %v1022_v36 }
 0x410   : > { %v1024_v38 = vmul.f32 %v1401_v33, %v1023_v37 }
 0x412   : > { %v1028_v43 = vsel %vm1027_vm12, %v1401_v33, %v1024_v38 }
 0x413   : > { %v1030_v44 = vmul.f32 %v1029_v39, %v1028_v43 }
 0x415   : > { %v1031_v47 = vperm.slane %v1030_v44, 0 }
 0x417   : > { %v1032_v48 = vmul.f32 %v1031_v47, %v1926_v40  ;;  %v1033_v50 = vmul.f32 %v1031_v47, %v1929_v41  ;;  %v1034_v51 = vmul.f32 %v1031_v47, %v1932_v42  ;;  %v1035_v17 = vmul.f32 %v1031_v47, %v1939_v45 }
 0x418   : > { %v1036_v55 = vmul.f32 %v1031_v47, %v1942_v46  ;;  %v1037_v56 = vmul.f32 %v1031_v47, %v1947_v49  ;;  %v1038_v58 = vmul.f32 %v1031_v47, %v1952_v52  ;;  %v1039_v59 = vmul.f32 %v1031_v47, %v1957_v54 }
 0x419   : > { %v1040_v61 = vmul.f32 %v1031_v47, %v1962_v57  ;;  %v1041_v62 = vmul.f32 %v1031_v47, %v931_v60  ;;  %v1042_v2 = vmul.f32 %v1031_v47, %v932_v63  ;;  %v1043_v40 = vmul.f32 %v1031_v47, %v933_v5 }
 0x41a   : > { %v1044_v3 = vmul.f32 %v1031_v47, %v934_v0  ;;  %v1045_v41 = vmul.f32 %v1031_v47, %v935_v4  ;;  %v1046_v6 = vmul.f32 %v1031_v47, %v936_v13  ;;  %v1047_v42 = vmul.f32 %v1031_v47, %v937_v16 }
 0x41b   : > { %v1052_v7 = vadd.f32 %v1399_v53, %v1032_v48  ;;  %v1053_v45 = vadd.f32 %v1399_v53, %v1033_v50  ;;  %v1054_v8 = vadd.f32 %v1399_v53, %v1034_v51  ;;  %v1055_v9 = vadd.f32 %v1399_v53, %v1035_v17 }
 0x41c   : > { %v1056_v46 = vadd.f32 %v1399_v53, %v1036_v55  ;;  %v1057_v10 = vadd.f32 %v1399_v53, %v1037_v56  ;;  %v1058_v49 = vadd.f32 %v1399_v53, %v1038_v58  ;;  %v1059_v12 = vadd.f32 %v1399_v53, %v1039_v59 }
 0x41d   : > { %v1060_v52 = vadd.f32 %v1399_v53, %v1040_v61  ;;  %v1061_v15 = vadd.f32 %v1399_v53, %v1041_v62  ;;  %v1062_v54 = vadd.f32 %v1399_v53, %v1042_v2  ;;  %v1063_v11 = vadd.f32 %v1399_v53, %v1043_v40 }
 0x41e   : > { %v1064_v57 = vadd.f32 %v1399_v53, %v1044_v3  ;;  %v1065_v60 = vadd.f32 %v1399_v53, %v1045_v41  ;;  %v1066_v63 = vadd.f32 %v1399_v53, %v1046_v6  ;;  %v1067_v5 = vadd.f32 %v1399_v53, %v1047_v42 }
 0x41f   : > { %v1068_v0 = vmax.f32 %v1052_v7, 0.0  ;;  %v1069_v4 = vmax.f32 %v1053_v45, 0.0  ;;  %v1070_v13 = vmax.f32 %v1054_v8, 0.0  ;;  %v1071_v16 = vmax.f32 %v1055_v9, 0.0 }
 0x420   : > { %v1072_v20 = vmax.f32 %v1056_v46, 0.0  ;;  %v1073_v21 = vmax.f32 %v1057_v10, 0.0  ;;  %v1074_v23 = vmax.f32 %v1058_v49, 0.0  ;;  %v1075_v18 = vmax.f32 %v1059_v12, 0.0 }
 0x421   : > { %v1076_v14 = vmax.f32 %v1060_v52, 0.0  ;;  %v1077_v25 = vmax.f32 %v1061_v15, 0.0  ;;  %v1078_v27 = vmax.f32 %v1062_v54, 0.0  ;;  %v1079_v28 = vmax.f32 %v1063_v11, 0.0 }
 0x422   : > { %v1080_v19 = vmax.f32 %v1064_v57, 0.0  ;;  %v1081_v1 = vmax.f32 %v1065_v60, 0.0  ;;  %v1282_v32 = vpack.c.bf16 %v1069_v4, %v1068_v0  ;;  %v1287_v29 = vpack.c.bf16 %v1071_v16, %v1070_v13 }
 0x423   : > { %v1292_v22 = vpack.c.bf16 %v1073_v21, %v1072_v20  ;;  %v1082_v31 = vmax.f32 %v1066_v63, 0.0  ;;  %v1083_v30 = vmax.f32 %v1067_v5, 0.0  ;;  %v1297_v24 = vpack.c.bf16 %v1075_v18, %v1074_v23 }
 0x424   : > { %1283 = vst [vmem:[%s1622_s7] sm:$0xff] %v1282_v32   ;;  %v1302_v26 = vpack.c.bf16 %v1077_v25, %v1076_v14  ;;  %v1307_v33 = vpack.c.bf16 %v1079_v28, %v1078_v27  ;;  %v1312_v34 = vpack.c.bf16 %v1081_v1, %v1080_v19 }
 0x425   : > { %1319 = vst [vmem:[%s1622_s7 + $0x8] sm:$0xff] %v1287_v29   ;;  %v1317_v35 = vpack.c.bf16 %v1083_v30, %v1082_v31 }
 0x426   : > { %1320 = vst [vmem:[%s1622_s7 + $0x10] sm:$0xff] %v1292_v22  }
 0x427   : > { %1321 = vst [vmem:[%s1622_s7 + $0x18] sm:$0xff] %v1297_v24  }
 0x428   : > { %1322 = vst [vmem:[%s1622_s7 + $0x20] sm:$0xff] %v1302_v26  }
 0x429   : > { %1323 = vst [vmem:[%s1622_s7 + $0x28] sm:$0xff] %v1307_v33  }
 0x42a   : > { %1324 = vst [vmem:[%s1622_s7 + $0x30] sm:$0xff] %v1312_v34  }
 0x42b   : > { %1325 = vst [vmem:[%s1622_s7 + $0x38] sm:$0xff] %v1317_v35  }
 0x42c PF: > { %s18_s25 = sadd.s32 1, %s1508_s25   ;;  %s2018_s21 = smov %s1500_s23 }
 0x42d   : > { %p15_p11 = scmp.ge.s32.totalorder %s18_s25, 6   ;;  %s2019_s22 = smov %s1504_s24 }
 0x42e   : > { %s2020_s23 = smov %s2023_s27  ;;  %s2021_s24 = smov %s2027_s28 }
 0x42f   :  { %17 = sbr.rel (!%p15_p11) target bundleno = 4 (0x4), region = 91 }
 0x434   :  { %1137 = vsyncpa [#allocation4], 1 }
 0x435   :  { %1139 = vsyncpa [#allocation4 + $0x1], 1 }
 0x436   :  { %1140 = vsyncpa [#allocation6], 1 }

// kernel: sfe_forward.10
= control target key start
LH: loop header
LB: loop body
LE: loop exit
PB: predicated region body
PF: predicated region fallthrough
CT: control target
= control target key end

     0   :  { %s2310_s21 = smov 0   ;;  %s2312_s22 = smov 0   ;;  %s2971_s0 = inlined_call_operand.vmem [shape: bf16[2,2,8,8,128], index: 0, kind: input, shape index: {}]   ;;  %s2972_s1 = inlined_call_operand.vmem [shape: bf16[3,384,32], index: 1, kind: input, shape index: {}]   ;;  %s2973_s2 = inlined_call_operand.vmem [shape: f32[1,32], index: 2, kind: input, shape index: {}]   ;;  %s2974_s3 = inlined_call_operand.vmem [shape: f32[1,32], index: 3, kind: input, shape index: {}]   ;;  %s2975_s4 = inlined_call_operand.vmem [shape: f32[32,32], index: 4, kind: input, shape index: {}]   ;;  %s2976_s5 = inlined_call_operand.vmem [shape: f32[32,32], index: 5, kind: input, shape index: {}]   ;;  %s2977_s6 = inlined_call_operand.vmem [shape: bf16[2,128,32], index: 6, kind: output, shape index: {}]  }
   0x1   :  { %s2314_s23 = smov 0   ;;  %s2316_s24 = smov 0  }
   0x2   :  { %s2318_s25 = smov 0  }
   0x3 LB: > { %s25_s26 = sadd.s32 1, %s2264_s23  ;;  %s28_s27 = sadd.s32 1, %s2268_s24  ;;  %s2272_s25 = sphi %s2318_s25, %s16_s25   ;;  %s2268_s24 = sphi %s2316_s24, %s2981_s24   ;;  %s2264_s23 = sphi %s2314_s23, %s2980_s23   ;;  %s2260_s22 = sphi %s2312_s22, %s2979_s22   ;;  %s2256_s21 = sphi %s2310_s21, %s2978_s21  }
   0x4   : > { %p26_p0 = scmp.ge.s32.totalorder %s25_s26, 2  ;;  %p1663_p1 = scmp.ge.s32.totalorder %s2272_s25, 1 }
   0x5   : > { %p230_p2 = scmp.lt.s32.totalorder %s2272_s25, 5 }
   0x6   : > { %s2983_s26 = smov (%p26_p0, %s25_s26), 0  ;;  %s2985_s27 = smov (!%p26_p0, %s28_s27), %s2268_s24 }
   0x7   : > { %p231_p3 = pnand %p1663_p1, %p230_p2  ;;  %p30_p4 = scmp.ge.s32.totalorder %s2985_s27, 2 }
   0x8   : > { %p264_p5 = scmp.lt.s32.totalorder (!%p231_p3), %s2260_s22, 1  ;;  %p266_p6 = scmp.lt.s32.totalorder (!%p231_p3), %s2256_s21, 1 }
   0x9   : > { %s2987_s27 = smov (%p30_p4, %s2985_s27), 0  ;;  %234 = sbr.rel (%p231_p3) target bundleno = 1001 (0x3e9), region = 44 }
   0xa   : > { %p2054_p7 = scmp.ne.s32.totalorder (!%p231_p3), %s2256_s21, 1 }
   0xe   : > { %v2069_v0 = vld [vmem:[%s2972_s1 + $0x38] sm:$0xff]  ;;  %v2068_v3 = vld [vmem:[%s2972_s1 + $0x30] sm:$0xff]  ;;  %s2989_s22 = smov (!%p264_p5, %s2260_s22), 1  ;;  %v2067_v6 = vld [vmem:[%s2972_s1 + $0x28] sm:$0xff]  ;;  %v2274_v23 = vmov 0   ;;  %vm1186_vm0 = vcmask 1040384  }
   0xf   : > { %v2085_v1 = vld [vmem:[%s2972_s1 + $0xb8] sm:$0xff]  ;;  %515 = vmatpush.bf16.msra.mxu0 %v2069_v0  ;;  %2168 = vmatpush.bf16.msra.mxu1 %v2069_v0  ;;  %v2084_v4 = vld [vmem:[%s2972_s1 + $0xb0] sm:$0xff]  ;;  %s2061_s16 = sshll.u32 %s2989_s22, 6  ;;  %v2083_v7 = vld [vmem:[%s2972_s1 + $0xa8] sm:$0xff]  ;;  %s1665_s13 = sshll.u32 %s2989_s22, 4  ;;  %v2423_v24 = vunpack.c.l.b16 %v2274_v23  ;;  %vm1227_vm1 = vcmask 1046528  }
  0x10   : > { %v2093_v2 = vld [vmem:[%s2972_s1 + $0xf8] sm:$0xff]  ;;  %573 = vmatpush.bf16.msra.mxu2 %v2085_v1  ;;  %v2092_v5 = vld [vmem:[%s2972_s1 + $0xf0] sm:$0xff]  ;;  %s2364_s19 = scalar_lea.vmem %s2977_s6, %s2061_s16  ;;  %v2091_v8 = vld [vmem:[%s2972_s1 + $0xe8] sm:$0xff]  ;;  %vm1246_vm2 = vcmask 261120  }
  0x11   : > { %795 = vmatpush.bf16.msra.mxu3 %v2093_v2  ;;  %s267_s29 = scalar_select %p266_p6, %s2256_s21, 1  ;;  %v2066_v9 = vld [vmem:[%s2972_s1 + $0x20] sm:$0xff]  ;;  %v2065_v12 = vld [vmem:[%s2972_s1 + $0x18] sm:$0xff]  ;;  %v2064_v15 = vld [vmem:[%s2972_s1 + $0x10] sm:$0xff] }
  0x12   : > { %v2082_v10 = vld [vmem:[%s2972_s1 + $0xa0] sm:$0xff]  ;;  %v2081_v13 = vld [vmem:[%s2972_s1 + $0x98] sm:$0xff]  ;;  %v2080_v16 = vld [vmem:[%s2972_s1 + $0x90] sm:$0xff] }
  0x13   : > { %516 = vmatpush.bf16.msra.mxu0 %v2068_v3  ;;  %2169 = vmatpush.bf16.msra.mxu1 %v2068_v3  ;;  %s1664_s12 = sshll.u32 %s267_s29, 3  ;;  %v2090_v11 = vld [vmem:[%s2972_s1 + $0xe0] sm:$0xff]  ;;  %v2089_v14 = vld [vmem:[%s2972_s1 + $0xd8] sm:$0xff]  ;;  %v2088_v17 = vld [vmem:[%s2972_s1 + $0xd0] sm:$0xff] }
  0x14   : > { %574 = vmatpush.bf16.msra.mxu2 %v2084_v4  ;;  %s270_s18 = sadd.s32 %s1665_s13, %s1664_s12  ;;  %v2063_v18 = vld [vmem:[%s2972_s1 + $0x8] sm:$0xff]  ;;  %v2062_v25 = vld [vmem:[%s2972_s1] sm:$0xff]  ;;  %v2077_v28 = vld [vmem:[%s2972_s1 + $0x78] sm:$0xff] }
  0x15   : > { %796 = vmatpush.bf16.msra.mxu3 %v2092_v5  ;;  %s1666_s8 = sshll.u32 %s270_s18, 2  ;;  %v2079_v20 = vld [vmem:[%s2972_s1 + $0x88] sm:$0xff]  ;;  %v2078_v26 = vld [vmem:[%s2972_s1 + $0x80] sm:$0xff]  ;;  %v2101_v29 = vld [vmem:[%s2972_s1 + $0x138] sm:$0xff] }
  0x16   : > { %s2408_s17 = scalar_lea.vmem %s2971_s0, %s1666_s8  ;;  %v2087_v21 = vld [vmem:[%s2972_s1 + $0xc8] sm:$0xff]  ;;  %v2086_v27 = vld [vmem:[%s2972_s1 + $0xc0] sm:$0xff]  ;;  %v2117_v33 = vld [vmem:[%s2972_s1 + $0x1b8] sm:$0xff] }
  0x17   : > { %517 = vmatpush.bf16.msra.mxu0 %v2067_v6  ;;  %2170 = vmatpush.bf16.msra.mxu1 %v2067_v6  ;;  %v2414_v19 = vld [vmem:[%s2408_s17] sm:$0xff]   ;;  %v2444_v31 = vld [vmem:[%s2408_s17 + $0xc] sm:$0xff]   ;;  %v2125_v34 = vld [vmem:[%s2972_s1 + $0x1f8] sm:$0xff] }
  0x18   : > { %575 = vmatpush.bf16.msra.mxu2 %v2083_v7  ;;  %v2136_v22 = vunpack.c.l.b16 %v2414_v19  ;;  %v2447_v32 = vld [vmem:[%s2408_s17 + $0x4] sm:$0xff]   ;;  %v2076_v35 = vld [vmem:[%s2972_s1 + $0x70] sm:$0xff]  ;;  %v2073_v47 = vld [vmem:[%s2972_s1 + $0x58] sm:$0xff] }
  0x19   : > { %797 = vmatpush.bf16.msra.mxu3 %v2091_v8  ;;  %v2100_v36 = vld [vmem:[%s2972_s1 + $0x130] sm:$0xff]  ;;  %v2075_v39 = vld [vmem:[%s2972_s1 + $0x68] sm:$0xff]  ;;  %v2074_v43 = vld [vmem:[%s2972_s1 + $0x60] sm:$0xff] }
  0x1a   : > { %v2441_v30 = vpack.c.b16 %v2136_v22, %v2423_v24  ;;  %v2116_v37 = vld [vmem:[%s2972_s1 + $0x1b0] sm:$0xff]  ;;  %v2099_v40 = vld [vmem:[%s2972_s1 + $0x128] sm:$0xff]  ;;  %v2098_v44 = vld [vmem:[%s2972_s1 + $0x120] sm:$0xff] }
  0x1b   : > { %518 = vmatpush.bf16.msra.mxu0 %v2066_v9  ;;  %2171 = vmatpush.bf16.msra.mxu1 %v2066_v9  ;;  %v2124_v38 = vld [vmem:[%s2972_s1 + $0x1f0] sm:$0xff]  ;;  %v2115_v41 = vld [vmem:[%s2972_s1 + $0x1a8] sm:$0xff]  ;;  %v2114_v45 = vld [vmem:[%s2972_s1 + $0x1a0] sm:$0xff] }
  0x1c   : > { %576 = vmatpush.bf16.msra.mxu2 %v2082_v10  ;;  %v2123_v42 = vld [vmem:[%s2972_s1 + $0x1e8] sm:$0xff]  ;;  %v2122_v46 = vld [vmem:[%s2972_s1 + $0x1e0] sm:$0xff]  ;;  %v2097_v48 = vld [vmem:[%s2972_s1 + $0x118] sm:$0xff] }
  0x1d   : > { %798 = vmatpush.bf16.msra.mxu3 %v2090_v11  ;;  %v2502_v49 = vld [vmem:[%s2408_s17 + $0x14] sm:$0xff]   ;;  %v2071_v55 = vld [vmem:[%s2972_s1 + $0x48] sm:$0xff]  ;;  %v2070_v59 = vld [vmem:[%s2972_s1 + $0x40] sm:$0xff] }
  0x1e   : > { %v2113_v50 = vld [vmem:[%s2972_s1 + $0x198] sm:$0xff]  ;;  %v2072_v51 = vld [vmem:[%s2972_s1 + $0x50] sm:$0xff]  ;;  %v2095_v56 = vld [vmem:[%s2972_s1 + $0x108] sm:$0xff] }
  0x1f   : > { %519 = vmatpush.bf16.msra.mxu0 %v2065_v12  ;;  %2172 = vmatpush.bf16.msra.mxu1 %v2065_v12  ;;  %v2096_v52 = vld [vmem:[%s2972_s1 + $0x110] sm:$0xff]  ;;  %v2121_v53 = vld [vmem:[%s2972_s1 + $0x1d8] sm:$0xff]  ;;  %v2111_v58 = vld [vmem:[%s2972_s1 + $0x188] sm:$0xff] }
  0x20   : > { %577 = vmatpush.bf16.msra.mxu2 %v2081_v13  ;;  %v2112_v54 = vld [vmem:[%s2972_s1 + $0x190] sm:$0xff]  ;;  %v2094_v60 = vld [vmem:[%s2972_s1 + $0x100] sm:$0xff]  ;;  %v2109_v61 = vld [vmem:[%s2972_s1 + $0x178] sm:$0xff] }
  0x21   : > { %799 = vmatpush.bf16.msra.mxu3 %v2089_v14  ;;  %v2120_v57 = vld [vmem:[%s2972_s1 + $0x1d0] sm:$0xff]  ;;  %v2133_v62 = vld [vmem:[%s2972_s1 + $0x238] sm:$0xff]  ;;  %v2119_v63 = vld [vmem:[%s2972_s1 + $0x1c8] sm:$0xff] }
  0x22   : > { %v2110_v0 = vld [vmem:[%s2972_s1 + $0x180] sm:$0xff]  ;;  %v2108_v1 = vld [vmem:[%s2972_s1 + $0x170] sm:$0xff]  ;;  %v2107_v4 = vld [vmem:[%s2972_s1 + $0x168] sm:$0xff] }
  0x23   : > { %520 = vmatpush.bf16.msra.mxu0 %v2064_v15  ;;  %2173 = vmatpush.bf16.msra.mxu1 %v2064_v15  ;;  %v2132_v2 = vld [vmem:[%s2972_s1 + $0x230] sm:$0xff]  ;;  %v2118_v3 = vld [vmem:[%s2972_s1 + $0x1c0] sm:$0xff]  ;;  %v2131_v5 = vld [vmem:[%s2972_s1 + $0x228] sm:$0xff] }
  0x24   : > { %578 = vmatpush.bf16.msra.mxu2 %v2080_v16  ;;  %v2152_v6 = vld [vmem:[%s2408_s17 + $0x18] sm:$0xff]   ;;  %v2106_v7 = vld [vmem:[%s2972_s1 + $0x160] sm:$0xff]  ;;  %v2150_v12 = vld [vmem:[%s2408_s17 + $0x8] sm:$0xff]  }
  0x25   : > { %800 = vmatpush.bf16.msra.mxu3 %v2088_v17  ;;  %v2130_v8 = vld [vmem:[%s2972_s1 + $0x220] sm:$0xff]  ;;  %v2149_v9 = vunpack.c.h.b16 %v2152_v6  ;;  %v2105_v10 = vld [vmem:[%s2972_s1 + $0x158] sm:$0xff]  ;;  %v2104_v14 = vld [vmem:[%s2972_s1 + $0x150] sm:$0xff] }
  0x26   : > { %v2129_v11 = vld [vmem:[%s2972_s1 + $0x218] sm:$0xff]  ;;  %v2128_v15 = vld [vmem:[%s2972_s1 + $0x210] sm:$0xff]  ;;  %v2103_v16 = vld [vmem:[%s2972_s1 + $0x148] sm:$0xff] }
  0x27   : > { %521 = vmatpush.bf16.msra.mxu0 %v2063_v18  ;;  %2174 = vmatpush.bf16.msra.mxu1 %v2063_v18  ;;  %v361_v13 = vpack.c.b16 %v2423_v24, %v2149_v9  ;;  %v2127_v17 = vld [vmem:[%s2972_s1 + $0x208] sm:$0xff]  ;;  %v2102_v18 = vld [vmem:[%s2972_s1 + $0x140] sm:$0xff] }
  0x28   : > { %579 = vmatpush.bf16.msra.mxu2 %v2079_v20  ;;  %v2126_v20 = vld [vmem:[%s2972_s1 + $0x200] sm:$0xff] }
  0x29   : > { %801 = vmatpush.bf16.msra.mxu3 %v2087_v21  ;;  %v2151_v21 = vld [vmem:[%s2408_s17 + $0x10] sm:$0xff]   ;;  %s2053_s17 = sshll.u32 %s2256_s21, 6 }
  0x2a   : > { %s2663_s13 = scalar_lea.vmem [#allocation2], %s2053_s17 }
  0x2b   : > { %522 = vmatpush.bf16.msra.mxu0 %v2062_v25  ;;  %2175 = vmatpush.bf16.msra.mxu1 %v2062_v25 }
  0x2c   : > { %580 = vmatpush.bf16.msra.mxu2 %v2078_v26 }
  0x2d   : > { %802 = vmatpush.bf16.msra.mxu3 %v2086_v27 }
  0x2e   : > { %523 = vmatmul.bf16.vlgmr.msra.gmra.mxu0 %v2441_v30  ;;  %533 = vmatmul.bf16.vlgmr.msra.gmra.mxu1 %v2444_v31 }
  0x2f   : > { %544 = vmatpush.bf16.msrb.mxu1 %v2077_v28  ;;  %824 = vmatpush.bf16.msrb.mxu0 %v2101_v29 }
  0x30   : > { %581 = vmatmul.bf16.vlgmr.msra.gmra.mxu2 %v2447_v32  ;;  %803 = vmatmul.bf16.vlgmr.msra.gmra.mxu3 %v2441_v30 }
  0x31   : > { %1075 = vmatpush.bf16.msrb.mxu2 %v2117_v33  ;;  %1104 = vmatpush.bf16.msrb.mxu3 %v2125_v34 }
  0x33   : > { %545 = vmatpush.bf16.msrb.mxu1 %v2076_v35  ;;  %825 = vmatpush.bf16.msrb.mxu0 %v2100_v36 }
  0x35   : > { %1076 = vmatpush.bf16.msrb.mxu2 %v2116_v37  ;;  %1105 = vmatpush.bf16.msrb.mxu3 %v2124_v38 }
  0x37   : > { %546 = vmatpush.bf16.msrb.mxu1 %v2075_v39  ;;  %826 = vmatpush.bf16.msrb.mxu0 %v2099_v40 }
  0x39   : > { %1077 = vmatpush.bf16.msrb.mxu2 %v2115_v41  ;;  %1106 = vmatpush.bf16.msrb.mxu3 %v2123_v42 }
  0x3b   : > { %547 = vmatpush.bf16.msrb.mxu1 %v2074_v43  ;;  %827 = vmatpush.bf16.msrb.mxu0 %v2098_v44 }
  0x3d   : > { %1078 = vmatpush.bf16.msrb.mxu2 %v2114_v45  ;;  %1107 = vmatpush.bf16.msrb.mxu3 %v2122_v46 }
  0x3e   : > { %528 = vmatmul.bf16.gmra.mxu0 %v2447_v32  ;;  %538 = vmatmul.bf16.gmra.mxu1 %v2502_v49 }
  0x3f   : > { %548 = vmatpush.bf16.msrb.mxu1 %v2073_v47  ;;  %828 = vmatpush.bf16.msrb.mxu0 %v2097_v48 }
  0x40   : > { %586 = vmatmul.bf16.gmra.mxu2 %v2444_v31  ;;  %808 = vmatmul.bf16.gmra.mxu3 %v2447_v32 }
  0x41   : > { %1079 = vmatpush.bf16.msrb.mxu2 %v2113_v50  ;;  %1108 = vmatpush.bf16.msrb.mxu3 %v2121_v53 }
  0x43   : > { %549 = vmatpush.bf16.msrb.mxu1 %v2072_v51  ;;  %829 = vmatpush.bf16.msrb.mxu0 %v2096_v52 }
  0x45   : > { %1080 = vmatpush.bf16.msrb.mxu2 %v2112_v54  ;;  %1109 = vmatpush.bf16.msrb.mxu3 %v2120_v57 }
  0x47   : > { %550 = vmatpush.bf16.msrb.mxu1 %v2071_v55  ;;  %830 = vmatpush.bf16.msrb.mxu0 %v2095_v56 }
  0x49   : > { %1081 = vmatpush.bf16.msrb.mxu2 %v2111_v58  ;;  %1110 = vmatpush.bf16.msrb.mxu3 %v2119_v63 }
  0x4b   : > { %551 = vmatpush.bf16.msrb.mxu1 %v2070_v59  ;;  %831 = vmatpush.bf16.msrb.mxu0 %v2094_v60 }
  0x4d   : > { %1082 = vmatpush.bf16.msrb.mxu2 %v2110_v0  ;;  %1111 = vmatpush.bf16.msrb.mxu3 %v2118_v3 }
  0x4e   : > { %552 = vmatmul.bf16.vlgmr.msrb.gmra.mxu1 %v2414_v19  ;;  %832 = vmatmul.bf16.vlgmr.msrb.gmra.mxu0 %v2414_v19 }
  0x4f   : > { %853 = vmatpush.bf16.msra.mxu1 %v2109_v61  ;;  %1133 = vmatpush.bf16.msra.mxu0 %v2133_v62 }
  0x50   : > { %591 = vmatmul.bf16.gmra.mxu2 %v2502_v49  ;;  %813 = vmatmul.bf16.gmra.mxu3 %v2444_v31 }
  0x51   : > { %2176 = vmatpush.bf16.msra.mxu2 %v2133_v62 }
  0x53   : > { %854 = vmatpush.bf16.msra.mxu1 %v2108_v1  ;;  %1134 = vmatpush.bf16.msra.mxu0 %v2132_v2 }
  0x55   : > { %2177 = vmatpush.bf16.msra.mxu2 %v2132_v2 }
  0x57   : > { %855 = vmatpush.bf16.msra.mxu1 %v2107_v4  ;;  %1135 = vmatpush.bf16.msra.mxu0 %v2131_v5 }
  0x59   : > { %2178 = vmatpush.bf16.msra.mxu2 %v2131_v5 }
  0x5b   : > { %856 = vmatpush.bf16.msra.mxu1 %v2106_v7  ;;  %1136 = vmatpush.bf16.msra.mxu0 %v2130_v8 }
  0x5d   : > { %2179 = vmatpush.bf16.msra.mxu2 %v2130_v8 }
  0x5e   : > { %557 = vmatmul.bf16.gmra.mxu1 %v2150_v12  ;;  %837 = vmatmul.bf16.gmra.mxu0 %v2150_v12 }
  0x5f   : > { %857 = vmatpush.bf16.msra.mxu1 %v2105_v10  ;;  %1137 = vmatpush.bf16.msra.mxu0 %v2129_v11 }
  0x60   : > { %596 = vmatmul.bf16.gmra.mxu2 %v361_v13  ;;  %818 = vmatmul.bf16.gmra.mxu3 %v2502_v49 }
  0x61   : > { %2180 = vmatpush.bf16.msra.mxu2 %v2129_v11 }
  0x63   : > { %858 = vmatpush.bf16.msra.mxu1 %v2104_v14  ;;  %1138 = vmatpush.bf16.msra.mxu0 %v2128_v15 }
  0x65   : > { %2181 = vmatpush.bf16.msra.mxu2 %v2128_v15 }
  0x67   : > { %859 = vmatpush.bf16.msra.mxu1 %v2103_v16  ;;  %1139 = vmatpush.bf16.msra.mxu0 %v2127_v17 }
  0x69   : > { %2182 = vmatpush.bf16.msra.mxu2 %v2127_v17 }
  0x6b   : > { %860 = vmatpush.bf16.msra.mxu1 %v2102_v18  ;;  %1140 = vmatpush.bf16.msra.mxu0 %v2126_v20 }
  0x6d   : > { %2183 = vmatpush.bf16.msra.mxu2 %v2126_v20 }
  0x6e   : > { %562 = vmatmul.bf16.gmra.mxu1 %v2151_v21  ;;  %842 = vmatmul.bf16.gmra.mxu0 %v2151_v21 }
  0x70   : > { %1083 = vmatmul.bf16.vlgmr.msrb.gmra.mxu2 %v2441_v30  ;;  %1112 = vmatmul.bf16.vlgmr.msrb.gmra.mxu3 %v2414_v19 }
  0x7e   : > { %567 = vmatmul.bf16.gmra.mxu1 %v2152_v6  ;;  %847 = vmatmul.bf16.gmra.mxu0 %v2152_v6 }
  0x80   : > { %1088 = vmatmul.bf16.gmra.mxu2 %v2447_v32  ;;  %1117 = vmatmul.bf16.gmra.mxu3 %v2150_v12 }
  0x8e   : > { %861 = vmatmul.bf16.vlgmr.msra.gmra.mxu1 %v2447_v32  ;;  %1141 = vmatmul.bf16.vlgmr.msra.gmra.mxu0 %v2447_v32 }
  0x90   : > { %1093 = vmatmul.bf16.gmra.mxu2 %v2444_v31  ;;  %1122 = vmatmul.bf16.gmra.mxu3 %v2151_v21 }
  0x9e   : > { %866 = vmatmul.bf16.gmra.mxu1 %v2444_v31  ;;  %1146 = vmatmul.bf16.gmra.mxu0 %v2444_v31 }
  0xa0   : > { %1098 = vmatmul.bf16.gmra.mxu2 %v2502_v49  ;;  %1127 = vmatmul.bf16.gmra.mxu3 %v2152_v6 }
  0xab   : > { %v524_v19 = vpop.f32.mrf.mxu0  ;;  %v534_v22 = vpop.f32.mrf.mxu1 }
  0xae   : > { %871 = vmatmul.bf16.gmra.mxu1 %v2502_v49  ;;  %1151 = vmatmul.bf16.gmra.mxu0 %v2502_v49 }
  0xb0   : > { %1156 = vmatmul.bf16.vlgmr.msra.gmra.mxu2 %v361_v13 }
  0xb3   : > { %v582_v23 = vpop.f32.mrf.mxu2  ;;  %v804_v24 = vpop.f32.mrf.mxu3 }
  0xb4   : > { %v526_v25 = vpop.f32.mrf.mxu0  ;;  %v536_v26 = vpop.f32.mrf.mxu1 }
  0xbb   : > { %v584_v27 = vpop.f32.mrf.mxu2  ;;  %v2618_v28 = vpop.f32.mrf.mxu3 }
  0xbc   : > { %v529_v29 = vpop.f32.mrf.mxu0  ;;  %v539_v30 = vpop.f32.mrf.mxu1 }
  0xbe   : > { %876 = vmatmul.bf16.gmra.mxu1 %v361_v13 }
  0xc3   : > { %v587_v31 = vpop.f32.mrf.mxu2  ;;  %v2620_v32 = vpop.f32.mrf.mxu3 }
  0xc4   : > { %v531_v33 = vpop.f32.mrf.mxu0  ;;  %v541_v34 = vpop.f32.mrf.mxu1 }
  0xcb   : > { %v589_v35 = vpop.f32.mrf.mxu2  ;;  %v2622_v36 = vpop.f32.mrf.mxu3 }
  0xcc   : > { %v553_v37 = vpop.f32.mrf.mxu1  ;;  %v833_v38 = vpop.f32.mrf.mxu0 }
  0xcd   : > { %v554_v39 = vadd.f32 %v553_v37, %v524_v19  ;;  %v834_v21 = vadd.f32 %v833_v38, %v804_v24 }
  0xcf   : > { %v583_v40 = vadd.f32 %v582_v23, %v554_v39 }
  0xd1   : > { %v1170_v20 = vrot.slane %v583_v40, 7 }
  0xd3   : > { %v592_v41 = vpop.f32.mrf.mxu2  ;;  %v2624_v42 = vpop.f32.mrf.mxu3 }
  0xd4   : > { %v555_v43 = vpop.f32.mrf.mxu1  ;;  %v835_v44 = vpop.f32.mrf.mxu0 }
  0xd5   : > { %v556_v45 = vadd.f32 %v555_v43, %v526_v25  ;;  %v836_v24 = vadd.f32 %v835_v44, %v2618_v28 }
  0xd7   : > { %v2626_v46 = vadd.f32 %v584_v27, %v556_v45 }
  0xdb   : > { %v594_v47 = vpop.f32.mrf.mxu2  ;;  %v2628_v48 = vpop.f32.mrf.mxu3 }
  0xdc   : > { %v558_v49 = vpop.f32.mrf.mxu1  ;;  %v2630_v50 = vpop.f32.mrf.mxu0 }
  0xdd   : > { %v559_v51 = vadd.f32 %v558_v49, %v529_v29  ;;  %v1187_v29 = vsel %vm1186_vm0, 0.0, %v1170_v20 }
  0xdf   : > { %v2632_v52 = vadd.f32 %v587_v31, %v559_v51 }
  0xe1   : > { %v1172_v28 = vrot.slane %v2632_v52, 7 }
  0xe3   : > { %v597_v53 = vpop.f32.mrf.mxu2  ;;  %v2634_v54 = vpop.f32.mrf.mxu3 }
  0xe4   : > { %v560_v55 = vpop.f32.mrf.mxu1  ;;  %v2636_v56 = vpop.f32.mrf.mxu0 }
  0xe5   : > { %v561_v57 = vadd.f32 %v560_v55, %v531_v33 }
  0xe7   : > { %v2638_v58 = vadd.f32 %v589_v35, %v561_v57 }
  0xeb   : > { %v599_v59 = vpop.f32.mrf.mxu2  ;;  %v2640_v60 = vpop.f32.mrf.mxu3 }
  0xec   : > { %v563_v61 = vpop.f32.mrf.mxu1  ;;  %v2642_v62 = vpop.f32.mrf.mxu0 }
  0xed   : > { %v564_v63 = vadd.f32 %v563_v61, %v534_v22 }
  0xef   : > { %v2644_v0 = vadd.f32 %v592_v41, %v564_v63 }
  0xf3   : > { %v1084_v1 = vpop.f32.mrf.mxu2  ;;  %v1113_v4 = vpop.f32.mrf.mxu3 }
  0xf4   : > { %v565_v2 = vpop.f32.mrf.mxu1  ;;  %v2646_v3 = vpop.f32.mrf.mxu0  ;;  %v1114_v19 = vadd.f32 %v1113_v4, %v1084_v1  ;;  %v1189_v4 = vsel %vm1186_vm0, 0.0, %v1172_v28 }
  0xf5   : > { %v566_v5 = vadd.f32 %v565_v2, %v536_v26 }
  0xf7   : > { %v2648_v6 = vadd.f32 %v594_v47, %v566_v5 }
  0xfb   : > { %v1086_v7 = vpop.f32.mrf.mxu2  ;;  %v1115_v11 = vpop.f32.mrf.mxu3 }
  0xfc   : > { %v568_v8 = vpop.f32.mrf.mxu1  ;;  %v2650_v9 = vpop.f32.mrf.mxu0  ;;  %v1116_v37 = vadd.f32 %v1115_v11, %v1086_v7 }
  0xfd   : > { %v569_v10 = vadd.f32 %v568_v8, %v539_v30  ;;  %v1173_v8 = vrot.slane %v2638_v58, 7 }
  0xff   : > { %v2652_v12 = vadd.f32 %v597_v53, %v569_v10  ;;  %v839_v53 = vadd.f32 %v2630_v50, %v2620_v32  ;;  %v841_v32 = vadd.f32 %v2636_v56, %v2622_v36  ;;  %v1190_v20 = vsel %vm1186_vm0, 0.0, %v1173_v8 }
 0x100   : > { %v844_v36 = vadd.f32 %v2642_v62, %v2624_v42  ;;  %v846_v42 = vadd.f32 %v2646_v3, %v2628_v48  ;;  %v849_v3 = vadd.f32 %v2650_v9, %v2634_v54 }
 0x103   : > { %v1089_v13 = vpop.f32.mrf.mxu2  ;;  %v1118_v18 = vpop.f32.mrf.mxu3 }
 0x104   : > { %v570_v14 = vpop.f32.mrf.mxu1  ;;  %v2654_v15 = vpop.f32.mrf.mxu0  ;;  %v1119_v55 = vadd.f32 %v1118_v18, %v1089_v13 }
 0x105   : > { %v571_v16 = vadd.f32 %v570_v14, %v541_v34  ;;  %v1171_v34 = vrot.slane %v2626_v46, 7  ;;  %v851_v54 = vadd.f32 %v2654_v15, %v2640_v60 }
 0x107   : > { %v2656_v17 = vadd.f32 %v599_v59, %v571_v16  ;;  %v1188_v47 = vsel %vm1186_vm0, 0.0, %v1171_v34 }
 0x10b   : > { %v1091_v22 = vpop.f32.mrf.mxu2  ;;  %v1120_v38 = vpop.f32.mrf.mxu3 }
 0x10c   : > { %v862_v23 = vpop.f32.mrf.mxu1  ;;  %v1142_v25 = vpop.f32.mrf.mxu0  ;;  %v1121_v50 = vadd.f32 %v1120_v38, %v1091_v22 }
 0x10d   : > { %v863_v26 = vadd.f32 %v862_v23, %v834_v21  ;;  %v1143_v27 = vadd.f32 %v1142_v25, %v1114_v19  ;;  %v1174_v25 = vrot.slane %v2644_v0, 7 }
 0x10f   : > { %v1195_v30 = vadd.f32 %v1187_v29, %v863_v26  ;;  %v1211_v31 = vrot.slane %v1143_v27, 1 }
 0x111   : > { %v1228_v33 = vsel %vm1227_vm1, %v1211_v31, 0.0 }
 0x112   : > { %v1236_v35 = vadd.f32 %v1228_v33, %v1195_v30  ;;  %v1191_v33 = vsel %vm1186_vm0, 0.0, %v1174_v25 }
 0x113   : > { %v1094_v39 = vpop.f32.mrf.mxu2  ;;  %v1123_v63 = vpop.f32.mrf.mxu3 }
 0x114   : > { %1247 = vst.msk [vmem:[%s2663_s13] sm:$0xff] %vm1246_vm2, %v1236_v35  ;;  %v864_v40 = vpop.f32.mrf.mxu1  ;;  %v1144_v41 = vpop.f32.mrf.mxu0  ;;  %v1124_v56 = vadd.f32 %v1123_v63, %v1094_v39 }
 0x115   : > { %v865_v43 = vadd.f32 %v864_v40, %v836_v24  ;;  %v1145_v45 = vadd.f32 %v1144_v41, %v1116_v37  ;;  %v1175_v37 = vrot.slane %v2648_v6, 7 }
 0x117   : > { %v1196_v49 = vadd.f32 %v1188_v47, %v865_v43  ;;  %v1212_v46 = vrot.slane %v1145_v45, 1 }
 0x119   : > { %v1229_v51 = vsel %vm1227_vm1, %v1212_v46, 0.0 }
 0x11a   : > { %v1237_v44 = vadd.f32 %v1229_v51, %v1196_v49  ;;  %v1192_v49 = vsel %vm1186_vm0, 0.0, %v1175_v37 }
 0x11b   : > { %v1096_v57 = vpop.f32.mrf.mxu2  ;;  %v1125_v21 = vpop.f32.mrf.mxu3 }
 0x11c   : > { %1248 = vst.msk [vmem:[%s2663_s13 + $0x8] sm:$0xff] %vm1246_vm2, %v1237_v44  ;;  %v867_v59 = vpop.f32.mrf.mxu1  ;;  %v1147_v61 = vpop.f32.mrf.mxu0  ;;  %v1126_v62 = vadd.f32 %v1125_v21, %v1096_v57  ;;  %v1176_v44 = vrot.slane %v2652_v12, 7 }
 0x11d   : > { %v868_v1 = vadd.f32 %v867_v59, %v839_v53  ;;  %v1148_v2 = vadd.f32 %v1147_v61, %v1119_v55 }
 0x11f   : > { %v1197_v5 = vadd.f32 %v1189_v4, %v868_v1  ;;  %v1213_v7 = vrot.slane %v1148_v2, 1  ;;  %v1193_v1 = vsel %vm1186_vm0, 0.0, %v1176_v44 }
 0x121   : > { %v1230_v52 = vsel %vm1227_vm1, %v1213_v7, 0.0  ;;  %v1177_v7 = vrot.slane %v2656_v17, 7 }
 0x122   : > { %v1238_v10 = vadd.f32 %v1230_v52, %v1197_v5 }
 0x123   : > { %v1099_v11 = vpop.f32.mrf.mxu2  ;;  %v1128_v24 = vpop.f32.mrf.mxu3 }
 0x124   : > { %1249 = vst.msk [vmem:[%s2663_s13 + $0x10] sm:$0xff] %vm1246_vm2, %v1238_v10  ;;  %v869_v13 = vpop.f32.mrf.mxu1  ;;  %v1149_v14 = vpop.f32.mrf.mxu0  ;;  %v1129_v47 = vadd.f32 %v1128_v24, %v1099_v11  ;;  %v1194_v10 = vsel %vm1186_vm0, 0.0, %v1177_v7 }
 0x125   : > { %v870_v16 = vadd.f32 %v869_v13, %v841_v32  ;;  %v1150_v18 = vadd.f32 %v1149_v14, %v1121_v50 }
 0x127   : > { %v1198_v19 = vadd.f32 %v1190_v20, %v870_v16  ;;  %v1214_v23 = vrot.slane %v1150_v18, 1 }
 0x129   : > { %v1231_v58 = vsel %vm1227_vm1, %v1214_v23, 0.0 }
 0x12a   : > { %v1239_v26 = vadd.f32 %v1231_v58, %v1198_v19 }
 0x12b   : > { %v1101_v22 = vpop.f32.mrf.mxu2  ;;  %v1130_v53 = vpop.f32.mrf.mxu3 }
 0x12c   : > { %1250 = vst.msk [vmem:[%s2663_s13 + $0x18] sm:$0xff] %vm1246_vm2, %v1239_v26  ;;  %v872_v27 = vpop.f32.mrf.mxu1  ;;  %v1152_v29 = vpop.f32.mrf.mxu0  ;;  %v1131_v63 = vadd.f32 %v1130_v53, %v1101_v22 }
 0x12d   : > { %v873_v30 = vadd.f32 %v872_v27, %v844_v36  ;;  %v1153_v31 = vadd.f32 %v1152_v29, %v1124_v56 }
 0x12f   : > { %v1199_v34 = vadd.f32 %v1191_v33, %v873_v30  ;;  %v1215_v35 = vrot.slane %v1153_v31, 1 }
 0x131   : > { %v1232_v0 = vsel %vm1227_vm1, %v1215_v35, 0.0 }
 0x132   : > { %v1240_v38 = vadd.f32 %v1232_v0, %v1199_v34 }
 0x133   : > { %v1157_v39 = vpop.f32.mrf.mxu2 }
 0x134   : > { %1251 = vst.msk [vmem:[%s2663_s13 + $0x20] sm:$0xff] %vm1246_vm2, %v1240_v38  ;;  %v874_v40 = vpop.f32.mrf.mxu1  ;;  %v1154_v41 = vpop.f32.mrf.mxu0  ;;  %v1158_v28 = vadd.f32 %v1157_v39, %v1129_v47 }
 0x135   : > { %v875_v43 = vadd.f32 %v874_v40, %v846_v42  ;;  %v1155_v45 = vadd.f32 %v1154_v41, %v1126_v62 }
 0x136   : > { %v1217_v55 = vrot.slane %v1158_v28, 1 }
 0x137   : > { %v1200_v46 = vadd.f32 %v1192_v49, %v875_v43  ;;  %v1216_v51 = vrot.slane %v1155_v45, 1 }
 0x138   : > { %v1234_v4 = vsel %vm1227_vm1, %v1217_v55, 0.0 }
 0x139   : > { %v1233_v6 = vsel %vm1227_vm1, %v1216_v51, 0.0 }
 0x13a   : > { %v1241_v48 = vadd.f32 %v1233_v6, %v1200_v46 }
 0x13b   : > { %v1159_v59 = vpop.f32.mrf.mxu2 }
 0x13c   : > { %1252 = vst.msk [vmem:[%s2663_s13 + $0x28] sm:$0xff] %vm1246_vm2, %v1241_v48  ;;  %v877_v57 = vpop.f32.mrf.mxu1  ;;  %v1160_v12 = vadd.f32 %v1159_v59, %v1131_v63 }
 0x13d   : > { %v878_v61 = vadd.f32 %v877_v57, %v849_v3 }
 0x13e   : > { %v1218_v9 = vrot.slane %v1160_v12, 1 }
 0x13f   : > { %v1201_v2 = vadd.f32 %v1193_v1, %v878_v61 }
 0x140   : > { %v1235_v50 = vsel %vm1227_vm1, %v1218_v9, 0.0 }
 0x141   : > { %v1242_v5 = vadd.f32 %v1234_v4, %v1201_v2 }
 0x143   : > { %1253 = vst.msk [vmem:[%s2663_s13 + $0x30] sm:$0xff] %vm1246_vm2, %v1242_v5 }
 0x144   : > { %v879_v52 = vpop.f32.mrf.mxu1 }
 0x145   : > { %v880_v8 = vadd.f32 %v879_v52, %v851_v54 }
 0x147   : > { %v1202_v32 = vadd.f32 %v1194_v10, %v880_v8  ;;  %1258 = sbr.rel (%p2054_p7) target bundleno = 1001 (0x3e9), region = 48 }
 0x149   : > { %v1243_v11 = vadd.f32 %v1235_v50, %v1202_v32 }
 0x14b   : > { %1254 = vst.msk [vmem:[%s2663_s13 + $0x38] sm:$0xff] %vm1246_vm2, %v1243_v11 }
 0x14c   : > { %v1315_v60 = vld [vmem:[%s2975_s4 + $0x18] sm:$0xff]  ;;  %v1314_v15 = vld [vmem:[%s2975_s4 + $0x10] sm:$0xff]  ;;  %v1313_v14 = vld [vmem:[%s2975_s4 + $0x8] sm:$0xff]  ;;  %vm1565_vm6 = vcmask 257024  }
 0x14d   : > { %1331 = vmatpush.msra.mxu0 %v1315_v60  ;;  %1452 = vmatpush.msra.mxu2 %v1315_v60  ;;  %v1312_v25 = vld [vmem:[%s2975_s4] sm:$0xff]  ;;  %v1343_v42 = vld [vmem:[%s2976_s5 + $0x18] sm:$0xff]  ;;  %v1342_v62 = vld [vmem:[%s2976_s5 + $0x10] sm:$0xff] }
 0x14e   : > { %1359 = vmatpush.msra.mxu1 %v1343_v42  ;;  %1476 = vmatpush.msra.mxu3 %v1343_v42  ;;  %v1341_v8 = vld [vmem:[%s2976_s5 + $0x8] sm:$0xff]  ;;  %v1340_v10 = vld [vmem:[%s2976_s5] sm:$0xff] }
 0x14f   : > { %1332 = vmatpush.msra.mxu0 %v1314_v15  ;;  %1453 = vmatpush.msra.mxu2 %v1314_v15 }
 0x150   : > { %1360 = vmatpush.msra.mxu1 %v1342_v62  ;;  %1477 = vmatpush.msra.mxu3 %v1342_v62 }
 0x151   : > { %1333 = vmatpush.msra.mxu0 %v1313_v14  ;;  %1454 = vmatpush.msra.mxu2 %v1313_v14 }
 0x152   : > { %v2720_v17 = vld [vmem:[#allocation2] sm:$0xff]  ;;  %v2722_v13 = vld [vmem:[#allocation2 + $0x8] sm:$0xff]  ;;  %v2727_v16 = vld [vmem:[#allocation2 + $0x10] sm:$0xff]  ;;  %1361 = vmatpush.msra.mxu1 %v1341_v8  ;;  %1478 = vmatpush.msra.mxu3 %v1341_v8 }
 0x153   : > { %v2729_v18 = vld [vmem:[#allocation2 + $0x18] sm:$0xff]  ;;  %v1275_v20 = vsel %vm1246_vm2, %v2720_v17, 0.0  ;;  %v1276_v21 = vsel %vm1246_vm2, %v2722_v13, 0.0  ;;  %v2735_v19 = vld [vmem:[#allocation2 + $0x20] sm:$0xff]  ;;  %v1278_v58 = vsel %vm1246_vm2, %v2727_v16, 0.0  ;;  %v2744_v36 = vld [vmem:[#allocation2 + $0x28] sm:$0xff]  ;;  %1334 = vmatpush.msra.mxu0 %v1312_v25  ;;  %1455 = vmatpush.msra.mxu2 %v1312_v25 }
 0x154   : > { %v1277_v23 = vadd.f32 %v1276_v21, %v1275_v20  ;;  %v1280_v26 = vsel %vm1246_vm2, %v2729_v18, 0.0  ;;  %v1282_v22 = vsel %vm1246_vm2, %v2735_v19, 0.0  ;;  %v2748_v27 = vld [vmem:[#allocation2 + $0x30] sm:$0xff]  ;;  %v1284_v30 = vsel %vm1246_vm2, %v2744_v36, 0.0  ;;  %v2752_v31 = vld [vmem:[#allocation2 + $0x38] sm:$0xff]  ;;  %v2756_v35 = vld [vmem:[#allocation2 + $0x40] sm:$0xff]  ;;  %1362 = vmatpush.msra.mxu1 %v1340_v10  ;;  %1479 = vmatpush.msra.mxu3 %v1340_v10 }
 0x155   : > { %v1286_v34 = vsel %vm1246_vm2, %v2748_v27, 0.0  ;;  %v1288_v0 = vsel %vm1246_vm2, %v2752_v31, 0.0  ;;  %v2760_v37 = vld [vmem:[#allocation2 + $0x48] sm:$0xff]  ;;  %v1290_v39 = vsel %vm1246_vm2, %v2756_v35, 0.0  ;;  %v2770_v40 = vld [vmem:[#allocation2 + $0x50] sm:$0xff]  ;;  %v2774_v45 = vld [vmem:[#allocation2 + $0x58] sm:$0xff] }
 0x156   : > { %v1279_v56 = vadd.f32 %v1278_v58, %v1277_v23  ;;  %v1292_v43 = vsel %vm1246_vm2, %v2760_v37, 0.0  ;;  %v1294_v49 = vsel %vm1246_vm2, %v2770_v40, 0.0  ;;  %v2778_v46 = vld [vmem:[#allocation2 + $0x60] sm:$0xff]  ;;  %v1296_v28 = vsel %vm1246_vm2, %v2774_v45, 0.0  ;;  %v2782_v6 = vld [vmem:[#allocation2 + $0x68] sm:$0xff]  ;;  %v2786_v3 = vld [vmem:[#allocation2 + $0x70] sm:$0xff] }
 0x157   : > { %v1298_v48 = vsel %vm1246_vm2, %v2778_v46, 0.0  ;;  %v1300_v55 = vsel %vm1246_vm2, %v2782_v6, 0.0  ;;  %v2790_v57 = vld [vmem:[#allocation2 + $0x78] sm:$0xff]  ;;  %v1302_v61 = vsel %vm1246_vm2, %v2786_v3, 0.0 }
 0x158   : > { %v1281_v29 = vadd.f32 %v1280_v26, %v1279_v56  ;;  %v1304_v1 = vsel %vm1246_vm2, %v2790_v57, 0.0 }
 0x15a   : > { %v1283_v33 = vadd.f32 %v1282_v22, %v1281_v29 }
 0x15c   : > { %v1285_v24 = vadd.f32 %v1284_v30, %v1283_v33 }
 0x15e   : > { %v1287_v38 = vadd.f32 %v1286_v34, %v1285_v24 }
 0x160   : > { %v1289_v41 = vadd.f32 %v1288_v0, %v1287_v38 }
 0x162   : > { %v1291_v47 = vadd.f32 %v1290_v39, %v1289_v41 }
 0x164   : > { %v1293_v51 = vadd.f32 %v1292_v43, %v1291_v47 }
 0x166   : > { %v1295_v44 = vadd.f32 %v1294_v49, %v1293_v51 }
 0x168   : > { %v1297_v53 = vadd.f32 %v1296_v28, %v1295_v44 }
 0x16a   : > { %v1299_v59 = vadd.f32 %v1298_v48, %v1297_v53 }
 0x16c   : > { %v1301_v63 = vadd.f32 %v1300_v55, %v1299_v59 }
 0x16e   : > { %v1303_v2 = vadd.f32 %v1302_v61, %v1301_v63 }
 0x170   : > { %v1305_v4 = vadd.f32 %v1304_v1, %v1303_v2 }
 0x172   : > { %v1306_v12 = vrot.slane %v1305_v4, 4 }
 0x174   : > { %v1307_v5 = vadd.f32 %v1306_v12, %v1305_v4 }
 0x176   : > { %v1308_v7 = vrot.slane %v1307_v5, 2 }
 0x178   : > { %v1309_v54 = vadd.f32 %v1308_v7, %v1307_v5 }
 0x17a   : > { %v1310_v9 = vrot.slane %v1309_v54, 1 }
 0x17c   : > { %v1311_v52 = vadd.f32 %v1310_v9, %v1309_v54 }
 0x17e   : > { %2055 = vmatmul.msk.f32.vlgmr.msra.gmra.mxu0 %vm1246_vm2, %v1311_v52 }
 0x1fb   : > { %v1336_v32 = vpop.f32.mrf.mxu0 }
 0x1fc   : > { %v1339_v50 = vmul.f32 0.0078125, %v1336_v32 }
 0x1fe   : > { %2056 = vmatmul.msk.f32.vlgmr.msra.gmra.mxu1 %vm1246_vm2, %v1339_v50 }
 0x27b   : > { %v1364_v11 = vpop.f32.mrf.mxu1 }
 0x27c   : > { %v1367_v60 = vperm.slane %v1364_v11, 0 }
 0x27e   : > { %v2805_v15 = vsub.f32 %v2720_v17, %v1367_v60  ;;  %v2808_v14 = vsub.f32 %v2722_v13, %v1367_v60  ;;  %v2811_v20 = vsub.f32 %v2727_v16, %v1367_v60  ;;  %v2814_v21 = vsub.f32 %v2729_v18, %v1367_v60 }
 0x27f   : > { %v2821_v25 = vsub.f32 %v2735_v19, %v1367_v60  ;;  %v2826_v13 = vsub.f32 %v2744_v36, %v1367_v60  ;;  %v2833_v22 = vsub.f32 %v2748_v27, %v1367_v60  ;;  %v2839_v36 = vsub.f32 %v2752_v31, %v1367_v60 }
 0x280   : > { %v1384_v23 = vmul.f32 %v2805_v15, %v2805_v15  ;;  %v1385_v58 = vmul.f32 %v2808_v14, %v2808_v14  ;;  %v1386_v17 = vmul.f32 %v2811_v20, %v2811_v20  ;;  %v1387_v16 = vmul.f32 %v2814_v21, %v2814_v21 }
 0x281   : > { %v1388_v19 = vmul.f32 %v2821_v25, %v2821_v25  ;;  %v1389_v33 = vmul.f32 %v2826_v13, %v2826_v13  ;;  %v2845_v0 = vsub.f32 %v2756_v35, %v1367_v60  ;;  %v1390_v27 = vmul.f32 %v2833_v22, %v2833_v22 }
 0x282   : > { %v1400_v18 = vsel %vm1246_vm2, %v1384_v23, 0.0  ;;  %v1401_v26 = vsel %vm1246_vm2, %v1385_v58, 0.0  ;;  %v1403_v29 = vsel %vm1246_vm2, %v1386_v17, 0.0  ;;  %v1405_v34 = vsel %vm1246_vm2, %v1387_v16, 0.0 }
 0x283   : > { %v1402_v56 = vadd.f32 %v1401_v26, %v1400_v18  ;;  %v1407_v38 = vsel %vm1246_vm2, %v1388_v19, 0.0  ;;  %v2851_v62 = vsub.f32 %v2760_v37, %v1367_v60  ;;  %v1391_v31 = vmul.f32 %v2839_v36, %v2839_v36 }
 0x284   : > { %v1409_v39 = vsel %vm1246_vm2, %v1389_v33, 0.0  ;;  %v2857_v43 = vsub.f32 %v2770_v40, %v1367_v60  ;;  %v1392_v35 = vmul.f32 %v2845_v0, %v2845_v0  ;;  %v1411_v47 = vsel %vm1246_vm2, %v1390_v27, 0.0 }
 0x285   : > { %v1404_v30 = vadd.f32 %v1403_v29, %v1402_v56  ;;  %v2863_v51 = vsub.f32 %v2774_v45, %v1367_v60  ;;  %v1393_v37 = vmul.f32 %v2851_v62, %v2851_v62  ;;  %v1413_v28 = vsel %vm1246_vm2, %v1391_v31, 0.0 }
 0x286   : > { %v2869_v48 = vsub.f32 %v2778_v46, %v1367_v60  ;;  %v1394_v40 = vmul.f32 %v2857_v43, %v2857_v43  ;;  %v1415_v53 = vsel %vm1246_vm2, %v1392_v35, 0.0  ;;  %v2875_v59 = vsub.f32 %v2782_v6, %v1367_v60 }
 0x287   : > { %v1406_v24 = vadd.f32 %v1405_v34, %v1404_v30  ;;  %v1395_v45 = vmul.f32 %v2863_v51, %v2863_v51  ;;  %v1417_v61 = vsel %vm1246_vm2, %v1393_v37, 0.0  ;;  %v2881_v1 = vsub.f32 %v2786_v3, %v1367_v60  ;;  %v2231_v37 = vld [vmem:[%s2974_s3] ss:$0 sm:$0xff] }
 0x288   : > { %v1396_v46 = vmul.f32 %v2869_v48, %v2869_v48  ;;  %v1419_v2 = vsel %vm1246_vm2, %v1394_v40, 0.0  ;;  %v2887_v12 = vsub.f32 %v2790_v57, %v1367_v60  ;;  %v1397_v6 = vmul.f32 %v2875_v59, %v2875_v59 }
 0x289   : > { %v1408_v42 = vadd.f32 %v1407_v38, %v1406_v24  ;;  %v1421_v5 = vsel %vm1246_vm2, %v1395_v45, 0.0  ;;  %v1398_v54 = vmul.f32 %v2881_v1, %v2881_v1 }
 0x28a   : > { %v1423_v3 = vsel %vm1246_vm2, %v1396_v46, 0.0  ;;  %v1399_v52 = vmul.f32 %v2887_v12, %v2887_v12  ;;  %v1425_v8 = vsel %vm1246_vm2, %v1397_v6, 0.0 }
 0x28b   : > { %v1410_v41 = vadd.f32 %v1409_v39, %v1408_v42  ;;  %v1427_v57 = vsel %vm1246_vm2, %v1398_v54, 0.0  ;;  %v1494_v42 = vld [vmem:[%s2973_s2] sm:$0x1] }
 0x28c   : > { %v1429_v50 = vsel %vm1246_vm2, %v1399_v52, 0.0 }
 0x28d   : > { %v1412_v49 = vadd.f32 %v1411_v47, %v1410_v41 }
 0x28f   : > { %v1414_v44 = vadd.f32 %v1413_v28, %v1412_v49 }
 0x291   : > { %v1416_v55 = vadd.f32 %v1415_v53, %v1414_v44 }
 0x293   : > { %v1418_v63 = vadd.f32 %v1417_v61, %v1416_v55 }
 0x295   : > { %v1420_v4 = vadd.f32 %v1419_v2, %v1418_v63 }
 0x297   : > { %v1422_v7 = vadd.f32 %v1421_v5, %v1420_v4 }
 0x299   : > { %v1424_v9 = vadd.f32 %v1423_v3, %v1422_v7 }
 0x29b   : > { %v1426_v10 = vadd.f32 %v1425_v8, %v1424_v9 }
 0x29d   : > { %v1428_v32 = vadd.f32 %v1427_v57, %v1426_v10 }
 0x29f   : > { %v1430_v11 = vadd.f32 %v1429_v50, %v1428_v32 }
 0x2a1   : > { %v1431_v60 = vrot.slane %v1430_v11, 4 }
 0x2a3   : > { %v1432_v23 = vadd.f32 %v1431_v60, %v1430_v11 }
 0x2a5   : > { %v1433_v58 = vrot.slane %v1432_v23, 2 }
 0x2a7   : > { %v1434_v17 = vadd.f32 %v1433_v58, %v1432_v23 }
 0x2a9   : > { %v1435_v16 = vrot.slane %v1434_v17, 1 }
 0x2ab   : > { %v1436_v18 = vadd.f32 %v1435_v16, %v1434_v17 }
 0x2ad   : > { %2057 = vmatmul.msk.f32.vlgmr.msra.gmra.mxu2 %vm1246_vm2, %v1436_v18 }
 0x330   : > { %v1457_v26 = vpop.f32.mrf.mxu2 }
 0x331   : > { %v1460_v56 = vmul.f32 0.0078125, %v1457_v26 }
 0x333   : > { %2058 = vmatmul.msk.f32.vlgmr.msra.gmra.mxu3 %vm1246_vm2, %v1460_v56 }
 0x3b6   : > { %v1481_v19 = vpop.f32.mrf.mxu3 }
 0x3b7   : > { %v1482_v29 = vadd.f32 1e-05, %v1481_v19 }
 0x3b9   : > { %2232 = vrsqrt.f32 %v1482_v29  ;;  %vm1490_vm4 = vweird.f32 %v1482_v29 }
 0x3bf   : > { %v2233_v30 = vpop.eup %2232 }
 0x3c0   : > { %v1485_v33 = vmul.f32 %v2233_v30, %v1482_v29  ;;  %vm1491_vm3 = vweird.f32 %v2233_v30 }
 0x3c1   : > { %vm1492_vm5 = vmor %vm1490_vm4, %vm1491_vm3 }
 0x3c2   : > { %v1486_v34 = vmul.f32 %v2233_v30, %v1485_v33 }
 0x3c4   : > { %v1487_v24 = vmul.f32 0.5, %v1486_v34 }
 0x3c6   : > { %v1488_v27 = vsub.f32 1.5, %v1487_v24 }
 0x3c8   : > { %v1489_v38 = vmul.f32 %v2233_v30, %v1488_v27 }
 0x3ca   : > { %v1493_v31 = vsel %vm1492_vm5, %v2233_v30, %v1489_v38 }
 0x3cb   : > { %v1495_v39 = vmul.f32 %v1494_v42, %v1493_v31 }
 0x3cd   : > { %v1496_v41 = vperm.slane %v1495_v39, 0 }
 0x3cf   : > { %v1497_v35 = vmul.f32 %v1496_v41, %v2805_v15  ;;  %v1498_v47 = vmul.f32 %v1496_v41, %v2808_v14  ;;  %v1499_v49 = vmul.f32 %v1496_v41, %v2811_v20  ;;  %v1500_v28 = vmul.f32 %v1496_v41, %v2814_v21 }
 0x3d0   : > { %v1501_v44 = vmul.f32 %v1496_v41, %v2821_v25  ;;  %v1502_v40 = vmul.f32 %v1496_v41, %v2826_v13  ;;  %v1503_v53 = vmul.f32 %v1496_v41, %v2833_v22  ;;  %v1504_v15 = vmul.f32 %v1496_v41, %v2839_v36 }
 0x3d1   : > { %v1517_v55 = vadd.f32 %v2231_v37, %v1497_v35  ;;  %v1518_v45 = vadd.f32 %v2231_v37, %v1498_v47  ;;  %v1519_v61 = vadd.f32 %v2231_v37, %v1499_v49  ;;  %v1520_v14 = vadd.f32 %v2231_v37, %v1500_v28 }
 0x3d2   : > { %v1505_v20 = vmul.f32 %v1496_v41, %v2845_v0  ;;  %v1521_v63 = vadd.f32 %v2231_v37, %v1501_v44  ;;  %v1506_v46 = vmul.f32 %v1496_v41, %v2851_v62  ;;  %v1507_v2 = vmul.f32 %v1496_v41, %v2857_v43 }
 0x3d3   : > { %v1522_v21 = vadd.f32 %v2231_v37, %v1502_v40  ;;  %v1523_v4 = vadd.f32 %v2231_v37, %v1503_v53  ;;  %v1533_v25 = vmax.f32 %v1517_v55, 0.0  ;;  %v1534_v6 = vmax.f32 %v1518_v45, 0.0 }
 0x3d4   : > { %v1535_v13 = vmax.f32 %v1519_v61, 0.0  ;;  %v1508_v22 = vmul.f32 %v1496_v41, %v2863_v51  ;;  %v1524_v5 = vadd.f32 %v2231_v37, %v1504_v15  ;;  %v1536_v7 = vmax.f32 %v1520_v14, 0.0 }
 0x3d5   : > { %v1509_v36 = vmul.f32 %v1496_v41, %v2869_v48  ;;  %v1510_v54 = vmul.f32 %v1496_v41, %v2875_v59  ;;  %v1525_v0 = vadd.f32 %v2231_v37, %v1505_v20  ;;  %v1537_v3 = vmax.f32 %v1521_v63, 0.0 }
 0x3d6   : > { %v1511_v62 = vmul.f32 %v1496_v41, %v2881_v1  ;;  %v1526_v43 = vadd.f32 %v2231_v37, %v1506_v46  ;;  %v1527_v9 = vadd.f32 %v2231_v37, %v1507_v2  ;;  %v1538_v52 = vmax.f32 %v1522_v21, 0.0 }
 0x3d7   : > { %v1539_v8 = vmax.f32 %v1523_v4, 0.0  ;;  %v1549_v10 = vpack.c.bf16 %v1533_v25, %v1533_v25  ;;  %v1550_v57 = vpack.c.bf16 %v1534_v6, %v1534_v6  ;;  %v1551_v51 = vpack.c.bf16 %v1535_v13, %v1535_v13 }
 0x3d8   : > { %v1512_v32 = vmul.f32 %v1496_v41, %v2887_v12  ;;  %v1528_v50 = vadd.f32 %v2231_v37, %v1508_v22  ;;  %v1540_v48 = vmax.f32 %v1524_v5, 0.0  ;;  %v1552_v11 = vpack.c.bf16 %v1536_v7, %v1536_v7 }
 0x3d9   : > { %v1529_v59 = vadd.f32 %v2231_v37, %v1509_v36  ;;  %v1541_v60 = vmax.f32 %v1525_v0, 0.0  ;;  %v1553_v23 = vpack.c.bf16 %v1537_v3, %v1537_v3  ;;  %1566 = vst.msk [vmem:[%s2364_s19] sm:$0xf] %vm1565_vm6, %v1549_v10  ;;  %v1530_v1 = vadd.f32 %v2231_v37, %v1510_v54 }
 0x3da   : > { %v1542_v58 = vmax.f32 %v1526_v43, 0.0  ;;  %v1554_v17 = vpack.c.bf16 %v1538_v52, %v1538_v52  ;;  %1567 = vst.msk [vmem:[%s2364_s19 + $0x4] sm:$0xf] %vm1565_vm6, %v1550_v57  ;;  %v1531_v16 = vadd.f32 %v2231_v37, %v1511_v62  ;;  %v1543_v18 = vmax.f32 %v1527_v9, 0.0 }
 0x3db   : > { %v1555_v12 = vpack.c.bf16 %v1539_v8, %v1539_v8  ;;  %1568 = vst.msk [vmem:[%s2364_s19 + $0x8] sm:$0xf] %vm1565_vm6, %v1551_v51  ;;  %v1532_v26 = vadd.f32 %v2231_v37, %v1512_v32  ;;  %v1544_v56 = vmax.f32 %v1528_v50, 0.0  ;;  %v1556_v19 = vpack.c.bf16 %v1540_v48, %v1540_v48 }
 0x3dc   : > { %1569 = vst.msk [vmem:[%s2364_s19 + $0xc] sm:$0xf] %vm1565_vm6, %v1552_v11  ;;  %v1545_v29 = vmax.f32 %v1529_v59, 0.0  ;;  %v1557_v30 = vpack.c.bf16 %v1541_v60, %v1541_v60  ;;  %v1546_v33 = vmax.f32 %v1530_v1, 0.0  ;;  %v1558_v34 = vpack.c.bf16 %v1542_v58, %v1542_v58 }
 0x3dd   : > { %1570 = vst.msk [vmem:[%s2364_s19 + $0x10] sm:$0xf] %vm1565_vm6, %v1553_v23  ;;  %v1547_v24 = vmax.f32 %v1531_v16, 0.0  ;;  %v1559_v27 = vpack.c.bf16 %v1543_v18, %v1543_v18  ;;  %v1548_v38 = vmax.f32 %v1532_v26, 0.0  ;;  %v1560_v42 = vpack.c.bf16 %v1544_v56, %v1544_v56 }
 0x3de   : > { %1571 = vst.msk [vmem:[%s2364_s19 + $0x14] sm:$0xf] %vm1565_vm6, %v1554_v17  ;;  %v1561_v31 = vpack.c.bf16 %v1545_v29, %v1545_v29  ;;  %v1562_v39 = vpack.c.bf16 %v1546_v33, %v1546_v33 }
 0x3df   : > { %1572 = vst.msk [vmem:[%s2364_s19 + $0x18] sm:$0xf] %vm1565_vm6, %v1555_v12  ;;  %v1563_v41 = vpack.c.bf16 %v1547_v24, %v1547_v24  ;;  %v1564_v35 = vpack.c.bf16 %v1548_v38, %v1548_v38 }
 0x3e0   : > { %1573 = vst.msk [vmem:[%s2364_s19 + $0x1c] sm:$0xf] %vm1565_vm6, %v1556_v19 }
 0x3e1   : > { %1574 = vst.msk [vmem:[%s2364_s19 + $0x20] sm:$0xf] %vm1565_vm6, %v1557_v30 }
 0x3e2   : > { %1575 = vst.msk [vmem:[%s2364_s19 + $0x24] sm:$0xf] %vm1565_vm6, %v1558_v34 }
 0x3e3   : > { %1576 = vst.msk [vmem:[%s2364_s19 + $0x28] sm:$0xf] %vm1565_vm6, %v1559_v27 }
 0x3e4   : > { %1577 = vst.msk [vmem:[%s2364_s19 + $0x2c] sm:$0xf] %vm1565_vm6, %v1560_v42 }
 0x3e5   : > { %1578 = vst.msk [vmem:[%s2364_s19 + $0x30] sm:$0xf] %vm1565_vm6, %v1561_v31 }
 0x3e6   : > { %1579 = vst.msk [vmem:[%s2364_s19 + $0x34] sm:$0xf] %vm1565_vm6, %v1562_v39 }
 0x3e7   : > { %1580 = vst.msk [vmem:[%s2364_s19 + $0x38] sm:$0xf] %vm1565_vm6, %v1563_v41 }
 0x3e8   : > { %1581 = vst.msk [vmem:[%s2364_s19 + $0x3c] sm:$0xf] %vm1565_vm6, %v1564_v35 }
 0x3e9 PF: > { %s16_s25 = sadd.s32 1, %s2272_s25   ;;  %s2978_s21 = smov %s2264_s23 }
 0x3ea   : > { %p13_p8 = scmp.ge.s32.totalorder %s16_s25, 6   ;;  %s2979_s22 = smov %s2268_s24 }
 0x3eb   : > { %s2980_s23 = smov %s2983_s26  ;;  %s2981_s24 = smov %s2987_s27 }
 0x3ec   :  { %15 = sbr.rel (!%p13_p8) target bundleno = 3 (0x3), region = 81 }

// kernel: sfe_forward.11
= control target key start
LH: loop header
LB: loop body
LE: loop exit
PB: predicated region body
PF: predicated region fallthrough
CT: control target
= control target key end

     0   :  { %s2918_s27 = smov 0   ;;  %s2920_s28 = smov 0   ;;  %s3748_s0 = inlined_call_operand.vmem [shape: bf16[2,2,8,8,128], index: 0, kind: input, shape index: {}]   ;;  %s3749_s1 = inlined_call_operand.vmem [shape: bf16[2,2,8,8,32], index: 1, kind: input, shape index: {}]   ;;  %s3750_s2 = inlined_call_operand.vmem [shape: bf16[3,384,32], index: 2, kind: input, shape index: {}]   ;;  %s3751_s3 = inlined_call_operand.vmem [shape: bf16[3,96,32], index: 3, kind: input, shape index: {}]   ;;  %s3752_s4 = inlined_call_operand.vmem [shape: f32[1,32], index: 4, kind: input, shape index: {}]   ;;  %s3753_s5 = inlined_call_operand.vmem [shape: f32[1,32], index: 5, kind: input, shape index: {}]   ;;  %s3754_s6 = inlined_call_operand.vmem [shape: f32[32,32], index: 6, kind: input, shape index: {}]   ;;  %s3755_s7 = inlined_call_operand.vmem [shape: f32[32,32], index: 7, kind: input, shape index: {}]   ;;  %s3756_s8 = inlined_call_operand.vmem [shape: bf16[2,128,32], index: 8, kind: output, shape index: {}]  }
   0x1   :  { %s2922_s29 = smov 0   ;;  %s2924_s30 = smov 0  }
   0x2   :  { %s2926_s9 = smov 0  }
   0x3 LB: > { %s27_s10 = sadd.s32 1, %s2860_s29  ;;  %s30_s11 = sadd.s32 1, %s2864_s30  ;;  %s2868_s9 = sphi %s2926_s9, %s18_s9   ;;  %s2864_s30 = sphi %s2924_s30, %s3760_s30   ;;  %s2860_s29 = sphi %s2922_s29, %s3759_s29   ;;  %s2856_s28 = sphi %s2920_s28, %s3758_s28   ;;  %s2852_s27 = sphi %s2918_s27, %s3757_s27  }
   0x4   : > { %p28_p0 = scmp.ge.s32.totalorder %s27_s10, 2  ;;  %p2144_p1 = scmp.ge.s32.totalorder %s2868_s9, 1 }
   0x5   : > { %p296_p2 = scmp.lt.s32.totalorder %s2868_s9, 5 }
   0x6   : > { %s3762_s10 = smov (%p28_p0, %s27_s10), 0  ;;  %s3764_s11 = smov (!%p28_p0, %s30_s11), %s2864_s30 }
   0x7   : > { %p297_p3 = pnand %p2144_p1, %p296_p2  ;;  %p32_p4 = scmp.ge.s32.totalorder %s3764_s11, 2 }
   0x8   : > { %p343_p5 = scmp.lt.s32.totalorder (!%p297_p3), %s2856_s28, 1  ;;  %p345_p6 = scmp.lt.s32.totalorder (!%p297_p3), %s2852_s27, 1 }
   0x9   : > { %s3766_s11 = smov (%p32_p4, %s3764_s11), 0  ;;  %300 = sbr.rel (%p297_p3) target bundleno = 1146 (0x47a), region = 52 }
   0xa   : > { %s2870_s24 = smov (!%p297_p3), 32   ;;  %s2871_s25 = smov (!%p297_p3), 64  }
   0xb   : > { %p2646_p7 = scmp.ne.s32.totalorder (!%p297_p3), %s2852_s27, 1 }
   0xe   : > { %s3768_s28 = smov (!%p343_p5, %s2856_s28), 1  ;;  %v2669_v14 = vld [vmem:[%s3750_s2 + $0x78] sm:$0xff]  ;;  %v2668_v17 = vld [vmem:[%s3750_s2 + $0x70] sm:$0xff]  ;;  %v2683_v22 = vld [vmem:[%s3751_s3 + $0x28] sm:$0xff]  ;;  %v2872_v48 = vmov 0   ;;  %vm458_vm0 = vcmask 261120  }
   0xf   : > { %s346_s12 = scalar_select %p345_p6, %s2852_s27, 1  ;;  %v2677_v15 = vld [vmem:[%s3750_s2 + $0xb8] sm:$0xff]  ;;  %849 = vmatpush.bf16.msra.mxu2 %v2669_v14  ;;  %v2676_v18 = vld [vmem:[%s3750_s2 + $0xb0] sm:$0xff]  ;;  %v2667_v23 = vld [vmem:[%s3750_s2 + $0x68] sm:$0xff]  ;;  %631 = vmatpush.bf16.msra.mxu0 %v2683_v22  ;;  %v3082_v49 = vunpack.c.l.b16 %v2872_v48  ;;  %vm483_vm1 = vcmask 523264   ;;  %vm616_vm2 = vcmask 785408  }
  0x10   : > { %s2146_s13 = sshll.u32 %s3768_s28, 4  ;;  %s2653_s14 = sshll.u32 %s3768_s28, 6  ;;  %v2661_v16 = vld [vmem:[%s3750_s2 + $0x38] sm:$0xff]  ;;  %878 = vmatpush.bf16.msra.mxu3 %v2677_v15  ;;  %v2660_v19 = vld [vmem:[%s3750_s2 + $0x30] sm:$0xff]  ;;  %v2675_v24 = vld [vmem:[%s3750_s2 + $0xa8] sm:$0xff]  ;;  %vm1647_vm3 = vcmask 1040384  }
  0x11   : > { %s2145_s15 = sshll.u32 %s346_s12, 3  ;;  %s2955_s18 = scalar_lea.vmem %s3756_s8, %s2653_s14  ;;  %820 = vmatpush.bf16.msra.mxu1 %v2661_v16  ;;  %v2659_v25 = vld [vmem:[%s3750_s2 + $0x28] sm:$0xff]  ;;  %v2682_v26 = vld [vmem:[%s3751_s3 + $0x20] sm:$0xff]  ;;  %v2681_v33 = vld [vmem:[%s3751_s3 + $0x18] sm:$0xff]  ;;  %v441_v51 = vpack.c.b16 %v3082_v49, %v3082_v49  ;;  %vm1688_vm4 = vcmask 1046528  }
  0x12   : > { %s2957_s19 = sadd.s32 %s2146_s13, %s2145_s15  ;;  %v2666_v29 = vld [vmem:[%s3750_s2 + $0x60] sm:$0xff]  ;;  %v2665_v36 = vld [vmem:[%s3750_s2 + $0x58] sm:$0xff]  ;;  %v2664_v41 = vld [vmem:[%s3750_s2 + $0x50] sm:$0xff] }
  0x13   : > { %s2147_s20 = sshll.u32 %s2957_s19, 2  ;;  %850 = vmatpush.bf16.msra.mxu2 %v2668_v17  ;;  %v2674_v30 = vld [vmem:[%s3750_s2 + $0xa0] sm:$0xff]  ;;  %632 = vmatpush.bf16.msra.mxu0 %v2682_v26  ;;  %v2673_v37 = vld [vmem:[%s3750_s2 + $0x98] sm:$0xff]  ;;  %v2672_v42 = vld [vmem:[%s3750_s2 + $0x90] sm:$0xff] }
  0x14   : > { %s2965_s23 = scalar_lea.vmem %s3749_s1, %s2147_s20  ;;  %879 = vmatpush.bf16.msra.mxu3 %v2676_v18  ;;  %v2658_v32 = vld [vmem:[%s3750_s2 + $0x20] sm:$0xff]  ;;  %v2657_v39 = vld [vmem:[%s3750_s2 + $0x18] sm:$0xff]  ;;  %v2656_v43 = vld [vmem:[%s3750_s2 + $0x10] sm:$0xff]  ;;  %s3096_s22 = scalar_lea.vmem %s3748_s0, %s2147_s20 }
  0x15   : > { %v2968_v0 = vld [vmem:[%s2965_s23] sm:$0xf]  ;;  %v2971_v1 = vld [vmem:[%s2965_s23 + $0x4] sm:$0xf]  ;;  %v2974_v2 = vld [vmem:[%s2965_s23 + $0x8] sm:$0xf]  ;;  %821 = vmatpush.bf16.msra.mxu1 %v2660_v19 }
  0x16   : > { %v409_v3 = vunpack.c.l.b16 %v2968_v0  ;;  %v410_v4 = vunpack.c.l.b16 %v2971_v1  ;;  %v411_v5 = vunpack.c.l.b16 %v2974_v2  ;;  %v2982_v9 = vld [vmem:[%s2965_s23 + $0xc] sm:$0xf]  ;;  %v2987_v11 = vld [vmem:[%s2965_s23 + $0x10] sm:$0xf]  ;;  %v3012_v21 = vld [vmem:[%s2965_s23 + $0x14] sm:$0xf] }
  0x17   : > { %v412_v10 = vunpack.c.l.b16 %v2982_v9  ;;  %v413_v13 = vunpack.c.l.b16 %v2987_v11  ;;  %v414_v27 = vunpack.c.l.b16 %v3012_v21  ;;  %v3033_v28 = vld [vmem:[%s2965_s23 + $0x18] sm:$0xf]  ;;  %851 = vmatpush.bf16.msra.mxu2 %v2667_v23  ;;  %v400_v35 = vld [vmem:[%s2965_s23 + $0x1c] sm:$0xf]  ;;  %633 = vmatpush.bf16.msra.mxu0 %v2681_v33  ;;  %v2663_v45 = vld [vmem:[%s3750_s2 + $0x48] sm:$0xff] }
  0x18   : > { %v417_v6 = vpack.c.b16 %v409_v3, %v409_v3  ;;  %v418_v7 = vpack.c.b16 %v410_v4, %v410_v4  ;;  %v419_v8 = vpack.c.b16 %v411_v5, %v411_v5  ;;  %880 = vmatpush.bf16.msra.mxu3 %v2675_v24  ;;  %v415_v31 = vunpack.c.l.b16 %v3033_v28  ;;  %v2671_v46 = vld [vmem:[%s3750_s2 + $0x88] sm:$0xff]  ;;  %v2662_v50 = vld [vmem:[%s3750_s2 + $0x40] sm:$0xff]  ;;  %v2680_v54 = vld [vmem:[%s3751_s3 + $0x10] sm:$0xff] }
  0x19   : > { %v420_v12 = vpack.c.b16 %v412_v10, %v412_v10  ;;  %v421_v20 = vpack.c.b16 %v413_v13, %v413_v13  ;;  %822 = vmatpush.bf16.msra.mxu1 %v2659_v25  ;;  %v422_v34 = vpack.c.b16 %v414_v27, %v414_v27  ;;  %v416_v40 = vunpack.c.l.b16 %v400_v35  ;;  %v2655_v47 = vld [vmem:[%s3750_s2 + $0x8] sm:$0xff]  ;;  %v2670_v52 = vld [vmem:[%s3750_s2 + $0x80] sm:$0xff]  ;;  %v2699_v61 = vld [vmem:[%s3750_s2 + $0x138] sm:$0xff] }
  0x1a   : > { %425 = vrot.lane.b32.xlu0 %v417_v6, %s2870_s24  ;;  %442 = vrot.lane.b32.xlu1 %v418_v7, %s2871_s25  ;;  %v423_v38 = vpack.c.b16 %v415_v31, %v415_v31  ;;  %v3102_v53 = vld [vmem:[%s3096_s22] sm:$0xff]   ;;  %v2679_v58 = vld [vmem:[%s3751_s3 + $0x8] sm:$0xff] }
  0x1b   : > { %429 = vrot.lane.b32.xlu2 %v419_v8, %s2870_s24  ;;  %852 = vmatpush.bf16.msra.mxu2 %v2666_v29  ;;  %v424_v44 = vpack.c.b16 %v416_v40, %v416_v40  ;;  %v2654_v55 = vld [vmem:[%s3750_s2] sm:$0xff]  ;;  %v2746_v57 = vunpack.c.l.b16 %v3102_v53  ;;  %v2707_v62 = vld [vmem:[%s3750_s2 + $0x178] sm:$0xff]  ;;  %v3139_v4 = vld [vmem:[%s3096_s22 + $0x8] sm:$0xff]  }
  0x1c   : > { %881 = vmatpush.bf16.msra.mxu3 %v2674_v30  ;;  %v3112_v56 = vld [vmem:[%s3096_s22 + $0x4] sm:$0xff]   ;;  %634 = vmatpush.bf16.msra.mxu0 %v2680_v54  ;;  %v2713_v63 = vld [vmem:[%s3751_s3 + $0x58] sm:$0xff]  ;;  %v2698_v5 = vld [vmem:[%s3750_s2 + $0x130] sm:$0xff] }
  0x1d   : > { %823 = vmatpush.bf16.msra.mxu1 %v2658_v32  ;;  %v3120_v59 = vpack.c.b16 %v2746_v57, %v3082_v49  ;;  %v2678_v60 = vld [vmem:[%s3751_s3] sm:$0xff]  ;;  %v2691_v3 = vld [vmem:[%s3750_s2 + $0xf8] sm:$0xff]  ;;  %v3145_v6 = vld [vmem:[%s3096_s22 + $0xc] sm:$0xff]  }
  0x1e   : > { %v2712_v10 = vld [vmem:[%s3751_s3 + $0x50] sm:$0xff]  ;;  %v2705_v13 = vld [vmem:[%s3750_s2 + $0x168] sm:$0xff]  ;;  %v2696_v15 = vld [vmem:[%s3750_s2 + $0x120] sm:$0xff] }
  0x1f   : > { %853 = vmatpush.bf16.msra.mxu2 %v2665_v36  ;;  %v2689_v14 = vld [vmem:[%s3750_s2 + $0xe8] sm:$0xff]  ;;  %v3172_v18 = vld [vmem:[%s3096_s22 + $0x10] sm:$0xff]   ;;  %v2688_v23 = vld [vmem:[%s3750_s2 + $0xe0] sm:$0xff] }
  0x20   : > { %882 = vmatpush.bf16.msra.mxu3 %v2673_v37  ;;  %635 = vmatpush.bf16.msra.mxu0 %v2679_v58  ;;  %v2711_v19 = vld [vmem:[%s3751_s3 + $0x48] sm:$0xff]  ;;  %v3181_v22 = vld [vmem:[%s3096_s22 + $0x14] sm:$0xff]   ;;  %v2710_v37 = vld [vmem:[%s3751_s3 + $0x40] sm:$0xff] }
  0x21   : > { %824 = vmatpush.bf16.msra.mxu1 %v2657_v39  ;;  %v2695_v24 = vld [vmem:[%s3750_s2 + $0x118] sm:$0xff]  ;;  %v2694_v40 = vld [vmem:[%s3750_s2 + $0x110] sm:$0xff]  ;;  %v2685_v58 = vld [vmem:[%s3750_s2 + $0xc8] sm:$0xff] }
  0x22   : > { %427 = vrot.lane.b32.xlu0 %v418_v7, %s2870_s24  ;;  %444 = vrot.lane.b32.xlu1 %v419_v8, %s2871_s25  ;;  %v2706_v7 = vld [vmem:[%s3750_s2 + $0x170] sm:$0xff]  ;;  %v2703_v25 = vld [vmem:[%s3750_s2 + $0x158] sm:$0xff] }
  0x23   : > { %431 = vrot.lane.b32.xlu2 %v420_v12, %s2870_s24  ;;  %854 = vmatpush.bf16.msra.mxu2 %v2664_v41  ;;  %v2690_v8 = vld [vmem:[%s3750_s2 + $0xf0] sm:$0xff]  ;;  %v3211_v39 = vld [vmem:[%s3096_s22 + $0x18] sm:$0xff]  }
  0x24   : > { %883 = vmatpush.bf16.msra.mxu3 %v2672_v42  ;;  %636 = vmatpush.bf16.msra.mxu0 %v2678_v60  ;;  %v2759_v41 = vunpack.c.h.b16 %v3211_v39  ;;  %v2702_v42 = vld [vmem:[%s3750_s2 + $0x150] sm:$0xff]  ;;  %v2692_v60 = vld [vmem:[%s3750_s2 + $0x100] sm:$0xff] }
  0x25   : > { %825 = vmatpush.bf16.msra.mxu1 %v2656_v43  ;;  %v2686_v43 = vld [vmem:[%s3750_s2 + $0xd0] sm:$0xff] }
  0x27   : > { %855 = vmatpush.bf16.msra.mxu2 %v2663_v45  ;;  %v2709_v45 = vld [vmem:[%s3751_s3 + $0x38] sm:$0xff] }
  0x28   : > { %884 = vmatpush.bf16.msra.mxu3 %v2671_v46  ;;  %1007 = vmatpush.bf16.msrb.mxu0 %v2713_v63  ;;  %v2693_v46 = vld [vmem:[%s3750_s2 + $0x108] sm:$0xff]  ;;  %v2708_v63 = vld [vmem:[%s3751_s3 + $0x30] sm:$0xff] }
  0x29   : > { %826 = vmatpush.bf16.msra.mxu1 %v2655_v47 }
  0x2a   : > { %448 = vrot.lane.b32.xlu1 %v421_v20, %s2871_s25  ;;  %446 = vrot.lane.b32.xlu0 %v420_v12, %s2871_s25  ;;  %v2697_v12 = vld [vmem:[%s3750_s2 + $0x128] sm:$0xff] }
  0x2b   : > { %433 = vrot.lane.b32.xlu2 %v421_v20, %s2870_s24  ;;  %856 = vmatpush.bf16.msra.mxu2 %v2662_v50  ;;  %v2704_v20 = vld [vmem:[%s3750_s2 + $0x160] sm:$0xff] }
  0x2c   : > { %885 = vmatpush.bf16.msra.mxu3 %v2670_v52  ;;  %1008 = vmatpush.bf16.msrb.mxu0 %v2712_v10 }
  0x2d   : > { %827 = vmatpush.bf16.msra.mxu1 %v2654_v55 }
  0x2e   : > { %857 = vmatmul.bf16.vlgmr.msra.gmra.mxu2 %v3102_v53 }
  0x2f   : > { %886 = vmatmul.bf16.vlgmr.msra.gmra.mxu3 %v3112_v56  ;;  %1207 = vmatpush.bf16.msrb.mxu2 %v2699_v61 }
  0x30   : > { %828 = vmatmul.bf16.vlgmr.msra.gmra.mxu1 %v3120_v59  ;;  %1236 = vmatpush.bf16.msrb.mxu3 %v2707_v62  ;;  %v2700_v62 = vld [vmem:[%s3750_s2 + $0x140] sm:$0xff] }
  0x31   : > { %1178 = vmatpush.bf16.msrb.mxu1 %v2691_v3  ;;  %1009 = vmatpush.bf16.msrb.mxu0 %v2711_v19  ;;  %v2684_v3 = vld [vmem:[%s3750_s2 + $0xc0] sm:$0xff] }
  0x32   : > { %435 = vrot.lane.b32.xlu0 %v422_v34, %s2870_s24  ;;  %450 = vrot.lane.b32.xlu1 %v422_v34, %s2871_s25 }
  0x33   : > { %452 = vrot.lane.b32.xlu2 %v423_v38, %s2871_s25  ;;  %1208 = vmatpush.bf16.msrb.mxu2 %v2698_v5  ;;  %v2729_v5 = vld [vmem:[%s3750_s2 + $0x1f8] sm:$0xff] }
  0x34   : > { %1237 = vmatpush.bf16.msrb.mxu3 %v2706_v7  ;;  %v2737_v7 = vld [vmem:[%s3750_s2 + $0x238] sm:$0xff] }
  0x35   : > { %1179 = vmatpush.bf16.msrb.mxu1 %v2690_v8  ;;  %1010 = vmatpush.bf16.msrb.mxu0 %v2710_v37 }
  0x37   : > { %1209 = vmatpush.bf16.msrb.mxu2 %v2697_v12 }
  0x38   : > { %1238 = vmatpush.bf16.msrb.mxu3 %v2705_v13 }
  0x39   : > { %1180 = vmatpush.bf16.msrb.mxu1 %v2689_v14  ;;  %1011 = vmatpush.bf16.msrb.mxu0 %v2709_v45  ;;  %v2725_v45 = vld [vmem:[%s3750_s2 + $0x1d8] sm:$0xff] }
  0x3a   : > { %437 = vrot.lane.b32.xlu0 %v423_v38, %s2870_s24  ;;  %439 = vrot.lane.b32.xlu1 %v424_v44, %s2870_s24  ;;  %v2687_v38 = vld [vmem:[%s3750_s2 + $0xd8] sm:$0xff]  ;;  %s2645_s24 = sshll.u32 %s2852_s27, 6 }
  0x3b   : > { %454 = vrot.lane.b32.xlu2 %v424_v44, %s2871_s25  ;;  %1210 = vmatpush.bf16.msrb.mxu2 %v2696_v15  ;;  %v3224_v44 = vpack.c.b16 %v3082_v49, %v2759_v41  ;;  %v2701_v49 = vld [vmem:[%s3750_s2 + $0x148] sm:$0xff]  ;;  %v2741_v41 = vld [vmem:[%s3751_s3 + $0x78] sm:$0xff]  ;;  %s3458_s21 = scalar_lea.vmem [#allocation2], %s2645_s24 }
  0x3c   : > { %1239 = vmatpush.bf16.msrb.mxu3 %v2704_v20  ;;  %v2721_v20 = vld [vmem:[%s3750_s2 + $0x1b8] sm:$0xff] }
  0x3d   : > { %1181 = vmatpush.bf16.msrb.mxu1 %v2688_v23  ;;  %1012 = vmatpush.bf16.msrb.mxu0 %v2708_v63  ;;  %v2728_v23 = vld [vmem:[%s3750_s2 + $0x1f0] sm:$0xff] }
  0x3e   : > { %862 = vmatmul.bf16.gmra.mxu2 %v3139_v4 }
  0x3f   : > { %891 = vmatmul.bf16.gmra.mxu3 %v3145_v6  ;;  %1211 = vmatpush.bf16.msrb.mxu2 %v2695_v24 }
  0x40   : > { %833 = vmatmul.bf16.gmra.mxu1 %v3112_v56  ;;  %1240 = vmatpush.bf16.msrb.mxu3 %v2703_v25  ;;  %v2736_v25 = vld [vmem:[%s3750_s2 + $0x230] sm:$0xff] }
  0x41   : > { %1182 = vmatpush.bf16.msrb.mxu1 %v2687_v38 }
  0x42   : > { %456 = vrot.lane.b32.xlu0 %v441_v51, %s2871_s25 }
  0x43   : > { %1212 = vmatpush.bf16.msrb.mxu2 %v2694_v40  ;;  %v2726_v40 = vld [vmem:[%s3750_s2 + $0x1e0] sm:$0xff] }
  0x44   : > { %1241 = vmatpush.bf16.msrb.mxu3 %v2702_v42  ;;  %v2734_v42 = vld [vmem:[%s3750_s2 + $0x220] sm:$0xff] }
  0x45   : > { %1183 = vmatpush.bf16.msrb.mxu1 %v2686_v43  ;;  %v2718_v43 = vld [vmem:[%s3750_s2 + $0x1a0] sm:$0xff] }
  0x47   : > { %1213 = vmatpush.bf16.msrb.mxu2 %v2693_v46  ;;  %v2733_v46 = vld [vmem:[%s3750_s2 + $0x218] sm:$0xff] }
  0x48   : > { %1242 = vmatpush.bf16.msrb.mxu3 %v2701_v49  ;;  %v2716_v49 = vld [vmem:[%s3750_s2 + $0x190] sm:$0xff] }
  0x49   : > { %1184 = vmatpush.bf16.msrb.mxu1 %v2685_v58  ;;  %v2730_v58 = vld [vmem:[%s3750_s2 + $0x200] sm:$0xff] }
  0x4b   : > { %1214 = vmatpush.bf16.msrb.mxu2 %v2692_v60  ;;  %v2738_v60 = vld [vmem:[%s3751_s3 + $0x60] sm:$0xff] }
  0x4c   : > { %1243 = vmatpush.bf16.msrb.mxu3 %v2700_v62 }
  0x4d   : > { %1185 = vmatpush.bf16.msrb.mxu1 %v2684_v3 }
  0x4e   : > { %867 = vmatmul.bf16.gmra.mxu2 %v3172_v18 }
  0x4f   : > { %896 = vmatmul.bf16.gmra.mxu3 %v3181_v22  ;;  %1565 = vmatpush.bf16.msra.mxu2 %v2729_v5 }
  0x50   : > { %838 = vmatmul.bf16.gmra.mxu1 %v3145_v6  ;;  %1594 = vmatpush.bf16.msra.mxu3 %v2737_v7 }
  0x51   : > { %1536 = vmatpush.bf16.msra.mxu1 %v2721_v20 }
  0x53   : > { %1566 = vmatpush.bf16.msra.mxu2 %v2728_v23 }
  0x54   : > { %1595 = vmatpush.bf16.msra.mxu3 %v2736_v25 }
  0x5e   : > { %872 = vmatmul.bf16.gmra.mxu2 %v3211_v39 }
  0x5f   : > { %901 = vmatmul.bf16.gmra.mxu3 %v3224_v44 }
  0x60   : > { %843 = vmatmul.bf16.gmra.mxu1 %v3181_v22 }
  0x6e   : > { %1215 = vmatmul.bf16.vlgmr.msrb.gmra.mxu2 %v3102_v53 }
  0x6f   : > { %1244 = vmatmul.bf16.vlgmr.msrb.gmra.mxu3 %v3112_v56 }
  0x70   : > { %1186 = vmatmul.bf16.vlgmr.msrb.gmra.mxu1 %v3120_v59 }
  0x75   : > { %v430_v27 = vpop.permute.xlu2 %429 }
  0x76   : > { %v467_v47 = vsel %vm458_vm0, %v2971_v1, %v430_v27  ;;  %v2742_v27 = vld [vmem:[%s3751_s3 + $0x80] sm:$0xff] }
  0x7e   : > { %1220 = vmatmul.bf16.gmra.mxu2 %v3139_v4 }
  0x7f   : > { %1249 = vmatmul.bf16.gmra.mxu3 %v3145_v6 }
  0x80   : > { %1191 = vmatmul.bf16.gmra.mxu1 %v3112_v56 }
  0x8c   : > { %v426_v16 = vpop.permute.xlu0 %425  ;;  %v443_v17 = vpop.permute.xlu1 %442 }
  0x8d   : > { %v461_v26 = vsel %vm458_vm0, 0, %v426_v16 }
  0x8e   : > { %v485_v29 = vsel %vm483_vm1, %v461_v26, %v443_v17  ;;  %v2720_v26 = vld [vmem:[%s3750_s2 + $0x1b0] sm:$0xff]  ;;  %1225 = vmatmul.bf16.gmra.mxu2 %v3172_v18 }
  0x8f   : > { %v568_v34 = vunpack.c.l.b16 %v485_v29  ;;  %v2727_v29 = vld [vmem:[%s3750_s2 + $0x1e8] sm:$0xff]  ;;  %1537 = vmatpush.bf16.msra.mxu1 %v2720_v26  ;;  %1254 = vmatmul.bf16.gmra.mxu3 %v3181_v22 }
  0x90   : > { %1567 = vmatpush.bf16.msra.mxu2 %v2727_v29  ;;  %1196 = vmatmul.bf16.gmra.mxu1 %v3145_v6 }
  0x94   : > { %v428_v30 = vpop.permute.xlu0 %427  ;;  %v445_v31 = vpop.permute.xlu1 %444  ;;  %1568 = vmatpush.bf16.msra.mxu2 %v2726_v40 }
  0x95   : > { %v464_v32 = vsel %vm458_vm0, %v2968_v0, %v428_v30  ;;  %v432_v0 = vpop.permute.xlu2 %431 }
  0x96   : > { %v487_v33 = vsel %vm483_vm1, %v464_v32, %v445_v31  ;;  %v470_v48 = vsel %vm458_vm0, %v2974_v2, %v432_v0  ;;  %v2719_v0 = vld [vmem:[%s3750_s2 + $0x1a8] sm:$0xff] }
  0x97   : > { %v569_v35 = vunpack.c.l.b16 %v487_v33  ;;  %1538 = vmatpush.bf16.msra.mxu1 %v2719_v0 }
  0x98   : > { %1569 = vmatpush.bf16.msra.mxu2 %v2725_v45 }
  0x99   : > { %v3200_v36 = vpack.c.b16 %v569_v35, %v568_v34  ;;  %v2735_v34 = vld [vmem:[%s3750_s2 + $0x228] sm:$0xff] }
  0x9a   : > { %1596 = vmatpush.bf16.msra.mxu3 %v2735_v34 }
  0x9b   : > { %2177 = vmatmul.msk.bf16.vlgmr.msra.gmra.mxu0 %vm616_vm2, %v3200_v36  ;;  %1539 = vmatpush.bf16.msra.mxu1 %v2718_v43 }
  0x9c   : > { %v449_v50 = vpop.permute.xlu1 %448  ;;  %v447_v51 = vpop.permute.xlu0 %446 }
  0x9d   : > { %v491_v52 = vsel %vm483_vm1, %v470_v48, %v449_v50  ;;  %v489_v54 = vsel %vm483_vm1, %v467_v47, %v447_v51  ;;  %v434_v55 = vpop.permute.xlu2 %433  ;;  %v2740_v47 = vld [vmem:[%s3751_s3 + $0x70] sm:$0xff]  ;;  %v2717_v48 = vld [vmem:[%s3750_s2 + $0x198] sm:$0xff] }
  0x9e   : > { %v571_v1 = vunpack.c.l.b16 %v491_v52  ;;  %v570_v2 = vunpack.c.l.b16 %v489_v54  ;;  %v473_v8 = vsel %vm458_vm0, %v2982_v9, %v434_v55  ;;  %1597 = vmatpush.bf16.msra.mxu3 %v2734_v42  ;;  %v2724_v50 = vld [vmem:[%s3750_s2 + $0x1d0] sm:$0xff]  ;;  %v2739_v52 = vld [vmem:[%s3751_s3 + $0x68] sm:$0xff]  ;;  %1230 = vmatmul.bf16.gmra.mxu2 %v3211_v39  ;;  %v2722_v55 = vld [vmem:[%s3750_s2 + $0x1c0] sm:$0xff] }
  0x9f   : > { %v2732_v51 = vld [vmem:[%s3750_s2 + $0x210] sm:$0xff]  ;;  %1540 = vmatpush.bf16.msra.mxu1 %v2717_v48  ;;  %1570 = vmatpush.bf16.msra.mxu2 %v2724_v50  ;;  %v2723_v54 = vld [vmem:[%s3750_s2 + $0x1c8] sm:$0xff] }
  0xa0   : > { %v3244_v57 = vpack.c.b16 %v571_v1, %v570_v2  ;;  %v2731_v1 = vld [vmem:[%s3750_s2 + $0x208] sm:$0xff]  ;;  %1259 = vmatmul.bf16.gmra.mxu3 %v3224_v44  ;;  %1201 = vmatmul.bf16.gmra.mxu1 %v3181_v22 }
  0xa1   : > { %v2715_v2 = vld [vmem:[%s3750_s2 + $0x188] sm:$0xff] }
  0xa2   : > { %1598 = vmatpush.bf16.msra.mxu3 %v2733_v46 }
  0xa3   : > { %1541 = vmatpush.bf16.msra.mxu1 %v2716_v49  ;;  %1571 = vmatpush.bf16.msra.mxu2 %v2723_v54 }
  0xa4   : > { %v436_v61 = vpop.permute.xlu0 %435  ;;  %v451_v13 = vpop.permute.xlu1 %450 }
  0xa5   : > { %v476_v10 = vsel %vm458_vm0, %v2987_v11, %v436_v61  ;;  %v453_v12 = vpop.permute.xlu2 %452  ;;  %v493_v15 = vsel %vm483_vm1, %v473_v8, %v451_v13  ;;  %v2743_v11 = vld [vmem:[%s3751_s3 + $0x88] sm:$0xff]  ;;  %v2714_v61 = vld [vmem:[%s3750_s2 + $0x180] sm:$0xff] }
  0xa6   : > { %v495_v14 = vsel %vm483_vm1, %v476_v10, %v453_v12  ;;  %v572_v17 = vunpack.c.l.b16 %v493_v15  ;;  %1365 = vmatpush.bf16.msra.mxu0 %v2743_v11  ;;  %1599 = vmatpush.bf16.msra.mxu3 %v2732_v51 }
  0xa7   : > { %v573_v16 = vunpack.c.l.b16 %v495_v14  ;;  %1542 = vmatpush.bf16.msra.mxu1 %v2715_v2  ;;  %1572 = vmatpush.bf16.msra.mxu2 %v2722_v55 }
  0xa9   : > { %v3278_v9 = vpack.c.b16 %v573_v16, %v572_v17 }
  0xaa   : > { %1366 = vmatpush.bf16.msra.mxu0 %v2742_v27  ;;  %1600 = vmatpush.bf16.msra.mxu3 %v2731_v1 }
  0xab   : > { %2178 = vmatmul.msk.bf16.gmra.mxu0 %vm616_vm2, %v3244_v57  ;;  %1543 = vmatpush.bf16.msra.mxu1 %v2714_v61 }
  0xac   : > { %v438_v19 = vpop.permute.xlu0 %437  ;;  %v440_v24 = vpop.permute.xlu1 %439 }
  0xad   : > { %v479_v30 = vsel %vm458_vm0, %v3012_v21, %v438_v19  ;;  %v482_v31 = vsel %vm458_vm0, %v3033_v28, %v440_v24  ;;  %v455_v32 = vpop.permute.xlu2 %454  ;;  %v829_v62 = vpop.f32.mrf.mxu1 }
  0xae   : > { %v497_v35 = vsel %vm483_vm1, %v479_v30, %v455_v32  ;;  %1367 = vmatpush.bf16.msra.mxu0 %v2741_v41  ;;  %1601 = vmatpush.bf16.msra.mxu3 %v2730_v58 }
  0xaf   : > { %v574_v21 = vunpack.c.l.b16 %v497_v35  ;;  %1573 = vmatmul.bf16.vlgmr.msra.gmra.mxu2 %v3102_v53 }
  0xb0   : > { %1544 = vmatmul.bf16.vlgmr.msra.gmra.mxu1 %v3120_v59 }
  0xb1   : > { %1602 = vmatmul.bf16.vlgmr.msra.gmra.mxu3 %v3112_v56  ;;  %v858_v63 = vpop.f32.mrf.mxu2 }
  0xb2   : > { %1368 = vmatpush.bf16.msra.mxu0 %v2740_v47  ;;  %v887_v3 = vpop.f32.mrf.mxu3 }
  0xb4   : > { %v457_v33 = vpop.permute.xlu0 %456 }
  0xb5   : > { %v499_v37 = vsel %vm483_vm1, %v482_v31, %v457_v33  ;;  %v831_v5 = vpop.f32.mrf.mxu1 }
  0xb6   : > { %v575_v28 = vunpack.c.l.b16 %v499_v37  ;;  %1369 = vmatpush.bf16.msra.mxu0 %v2739_v52 }
  0xb8   : > { %v3315_v38 = vpack.c.b16 %v575_v28, %v574_v21 }
  0xb9   : > { %v860_v7 = vpop.f32.mrf.mxu2 }
  0xba   : > { %1370 = vmatpush.bf16.msra.mxu0 %v2738_v60  ;;  %v889_v8 = vpop.f32.mrf.mxu3 }
  0xbb   : > { %2179 = vmatmul.msk.bf16.gmra.mxu0 %vm616_vm2, %v3278_v9 }
  0xbd   : > { %v834_v10 = vpop.f32.mrf.mxu1 }
  0xbf   : > { %1578 = vmatmul.bf16.gmra.mxu2 %v3139_v4 }
  0xc0   : > { %1549 = vmatmul.bf16.gmra.mxu1 %v3112_v56 }
  0xc1   : > { %1607 = vmatmul.bf16.gmra.mxu3 %v3145_v6  ;;  %v863_v53 = vpop.f32.mrf.mxu2 }
  0xc2   : > { %v892_v12 = vpop.f32.mrf.mxu3 }
  0xc5   : > { %v836_v13 = vpop.f32.mrf.mxu1 }
  0xc9   : > { %v865_v14 = vpop.f32.mrf.mxu2 }
  0xca   : > { %v894_v59 = vpop.f32.mrf.mxu3 }
  0xcb   : > { %2180 = vmatmul.msk.bf16.gmra.mxu0 %vm616_vm2, %v3315_v38 }
  0xcd   : > { %v839_v15 = vpop.f32.mrf.mxu1 }
  0xcf   : > { %1583 = vmatmul.bf16.gmra.mxu2 %v3172_v18 }
  0xd0   : > { %1554 = vmatmul.bf16.gmra.mxu1 %v3145_v6 }
  0xd1   : > { %1612 = vmatmul.bf16.gmra.mxu3 %v3181_v22  ;;  %v868_v4 = vpop.f32.mrf.mxu2 }
  0xd2   : > { %v897_v16 = vpop.f32.mrf.mxu3 }
  0xd5   : > { %v841_v56 = vpop.f32.mrf.mxu1 }
  0xd9   : > { %v870_v23 = vpop.f32.mrf.mxu2 }
  0xda   : > { %v899_v18 = vpop.f32.mrf.mxu3 }
  0xdb   : > { %2361 = vmatmul.msk.bf16.vlgmr.msrb.gmra.mxu0 %vm616_vm2, %v3200_v36 }
  0xdd   : > { %v844_v27 = vpop.f32.mrf.mxu1 }
  0xdf   : > { %1588 = vmatmul.bf16.gmra.mxu2 %v3211_v39 }
  0xe0   : > { %1559 = vmatmul.bf16.gmra.mxu1 %v3181_v22 }
  0xe1   : > { %1617 = vmatmul.bf16.gmra.mxu3 %v3224_v44  ;;  %v873_v30 = vpop.f32.mrf.mxu2 }
  0xe2   : > { %v902_v32 = vpop.f32.mrf.mxu3 }
  0xe5   : > { %v846_v34 = vpop.f32.mrf.mxu1 }
  0xe9   : > { %v875_v37 = vpop.f32.mrf.mxu2 }
  0xea   : > { %v904_v21 = vpop.f32.mrf.mxu3 }
  0xeb   : > { %2362 = vmatmul.msk.bf16.gmra.mxu0 %vm616_vm2, %v3244_v57 }
  0xed   : > { %v1187_v40 = vpop.f32.mrf.mxu1 }
  0xf1   : > { %v1216_v42 = vpop.f32.mrf.mxu2 }
  0xf5   : > { %v1189_v48 = vpop.f32.mrf.mxu1 }
  0xf9   : > { %v1218_v51 = vpop.f32.mrf.mxu2 }
  0xfb   : > { %2363 = vmatmul.msk.bf16.gmra.mxu0 %vm616_vm2, %v3278_v9 }
 0x101   : > { %v1221_v58 = vpop.f32.mrf.mxu2 }
 0x10b   : > { %2364 = vmatmul.msk.bf16.gmra.mxu0 %vm616_vm2, %v3315_v38 }
 0x118   : > { %v638_v17 = vpop.f32.mrf.mxu0 }
 0x119   : > { %v830_v19 = vadd.f32 %v829_v62, %v638_v17 }
 0x11b   : > { %v859_v11 = vadd.f32 %v858_v63, %v830_v19  ;;  %2545 = vmatmul.msk.bf16.vlgmr.msra.gmra.mxu0 %vm616_vm2, %v3200_v36 }
 0x11d   : > { %v888_v20 = vadd.f32 %v887_v3, %v859_v11 }
 0x120   : > { %v640_v24 = vpop.f32.mrf.mxu0 }
 0x121   : > { %v832_v25 = vadd.f32 %v831_v5, %v640_v24 }
 0x123   : > { %v861_v26 = vadd.f32 %v860_v7, %v832_v25 }
 0x125   : > { %v890_v6 = vadd.f32 %v889_v8, %v861_v26  ;;  %v1631_v8 = vrot.slane %v888_v20, 7 }
 0x128   : > { %v643_v29 = vpop.f32.mrf.mxu0 }
 0x129   : > { %v835_v31 = vadd.f32 %v834_v10, %v643_v29  ;;  %v1223_v10 = vpop.f32.mrf.mxu2 }
 0x12b   : > { %v864_v36 = vadd.f32 %v863_v53, %v835_v31  ;;  %2546 = vmatmul.msk.bf16.gmra.mxu0 %vm616_vm2, %v3244_v57  ;;  %v1245_v57 = vpop.f32.mrf.mxu3 }
 0x12d   : > { %v3409_v33 = vadd.f32 %v892_v12, %v864_v36 }
 0x12f   : > { %v1633_v25 = vrot.slane %v3409_v33, 7 }
 0x130   : > { %v645_v39 = vpop.f32.mrf.mxu0 }
 0x131   : > { %v837_v35 = vadd.f32 %v836_v13, %v645_v39  ;;  %v1226_v19 = vpop.f32.mrf.mxu2 }
 0x133   : > { %v866_v44 = vadd.f32 %v865_v14, %v837_v35  ;;  %v1247_v52 = vpop.f32.mrf.mxu3 }
 0x135   : > { %v3411_v28 = vadd.f32 %v894_v59, %v866_v44 }
 0x138   : > { %v648_v22 = vpop.f32.mrf.mxu0 }
 0x139   : > { %v840_v0 = vadd.f32 %v839_v15, %v648_v22  ;;  %v1228_v31 = vpop.f32.mrf.mxu2 }
 0x13b   : > { %v869_v41 = vadd.f32 %v868_v4, %v840_v0  ;;  %2547 = vmatmul.msk.bf16.gmra.mxu0 %vm616_vm2, %v3278_v9  ;;  %v1192_v9 = vpop.f32.mrf.mxu1  ;;  %v1250_v61 = vpop.f32.mrf.mxu3  ;;  %v1632_v4 = vrot.slane %v890_v6, 7 }
 0x13d   : > { %v3415_v43 = vadd.f32 %v897_v16, %v869_v41 }
 0x13f   : > { %v1635_v41 = vrot.slane %v3415_v43, 7 }
 0x140   : > { %v650_v45 = vpop.f32.mrf.mxu0 }
 0x141   : > { %v842_v46 = vadd.f32 %v841_v56, %v650_v45  ;;  %v1649_v56 = vsel %vm1647_vm3, 0.0, %v1632_v4  ;;  %v1231_v0 = vpop.f32.mrf.mxu2 }
 0x143   : > { %v871_v47 = vadd.f32 %v870_v23, %v842_v46  ;;  %v1194_v5 = vpop.f32.mrf.mxu1  ;;  %v1252_v12 = vpop.f32.mrf.mxu3  ;;  %v1652_v46 = vsel %vm1647_vm3, 0.0, %v1635_v41 }
 0x145   : > { %v3417_v50 = vadd.f32 %v899_v18, %v871_v47 }
 0x148   : > { %v653_v49 = vpop.f32.mrf.mxu0 }
 0x149   : > { %v845_v54 = vadd.f32 %v844_v27, %v653_v49  ;;  %v1636_v49 = vrot.slane %v3417_v50, 7 }
 0x14b   : > { %v874_v1 = vadd.f32 %v873_v30, %v845_v54  ;;  %2548 = vmatmul.msk.bf16.gmra.mxu0 %vm616_vm2, %v3315_v38  ;;  %v1648_v38 = vsel %vm1647_vm3, 0.0, %v1631_v8  ;;  %v1197_v16 = vpop.f32.mrf.mxu1  ;;  %v1255_v23 = vpop.f32.mrf.mxu3  ;;  %v1650_v30 = vsel %vm1647_vm3, 0.0, %v1633_v25 }
 0x14d   : > { %v3421_v2 = vadd.f32 %v902_v32, %v874_v1 }
 0x150   : > { %v655_v55 = vpop.f32.mrf.mxu0 }
 0x151   : > { %v847_v60 = vadd.f32 %v846_v34, %v655_v55  ;;  %v1634_v34 = vrot.slane %v3411_v28, 7  ;;  %v1653_v55 = vsel %vm1647_vm3, 0.0, %v1636_v49 }
 0x153   : > { %v876_v62 = vadd.f32 %v875_v37, %v847_v60  ;;  %v1199_v27 = vpop.f32.mrf.mxu1  ;;  %v1257_v36 = vpop.f32.mrf.mxu3  ;;  %v1651_v44 = vsel %vm1647_vm3, 0.0, %v1634_v34 }
 0x155   : > { %v3423_v63 = vadd.f32 %v904_v21, %v876_v62 }
 0x158   : > { %v1014_v3 = vpop.f32.mrf.mxu0 }
 0x159   : > { %v1188_v7 = vadd.f32 %v1187_v40, %v1014_v3 }
 0x15b   : > { %v1217_v53 = vadd.f32 %v1216_v42, %v1188_v7  ;;  %v1202_v21 = vpop.f32.mrf.mxu1  ;;  %v1260_v42 = vpop.f32.mrf.mxu3 }
 0x15d   : > { %v1246_v13 = vadd.f32 %v1245_v57, %v1217_v53 }
 0x15f   : > { %v3426_v14 = vadd.f32 %v1648_v38, %v1246_v13  ;;  %v1638_v13 = vrot.slane %v3423_v63, 7 }
 0x160   : > { %v1016_v59 = vpop.f32.mrf.mxu0 }
 0x161   : > { %v1190_v15 = vadd.f32 %v1189_v48, %v1016_v59  ;;  %v1655_v4 = vsel %vm1647_vm3, 0.0, %v1638_v13 }
 0x163   : > { %v1219_v17 = vadd.f32 %v1218_v51, %v1190_v15  ;;  %v1204_v48 = vpop.f32.mrf.mxu1  ;;  %v1262_v1 = vpop.f32.mrf.mxu3 }
 0x165   : > { %v1248_v11 = vadd.f32 %v1247_v52, %v1219_v17  ;;  %v1233_v52 = vpop.f32.mrf.mxu2 }
 0x167   : > { %v3429_v20 = vadd.f32 %v1649_v56, %v1248_v11 }
 0x168   : > { %v1019_v24 = vpop.f32.mrf.mxu0 }
 0x169   : > { %v1193_v18 = vadd.f32 %v1192_v9, %v1019_v24 }
 0x16b   : > { %v1222_v26 = vadd.f32 %v1221_v58, %v1193_v18  ;;  %v1545_v62 = vpop.f32.mrf.mxu1 }
 0x16d   : > { %v1251_v29 = vadd.f32 %v1250_v61, %v1222_v26  ;;  %v1637_v61 = vrot.slane %v3421_v2, 7 }
 0x16f   : > { %v3433_v6 = vadd.f32 %v1650_v30, %v1251_v29  ;;  %v1654_v8 = vsel %vm1647_vm3, 0.0, %v1637_v61 }
 0x170   : > { %v1021_v32 = vpop.f32.mrf.mxu0 }
 0x171   : > { %v1195_v39 = vadd.f32 %v1194_v5, %v1021_v32  ;;  %v1574_v5 = vpop.f32.mrf.mxu2 }
 0x173   : > { %v1224_v35 = vadd.f32 %v1223_v10, %v1195_v39  ;;  %v1603_v10 = vpop.f32.mrf.mxu3  ;;  %v1547_v59 = vpop.f32.mrf.mxu1 }
 0x175   : > { %v1253_v37 = vadd.f32 %v1252_v12, %v1224_v35 }
 0x177   : > { %v3437_v22 = vadd.f32 %v1651_v44, %v1253_v37 }
 0x178   : > { %v1024_v33 = vpop.f32.mrf.mxu0 }
 0x179   : > { %v1198_v40 = vadd.f32 %v1197_v16, %v1024_v33  ;;  %v1576_v2 = vpop.f32.mrf.mxu2 }
 0x17b   : > { %v1227_v57 = vadd.f32 %v1226_v19, %v1198_v40  ;;  %v1605_v19 = vpop.f32.mrf.mxu3  ;;  %v1550_v24 = vpop.f32.mrf.mxu1 }
 0x17d   : > { %v1256_v45 = vadd.f32 %v1255_v23, %v1227_v57 }
 0x17f   : > { %v3441_v47 = vadd.f32 %v1652_v46, %v1256_v45 }
 0x180   : > { %v1026_v28 = vpop.f32.mrf.mxu0 }
 0x181   : > { %v1200_v51 = vadd.f32 %v1199_v27, %v1026_v28  ;;  %v1579_v26 = vpop.f32.mrf.mxu2 }
 0x183   : > { %v1229_v54 = vadd.f32 %v1228_v31, %v1200_v51  ;;  %v1608_v30 = vpop.f32.mrf.mxu3  ;;  %v1552_v34 = vpop.f32.mrf.mxu1 }
 0x185   : > { %v1258_v9 = vadd.f32 %v1257_v36, %v1229_v54 }
 0x187   : > { %v3445_v58 = vadd.f32 %v1653_v55, %v1258_v9 }
 0x188   : > { %v1029_v43 = vpop.f32.mrf.mxu0 }
 0x189   : > { %v1203_v60 = vadd.f32 %v1202_v21, %v1029_v43  ;;  %v1581_v21 = vpop.f32.mrf.mxu2 }
 0x18b   : > { %v1232_v3 = vadd.f32 %v1231_v0, %v1203_v60  ;;  %v1610_v33 = vpop.f32.mrf.mxu3  ;;  %v1555_v46 = vpop.f32.mrf.mxu1 }
 0x18d   : > { %v1261_v7 = vadd.f32 %v1260_v42, %v1232_v3 }
 0x18f   : > { %v3449_v50 = vadd.f32 %v1654_v8, %v1261_v7 }
 0x190   : > { %v1031_v53 = vpop.f32.mrf.mxu0 }
 0x191   : > { %v1205_v12 = vadd.f32 %v1204_v48, %v1031_v53  ;;  %v1584_v48 = vpop.f32.mrf.mxu2 }
 0x193   : > { %v1234_v38 = vadd.f32 %v1233_v52, %v1205_v12  ;;  %v1613_v51 = vpop.f32.mrf.mxu3  ;;  %v1557_v43 = vpop.f32.mrf.mxu1 }
 0x195   : > { %v1263_v15 = vadd.f32 %v1262_v1, %v1234_v38 }
 0x197   : > { %v3453_v16 = vadd.f32 %v1655_v4, %v1263_v15 }
 0x198   : > { %v1372_v17 = vpop.f32.mrf.mxu0 }
 0x199   : > { %v1546_v11 = vadd.f32 %v1545_v62, %v1372_v17  ;;  %v1586_v60 = vpop.f32.mrf.mxu2 }
 0x19b   : > { %v1575_v56 = vadd.f32 %v1574_v5, %v1546_v11  ;;  %v1615_v62 = vpop.f32.mrf.mxu3 }
 0x19d   : > { %v1604_v23 = vadd.f32 %v1603_v10, %v1575_v56 }
 0x19f   : > { %v1672_v18 = vrot.slane %v1604_v23, 1 }
 0x1a0   : > { %v1374_v25 = vpop.f32.mrf.mxu0 }
 0x1a1   : > { %v1689_v63 = vsel %vm1688_vm4, %v1672_v18, 0.0  ;;  %v1548_v27 = vadd.f32 %v1547_v59, %v1374_v25  ;;  %v1589_v13 = vpop.f32.mrf.mxu2 }
 0x1a2   : > { %v1697_v29 = vadd.f32 %v1689_v63, %v3426_v14 }
 0x1a3   : > { %v1577_v31 = vadd.f32 %v1576_v2, %v1548_v27  ;;  %v1618_v2 = vpop.f32.mrf.mxu3 }
 0x1a4   : > { %1707 = vst.msk [vmem:[%s3458_s21] sm:$0xff] %vm458_vm0, %v1697_v29 }
 0x1a5   : > { %v1606_v32 = vadd.f32 %v1605_v19, %v1577_v31 }
 0x1a7   : > { %v1673_v36 = vrot.slane %v1606_v32, 1 }
 0x1a8   : > { %v1377_v39 = vpop.f32.mrf.mxu0 }
 0x1a9   : > { %v1690_v35 = vsel %vm1688_vm4, %v1673_v36, 0.0  ;;  %v1551_v37 = vadd.f32 %v1550_v24, %v1377_v39  ;;  %v1591_v25 = vpop.f32.mrf.mxu2 }
 0x1aa   : > { %v1698_v44 = vadd.f32 %v1690_v35, %v3429_v20 }
 0x1ab   : > { %v1580_v14 = vadd.f32 %v1579_v26, %v1551_v37  ;;  %v1620_v63 = vpop.f32.mrf.mxu3 }
 0x1ac   : > { %1708 = vst.msk [vmem:[%s3458_s21 + $0x8] sm:$0xff] %vm458_vm0, %v1698_v44 }
 0x1ad   : > { %v1609_v0 = vadd.f32 %v1608_v30, %v1580_v14 }
 0x1af   : > { %v1674_v40 = vrot.slane %v1609_v0, 1 }
 0x1b0   : > { %v1379_v41 = vpop.f32.mrf.mxu0 }
 0x1b1   : > { %v1691_v42 = vsel %vm1688_vm4, %v1674_v40, 0.0  ;;  %v1553_v57 = vadd.f32 %v1552_v34, %v1379_v41 }
 0x1b2   : > { %v1699_v45 = vadd.f32 %v1691_v42, %v3433_v6 }
 0x1b3   : > { %v1582_v28 = vadd.f32 %v1581_v21, %v1553_v57 }
 0x1b4   : > { %1709 = vst.msk [vmem:[%s3458_s21 + $0x10] sm:$0xff] %vm458_vm0, %v1699_v45 }
 0x1b5   : > { %v1611_v20 = vadd.f32 %v1610_v33, %v1582_v28 }
 0x1b7   : > { %v1675_v49 = vrot.slane %v1611_v20, 1 }
 0x1b8   : > { %v1382_v52 = vpop.f32.mrf.mxu0 }
 0x1b9   : > { %v1692_v54 = vsel %vm1688_vm4, %v1675_v49, 0.0  ;;  %v1556_v1 = vadd.f32 %v1555_v46, %v1382_v52 }
 0x1ba   : > { %v1700_v9 = vadd.f32 %v1692_v54, %v3437_v22  ;;  %v1560_v22 = vpop.f32.mrf.mxu1 }
 0x1bb   : > { %v1585_v55 = vadd.f32 %v1584_v48, %v1556_v1 }
 0x1bc   : > { %1710 = vst.msk [vmem:[%s3458_s21 + $0x18] sm:$0xff] %vm458_vm0, %v1700_v9 }
 0x1bd   : > { %v1614_v6 = vadd.f32 %v1613_v51, %v1585_v55 }
 0x1bf   : > { %v1676_v61 = vrot.slane %v1614_v6, 1 }
 0x1c0   : > { %v1384_v3 = vpop.f32.mrf.mxu0 }
 0x1c1   : > { %v1693_v5 = vsel %vm1688_vm4, %v1676_v61, 0.0  ;;  %v1558_v7 = vadd.f32 %v1557_v43, %v1384_v3 }
 0x1c2   : > { %v1701_v8 = vadd.f32 %v1693_v5, %v3441_v47  ;;  %v1562_v11 = vpop.f32.mrf.mxu1 }
 0x1c3   : > { %v1587_v10 = vadd.f32 %v1586_v60, %v1558_v7 }
 0x1c4   : > { %1711 = vst.msk [vmem:[%s3458_s21 + $0x20] sm:$0xff] %vm458_vm0, %v1701_v8 }
 0x1c5   : > { %v1616_v53 = vadd.f32 %v1615_v62, %v1587_v10 }
 0x1c7   : > { %v1677_v12 = vrot.slane %v1616_v53, 1 }
 0x1c8   : > { %v1387_v38 = vpop.f32.mrf.mxu0 }
 0x1c9   : > { %v1694_v59 = vsel %vm1688_vm4, %v1677_v12, 0.0  ;;  %v1561_v15 = vadd.f32 %v1560_v22, %v1387_v38 }
 0x1ca   : > { %v1702_v4 = vadd.f32 %v1694_v59, %v3445_v58 }
 0x1cb   : > { %v1590_v17 = vadd.f32 %v1589_v13, %v1561_v15 }
 0x1cc   : > { %1712 = vst.msk [vmem:[%s3458_s21 + $0x28] sm:$0xff] %vm458_vm0, %v1702_v4 }
 0x1cd   : > { %v1619_v47 = vadd.f32 %v1618_v2, %v1590_v17 }
 0x1cf   : > { %v1678_v19 = vrot.slane %v1619_v47, 1 }
 0x1d0   : > { %v1389_v56 = vpop.f32.mrf.mxu0 }
 0x1d1   : > { %v1695_v23 = vsel %vm1688_vm4, %v1678_v19, 0.0  ;;  %v1563_v24 = vadd.f32 %v1562_v11, %v1389_v56 }
 0x1d2   : > { %v1703_v18 = vadd.f32 %v1695_v23, %v3449_v50 }
 0x1d3   : > { %v1592_v26 = vadd.f32 %v1591_v25, %v1563_v24 }
 0x1d4   : > { %1713 = vst.msk [vmem:[%s3458_s21 + $0x30] sm:$0xff] %vm458_vm0, %v1703_v18 }
 0x1d5   : > { %v1621_v58 = vadd.f32 %v1620_v63, %v1592_v26 }
 0x1d7   : > { %v1679_v27 = vrot.slane %v1621_v58, 1 }
 0x1d8   : > { %1718 = sbr.rel (%p2646_p7) target bundleno = 1146 (0x47a), region = 56 }
 0x1d9   : > { %v1696_v29 = vsel %vm1688_vm4, %v1679_v27, 0.0 }
 0x1da   : > { %v1704_v30 = vadd.f32 %v1696_v29, %v3453_v16 }
 0x1dc   : > { %1714 = vst.msk [vmem:[%s3458_s21 + $0x38] sm:$0xff] %vm458_vm0, %v1704_v30 }
 0x1dd   : > { %v1775_v50 = vld [vmem:[%s3754_s6 + $0x18] sm:$0xff]  ;;  %v1774_v31 = vld [vmem:[%s3754_s6 + $0x10] sm:$0xff]  ;;  %v1773_v16 = vld [vmem:[%s3754_s6 + $0x8] sm:$0xff]  ;;  %vm2025_vm8 = vcmask 257024  }
 0x1de   : > { %1791 = vmatpush.msra.mxu0 %v1775_v50  ;;  %1912 = vmatpush.msra.mxu2 %v1775_v50  ;;  %v1772_v33 = vld [vmem:[%s3754_s6] sm:$0xff]  ;;  %v1803_v9 = vld [vmem:[%s3755_s7 + $0x18] sm:$0xff]  ;;  %v1802_v55 = vld [vmem:[%s3755_s7 + $0x10] sm:$0xff] }
 0x1df   : > { %1819 = vmatpush.msra.mxu1 %v1803_v9  ;;  %1936 = vmatpush.msra.mxu3 %v1803_v9  ;;  %v1801_v63 = vld [vmem:[%s3755_s7 + $0x8] sm:$0xff]  ;;  %v1800_v58 = vld [vmem:[%s3755_s7] sm:$0xff] }
 0x1e0   : > { %1792 = vmatpush.msra.mxu0 %v1774_v31  ;;  %1913 = vmatpush.msra.mxu2 %v1774_v31 }
 0x1e1   : > { %1820 = vmatpush.msra.mxu1 %v1802_v55  ;;  %1937 = vmatpush.msra.mxu3 %v1802_v55 }
 0x1e2   : > { %1793 = vmatpush.msra.mxu0 %v1773_v16  ;;  %1914 = vmatpush.msra.mxu2 %v1773_v16 }
 0x1e3   : > { %v3497_v32 = vld [vmem:[#allocation2] sm:$0xff]  ;;  %v3499_v36 = vld [vmem:[#allocation2 + $0x8] sm:$0xff]  ;;  %v3504_v39 = vld [vmem:[#allocation2 + $0x10] sm:$0xff]  ;;  %1821 = vmatpush.msra.mxu1 %v1801_v63  ;;  %1938 = vmatpush.msra.mxu3 %v1801_v63 }
 0x1e4   : > { %v3506_v34 = vld [vmem:[#allocation2 + $0x18] sm:$0xff]  ;;  %v1735_v35 = vsel %vm458_vm0, %v3497_v32, 0.0  ;;  %v1736_v37 = vsel %vm458_vm0, %v3499_v36, 0.0  ;;  %v3512_v44 = vld [vmem:[#allocation2 + $0x20] sm:$0xff]  ;;  %v1738_v14 = vsel %vm458_vm0, %v3504_v39, 0.0  ;;  %v3521_v40 = vld [vmem:[#allocation2 + $0x28] sm:$0xff]  ;;  %1794 = vmatpush.msra.mxu0 %v1772_v33  ;;  %1915 = vmatpush.msra.mxu2 %v1772_v33 }
 0x1e5   : > { %v1737_v21 = vadd.f32 %v1736_v37, %v1735_v35  ;;  %v1740_v0 = vsel %vm458_vm0, %v3506_v34, 0.0  ;;  %v1742_v42 = vsel %vm458_vm0, %v3512_v44, 0.0  ;;  %v3525_v57 = vld [vmem:[#allocation2 + $0x30] sm:$0xff]  ;;  %v1744_v46 = vsel %vm458_vm0, %v3521_v40, 0.0  ;;  %v3529_v28 = vld [vmem:[#allocation2 + $0x38] sm:$0xff]  ;;  %v3533_v51 = vld [vmem:[#allocation2 + $0x40] sm:$0xff]  ;;  %1822 = vmatpush.msra.mxu1 %v1800_v58  ;;  %1939 = vmatpush.msra.mxu3 %v1800_v58 }
 0x1e6   : > { %v1746_v20 = vsel %vm458_vm0, %v3525_v57, 0.0  ;;  %v1748_v52 = vsel %vm458_vm0, %v3529_v28, 0.0  ;;  %v3537_v54 = vld [vmem:[#allocation2 + $0x48] sm:$0xff]  ;;  %v1750_v43 = vsel %vm458_vm0, %v3533_v51, 0.0  ;;  %v3547_v6 = vld [vmem:[#allocation2 + $0x50] sm:$0xff]  ;;  %v3551_v62 = vld [vmem:[#allocation2 + $0x58] sm:$0xff] }
 0x1e7   : > { %v1739_v41 = vadd.f32 %v1738_v14, %v1737_v21  ;;  %v1752_v61 = vsel %vm458_vm0, %v3537_v54, 0.0  ;;  %v1754_v5 = vsel %vm458_vm0, %v3547_v6, 0.0  ;;  %v3555_v7 = vld [vmem:[#allocation2 + $0x60] sm:$0xff]  ;;  %v1756_v10 = vsel %vm458_vm0, %v3551_v62, 0.0  ;;  %v3559_v53 = vld [vmem:[#allocation2 + $0x68] sm:$0xff]  ;;  %v3563_v13 = vld [vmem:[#allocation2 + $0x70] sm:$0xff] }
 0x1e8   : > { %v1758_v12 = vsel %vm458_vm0, %v3555_v7, 0.0  ;;  %v1760_v59 = vsel %vm458_vm0, %v3559_v53, 0.0  ;;  %v3567_v15 = vld [vmem:[#allocation2 + $0x78] sm:$0xff]  ;;  %v1762_v2 = vsel %vm458_vm0, %v3563_v13, 0.0 }
 0x1e9   : > { %v1741_v45 = vadd.f32 %v1740_v0, %v1739_v41  ;;  %v1764_v47 = vsel %vm458_vm0, %v3567_v15, 0.0 }
 0x1eb   : > { %v1743_v48 = vadd.f32 %v1742_v42, %v1741_v45 }
 0x1ed   : > { %v1745_v49 = vadd.f32 %v1744_v46, %v1743_v48 }
 0x1ef   : > { %v1747_v1 = vadd.f32 %v1746_v20, %v1745_v49 }
 0x1f1   : > { %v1749_v60 = vadd.f32 %v1748_v52, %v1747_v1 }
 0x1f3   : > { %v1751_v3 = vadd.f32 %v1750_v43, %v1749_v60 }
 0x1f5   : > { %v1753_v8 = vadd.f32 %v1752_v61, %v1751_v3 }
 0x1f7   : > { %v1755_v22 = vadd.f32 %v1754_v5, %v1753_v8 }
 0x1f9   : > { %v1757_v38 = vadd.f32 %v1756_v10, %v1755_v22 }
 0x1fb   : > { %v1759_v4 = vadd.f32 %v1758_v12, %v1757_v38 }
 0x1fd   : > { %v1761_v17 = vadd.f32 %v1760_v59, %v1759_v4 }
 0x1ff   : > { %v1763_v19 = vadd.f32 %v1762_v2, %v1761_v17 }
 0x201   : > { %v1765_v11 = vadd.f32 %v1764_v47, %v1763_v19 }
 0x203   : > { %v1766_v56 = vrot.slane %v1765_v11, 4 }
 0x205   : > { %v1767_v23 = vadd.f32 %v1766_v56, %v1765_v11 }
 0x207   : > { %v1768_v24 = vrot.slane %v1767_v23, 2 }
 0x209   : > { %v1769_v18 = vadd.f32 %v1768_v24, %v1767_v23 }
 0x20b   : > { %v1770_v25 = vrot.slane %v1769_v18, 1 }
 0x20d   : > { %v1771_v26 = vadd.f32 %v1770_v25, %v1769_v18 }
 0x20f   : > { %2647 = vmatmul.msk.f32.vlgmr.msra.gmra.mxu0 %vm458_vm0, %v1771_v26 }
 0x28c   : > { %v1796_v27 = vpop.f32.mrf.mxu0 }
 0x28d   : > { %v1799_v29 = vmul.f32 0.0078125, %v1796_v27 }
 0x28f   : > { %2648 = vmatmul.msk.f32.vlgmr.msra.gmra.mxu1 %vm458_vm0, %v1799_v29 }
 0x30c   : > { %v1824_v30 = vpop.f32.mrf.mxu1 }
 0x30d   : > { %v1827_v50 = vperm.slane %v1824_v30, 0 }
 0x30f   : > { %v3582_v31 = vsub.f32 %v3497_v32, %v1827_v50  ;;  %v3585_v16 = vsub.f32 %v3499_v36, %v1827_v50  ;;  %v3588_v35 = vsub.f32 %v3504_v39, %v1827_v50  ;;  %v3591_v37 = vsub.f32 %v3506_v34, %v1827_v50 }
 0x310   : > { %v3598_v33 = vsub.f32 %v3512_v44, %v1827_v50  ;;  %v3603_v36 = vsub.f32 %v3521_v40, %v1827_v50  ;;  %v3610_v42 = vsub.f32 %v3525_v57, %v1827_v50  ;;  %v3616_v40 = vsub.f32 %v3529_v28, %v1827_v50 }
 0x311   : > { %v1844_v21 = vmul.f32 %v3582_v31, %v3582_v31  ;;  %v1845_v14 = vmul.f32 %v3585_v16, %v3585_v16  ;;  %v1846_v32 = vmul.f32 %v3588_v35, %v3588_v35  ;;  %v1847_v39 = vmul.f32 %v3591_v37, %v3591_v37 }
 0x312   : > { %v1848_v44 = vmul.f32 %v3598_v33, %v3598_v33  ;;  %v1849_v48 = vmul.f32 %v3603_v36, %v3603_v36  ;;  %v3622_v52 = vsub.f32 %v3533_v51, %v1827_v50  ;;  %v1850_v57 = vmul.f32 %v3610_v42, %v3610_v42 }
 0x313   : > { %v1860_v34 = vsel %vm458_vm0, %v1844_v21, 0.0  ;;  %v1861_v0 = vsel %vm458_vm0, %v1845_v14, 0.0  ;;  %v1863_v45 = vsel %vm458_vm0, %v1846_v32, 0.0  ;;  %v1865_v20 = vsel %vm458_vm0, %v1847_v39, 0.0 }
 0x314   : > { %v1862_v41 = vadd.f32 %v1861_v0, %v1860_v34  ;;  %v1867_v1 = vsel %vm458_vm0, %v1848_v44, 0.0  ;;  %v3628_v55 = vsub.f32 %v3537_v54, %v1827_v50  ;;  %v1851_v28 = vmul.f32 %v3616_v40, %v3616_v40 }
 0x315   : > { %v1869_v43 = vsel %vm458_vm0, %v1849_v48, 0.0  ;;  %v3634_v61 = vsub.f32 %v3547_v6, %v1827_v50  ;;  %v1852_v51 = vmul.f32 %v3622_v52, %v3622_v52  ;;  %v1871_v3 = vsel %vm458_vm0, %v1850_v57, 0.0 }
 0x316   : > { %v1864_v46 = vadd.f32 %v1863_v45, %v1862_v41  ;;  %v3640_v8 = vsub.f32 %v3551_v62, %v1827_v50  ;;  %v1853_v54 = vmul.f32 %v3628_v55, %v3628_v55  ;;  %v1873_v10 = vsel %vm458_vm0, %v1851_v28, 0.0 }
 0x317   : > { %v3646_v12 = vsub.f32 %v3555_v7, %v1827_v50  ;;  %v1854_v6 = vmul.f32 %v3634_v61, %v3634_v61  ;;  %v1875_v38 = vsel %vm458_vm0, %v1852_v51, 0.0  ;;  %v3652_v4 = vsub.f32 %v3559_v53, %v1827_v50 }
 0x318   : > { %v1866_v49 = vadd.f32 %v1865_v20, %v1864_v46  ;;  %v1855_v62 = vmul.f32 %v3640_v8, %v3640_v8  ;;  %v1877_v2 = vsel %vm458_vm0, %v1853_v54, 0.0  ;;  %v3658_v47 = vsub.f32 %v3563_v13, %v1827_v50  ;;  %v2827_v54 = vld [vmem:[%s3753_s5] ss:$0 sm:$0xff] }
 0x319   : > { %v1856_v7 = vmul.f32 %v3646_v12, %v3646_v12  ;;  %v1879_v19 = vsel %vm458_vm0, %v1854_v6, 0.0  ;;  %v3664_v56 = vsub.f32 %v3567_v15, %v1827_v50  ;;  %v1857_v53 = vmul.f32 %v3652_v4, %v3652_v4 }
 0x31a   : > { %v1868_v9 = vadd.f32 %v1867_v1, %v1866_v49  ;;  %v1881_v23 = vsel %vm458_vm0, %v1855_v62, 0.0  ;;  %v1858_v18 = vmul.f32 %v3658_v47, %v3658_v47 }
 0x31b   : > { %v1883_v13 = vsel %vm458_vm0, %v1856_v7, 0.0  ;;  %v1859_v26 = vmul.f32 %v3664_v56, %v3664_v56  ;;  %v1885_v63 = vsel %vm458_vm0, %v1857_v53, 0.0 }
 0x31c   : > { %v1870_v60 = vadd.f32 %v1869_v43, %v1868_v9  ;;  %v1887_v15 = vsel %vm458_vm0, %v1858_v18, 0.0  ;;  %v1954_v9 = vld [vmem:[%s3752_s4] sm:$0x1] }
 0x31d   : > { %v1889_v29 = vsel %vm458_vm0, %v1859_v26, 0.0 }
 0x31e   : > { %v1872_v5 = vadd.f32 %v1871_v3, %v1870_v60 }
 0x320   : > { %v1874_v22 = vadd.f32 %v1873_v10, %v1872_v5 }
 0x322   : > { %v1876_v59 = vadd.f32 %v1875_v38, %v1874_v22 }
 0x324   : > { %v1878_v17 = vadd.f32 %v1877_v2, %v1876_v59 }
 0x326   : > { %v1880_v11 = vadd.f32 %v1879_v19, %v1878_v17 }
 0x328   : > { %v1882_v24 = vadd.f32 %v1881_v23, %v1880_v11 }
 0x32a   : > { %v1884_v25 = vadd.f32 %v1883_v13, %v1882_v24 }
 0x32c   : > { %v1886_v58 = vadd.f32 %v1885_v63, %v1884_v25 }
 0x32e   : > { %v1888_v27 = vadd.f32 %v1887_v15, %v1886_v58 }
 0x330   : > { %v1890_v30 = vadd.f32 %v1889_v29, %v1888_v27 }
 0x332   : > { %v1891_v50 = vrot.slane %v1890_v30, 4 }
 0x334   : > { %v1892_v21 = vadd.f32 %v1891_v50, %v1890_v30 }
 0x336   : > { %v1893_v14 = vrot.slane %v1892_v21, 2 }
 0x338   : > { %v1894_v32 = vadd.f32 %v1893_v14, %v1892_v21 }
 0x33a   : > { %v1895_v39 = vrot.slane %v1894_v32, 1 }
 0x33c   : > { %v1896_v34 = vadd.f32 %v1895_v39, %v1894_v32 }
 0x33e   : > { %2649 = vmatmul.msk.f32.vlgmr.msra.gmra.mxu2 %vm458_vm0, %v1896_v34 }
 0x3c1   : > { %v1917_v0 = vpop.f32.mrf.mxu2 }
 0x3c2   : > { %v1920_v41 = vmul.f32 0.0078125, %v1917_v0 }
 0x3c4   : > { %2650 = vmatmul.msk.f32.vlgmr.msra.gmra.mxu3 %vm458_vm0, %v1920_v41 }
 0x447   : > { %v1941_v44 = vpop.f32.mrf.mxu3 }
 0x448   : > { %v1942_v45 = vadd.f32 1e-05, %v1941_v44 }
 0x44a   : > { %2828 = vrsqrt.f32 %v1942_v45  ;;  %vm1950_vm6 = vweird.f32 %v1942_v45 }
 0x450   : > { %v2829_v46 = vpop.eup %2828 }
 0x451   : > { %v1945_v48 = vmul.f32 %v2829_v46, %v1942_v45  ;;  %vm1951_vm5 = vweird.f32 %v2829_v46 }
 0x452   : > { %vm1952_vm7 = vmor %vm1950_vm6, %vm1951_vm5 }
 0x453   : > { %v1946_v20 = vmul.f32 %v2829_v46, %v1945_v48 }
 0x455   : > { %v1947_v49 = vmul.f32 0.5, %v1946_v20 }
 0x457   : > { %v1948_v57 = vsub.f32 1.5, %v1947_v49 }
 0x459   : > { %v1949_v1 = vmul.f32 %v2829_v46, %v1948_v57 }
 0x45b   : > { %v1953_v28 = vsel %vm1952_vm7, %v2829_v46, %v1949_v1 }
 0x45c   : > { %v1955_v43 = vmul.f32 %v1954_v9, %v1953_v28 }
 0x45e   : > { %v1956_v60 = vperm.slane %v1955_v43, 0 }
 0x460   : > { %v1957_v51 = vmul.f32 %v1956_v60, %v3582_v31  ;;  %v1958_v3 = vmul.f32 %v1956_v60, %v3585_v16  ;;  %v1959_v5 = vmul.f32 %v1956_v60, %v3588_v35  ;;  %v1960_v10 = vmul.f32 %v1956_v60, %v3591_v37 }
 0x461   : > { %v1961_v22 = vmul.f32 %v1956_v60, %v3598_v33  ;;  %v1962_v6 = vmul.f32 %v1956_v60, %v3603_v36  ;;  %v1963_v38 = vmul.f32 %v1956_v60, %v3610_v42  ;;  %v1964_v31 = vmul.f32 %v1956_v60, %v3616_v40 }
 0x462   : > { %v1977_v59 = vadd.f32 %v2827_v54, %v1957_v51  ;;  %v1978_v62 = vadd.f32 %v2827_v54, %v1958_v3  ;;  %v1979_v2 = vadd.f32 %v2827_v54, %v1959_v5  ;;  %v1980_v16 = vadd.f32 %v2827_v54, %v1960_v10 }
 0x463   : > { %v1965_v35 = vmul.f32 %v1956_v60, %v3622_v52  ;;  %v1981_v17 = vadd.f32 %v2827_v54, %v1961_v22  ;;  %v1966_v7 = vmul.f32 %v1956_v60, %v3628_v55  ;;  %v1967_v19 = vmul.f32 %v1956_v60, %v3634_v61 }
 0x464   : > { %v1982_v37 = vadd.f32 %v2827_v54, %v1962_v6  ;;  %v1983_v11 = vadd.f32 %v2827_v54, %v1963_v38  ;;  %v1993_v33 = vmax.f32 %v1977_v59, 0.0  ;;  %v1994_v53 = vmax.f32 %v1978_v62, 0.0 }
 0x465   : > { %v1995_v36 = vmax.f32 %v1979_v2, 0.0  ;;  %v1968_v42 = vmul.f32 %v1956_v60, %v3640_v8  ;;  %v1984_v23 = vadd.f32 %v2827_v54, %v1964_v31  ;;  %v1996_v24 = vmax.f32 %v1980_v16, 0.0 }
 0x466   : > { %v1969_v40 = vmul.f32 %v1956_v60, %v3646_v12  ;;  %v1970_v18 = vmul.f32 %v1956_v60, %v3652_v4  ;;  %v1985_v52 = vadd.f32 %v2827_v54, %v1965_v35  ;;  %v1997_v13 = vmax.f32 %v1981_v17, 0.0 }
 0x467   : > { %v1971_v55 = vmul.f32 %v1956_v60, %v3658_v47  ;;  %v1986_v61 = vadd.f32 %v2827_v54, %v1966_v7  ;;  %v1987_v25 = vadd.f32 %v2827_v54, %v1967_v19  ;;  %v1998_v26 = vmax.f32 %v1982_v37, 0.0 }
 0x468   : > { %v1999_v63 = vmax.f32 %v1983_v11, 0.0  ;;  %v2009_v58 = vpack.c.bf16 %v1993_v33, %v1993_v33  ;;  %v2010_v15 = vpack.c.bf16 %v1994_v53, %v1994_v53  ;;  %v2011_v8 = vpack.c.bf16 %v1995_v36, %v1995_v36 }
 0x469   : > { %v1972_v27 = vmul.f32 %v1956_v60, %v3664_v56  ;;  %v1988_v29 = vadd.f32 %v2827_v54, %v1968_v42  ;;  %v2000_v12 = vmax.f32 %v1984_v23, 0.0  ;;  %v2012_v30 = vpack.c.bf16 %v1996_v24, %v1996_v24 }
 0x46a   : > { %v1989_v4 = vadd.f32 %v2827_v54, %v1969_v40  ;;  %v2001_v50 = vmax.f32 %v1985_v52, 0.0  ;;  %v2013_v21 = vpack.c.bf16 %v1997_v13, %v1997_v13  ;;  %2026 = vst.msk [vmem:[%s2955_s18] sm:$0xf] %vm2025_vm8, %v2009_v58  ;;  %v1990_v47 = vadd.f32 %v2827_v54, %v1970_v18 }
 0x46b   : > { %v2002_v14 = vmax.f32 %v1986_v61, 0.0  ;;  %v2014_v32 = vpack.c.bf16 %v1998_v26, %v1998_v26  ;;  %2027 = vst.msk [vmem:[%s2955_s18 + $0x4] sm:$0xf] %vm2025_vm8, %v2010_v15  ;;  %v1991_v39 = vadd.f32 %v2827_v54, %v1971_v55  ;;  %v2003_v34 = vmax.f32 %v1987_v25, 0.0 }
 0x46c   : > { %v2015_v56 = vpack.c.bf16 %v1999_v63, %v1999_v63  ;;  %2028 = vst.msk [vmem:[%s2955_s18 + $0x8] sm:$0xf] %vm2025_vm8, %v2011_v8  ;;  %v1992_v0 = vadd.f32 %v2827_v54, %v1972_v27  ;;  %v2004_v41 = vmax.f32 %v1988_v29, 0.0  ;;  %v2016_v44 = vpack.c.bf16 %v2000_v12, %v2000_v12 }
 0x46d   : > { %2029 = vst.msk [vmem:[%s2955_s18 + $0xc] sm:$0xf] %vm2025_vm8, %v2012_v30  ;;  %v2005_v45 = vmax.f32 %v1989_v4, 0.0  ;;  %v2017_v46 = vpack.c.bf16 %v2001_v50, %v2001_v50  ;;  %v2006_v48 = vmax.f32 %v1990_v47, 0.0  ;;  %v2018_v20 = vpack.c.bf16 %v2002_v14, %v2002_v14 }
 0x46e   : > { %2030 = vst.msk [vmem:[%s2955_s18 + $0x10] sm:$0xf] %vm2025_vm8, %v2013_v21  ;;  %v2007_v49 = vmax.f32 %v1991_v39, 0.0  ;;  %v2019_v57 = vpack.c.bf16 %v2003_v34, %v2003_v34  ;;  %v2008_v1 = vmax.f32 %v1992_v0, 0.0  ;;  %v2020_v9 = vpack.c.bf16 %v2004_v41, %v2004_v41 }
 0x46f   : > { %2031 = vst.msk [vmem:[%s2955_s18 + $0x14] sm:$0xf] %vm2025_vm8, %v2014_v32  ;;  %v2021_v28 = vpack.c.bf16 %v2005_v45, %v2005_v45  ;;  %v2022_v43 = vpack.c.bf16 %v2006_v48, %v2006_v48 }
 0x470   : > { %2032 = vst.msk [vmem:[%s2955_s18 + $0x18] sm:$0xf] %vm2025_vm8, %v2015_v56  ;;  %v2023_v60 = vpack.c.bf16 %v2007_v49, %v2007_v49  ;;  %v2024_v51 = vpack.c.bf16 %v2008_v1, %v2008_v1 }
 0x471   : > { %2033 = vst.msk [vmem:[%s2955_s18 + $0x1c] sm:$0xf] %vm2025_vm8, %v2016_v44 }
 0x472   : > { %2034 = vst.msk [vmem:[%s2955_s18 + $0x20] sm:$0xf] %vm2025_vm8, %v2017_v46 }
 0x473   : > { %2035 = vst.msk [vmem:[%s2955_s18 + $0x24] sm:$0xf] %vm2025_vm8, %v2018_v20 }
 0x474   : > { %2036 = vst.msk [vmem:[%s2955_s18 + $0x28] sm:$0xf] %vm2025_vm8, %v2019_v57 }
 0x475   : > { %2037 = vst.msk [vmem:[%s2955_s18 + $0x2c] sm:$0xf] %vm2025_vm8, %v2020_v9 }
 0x476   : > { %2038 = vst.msk [vmem:[%s2955_s18 + $0x30] sm:$0xf] %vm2025_vm8, %v2021_v28 }
 0x477   : > { %2039 = vst.msk [vmem:[%s2955_s18 + $0x34] sm:$0xf] %vm2025_vm8, %v2022_v43 }
 0x478   : > { %2040 = vst.msk [vmem:[%s2955_s18 + $0x38] sm:$0xf] %vm2025_vm8, %v2023_v60 }
 0x479   : > { %2041 = vst.msk [vmem:[%s2955_s18 + $0x3c] sm:$0xf] %vm2025_vm8, %v2024_v51 }
 0x47a PF: > { %s18_s9 = sadd.s32 1, %s2868_s9   ;;  %s3757_s27 = smov %s2860_s29 }
 0x47b   : > { %p15_p8 = scmp.ge.s32.totalorder %s18_s9, 6   ;;  %s3758_s28 = smov %s2864_s30 }
 0x47c   : > { %s3759_s29 = smov %s3762_s10  ;;  %s3760_s30 = smov %s3766_s11 }
 0x47d   :  { %17 = sbr.rel (!%p15_p8) target bundleno = 3 (0x3), region = 94 }

// kernel: sfe_forward.13
= control target key start
LH: loop header
LB: loop body
LE: loop exit
PB: predicated region body
PF: predicated region fallthrough
CT: control target
= control target key end

     0   :  { %s1935_s25 = smov 0   ;;  %s1937_s26 = smov 0   ;;  %s2380_s0 = inlined_call_operand.vmem [shape: bf16[2,2,8,8,128], index: 0, kind: input, shape index: {}]   ;;  %s2381_s1 = inlined_call_operand.vmem [shape: bf16[2,2,8,8,32], index: 1, kind: input, shape index: {}]   ;;  %s2382_s2 = inlined_call_operand.vmem [shape: bf16[2,2,8,8,32], index: 2, kind: input, shape index: {}]   ;;  %s2383_s3 = inlined_call_operand.vmem [shape: bf16[2,2,8,8,32], index: 3, kind: input, shape index: {}]   ;;  %s2384_s4 = inlined_call_operand.vmem [shape: bf16[2,128,128], index: 4, kind: input, shape index: {}]   ;;  %s2385_s5 = inlined_call_operand.vmem [shape: bf16[1,128,128], index: 5, kind: input, shape index: {}]   ;;  %s2386_s6 = inlined_call_operand.vmem [shape: bf16[1,32,128], index: 6, kind: input, shape index: {}]   ;;  %s2387_s7 = inlined_call_operand.vmem [shape: bf16[1,32,128], index: 7, kind: input, shape index: {}]   ;;  %s2388_s8 = inlined_call_operand.vmem [shape: bf16[1,32,128], index: 8, kind: input, shape index: {}]   ;;  %s2389_s9 = inlined_call_operand.vmem [shape: f32[1,128], index: 9, kind: input, shape index: {}]   ;;  %s2390_s10 = inlined_call_operand.vmem [shape: f32[1,128], index: 10, kind: input, shape index: {}]   ;;  %s2391_s11 = inlined_call_operand.vmem [shape: f32[128,32], index: 11, kind: input, shape index: {}]   ;;  %s2392_s12 = inlined_call_operand.vmem [shape: f32[32,128], index: 12, kind: input, shape index: {}]   ;;  %s2393_s13 = inlined_call_operand.vmem [shape: bf16[2,128,128], index: 13, kind: output, shape index: {}]  }
   0x1   :  { %2395 = sst [smem:[#allocation6_spill]] %s2386_s6  ;;  %s1939_s27 = smov 0  }
   0x2   :  { %s1941_s28 = smov 0   ;;  %s1943_s29 = smov 0  }
   0x3 LB: > { %2396 = sst [smem:[#allocation3_spill]] %s1859_s28  ;;  %s32_s30 = sadd.s32 1, %s1855_s27  ;;  %s1863_s29 = sphi %s1943_s29, %s23_s29   ;;  %s1859_s28 = sphi %s1941_s28, %s2402_s28   ;;  %s1855_s27 = sphi %s1939_s27, %s2404_s27   ;;  %s1851_s26 = sphi %s1937_s26, %s2400_s26   ;;  %s1847_s25 = sphi %s1935_s25, %s2403_s25  }
   0x4   : > { %s35_s14 = sadd.s32 1, %s1859_s28  ;;  %p33_p0 = scmp.ge.s32.totalorder %s32_s30, 2 }
   0x5   : > { %p1501_p1 = scmp.ge.s32.totalorder %s1863_s29, 1  ;;  %p463_p2 = scmp.lt.s32.totalorder %s1863_s29, 5 }
   0x6   : > { %s2406_s30 = smov (%p33_p0, %s32_s30), 0  ;;  %s2408_s14 = smov (!%p33_p0, %s35_s14), %s1859_s28 }
   0x7   : > { %2397 = sst [smem:[#allocation4_spill]] %s2406_s30  ;;  %p464_p3 = pnand %p1501_p1, %p463_p2 }
   0x8   : > { %p37_p4 = scmp.ge.s32.totalorder %s2408_s14, 2  ;;  %s2399_s6 = sld [smem:[#allocation6_spill]] (!%p464_p3) }
   0x9   : > { %467 = sbr.rel (%p464_p3) target bundleno = 894 (0x37e), region = 72  ;;  %p543_p5 = scmp.lt.s32.totalorder (!%p464_p3), %s1851_s26, 1 }
   0xa   : > { %s2410_s14 = smov (%p37_p4, %s2408_s14), 0  ;;  %p545_p6 = scmp.lt.s32.totalorder (!%p464_p3), %s1847_s25, 1 }
   0xb   : > { %2398 = sst [smem:[#allocation5_spill]] %s2410_s14  ;;  %p1651_p7 = scmp.ne.s32.totalorder (!%p464_p3), %s1847_s25, 1 }
   0xe   : > { %v1681_v0 = vld [vmem:[%s2385_s5 + $0x38] sm:$0xff]  ;;  %v1683_v1 = vld [vmem:[%s2399_s6 + $0x8] sm:$0xff]  ;;  %v1680_v4 = vld [vmem:[%s2385_s5 + $0x30] sm:$0xff]  ;;  %s2412_s26 = smov (!%p543_p5, %s1851_s26), 1  ;;  %vm674_vm0 = vcmask 261120  }
   0xf   : > { %v1685_v2 = vld [vmem:[%s2387_s7 + $0x8] sm:$0xff]  ;;  %1774 = vmatpush.bf16.msra.mxu1 %v1681_v0  ;;  %693 = vmatpush.bf16.msra.mxu0 %v1683_v1  ;;  %v1682_v5 = vld [vmem:[%s2399_s6] sm:$0xff]  ;;  %s546_s17 = scalar_select %p545_p6, %s1847_s25, 1  ;;  %v1677_v13 = vld [vmem:[%s2385_s5 + $0x18] sm:$0xff] }
  0x10   : > { %v1687_v3 = vld [vmem:[%s2388_s8 + $0x8] sm:$0xff]  ;;  %871 = vmatpush.bf16.msra.mxu2 %v1685_v2  ;;  %v1684_v6 = vld [vmem:[%s2387_s7] sm:$0xff]  ;;  %s1503_s20 = sshll.u32 %s2412_s26, 4  ;;  %s1656_s21 = sshll.u32 %s2412_s26, 6  ;;  %v1676_v14 = vld [vmem:[%s2385_s5 + $0x10] sm:$0xff] }
  0x11   : > { %956 = vmatpush.bf16.msra.mxu3 %v1687_v3  ;;  %v1686_v7 = vld [vmem:[%s2388_s8] sm:$0xff]  ;;  %s1502_s23 = sshll.u32 %s546_s17, 3  ;;  %s1996_s15 = scalar_lea.vmem %s2384_s4, %s1656_s21  ;;  %v1679_v8 = vld [vmem:[%s2385_s5 + $0x28] sm:$0xff] }
  0x12   : > { %s549_s16 = sadd.s32 %s1503_s20, %s1502_s23  ;;  %s2001_s18 = scalar_lea.vmem %s2393_s13, %s1656_s21  ;;  %v1678_v11 = vld [vmem:[%s2385_s5 + $0x20] sm:$0xff]  ;;  %v1675_v15 = vld [vmem:[%s2385_s5 + $0x8] sm:$0xff] }
  0x13   : > { %1775 = vmatpush.bf16.msra.mxu1 %v1680_v4  ;;  %694 = vmatpush.bf16.msra.mxu0 %v1682_v5  ;;  %s2006_s14 = sshll.u32 %s549_s16, 2  ;;  %v1674_v19 = vld [vmem:[%s2385_s5] sm:$0xff] }
  0x14   : > { %872 = vmatpush.bf16.msra.mxu2 %v1684_v6  ;;  %s2012_s20 = scalar_lea.vmem %s2381_s1, %s2006_s14  ;;  %s2018_s21 = scalar_lea.vmem %s2382_s2, %s2006_s14 }
  0x15   : > { %957 = vmatpush.bf16.msra.mxu3 %v1686_v7  ;;  %v1662_v9 = vld [vmem:[%s2012_s20] sm:$0xff]  ;;  %s2026_s24 = scalar_lea.vmem %s2383_s3, %s2006_s14  ;;  %v1663_v16 = vld [vmem:[%s2012_s20 + $0x8] sm:$0xff]  ;;  %s551_s30 = scalar_lea.vmem %s2380_s0, %s2006_s14  ;;  %v1664_v21 = vld [vmem:[%s2012_s20 + $0x10] sm:$0xff] }
  0x16   : > { %v1666_v10 = vld [vmem:[%s2018_s21] sm:$0xff]  ;;  %1542 = vmatmul.msk.bf16.vlgmr.msra.gmra.mxu0 %vm674_vm0, %v1662_v9  ;;  %v1667_v17 = vld [vmem:[%s2018_s21 + $0x8] sm:$0xff]  ;;  %v1668_v22 = vld [vmem:[%s2018_s21 + $0x10] sm:$0xff]  ;;  %s1650_s14 = sshll.u32 %s1847_s25, 6 }
  0x17   : > { %788 = vmatpush.bf16.msrb.mxu0 %v1681_v0  ;;  %1776 = vmatpush.bf16.msra.mxu1 %v1679_v8  ;;  %v1670_v12 = vld [vmem:[%s2026_s24] sm:$0xff]  ;;  %v1671_v18 = vld [vmem:[%s2026_s24 + $0x8] sm:$0xff]  ;;  %v1672_v23 = vld [vmem:[%s2026_s24 + $0x10] sm:$0xff] }
  0x18   : > { %1618 = vmatmul.msk.bf16.vlgmr.msra.gmra.mxu2 %vm674_vm0, %v1666_v10  ;;  %1646 = vmatmul.msk.bf16.vlgmr.msra.gmra.mxu3 %vm674_vm0, %v1670_v12  ;;  %v1659_v20 = vld [vmem:[%s551_s30 + $0x8] sm:$0xff]  ;;  %v1660_v24 = vld [vmem:[%s551_s30 + $0x10] sm:$0xff]  ;;  %v1665_v25 = vld [vmem:[%s2012_s20 + $0x18] sm:$0xff]  ;;  %s2070_s20 = scalar_lea.vmem [#allocation2], %s1650_s14 }
  0x19   : > { %v1669_v26 = vld [vmem:[%s2018_s21 + $0x18] sm:$0xff]  ;;  %v1658_v29 = vld [vmem:[%s551_s30] sm:$0xff] }
  0x1a   : > { %v1673_v27 = vld [vmem:[%s2026_s24 + $0x18] sm:$0xff] }
  0x1b   : > { %789 = vmatpush.bf16.msrb.mxu0 %v1680_v4  ;;  %1777 = vmatpush.bf16.msra.mxu1 %v1678_v11  ;;  %v1661_v28 = vld [vmem:[%s551_s30 + $0x18] sm:$0xff] }
  0x1f   : > { %790 = vmatpush.bf16.msrb.mxu0 %v1679_v8  ;;  %1778 = vmatpush.bf16.msra.mxu1 %v1677_v13 }
  0x23   : > { %791 = vmatpush.bf16.msrb.mxu0 %v1678_v11  ;;  %1779 = vmatpush.bf16.msra.mxu1 %v1676_v14 }
  0x26   : > { %1543 = vmatmul.msk.bf16.gmra.mxu0 %vm674_vm0, %v1663_v16 }
  0x27   : > { %792 = vmatpush.bf16.msrb.mxu0 %v1677_v13  ;;  %1780 = vmatpush.bf16.msra.mxu1 %v1675_v15 }
  0x28   : > { %1619 = vmatmul.msk.bf16.gmra.mxu2 %vm674_vm0, %v1667_v17  ;;  %1647 = vmatmul.msk.bf16.gmra.mxu3 %vm674_vm0, %v1671_v18 }
  0x2b   : > { %793 = vmatpush.bf16.msrb.mxu0 %v1676_v14  ;;  %1781 = vmatpush.bf16.msra.mxu1 %v1674_v19 }
  0x2e   : > { %801 = vmatmul.bf16.vlgmr.msra.gmra.mxu1 %v1659_v20 }
  0x2f   : > { %794 = vmatpush.bf16.msrb.mxu0 %v1675_v15 }
  0x33   : > { %795 = vmatpush.bf16.msrb.mxu0 %v1674_v19 }
  0x36   : > { %1544 = vmatmul.msk.bf16.gmra.mxu0 %vm674_vm0, %v1664_v21 }
  0x38   : > { %1620 = vmatmul.msk.bf16.gmra.mxu2 %vm674_vm0, %v1668_v22  ;;  %1648 = vmatmul.msk.bf16.gmra.mxu3 %vm674_vm0, %v1672_v23 }
  0x3e   : > { %806 = vmatmul.bf16.gmra.mxu1 %v1660_v24 }
  0x46   : > { %1545 = vmatmul.msk.bf16.gmra.mxu0 %vm674_vm0, %v1665_v25 }
  0x48   : > { %1621 = vmatmul.msk.bf16.gmra.mxu2 %vm674_vm0, %v1669_v26  ;;  %1649 = vmatmul.msk.bf16.gmra.mxu3 %vm674_vm0, %v1673_v27 }
  0x4e   : > { %811 = vmatmul.bf16.gmra.mxu1 %v1661_v28 }
  0x56   : > { %796 = vmatmul.bf16.vlgmr.msrb.gmra.mxu0 %v1658_v29 }
  0x93   : > { %v696_v30 = vpop.f32.mrf.mxu0 }
  0x9b   : > { %v874_v31 = vpop.f32.mrf.mxu2  ;;  %v959_v32 = vpop.f32.mrf.mxu3 }
  0x9c   : > { %v698_v33 = vpop.f32.mrf.mxu0 }
  0xa3   : > { %v876_v34 = vpop.f32.mrf.mxu2  ;;  %v961_v35 = vpop.f32.mrf.mxu3 }
  0xa4   : > { %v701_v36 = vpop.f32.mrf.mxu0 }
  0xab   : > { %v802_v37 = vpop.f32.mrf.mxu1  ;;  %v879_v38 = vpop.f32.mrf.mxu2 }
  0xac   : > { %v803_v39 = vadd.f32 %v802_v37, %v701_v36  ;;  %v964_v40 = vpop.f32.mrf.mxu3  ;;  %v703_v41 = vpop.f32.mrf.mxu0 }
  0xae   : > { %v896_v42 = vadd.f32 %v879_v38, %v803_v39 }
  0xb0   : > { %v981_v43 = vadd.f32 %v964_v40, %v896_v42 }
  0xb2   : > { %991 = vst [vmem:[%s2070_s20 + $0x10] sm:$0xff] %v981_v43 }
  0xb3   : > { %v804_v44 = vpop.f32.mrf.mxu1  ;;  %v881_v45 = vpop.f32.mrf.mxu2 }
  0xb4   : > { %v805_v46 = vadd.f32 %v804_v44, %v703_v41  ;;  %v966_v47 = vpop.f32.mrf.mxu3  ;;  %v706_v48 = vpop.f32.mrf.mxu0 }
  0xb6   : > { %v897_v49 = vadd.f32 %v881_v45, %v805_v46 }
  0xb8   : > { %v982_v50 = vadd.f32 %v966_v47, %v897_v49 }
  0xba   : > { %992 = vst [vmem:[%s2070_s20 + $0x18] sm:$0xff] %v982_v50 }
  0xbb   : > { %v807_v51 = vpop.f32.mrf.mxu1  ;;  %v884_v52 = vpop.f32.mrf.mxu2 }
  0xbc   : > { %v808_v53 = vadd.f32 %v807_v51, %v706_v48  ;;  %v969_v54 = vpop.f32.mrf.mxu3  ;;  %v708_v55 = vpop.f32.mrf.mxu0 }
  0xbe   : > { %v898_v56 = vadd.f32 %v884_v52, %v808_v53 }
  0xc0   : > { %v983_v57 = vadd.f32 %v969_v54, %v898_v56 }
  0xc2   : > { %993 = vst [vmem:[%s2070_s20 + $0x20] sm:$0xff] %v983_v57 }
  0xc3   : > { %v809_v58 = vpop.f32.mrf.mxu1  ;;  %v886_v59 = vpop.f32.mrf.mxu2 }
  0xc4   : > { %v810_v60 = vadd.f32 %v809_v58, %v708_v55  ;;  %v971_v61 = vpop.f32.mrf.mxu3  ;;  %v711_v62 = vpop.f32.mrf.mxu0 }
  0xc6   : > { %v899_v63 = vadd.f32 %v886_v59, %v810_v60 }
  0xc8   : > { %v984_v0 = vadd.f32 %v971_v61, %v899_v63 }
  0xca   : > { %994 = vst [vmem:[%s2070_s20 + $0x28] sm:$0xff] %v984_v0 }
  0xcb   : > { %v812_v1 = vpop.f32.mrf.mxu1  ;;  %v889_v2 = vpop.f32.mrf.mxu2 }
  0xcc   : > { %v813_v3 = vadd.f32 %v812_v1, %v711_v62  ;;  %v974_v4 = vpop.f32.mrf.mxu3  ;;  %v713_v5 = vpop.f32.mrf.mxu0 }
  0xce   : > { %v900_v6 = vadd.f32 %v889_v2, %v813_v3 }
  0xd0   : > { %v985_v7 = vadd.f32 %v974_v4, %v900_v6 }
  0xd2   : > { %995 = vst [vmem:[%s2070_s20 + $0x30] sm:$0xff] %v985_v7 }
  0xd3   : > { %v814_v8 = vpop.f32.mrf.mxu1  ;;  %v891_v9 = vpop.f32.mrf.mxu2 }
  0xd4   : > { %v815_v10 = vadd.f32 %v814_v8, %v713_v5  ;;  %v797_v11 = vpop.f32.mrf.mxu0  ;;  %v976_v12 = vpop.f32.mrf.mxu3 }
  0xd5   : > { %v798_v13 = vadd.f32 %v797_v11, %v696_v30 }
  0xd6   : > { %v901_v14 = vadd.f32 %v891_v9, %v815_v10 }
  0xd7   : > { %v894_v15 = vadd.f32 %v874_v31, %v798_v13 }
  0xd8   : > { %v986_v16 = vadd.f32 %v976_v12, %v901_v14 }
  0xd9   : > { %v979_v17 = vadd.f32 %v959_v32, %v894_v15 }
  0xda   : > { %996 = vst [vmem:[%s2070_s20 + $0x38] sm:$0xff] %v986_v16 }
  0xdb   : > { %989 = vst [vmem:[%s2070_s20] sm:$0xff] %v979_v17 }
  0xdc   : > { %v799_v18 = vpop.f32.mrf.mxu0 }
  0xdd   : > { %v800_v19 = vadd.f32 %v799_v18, %v698_v33 }
  0xdf   : > { %v895_v20 = vadd.f32 %v876_v34, %v800_v19  ;;  %1000 = sbr.rel (%p1651_p7) target bundleno = 894 (0x37e), region = 76 }
  0xe1   : > { %v980_v21 = vadd.f32 %v961_v35, %v895_v20 }
  0xe3   : > { %990 = vst [vmem:[%s2070_s20 + $0x8] sm:$0xff] %v980_v21 }
  0xe4   : > { %v1053_v22 = vld [vmem:[%s2391_s11 + $0x78] sm:$0xff]  ;;  %v1052_v23 = vld [vmem:[%s2391_s11 + $0x70] sm:$0xff]  ;;  %v1051_v24 = vld [vmem:[%s2391_s11 + $0x68] sm:$0xff] }
  0xe5   : > { %1054 = vmatpush.msra.mxu0 %v1053_v22  ;;  %1156 = vmatpush.msra.mxu2 %v1053_v22  ;;  %v1050_v25 = vld [vmem:[%s2391_s11 + $0x60] sm:$0xff]  ;;  %v1049_v28 = vld [vmem:[%s2391_s11 + $0x58] sm:$0xff]  ;;  %v1048_v32 = vld [vmem:[%s2391_s11 + $0x50] sm:$0xff] }
  0xe6   : > { %v1047_v35 = vld [vmem:[%s2391_s11 + $0x48] sm:$0xff]  ;;  %v1046_v38 = vld [vmem:[%s2391_s11 + $0x40] sm:$0xff]  ;;  %v1045_v41 = vld [vmem:[%s2391_s11 + $0x38] sm:$0xff] }
  0xe7   : > { %1055 = vmatpush.msra.mxu0 %v1052_v23  ;;  %1157 = vmatpush.msra.mxu2 %v1052_v23  ;;  %v1044_v44 = vld [vmem:[%s2391_s11 + $0x30] sm:$0xff]  ;;  %v1078_v46 = vld [vmem:[%s2392_s12 + $0x18] sm:$0xff]  ;;  %v1043_v49 = vld [vmem:[%s2391_s11 + $0x28] sm:$0xff] }
  0xe8   : > { %v1077_v47 = vld [vmem:[%s2392_s12 + $0x10] sm:$0xff]  ;;  %1094 = vmatpush.msra.mxu1 %v1078_v46  ;;  %1192 = vmatpush.msra.mxu3 %v1078_v46  ;;  %v1042_v52 = vld [vmem:[%s2391_s11 + $0x20] sm:$0xff]  ;;  %v1041_v55 = vld [vmem:[%s2391_s11 + $0x18] sm:$0xff] }
  0xe9   : > { %1056 = vmatpush.msra.mxu0 %v1051_v24  ;;  %1158 = vmatpush.msra.mxu2 %v1051_v24  ;;  %v1040_v58 = vld [vmem:[%s2391_s11 + $0x10] sm:$0xff]  ;;  %v1039_v61 = vld [vmem:[%s2391_s11 + $0x8] sm:$0xff]  ;;  %v1038_v0 = vld [vmem:[%s2391_s11] sm:$0xff] }
  0xea   : > { %v2093_v26 = vld [vmem:[#allocation2] sm:$0xff]  ;;  %v2095_v27 = vld [vmem:[#allocation2 + $0x8] sm:$0xff]  ;;  %v2100_v29 = vld [vmem:[#allocation2 + $0x10] sm:$0xff]  ;;  %1095 = vmatpush.msra.mxu1 %v1077_v47  ;;  %1193 = vmatpush.msra.mxu3 %v1077_v47 }
  0xeb   : > { %v1017_v30 = vadd.f32 %v2095_v27, %v2093_v26  ;;  %1057 = vmatpush.msra.mxu0 %v1050_v25  ;;  %v2104_v31 = vld [vmem:[#allocation2 + $0x18] sm:$0xff]  ;;  %1159 = vmatpush.msra.mxu2 %v1050_v25  ;;  %v2110_v34 = vld [vmem:[#allocation2 + $0x20] sm:$0xff]  ;;  %v2116_v37 = vld [vmem:[#allocation2 + $0x28] sm:$0xff] }
  0xec   : > { %v2122_v40 = vld [vmem:[#allocation2 + $0x30] sm:$0xff]  ;;  %v2128_v43 = vld [vmem:[#allocation2 + $0x38] sm:$0xff]  ;;  %v2140_v48 = vld [vmem:[#allocation2 + $0x40] sm:$0xff] }
  0xed   : > { %v1018_v33 = vadd.f32 %v1017_v30, %v2100_v29  ;;  %1058 = vmatpush.msra.mxu0 %v1049_v28  ;;  %1160 = vmatpush.msra.mxu2 %v1049_v28  ;;  %v2146_v51 = vld [vmem:[#allocation2 + $0x48] sm:$0xff]  ;;  %v2152_v54 = vld [vmem:[#allocation2 + $0x50] sm:$0xff]  ;;  %v2158_v57 = vld [vmem:[#allocation2 + $0x58] sm:$0xff] }
  0xee   : > { %v2164_v60 = vld [vmem:[#allocation2 + $0x60] sm:$0xff]  ;;  %v2170_v63 = vld [vmem:[#allocation2 + $0x68] sm:$0xff]  ;;  %v1015_v2 = vld [vmem:[#allocation2 + $0x70] sm:$0xff] }
  0xef   : > { %v1019_v36 = vadd.f32 %v1018_v33, %v2104_v31  ;;  %1059 = vmatpush.msra.mxu0 %v1048_v32  ;;  %1161 = vmatpush.msra.mxu2 %v1048_v32  ;;  %v1016_v4 = vld [vmem:[#allocation2 + $0x78] sm:$0xff]  ;;  %v1076_v13 = vld [vmem:[%s2392_s12 + $0x8] sm:$0xff]  ;;  %v1075_v14 = vld [vmem:[%s2392_s12] sm:$0xff] }
  0xf0   : > { %1096 = vmatpush.msra.mxu1 %v1076_v13  ;;  %1194 = vmatpush.msra.mxu3 %v1076_v13 }
  0xf1   : > { %v1020_v39 = vadd.f32 %v1019_v36, %v2110_v34  ;;  %1060 = vmatpush.msra.mxu0 %v1047_v35  ;;  %1162 = vmatpush.msra.mxu2 %v1047_v35 }
  0xf2   : > { %1097 = vmatpush.msra.mxu1 %v1075_v14  ;;  %1195 = vmatpush.msra.mxu3 %v1075_v14 }
  0xf3   : > { %v1021_v42 = vadd.f32 %v1020_v39, %v2116_v37  ;;  %1061 = vmatpush.msra.mxu0 %v1046_v38  ;;  %1163 = vmatpush.msra.mxu2 %v1046_v38 }
  0xf5   : > { %v1022_v45 = vadd.f32 %v1021_v42, %v2122_v40  ;;  %1062 = vmatpush.msra.mxu0 %v1045_v41  ;;  %1164 = vmatpush.msra.mxu2 %v1045_v41 }
  0xf7   : > { %v1023_v50 = vadd.f32 %v1022_v45, %v2128_v43  ;;  %1063 = vmatpush.msra.mxu0 %v1044_v44  ;;  %1165 = vmatpush.msra.mxu2 %v1044_v44 }
  0xf9   : > { %v1024_v53 = vadd.f32 %v1023_v50, %v2140_v48  ;;  %1064 = vmatpush.msra.mxu0 %v1043_v49  ;;  %1166 = vmatpush.msra.mxu2 %v1043_v49 }
  0xfb   : > { %v1025_v56 = vadd.f32 %v1024_v53, %v2146_v51  ;;  %1065 = vmatpush.msra.mxu0 %v1042_v52  ;;  %1167 = vmatpush.msra.mxu2 %v1042_v52 }
  0xfd   : > { %v1026_v59 = vadd.f32 %v1025_v56, %v2152_v54  ;;  %1066 = vmatpush.msra.mxu0 %v1041_v55  ;;  %1168 = vmatpush.msra.mxu2 %v1041_v55 }
  0xff   : > { %v1027_v62 = vadd.f32 %v1026_v59, %v2158_v57  ;;  %1067 = vmatpush.msra.mxu0 %v1040_v58  ;;  %1169 = vmatpush.msra.mxu2 %v1040_v58 }
 0x101   : > { %v1028_v1 = vadd.f32 %v1027_v62, %v2164_v60  ;;  %1068 = vmatpush.msra.mxu0 %v1039_v61  ;;  %1170 = vmatpush.msra.mxu2 %v1039_v61 }
 0x103   : > { %v1029_v3 = vadd.f32 %v1028_v1, %v2170_v63  ;;  %1069 = vmatpush.msra.mxu0 %v1038_v0  ;;  %1171 = vmatpush.msra.mxu2 %v1038_v0 }
 0x105   : > { %v1030_v5 = vadd.f32 %v1029_v3, %v1015_v2 }
 0x107   : > { %v1031_v6 = vadd.f32 %v1030_v5, %v1016_v4 }
 0x109   : > { %v1032_v7 = vrot.slane %v1031_v6, 4 }
 0x10b   : > { %v1033_v8 = vadd.f32 %v1032_v7, %v1031_v6 }
 0x10d   : > { %v1034_v9 = vrot.slane %v1033_v8, 2 }
 0x10f   : > { %v1035_v10 = vadd.f32 %v1034_v9, %v1033_v8 }
 0x111   : > { %v1036_v11 = vrot.slane %v1035_v10, 1 }
 0x113   : > { %v1037_v12 = vadd.f32 %v1036_v11, %v1035_v10 }
 0x115   : > { %1070 = vmatmul.f32.vlgmr.msra.gmra.mxu0 %v1037_v12 }
 0x192   : > { %v1071_v15 = vpop.f32.mrf.mxu0 }
 0x193   : > { %v1074_v16 = vmul.f32 0.001953125, %v1071_v15 }
 0x195   : > { %1652 = vmatmul.msk.f32.vlgmr.msra.gmra.mxu1 %vm674_vm0, %v1074_v16 }
 0x212   : > { %v1099_v17 = vpop.f32.mrf.mxu1 }
 0x213   : > { %v1102_v18 = vperm.slane %v1099_v17, 0  ;;  %v2264_v17 = vld [vmem:[%s1996_s15] sm:$0xff]  }
 0x215   : > { %v2185_v19 = vsub.f32 %v2093_v26, %v1102_v18  ;;  %v2188_v20 = vsub.f32 %v2095_v27, %v1102_v18  ;;  %v2191_v21 = vsub.f32 %v2100_v29, %v1102_v18  ;;  %v2198_v24 = vsub.f32 %v2104_v31, %v1102_v18 }
 0x216   : > { %v2201_v25 = vsub.f32 %v2110_v34, %v1102_v18  ;;  %v2206_v28 = vsub.f32 %v2116_v37, %v1102_v18  ;;  %v2211_v32 = vsub.f32 %v2122_v40, %v1102_v18  ;;  %v2216_v34 = vsub.f32 %v2128_v43, %v1102_v18 }
 0x217   : > { %v1119_v22 = vmul.f32 %v2185_v19, %v2185_v19  ;;  %v1120_v23 = vmul.f32 %v2188_v20, %v2188_v20  ;;  %v1121_v26 = vmul.f32 %v2191_v21, %v2191_v21  ;;  %v1122_v29 = vmul.f32 %v2198_v24, %v2198_v24 }
 0x218   : > { %v1123_v31 = vmul.f32 %v2201_v25, %v2201_v25  ;;  %v1124_v35 = vmul.f32 %v2206_v28, %v2206_v28  ;;  %v2221_v37 = vsub.f32 %v2140_v48, %v1102_v18  ;;  %v1125_v38 = vmul.f32 %v2211_v32, %v2211_v32 }
 0x219   : > { %v1135_v27 = vadd.f32 %v1120_v23, %v1119_v22  ;;  %v2226_v40 = vsub.f32 %v2146_v51, %v1102_v18  ;;  %v1126_v41 = vmul.f32 %v2216_v34, %v2216_v34  ;;  %v2231_v43 = vsub.f32 %v2152_v54, %v1102_v18  ;;  %v1210_v22 = vld [vmem:[%s2389_s9] sm:$0x1]  ;;  %v2270_v23 = vld [vmem:[%s1996_s15 + $0x8] sm:$0xff]  }
 0x21a   : > { %v1127_v44 = vmul.f32 %v2221_v37, %v2221_v37  ;;  %v2236_v46 = vsub.f32 %v2158_v57, %v1102_v18  ;;  %v2241_v49 = vsub.f32 %v2164_v60, %v1102_v18  ;;  %v2246_v52 = vsub.f32 %v2170_v63, %v1102_v18 }
 0x21b   : > { %v1136_v30 = vadd.f32 %v1135_v27, %v1121_v26  ;;  %v1128_v47 = vmul.f32 %v2226_v40, %v2226_v40  ;;  %v1129_v50 = vmul.f32 %v2231_v43, %v2231_v43  ;;  %v2250_v55 = vsub.f32 %v1015_v2, %v1102_v18  ;;  %v2273_v26 = vld [vmem:[%s1996_s15 + $0x10] sm:$0xff]   ;;  %v2276_v27 = vld [vmem:[%s1996_s15 + $0x18] sm:$0xff]  }
 0x21c   : > { %v1130_v53 = vmul.f32 %v2236_v46, %v2236_v46  ;;  %v1131_v56 = vmul.f32 %v2241_v49, %v2241_v49  ;;  %v2254_v58 = vsub.f32 %v1016_v4, %v1102_v18  ;;  %v1132_v59 = vmul.f32 %v2246_v52, %v2246_v52 }
 0x21d   : > { %v1137_v33 = vadd.f32 %v1136_v30, %v1122_v29  ;;  %v1133_v61 = vmul.f32 %v2250_v55, %v2250_v55  ;;  %v2279_v29 = vld [vmem:[%s1996_s15 + $0x20] sm:$0xff]  }
 0x21e   : > { %v1134_v63 = vmul.f32 %v2254_v58, %v2254_v58 }
 0x21f   : > { %v1138_v36 = vadd.f32 %v1137_v33, %v1123_v31  ;;  %v1690_v31 = vunpack.c.l.bf16 %v2264_v17  ;;  %v1691_v33 = vunpack.c.h.bf16 %v2264_v17 }
 0x221   : > { %v1139_v39 = vadd.f32 %v1138_v36, %v1124_v35  ;;  %v2284_v35 = vld [vmem:[%s1996_s15 + $0x28] sm:$0xff]  }
 0x223   : > { %v1140_v42 = vadd.f32 %v1139_v39, %v1125_v38  ;;  %v1694_v38 = vunpack.c.l.bf16 %v2270_v23  ;;  %v1695_v39 = vunpack.c.h.bf16 %v2270_v23 }
 0x225   : > { %v1141_v45 = vadd.f32 %v1140_v42, %v1126_v41  ;;  %v1698_v41 = vunpack.c.l.bf16 %v2273_v26  ;;  %v2290_v42 = vld [vmem:[%s1996_s15 + $0x30] sm:$0xff]  }
 0x227   : > { %v1142_v48 = vadd.f32 %v1141_v45, %v1127_v44  ;;  %v2293_v44 = vld [vmem:[%s1996_s15 + $0x38] sm:$0xff]   ;;  %v1699_v45 = vunpack.c.h.bf16 %v2273_v26 }
 0x229   : > { %v1143_v51 = vadd.f32 %v1142_v48, %v1128_v47  ;;  %v1702_v47 = vunpack.c.l.bf16 %v2276_v27  ;;  %v1703_v48 = vunpack.c.h.bf16 %v2276_v27 }
 0x22b   : > { %v1144_v54 = vadd.f32 %v1143_v51, %v1129_v50  ;;  %v1706_v50 = vunpack.c.l.bf16 %v2279_v29 }
 0x22d   : > { %v1145_v57 = vadd.f32 %v1144_v54, %v1130_v53  ;;  %v1707_v53 = vunpack.c.h.bf16 %v2279_v29  ;;  %v1710_v54 = vunpack.c.l.bf16 %v2284_v35 }
 0x22f   : > { %v1146_v60 = vadd.f32 %v1145_v57, %v1131_v56  ;;  %v1711_v56 = vunpack.c.h.bf16 %v2284_v35  ;;  %v1714_v57 = vunpack.c.l.bf16 %v2290_v42 }
 0x231   : > { %v1147_v62 = vadd.f32 %v1146_v60, %v1132_v59  ;;  %v1715_v59 = vunpack.c.h.bf16 %v2290_v42  ;;  %v1718_v60 = vunpack.c.l.bf16 %v2293_v44 }
 0x233   : > { %v1148_v0 = vadd.f32 %v1147_v62, %v1133_v61  ;;  %v1719_v61 = vunpack.c.h.bf16 %v2293_v44 }
 0x235   : > { %v1149_v1 = vadd.f32 %v1148_v0, %v1134_v63 }
 0x237   : > { %v1150_v2 = vrot.slane %v1149_v1, 4 }
 0x239   : > { %v1151_v3 = vadd.f32 %v1150_v2, %v1149_v1  ;;  %v1822_v2 = vld [vmem:[%s2390_s10] ss:$0 sm:$0xff] }
 0x23b   : > { %v1152_v5 = vrot.slane %v1151_v3, 2 }
 0x23d   : > { %v1153_v6 = vadd.f32 %v1152_v5, %v1151_v3 }
 0x23f   : > { %v1154_v4 = vrot.slane %v1153_v6, 1 }
 0x241   : > { %v1155_v7 = vadd.f32 %v1154_v4, %v1153_v6 }
 0x243   : > { %1172 = vmatmul.f32.vlgmr.msra.gmra.mxu2 %v1155_v7 }
 0x2c6   : > { %v1173_v8 = vpop.f32.mrf.mxu2 }
 0x2c7   : > { %v1176_v9 = vmul.f32 0.001953125, %v1173_v8 }
 0x2c9   : > { %1653 = vmatmul.msk.f32.vlgmr.msra.gmra.mxu3 %vm674_vm0, %v1176_v9 }
 0x34c   : > { %v1197_v10 = vpop.f32.mrf.mxu3 }
 0x34d   : > { %v1198_v11 = vadd.f32 1e-05, %v1197_v10 }
 0x34f   : > { %1823 = vrsqrt.f32 %v1198_v11  ;;  %vm1206_vm2 = vweird.f32 %v1198_v11 }
 0x355   : > { %v1824_v12 = vpop.eup %1823 }
 0x356   : > { %v1201_v13 = vmul.f32 %v1824_v12, %v1198_v11  ;;  %vm1207_vm1 = vweird.f32 %v1824_v12 }
 0x357   : > { %vm1208_vm3 = vmor %vm1206_vm2, %vm1207_vm1 }
 0x358   : > { %v1202_v14 = vmul.f32 %v1824_v12, %v1201_v13 }
 0x35a   : > { %v1203_v15 = vmul.f32 0.5, %v1202_v14 }
 0x35c   : > { %v1204_v16 = vsub.f32 1.5, %v1203_v15 }
 0x35e   : > { %v1205_v18 = vmul.f32 %v1824_v12, %v1204_v16 }
 0x360   : > { %v1209_v30 = vsel %vm1208_vm3, %v1824_v12, %v1205_v18 }
 0x361   : > { %v1211_v36 = vmul.f32 %v1210_v22, %v1209_v30 }
 0x363   : > { %v1212_v51 = vperm.slane %v1211_v36, 0 }
 0x365   : > { %v1213_v62 = vmul.f32 %v1212_v51, %v2185_v19  ;;  %v1214_v63 = vmul.f32 %v1212_v51, %v2188_v20  ;;  %v1215_v0 = vmul.f32 %v1212_v51, %v2191_v21  ;;  %v1216_v1 = vmul.f32 %v1212_v51, %v2198_v24 }
 0x366   : > { %v1217_v3 = vmul.f32 %v1212_v51, %v2201_v25  ;;  %v1218_v5 = vmul.f32 %v1212_v51, %v2206_v28  ;;  %v1219_v6 = vmul.f32 %v1212_v51, %v2211_v32  ;;  %v1220_v4 = vmul.f32 %v1212_v51, %v2216_v34 }
 0x367   : > { %v1221_v19 = vmul.f32 %v1212_v51, %v2221_v37  ;;  %v1222_v20 = vmul.f32 %v1212_v51, %v2226_v40  ;;  %v1223_v21 = vmul.f32 %v1212_v51, %v2231_v43  ;;  %v1224_v24 = vmul.f32 %v1212_v51, %v2236_v46 }
 0x368   : > { %v1225_v7 = vmul.f32 %v1212_v51, %v2241_v49  ;;  %v1226_v8 = vmul.f32 %v1212_v51, %v2246_v52  ;;  %v1227_v25 = vmul.f32 %v1212_v51, %v2250_v55  ;;  %v1228_v28 = vmul.f32 %v1212_v51, %v2254_v58 }
 0x369   : > { %v1233_v9 = vadd.f32 %v1822_v2, %v1213_v62  ;;  %v1234_v32 = vadd.f32 %v1822_v2, %v1214_v63  ;;  %v1235_v10 = vadd.f32 %v1822_v2, %v1215_v0  ;;  %v1236_v34 = vadd.f32 %v1822_v2, %v1216_v1 }
 0x36a   : > { %v1237_v11 = vadd.f32 %v1822_v2, %v1217_v3  ;;  %v1238_v37 = vadd.f32 %v1822_v2, %v1218_v5  ;;  %v1239_v12 = vadd.f32 %v1822_v2, %v1219_v6  ;;  %v1240_v40 = vadd.f32 %v1822_v2, %v1220_v4 }
 0x36b   : > { %v1241_v13 = vadd.f32 %v1822_v2, %v1221_v19  ;;  %v1242_v43 = vadd.f32 %v1822_v2, %v1222_v20  ;;  %v1243_v14 = vadd.f32 %v1822_v2, %v1223_v21  ;;  %v1244_v46 = vadd.f32 %v1822_v2, %v1224_v24 }
 0x36c   : > { %v1245_v15 = vadd.f32 %v1822_v2, %v1225_v7  ;;  %v1246_v49 = vadd.f32 %v1822_v2, %v1226_v8  ;;  %v1247_v16 = vadd.f32 %v1822_v2, %v1227_v25  ;;  %v1248_v52 = vadd.f32 %v1822_v2, %v1228_v28 }
 0x36d   : > { %v1249_v18 = vmax.f32 %v1233_v9, 0.0  ;;  %v1250_v55 = vmax.f32 %v1234_v32, 0.0  ;;  %v1251_v22 = vmax.f32 %v1235_v10, 0.0  ;;  %v1252_v58 = vmax.f32 %v1236_v34, 0.0 }
 0x36e   : > { %v1253_v30 = vmax.f32 %v1237_v11, 0.0  ;;  %v1254_v36 = vmax.f32 %v1238_v37, 0.0  ;;  %v1255_v51 = vmax.f32 %v1239_v12, 0.0  ;;  %v1256_v62 = vmax.f32 %v1240_v40, 0.0 }
 0x36f   : > { %v1257_v63 = vmax.f32 %v1241_v13, 0.0  ;;  %v1258_v0 = vmax.f32 %v1242_v43, 0.0  ;;  %v1259_v1 = vmax.f32 %v1243_v14, 0.0  ;;  %v1260_v3 = vmax.f32 %v1244_v46, 0.0 }
 0x370   : > { %v1261_v5 = vmax.f32 %v1245_v15, 0.0  ;;  %v1262_v6 = vmax.f32 %v1246_v49, 0.0  ;;  %v1263_v4 = vmax.f32 %v1247_v16, 0.0  ;;  %v1264_v19 = vmax.f32 %v1248_v52, 0.0 }
 0x371   : > { %v1297_v20 = vadd.f32 %v1690_v31, %v1249_v18  ;;  %v1298_v2 = vadd.f32 %v1691_v33, %v1250_v55  ;;  %v1299_v21 = vadd.f32 %v1694_v38, %v1251_v22  ;;  %v1300_v24 = vadd.f32 %v1695_v39, %v1252_v58 }
 0x372   : > { %v1301_v7 = vadd.f32 %v1698_v41, %v1253_v30  ;;  %v1302_v8 = vadd.f32 %v1699_v45, %v1254_v36  ;;  %v1303_v25 = vadd.f32 %v1702_v47, %v1255_v51  ;;  %v1304_v17 = vadd.f32 %v1703_v48, %v1256_v62 }
 0x373   : > { %v1305_v31 = vadd.f32 %v1706_v50, %v1257_v63  ;;  %v1306_v23 = vadd.f32 %v1707_v53, %v1258_v0  ;;  %v1307_v33 = vadd.f32 %v1710_v54, %v1259_v1  ;;  %v1308_v26 = vadd.f32 %v1711_v56, %v1260_v3 }
 0x374   : > { %v1309_v38 = vadd.f32 %v1714_v57, %v1261_v5  ;;  %v1310_v27 = vadd.f32 %v1715_v59, %v1262_v6  ;;  %v1723_v39 = vpack.c.bf16 %v1298_v2, %v1297_v20  ;;  %v1728_v29 = vpack.c.bf16 %v1300_v24, %v1299_v21 }
 0x375   : > { %v1733_v41 = vpack.c.bf16 %v1302_v8, %v1301_v7  ;;  %v1311_v45 = vadd.f32 %v1718_v60, %v1263_v4  ;;  %v1312_v35 = vadd.f32 %v1719_v61, %v1264_v19  ;;  %v1738_v47 = vpack.c.bf16 %v1304_v17, %v1303_v25 }
 0x376   : > { %1724 = vst [vmem:[%s2001_s18] sm:$0xff] %v1723_v39   ;;  %v1743_v48 = vpack.c.bf16 %v1306_v23, %v1305_v31  ;;  %v1748_v50 = vpack.c.bf16 %v1308_v26, %v1307_v33  ;;  %v1753_v42 = vpack.c.bf16 %v1310_v27, %v1309_v38 }
 0x377   : > { %1767 = vst [vmem:[%s2001_s18 + $0x8] sm:$0xff] %v1728_v29   ;;  %v1758_v53 = vpack.c.bf16 %v1312_v35, %v1311_v45 }
 0x378   : > { %1768 = vst [vmem:[%s2001_s18 + $0x10] sm:$0xff] %v1733_v41  }
 0x379   : > { %1769 = vst [vmem:[%s2001_s18 + $0x18] sm:$0xff] %v1738_v47  }
 0x37a   : > { %1770 = vst [vmem:[%s2001_s18 + $0x20] sm:$0xff] %v1743_v48  }
 0x37b   : > { %1771 = vst [vmem:[%s2001_s18 + $0x28] sm:$0xff] %v1748_v50  }
 0x37c   : > { %1772 = vst [vmem:[%s2001_s18 + $0x30] sm:$0xff] %v1753_v42  }
 0x37d   : > { %1773 = vst [vmem:[%s2001_s18 + $0x38] sm:$0xff] %v1758_v53  }
 0x37e PF: > { %s23_s29 = sadd.s32 1, %s1863_s29   ;;  %s2400_s26 = sld [smem:[#allocation3_spill]] }
 0x37f   : > { %p20_p8 = scmp.ge.s32.totalorder %s23_s29, 6   ;;  %s2401_s24 = sld [smem:[#allocation4_spill]] }
 0x380   : > { %s2402_s28 = sld [smem:[#allocation5_spill]]  ;;  %s2403_s25 = smov %s1855_s27 }
 0x381   :  { %22 = sbr.rel (!%p20_p8) target bundleno = 3 (0x3), region = 119 }
 0x385   : > { %s2404_s27 = smov %s2401_s24 }

// kernel: sfe_forward.14
= control target key start
LH: loop header
LB: loop body
LE: loop exit
PB: predicated region body
PF: predicated region fallthrough
CT: control target
= control target key end

     0   :  { %s2328_s21 = smov 0   ;;  %s2330_s22 = smov 0   ;;  %s2920_s0 = inlined_call_operand.vmem [shape: bf16[2,2,8,8,128], index: 0, kind: input, shape index: {}]   ;;  %s2921_s1 = inlined_call_operand.vmem [shape: bf16[3,384,128], index: 1, kind: input, shape index: {}]   ;;  %s2922_s2 = inlined_call_operand.vmem [shape: f32[1,128], index: 2, kind: input, shape index: {}]   ;;  %s2923_s3 = inlined_call_operand.vmem [shape: f32[1,128], index: 3, kind: input, shape index: {}]   ;;  %s2924_s4 = inlined_call_operand.vmem [shape: f32[128,32], index: 4, kind: input, shape index: {}]   ;;  %s2925_s5 = inlined_call_operand.vmem [shape: f32[32,128], index: 5, kind: input, shape index: {}]   ;;  %s2926_s6 = inlined_call_operand.vmem [shape: bf16[2,128,128], index: 6, kind: output, shape index: {}]  }
   0x1   :  { %s2332_s23 = smov 0   ;;  %s2334_s24 = smov 0  }
   0x2   :  { %s2336_s25 = smov 0  }
   0x3 LB: > { %s25_s26 = sadd.s32 1, %s2282_s23  ;;  %s28_s27 = sadd.s32 1, %s2286_s24  ;;  %s2290_s25 = sphi %s2336_s25, %s16_s25   ;;  %s2286_s24 = sphi %s2334_s24, %s2930_s24   ;;  %s2282_s23 = sphi %s2332_s23, %s2929_s23   ;;  %s2278_s22 = sphi %s2330_s22, %s2928_s22   ;;  %s2274_s21 = sphi %s2328_s21, %s2927_s21  }
   0x4   : > { %p26_p0 = scmp.ge.s32.totalorder %s25_s26, 2  ;;  %p1636_p1 = scmp.ge.s32.totalorder %s2290_s25, 1 }
   0x5   : > { %p230_p2 = scmp.lt.s32.totalorder %s2290_s25, 5 }
   0x6   : > { %s2932_s26 = smov (%p26_p0, %s25_s26), 0  ;;  %s2934_s27 = smov (!%p26_p0, %s28_s27), %s2286_s24 }
   0x7   : > { %p231_p3 = pnand %p1636_p1, %p230_p2  ;;  %p30_p4 = scmp.ge.s32.totalorder %s2934_s27, 2 }
   0x8   : > { %p264_p5 = scmp.lt.s32.totalorder (!%p231_p3), %s2278_s22, 1  ;;  %p266_p6 = scmp.lt.s32.totalorder (!%p231_p3), %s2274_s21, 1 }
   0x9   : > { %s2936_s27 = smov (%p30_p4, %s2934_s27), 0  ;;  %234 = sbr.rel (%p231_p3) target bundleno = 994 (0x3e2), region = 44 }
   0xa   : > { %p2027_p7 = scmp.ne.s32.totalorder (!%p231_p3), %s2274_s21, 1 }
   0xe   : > { %v2040_v0 = vld [vmem:[%s2921_s1 + $0x38] sm:$0xff]  ;;  %v2039_v3 = vld [vmem:[%s2921_s1 + $0x30] sm:$0xff]  ;;  %s2938_s22 = smov (!%p264_p5, %s2278_s22), 1  ;;  %v2038_v6 = vld [vmem:[%s2921_s1 + $0x28] sm:$0xff]  ;;  %v2292_v23 = vmov 0   ;;  %vm1186_vm0 = vcmask 1040384  }
   0xf   : > { %v2056_v1 = vld [vmem:[%s2921_s1 + $0xb8] sm:$0xff]  ;;  %515 = vmatpush.bf16.msra.mxu0 %v2040_v0  ;;  %2186 = vmatpush.bf16.msra.mxu1 %v2040_v0  ;;  %v2055_v4 = vld [vmem:[%s2921_s1 + $0xb0] sm:$0xff]  ;;  %s2032_s16 = sshll.u32 %s2938_s22, 6  ;;  %v2054_v7 = vld [vmem:[%s2921_s1 + $0xa8] sm:$0xff]  ;;  %s1638_s13 = sshll.u32 %s2938_s22, 4  ;;  %v2441_v24 = vunpack.c.l.b16 %v2292_v23  ;;  %vm1227_vm1 = vcmask 1046528  }
  0x10   : > { %v2064_v2 = vld [vmem:[%s2921_s1 + $0xf8] sm:$0xff]  ;;  %573 = vmatpush.bf16.msra.mxu2 %v2056_v1  ;;  %v2063_v5 = vld [vmem:[%s2921_s1 + $0xf0] sm:$0xff]  ;;  %s2382_s19 = scalar_lea.vmem %s2926_s6, %s2032_s16  ;;  %v2062_v8 = vld [vmem:[%s2921_s1 + $0xe8] sm:$0xff] }
  0x11   : > { %795 = vmatpush.bf16.msra.mxu3 %v2064_v2  ;;  %s267_s29 = scalar_select %p266_p6, %s2274_s21, 1  ;;  %v2037_v9 = vld [vmem:[%s2921_s1 + $0x20] sm:$0xff]  ;;  %v2036_v12 = vld [vmem:[%s2921_s1 + $0x18] sm:$0xff]  ;;  %v2035_v15 = vld [vmem:[%s2921_s1 + $0x10] sm:$0xff] }
  0x12   : > { %v2053_v10 = vld [vmem:[%s2921_s1 + $0xa0] sm:$0xff]  ;;  %v2052_v13 = vld [vmem:[%s2921_s1 + $0x98] sm:$0xff]  ;;  %v2051_v16 = vld [vmem:[%s2921_s1 + $0x90] sm:$0xff] }
  0x13   : > { %516 = vmatpush.bf16.msra.mxu0 %v2039_v3  ;;  %2187 = vmatpush.bf16.msra.mxu1 %v2039_v3  ;;  %s1637_s12 = sshll.u32 %s267_s29, 3  ;;  %v2061_v11 = vld [vmem:[%s2921_s1 + $0xe0] sm:$0xff]  ;;  %v2060_v14 = vld [vmem:[%s2921_s1 + $0xd8] sm:$0xff]  ;;  %v2059_v17 = vld [vmem:[%s2921_s1 + $0xd0] sm:$0xff] }
  0x14   : > { %574 = vmatpush.bf16.msra.mxu2 %v2055_v4  ;;  %s270_s18 = sadd.s32 %s1638_s13, %s1637_s12  ;;  %v2034_v18 = vld [vmem:[%s2921_s1 + $0x8] sm:$0xff]  ;;  %v2033_v25 = vld [vmem:[%s2921_s1] sm:$0xff]  ;;  %v2048_v28 = vld [vmem:[%s2921_s1 + $0x78] sm:$0xff] }
  0x15   : > { %796 = vmatpush.bf16.msra.mxu3 %v2063_v5  ;;  %s1639_s8 = sshll.u32 %s270_s18, 2  ;;  %v2050_v20 = vld [vmem:[%s2921_s1 + $0x88] sm:$0xff]  ;;  %v2049_v26 = vld [vmem:[%s2921_s1 + $0x80] sm:$0xff]  ;;  %v2072_v29 = vld [vmem:[%s2921_s1 + $0x138] sm:$0xff] }
  0x16   : > { %s2426_s17 = scalar_lea.vmem %s2920_s0, %s1639_s8  ;;  %v2058_v21 = vld [vmem:[%s2921_s1 + $0xc8] sm:$0xff]  ;;  %v2057_v27 = vld [vmem:[%s2921_s1 + $0xc0] sm:$0xff]  ;;  %v2088_v33 = vld [vmem:[%s2921_s1 + $0x1b8] sm:$0xff] }
  0x17   : > { %517 = vmatpush.bf16.msra.mxu0 %v2038_v6  ;;  %2188 = vmatpush.bf16.msra.mxu1 %v2038_v6  ;;  %v2432_v19 = vld [vmem:[%s2426_s17] sm:$0xff]   ;;  %v2462_v31 = vld [vmem:[%s2426_s17 + $0xc] sm:$0xff]   ;;  %v2096_v34 = vld [vmem:[%s2921_s1 + $0x1f8] sm:$0xff] }
  0x18   : > { %575 = vmatpush.bf16.msra.mxu2 %v2054_v7  ;;  %v2107_v22 = vunpack.c.l.b16 %v2432_v19  ;;  %v2465_v32 = vld [vmem:[%s2426_s17 + $0x4] sm:$0xff]   ;;  %v2047_v35 = vld [vmem:[%s2921_s1 + $0x70] sm:$0xff]  ;;  %v2044_v47 = vld [vmem:[%s2921_s1 + $0x58] sm:$0xff] }
  0x19   : > { %797 = vmatpush.bf16.msra.mxu3 %v2062_v8  ;;  %v2071_v36 = vld [vmem:[%s2921_s1 + $0x130] sm:$0xff]  ;;  %v2046_v39 = vld [vmem:[%s2921_s1 + $0x68] sm:$0xff]  ;;  %v2045_v43 = vld [vmem:[%s2921_s1 + $0x60] sm:$0xff] }
  0x1a   : > { %v2459_v30 = vpack.c.b16 %v2107_v22, %v2441_v24  ;;  %v2087_v37 = vld [vmem:[%s2921_s1 + $0x1b0] sm:$0xff]  ;;  %v2070_v40 = vld [vmem:[%s2921_s1 + $0x128] sm:$0xff]  ;;  %v2069_v44 = vld [vmem:[%s2921_s1 + $0x120] sm:$0xff] }
  0x1b   : > { %518 = vmatpush.bf16.msra.mxu0 %v2037_v9  ;;  %2189 = vmatpush.bf16.msra.mxu1 %v2037_v9  ;;  %v2095_v38 = vld [vmem:[%s2921_s1 + $0x1f0] sm:$0xff]  ;;  %v2086_v41 = vld [vmem:[%s2921_s1 + $0x1a8] sm:$0xff]  ;;  %v2085_v45 = vld [vmem:[%s2921_s1 + $0x1a0] sm:$0xff] }
  0x1c   : > { %576 = vmatpush.bf16.msra.mxu2 %v2053_v10  ;;  %v2094_v42 = vld [vmem:[%s2921_s1 + $0x1e8] sm:$0xff]  ;;  %v2093_v46 = vld [vmem:[%s2921_s1 + $0x1e0] sm:$0xff]  ;;  %v2068_v48 = vld [vmem:[%s2921_s1 + $0x118] sm:$0xff] }
  0x1d   : > { %798 = vmatpush.bf16.msra.mxu3 %v2061_v11  ;;  %v2520_v49 = vld [vmem:[%s2426_s17 + $0x14] sm:$0xff]   ;;  %v2042_v55 = vld [vmem:[%s2921_s1 + $0x48] sm:$0xff]  ;;  %v2041_v59 = vld [vmem:[%s2921_s1 + $0x40] sm:$0xff] }
  0x1e   : > { %v2084_v50 = vld [vmem:[%s2921_s1 + $0x198] sm:$0xff]  ;;  %v2043_v51 = vld [vmem:[%s2921_s1 + $0x50] sm:$0xff]  ;;  %v2066_v56 = vld [vmem:[%s2921_s1 + $0x108] sm:$0xff] }
  0x1f   : > { %519 = vmatpush.bf16.msra.mxu0 %v2036_v12  ;;  %2190 = vmatpush.bf16.msra.mxu1 %v2036_v12  ;;  %v2067_v52 = vld [vmem:[%s2921_s1 + $0x110] sm:$0xff]  ;;  %v2092_v53 = vld [vmem:[%s2921_s1 + $0x1d8] sm:$0xff]  ;;  %v2082_v58 = vld [vmem:[%s2921_s1 + $0x188] sm:$0xff] }
  0x20   : > { %577 = vmatpush.bf16.msra.mxu2 %v2052_v13  ;;  %v2083_v54 = vld [vmem:[%s2921_s1 + $0x190] sm:$0xff]  ;;  %v2065_v60 = vld [vmem:[%s2921_s1 + $0x100] sm:$0xff]  ;;  %v2080_v61 = vld [vmem:[%s2921_s1 + $0x178] sm:$0xff] }
  0x21   : > { %799 = vmatpush.bf16.msra.mxu3 %v2060_v14  ;;  %v2091_v57 = vld [vmem:[%s2921_s1 + $0x1d0] sm:$0xff]  ;;  %v2104_v62 = vld [vmem:[%s2921_s1 + $0x238] sm:$0xff]  ;;  %v2090_v63 = vld [vmem:[%s2921_s1 + $0x1c8] sm:$0xff] }
  0x22   : > { %v2081_v0 = vld [vmem:[%s2921_s1 + $0x180] sm:$0xff]  ;;  %v2079_v1 = vld [vmem:[%s2921_s1 + $0x170] sm:$0xff]  ;;  %v2078_v4 = vld [vmem:[%s2921_s1 + $0x168] sm:$0xff] }
  0x23   : > { %520 = vmatpush.bf16.msra.mxu0 %v2035_v15  ;;  %2191 = vmatpush.bf16.msra.mxu1 %v2035_v15  ;;  %v2103_v2 = vld [vmem:[%s2921_s1 + $0x230] sm:$0xff]  ;;  %v2089_v3 = vld [vmem:[%s2921_s1 + $0x1c0] sm:$0xff]  ;;  %v2102_v5 = vld [vmem:[%s2921_s1 + $0x228] sm:$0xff] }
  0x24   : > { %578 = vmatpush.bf16.msra.mxu2 %v2051_v16  ;;  %v2163_v6 = vld [vmem:[%s2426_s17 + $0x18] sm:$0xff]   ;;  %v2077_v7 = vld [vmem:[%s2921_s1 + $0x160] sm:$0xff]  ;;  %v2161_v12 = vld [vmem:[%s2426_s17 + $0x8] sm:$0xff]  }
  0x25   : > { %800 = vmatpush.bf16.msra.mxu3 %v2059_v17  ;;  %v2101_v8 = vld [vmem:[%s2921_s1 + $0x220] sm:$0xff]  ;;  %v2120_v9 = vunpack.c.h.b16 %v2163_v6  ;;  %v2076_v10 = vld [vmem:[%s2921_s1 + $0x158] sm:$0xff]  ;;  %v2075_v14 = vld [vmem:[%s2921_s1 + $0x150] sm:$0xff] }
  0x26   : > { %v2100_v11 = vld [vmem:[%s2921_s1 + $0x218] sm:$0xff]  ;;  %v2099_v15 = vld [vmem:[%s2921_s1 + $0x210] sm:$0xff]  ;;  %v2074_v16 = vld [vmem:[%s2921_s1 + $0x148] sm:$0xff] }
  0x27   : > { %521 = vmatpush.bf16.msra.mxu0 %v2034_v18  ;;  %2192 = vmatpush.bf16.msra.mxu1 %v2034_v18  ;;  %v361_v13 = vpack.c.b16 %v2441_v24, %v2120_v9  ;;  %v2098_v17 = vld [vmem:[%s2921_s1 + $0x208] sm:$0xff]  ;;  %v2073_v18 = vld [vmem:[%s2921_s1 + $0x140] sm:$0xff] }
  0x28   : > { %579 = vmatpush.bf16.msra.mxu2 %v2050_v20  ;;  %v2097_v20 = vld [vmem:[%s2921_s1 + $0x200] sm:$0xff] }
  0x29   : > { %801 = vmatpush.bf16.msra.mxu3 %v2058_v21  ;;  %v2162_v21 = vld [vmem:[%s2426_s17 + $0x10] sm:$0xff]   ;;  %s2026_s17 = sshll.u32 %s2274_s21, 6 }
  0x2a   : > { %s2681_s13 = scalar_lea.vmem [#allocation2], %s2026_s17 }
  0x2b   : > { %522 = vmatpush.bf16.msra.mxu0 %v2033_v25  ;;  %2193 = vmatpush.bf16.msra.mxu1 %v2033_v25 }
  0x2c   : > { %580 = vmatpush.bf16.msra.mxu2 %v2049_v26 }
  0x2d   : > { %802 = vmatpush.bf16.msra.mxu3 %v2057_v27 }
  0x2e   : > { %523 = vmatmul.bf16.vlgmr.msra.gmra.mxu0 %v2459_v30  ;;  %533 = vmatmul.bf16.vlgmr.msra.gmra.mxu1 %v2462_v31 }
  0x2f   : > { %544 = vmatpush.bf16.msrb.mxu1 %v2048_v28  ;;  %824 = vmatpush.bf16.msrb.mxu0 %v2072_v29 }
  0x30   : > { %581 = vmatmul.bf16.vlgmr.msra.gmra.mxu2 %v2465_v32  ;;  %803 = vmatmul.bf16.vlgmr.msra.gmra.mxu3 %v2459_v30 }
  0x31   : > { %1075 = vmatpush.bf16.msrb.mxu2 %v2088_v33  ;;  %1104 = vmatpush.bf16.msrb.mxu3 %v2096_v34 }
  0x33   : > { %545 = vmatpush.bf16.msrb.mxu1 %v2047_v35  ;;  %825 = vmatpush.bf16.msrb.mxu0 %v2071_v36 }
  0x35   : > { %1076 = vmatpush.bf16.msrb.mxu2 %v2087_v37  ;;  %1105 = vmatpush.bf16.msrb.mxu3 %v2095_v38 }
  0x37   : > { %546 = vmatpush.bf16.msrb.mxu1 %v2046_v39  ;;  %826 = vmatpush.bf16.msrb.mxu0 %v2070_v40 }
  0x39   : > { %1077 = vmatpush.bf16.msrb.mxu2 %v2086_v41  ;;  %1106 = vmatpush.bf16.msrb.mxu3 %v2094_v42 }
  0x3b   : > { %547 = vmatpush.bf16.msrb.mxu1 %v2045_v43  ;;  %827 = vmatpush.bf16.msrb.mxu0 %v2069_v44 }
  0x3d   : > { %1078 = vmatpush.bf16.msrb.mxu2 %v2085_v45  ;;  %1107 = vmatpush.bf16.msrb.mxu3 %v2093_v46 }
  0x3e   : > { %528 = vmatmul.bf16.gmra.mxu0 %v2465_v32  ;;  %538 = vmatmul.bf16.gmra.mxu1 %v2520_v49 }
  0x3f   : > { %548 = vmatpush.bf16.msrb.mxu1 %v2044_v47  ;;  %828 = vmatpush.bf16.msrb.mxu0 %v2068_v48 }
  0x40   : > { %586 = vmatmul.bf16.gmra.mxu2 %v2462_v31  ;;  %808 = vmatmul.bf16.gmra.mxu3 %v2465_v32 }
  0x41   : > { %1079 = vmatpush.bf16.msrb.mxu2 %v2084_v50  ;;  %1108 = vmatpush.bf16.msrb.mxu3 %v2092_v53 }
  0x43   : > { %549 = vmatpush.bf16.msrb.mxu1 %v2043_v51  ;;  %829 = vmatpush.bf16.msrb.mxu0 %v2067_v52 }
  0x45   : > { %1080 = vmatpush.bf16.msrb.mxu2 %v2083_v54  ;;  %1109 = vmatpush.bf16.msrb.mxu3 %v2091_v57 }
  0x47   : > { %550 = vmatpush.bf16.msrb.mxu1 %v2042_v55  ;;  %830 = vmatpush.bf16.msrb.mxu0 %v2066_v56 }
  0x49   : > { %1081 = vmatpush.bf16.msrb.mxu2 %v2082_v58  ;;  %1110 = vmatpush.bf16.msrb.mxu3 %v2090_v63 }
  0x4b   : > { %551 = vmatpush.bf16.msrb.mxu1 %v2041_v59  ;;  %831 = vmatpush.bf16.msrb.mxu0 %v2065_v60 }
  0x4d   : > { %1082 = vmatpush.bf16.msrb.mxu2 %v2081_v0  ;;  %1111 = vmatpush.bf16.msrb.mxu3 %v2089_v3 }
  0x4e   : > { %552 = vmatmul.bf16.vlgmr.msrb.gmra.mxu1 %v2432_v19  ;;  %832 = vmatmul.bf16.vlgmr.msrb.gmra.mxu0 %v2432_v19 }
  0x4f   : > { %853 = vmatpush.bf16.msra.mxu1 %v2080_v61  ;;  %1133 = vmatpush.bf16.msra.mxu0 %v2104_v62 }
  0x50   : > { %591 = vmatmul.bf16.gmra.mxu2 %v2520_v49  ;;  %813 = vmatmul.bf16.gmra.mxu3 %v2462_v31 }
  0x51   : > { %2194 = vmatpush.bf16.msra.mxu2 %v2104_v62 }
  0x53   : > { %854 = vmatpush.bf16.msra.mxu1 %v2079_v1  ;;  %1134 = vmatpush.bf16.msra.mxu0 %v2103_v2 }
  0x55   : > { %2195 = vmatpush.bf16.msra.mxu2 %v2103_v2 }
  0x57   : > { %855 = vmatpush.bf16.msra.mxu1 %v2078_v4  ;;  %1135 = vmatpush.bf16.msra.mxu0 %v2102_v5 }
  0x59   : > { %2196 = vmatpush.bf16.msra.mxu2 %v2102_v5 }
  0x5b   : > { %856 = vmatpush.bf16.msra.mxu1 %v2077_v7  ;;  %1136 = vmatpush.bf16.msra.mxu0 %v2101_v8 }
  0x5d   : > { %2197 = vmatpush.bf16.msra.mxu2 %v2101_v8 }
  0x5e   : > { %557 = vmatmul.bf16.gmra.mxu1 %v2161_v12  ;;  %837 = vmatmul.bf16.gmra.mxu0 %v2161_v12 }
  0x5f   : > { %857 = vmatpush.bf16.msra.mxu1 %v2076_v10  ;;  %1137 = vmatpush.bf16.msra.mxu0 %v2100_v11 }
  0x60   : > { %596 = vmatmul.bf16.gmra.mxu2 %v361_v13  ;;  %818 = vmatmul.bf16.gmra.mxu3 %v2520_v49 }
  0x61   : > { %2198 = vmatpush.bf16.msra.mxu2 %v2100_v11 }
  0x63   : > { %858 = vmatpush.bf16.msra.mxu1 %v2075_v14  ;;  %1138 = vmatpush.bf16.msra.mxu0 %v2099_v15 }
  0x65   : > { %2199 = vmatpush.bf16.msra.mxu2 %v2099_v15 }
  0x67   : > { %859 = vmatpush.bf16.msra.mxu1 %v2074_v16  ;;  %1139 = vmatpush.bf16.msra.mxu0 %v2098_v17 }
  0x69   : > { %2200 = vmatpush.bf16.msra.mxu2 %v2098_v17 }
  0x6b   : > { %860 = vmatpush.bf16.msra.mxu1 %v2073_v18  ;;  %1140 = vmatpush.bf16.msra.mxu0 %v2097_v20 }
  0x6d   : > { %2201 = vmatpush.bf16.msra.mxu2 %v2097_v20 }
  0x6e   : > { %562 = vmatmul.bf16.gmra.mxu1 %v2162_v21  ;;  %842 = vmatmul.bf16.gmra.mxu0 %v2162_v21 }
  0x70   : > { %1083 = vmatmul.bf16.vlgmr.msrb.gmra.mxu2 %v2459_v30  ;;  %1112 = vmatmul.bf16.vlgmr.msrb.gmra.mxu3 %v2432_v19 }
  0x7e   : > { %567 = vmatmul.bf16.gmra.mxu1 %v2163_v6  ;;  %847 = vmatmul.bf16.gmra.mxu0 %v2163_v6 }
  0x80   : > { %1088 = vmatmul.bf16.gmra.mxu2 %v2465_v32  ;;  %1117 = vmatmul.bf16.gmra.mxu3 %v2161_v12 }
  0x8e   : > { %861 = vmatmul.bf16.vlgmr.msra.gmra.mxu1 %v2465_v32  ;;  %1141 = vmatmul.bf16.vlgmr.msra.gmra.mxu0 %v2465_v32 }
  0x90   : > { %1093 = vmatmul.bf16.gmra.mxu2 %v2462_v31  ;;  %1122 = vmatmul.bf16.gmra.mxu3 %v2162_v21 }
  0x9e   : > { %866 = vmatmul.bf16.gmra.mxu1 %v2462_v31  ;;  %1146 = vmatmul.bf16.gmra.mxu0 %v2462_v31 }
  0xa0   : > { %1098 = vmatmul.bf16.gmra.mxu2 %v2520_v49  ;;  %1127 = vmatmul.bf16.gmra.mxu3 %v2163_v6 }
  0xab   : > { %v524_v19 = vpop.f32.mrf.mxu0  ;;  %v534_v22 = vpop.f32.mrf.mxu1 }
  0xae   : > { %871 = vmatmul.bf16.gmra.mxu1 %v2520_v49  ;;  %1151 = vmatmul.bf16.gmra.mxu0 %v2520_v49 }
  0xb0   : > { %1156 = vmatmul.bf16.vlgmr.msra.gmra.mxu2 %v361_v13 }
  0xb3   : > { %v582_v23 = vpop.f32.mrf.mxu2  ;;  %v804_v24 = vpop.f32.mrf.mxu3 }
  0xb4   : > { %v526_v25 = vpop.f32.mrf.mxu0  ;;  %v536_v26 = vpop.f32.mrf.mxu1 }
  0xbb   : > { %v584_v27 = vpop.f32.mrf.mxu2  ;;  %v2636_v28 = vpop.f32.mrf.mxu3 }
  0xbc   : > { %v529_v29 = vpop.f32.mrf.mxu0  ;;  %v539_v30 = vpop.f32.mrf.mxu1 }
  0xbe   : > { %876 = vmatmul.bf16.gmra.mxu1 %v361_v13 }
  0xc3   : > { %v587_v31 = vpop.f32.mrf.mxu2  ;;  %v2638_v32 = vpop.f32.mrf.mxu3 }
  0xc4   : > { %v531_v33 = vpop.f32.mrf.mxu0  ;;  %v541_v34 = vpop.f32.mrf.mxu1 }
  0xcb   : > { %v589_v35 = vpop.f32.mrf.mxu2  ;;  %v2640_v36 = vpop.f32.mrf.mxu3 }
  0xcc   : > { %v553_v37 = vpop.f32.mrf.mxu1  ;;  %v833_v38 = vpop.f32.mrf.mxu0 }
  0xcd   : > { %v554_v39 = vadd.f32 %v553_v37, %v524_v19  ;;  %v834_v21 = vadd.f32 %v833_v38, %v804_v24 }
  0xcf   : > { %v583_v40 = vadd.f32 %v582_v23, %v554_v39 }
  0xd1   : > { %v1170_v20 = vrot.slane %v583_v40, 7 }
  0xd3   : > { %v592_v41 = vpop.f32.mrf.mxu2  ;;  %v2642_v42 = vpop.f32.mrf.mxu3 }
  0xd4   : > { %v555_v43 = vpop.f32.mrf.mxu1  ;;  %v835_v44 = vpop.f32.mrf.mxu0 }
  0xd5   : > { %v556_v45 = vadd.f32 %v555_v43, %v526_v25  ;;  %v836_v24 = vadd.f32 %v835_v44, %v2636_v28 }
  0xd7   : > { %v2644_v46 = vadd.f32 %v584_v27, %v556_v45 }
  0xdb   : > { %v594_v47 = vpop.f32.mrf.mxu2  ;;  %v2646_v48 = vpop.f32.mrf.mxu3 }
  0xdc   : > { %v558_v49 = vpop.f32.mrf.mxu1  ;;  %v2648_v50 = vpop.f32.mrf.mxu0 }
  0xdd   : > { %v559_v51 = vadd.f32 %v558_v49, %v529_v29  ;;  %v1187_v29 = vsel %vm1186_vm0, 0.0, %v1170_v20 }
  0xdf   : > { %v2650_v52 = vadd.f32 %v587_v31, %v559_v51 }
  0xe1   : > { %v1172_v28 = vrot.slane %v2650_v52, 7 }
  0xe3   : > { %v597_v53 = vpop.f32.mrf.mxu2  ;;  %v2652_v54 = vpop.f32.mrf.mxu3 }
  0xe4   : > { %v560_v55 = vpop.f32.mrf.mxu1  ;;  %v2654_v56 = vpop.f32.mrf.mxu0 }
  0xe5   : > { %v561_v57 = vadd.f32 %v560_v55, %v531_v33 }
  0xe7   : > { %v2656_v58 = vadd.f32 %v589_v35, %v561_v57 }
  0xe9   : > { %v1173_v52 = vrot.slane %v2656_v58, 7 }
  0xeb   : > { %v599_v59 = vpop.f32.mrf.mxu2  ;;  %v2658_v60 = vpop.f32.mrf.mxu3  ;;  %v1190_v20 = vsel %vm1186_vm0, 0.0, %v1173_v52 }
  0xec   : > { %v563_v61 = vpop.f32.mrf.mxu1  ;;  %v2660_v62 = vpop.f32.mrf.mxu0 }
  0xed   : > { %v564_v63 = vadd.f32 %v563_v61, %v534_v22 }
  0xef   : > { %v2662_v0 = vadd.f32 %v592_v41, %v564_v63 }
  0xf1   : > { %v1174_v58 = vrot.slane %v2662_v0, 7 }
  0xf3   : > { %v1084_v1 = vpop.f32.mrf.mxu2  ;;  %v1113_v4 = vpop.f32.mrf.mxu3 }
  0xf4   : > { %v565_v2 = vpop.f32.mrf.mxu1  ;;  %v2664_v3 = vpop.f32.mrf.mxu0  ;;  %v1114_v19 = vadd.f32 %v1113_v4, %v1084_v1  ;;  %v1189_v4 = vsel %vm1186_vm0, 0.0, %v1172_v28 }
  0xf5   : > { %v566_v5 = vadd.f32 %v565_v2, %v536_v26 }
  0xf7   : > { %v2666_v6 = vadd.f32 %v594_v47, %v566_v5 }
  0xf9   : > { %v1175_v0 = vrot.slane %v2666_v6, 7 }
  0xfb   : > { %v1086_v7 = vpop.f32.mrf.mxu2  ;;  %v1115_v11 = vpop.f32.mrf.mxu3 }
  0xfc   : > { %v568_v8 = vpop.f32.mrf.mxu1  ;;  %v2668_v9 = vpop.f32.mrf.mxu0  ;;  %v1116_v37 = vadd.f32 %v1115_v11, %v1086_v7 }
  0xfd   : > { %v569_v10 = vadd.f32 %v568_v8, %v539_v30 }
  0xff   : > { %v2670_v12 = vadd.f32 %v597_v53, %v569_v10  ;;  %v839_v53 = vadd.f32 %v2648_v50, %v2638_v32  ;;  %v841_v32 = vadd.f32 %v2654_v56, %v2640_v36  ;;  %v844_v36 = vadd.f32 %v2660_v62, %v2642_v42 }
 0x100   : > { %v846_v42 = vadd.f32 %v2664_v3, %v2646_v48  ;;  %v849_v48 = vadd.f32 %v2668_v9, %v2652_v54 }
 0x103   : > { %v1089_v13 = vpop.f32.mrf.mxu2  ;;  %v1118_v18 = vpop.f32.mrf.mxu3 }
 0x104   : > { %v570_v14 = vpop.f32.mrf.mxu1  ;;  %v2672_v15 = vpop.f32.mrf.mxu0  ;;  %v1119_v55 = vadd.f32 %v1118_v18, %v1089_v13 }
 0x105   : > { %v571_v16 = vadd.f32 %v570_v14, %v541_v34  ;;  %v1171_v34 = vrot.slane %v2644_v46, 7  ;;  %v851_v54 = vadd.f32 %v2672_v15, %v2658_v60 }
 0x107   : > { %v2674_v17 = vadd.f32 %v599_v59, %v571_v16  ;;  %v1188_v47 = vsel %vm1186_vm0, 0.0, %v1171_v34 }
 0x10b   : > { %v1091_v22 = vpop.f32.mrf.mxu2  ;;  %v1120_v38 = vpop.f32.mrf.mxu3 }
 0x10c   : > { %v862_v23 = vpop.f32.mrf.mxu1  ;;  %v1142_v25 = vpop.f32.mrf.mxu0  ;;  %v1121_v50 = vadd.f32 %v1120_v38, %v1091_v22 }
 0x10d   : > { %v863_v26 = vadd.f32 %v862_v23, %v834_v21  ;;  %v1143_v27 = vadd.f32 %v1142_v25, %v1114_v19 }
 0x10f   : > { %v1195_v30 = vadd.f32 %v1187_v29, %v863_v26  ;;  %v1211_v31 = vrot.slane %v1143_v27, 1 }
 0x111   : > { %v1228_v33 = vsel %vm1227_vm1, %v1211_v31, 0.0 }
 0x112   : > { %v1236_v35 = vadd.f32 %v1228_v33, %v1195_v30  ;;  %v1191_v33 = vsel %vm1186_vm0, 0.0, %v1174_v58 }
 0x113   : > { %v1094_v39 = vpop.f32.mrf.mxu2  ;;  %v1123_v63 = vpop.f32.mrf.mxu3 }
 0x114   : > { %1246 = vst [vmem:[%s2681_s13] sm:$0xff] %v1236_v35  ;;  %v864_v40 = vpop.f32.mrf.mxu1  ;;  %v1144_v41 = vpop.f32.mrf.mxu0  ;;  %v1124_v56 = vadd.f32 %v1123_v63, %v1094_v39 }
 0x115   : > { %v865_v43 = vadd.f32 %v864_v40, %v836_v24  ;;  %v1145_v45 = vadd.f32 %v1144_v41, %v1116_v37 }
 0x117   : > { %v1196_v49 = vadd.f32 %v1188_v47, %v865_v43  ;;  %v1212_v51 = vrot.slane %v1145_v45, 1 }
 0x119   : > { %v1229_v46 = vsel %vm1227_vm1, %v1212_v51, 0.0 }
 0x11a   : > { %v1237_v44 = vadd.f32 %v1229_v46, %v1196_v49  ;;  %v1192_v49 = vsel %vm1186_vm0, 0.0, %v1175_v0 }
 0x11b   : > { %v1096_v57 = vpop.f32.mrf.mxu2  ;;  %v1125_v21 = vpop.f32.mrf.mxu3 }
 0x11c   : > { %1247 = vst [vmem:[%s2681_s13 + $0x8] sm:$0xff] %v1237_v44  ;;  %v867_v59 = vpop.f32.mrf.mxu1  ;;  %v1147_v61 = vpop.f32.mrf.mxu0  ;;  %v1126_v62 = vadd.f32 %v1125_v21, %v1096_v57  ;;  %v1176_v44 = vrot.slane %v2670_v12, 7 }
 0x11d   : > { %v868_v1 = vadd.f32 %v867_v59, %v839_v53  ;;  %v1148_v2 = vadd.f32 %v1147_v61, %v1119_v55 }
 0x11f   : > { %v1197_v5 = vadd.f32 %v1189_v4, %v868_v1  ;;  %v1213_v7 = vrot.slane %v1148_v2, 1  ;;  %v1193_v1 = vsel %vm1186_vm0, 0.0, %v1176_v44 }
 0x121   : > { %v1230_v8 = vsel %vm1227_vm1, %v1213_v7, 0.0  ;;  %v1177_v7 = vrot.slane %v2674_v17, 7 }
 0x122   : > { %v1238_v10 = vadd.f32 %v1230_v8, %v1197_v5 }
 0x123   : > { %v1099_v11 = vpop.f32.mrf.mxu2  ;;  %v1128_v24 = vpop.f32.mrf.mxu3 }
 0x124   : > { %1248 = vst [vmem:[%s2681_s13 + $0x10] sm:$0xff] %v1238_v10  ;;  %v869_v13 = vpop.f32.mrf.mxu1  ;;  %v1149_v14 = vpop.f32.mrf.mxu0  ;;  %v1129_v47 = vadd.f32 %v1128_v24, %v1099_v11  ;;  %v1194_v10 = vsel %vm1186_vm0, 0.0, %v1177_v7 }
 0x125   : > { %v870_v16 = vadd.f32 %v869_v13, %v841_v32  ;;  %v1150_v18 = vadd.f32 %v1149_v14, %v1121_v50 }
 0x127   : > { %v1198_v19 = vadd.f32 %v1190_v20, %v870_v16  ;;  %v1214_v23 = vrot.slane %v1150_v18, 1 }
 0x129   : > { %v1231_v25 = vsel %vm1227_vm1, %v1214_v23, 0.0 }
 0x12a   : > { %v1239_v26 = vadd.f32 %v1231_v25, %v1198_v19 }
 0x12b   : > { %v1101_v22 = vpop.f32.mrf.mxu2  ;;  %v1130_v3 = vpop.f32.mrf.mxu3 }
 0x12c   : > { %1249 = vst [vmem:[%s2681_s13 + $0x18] sm:$0xff] %v1239_v26  ;;  %v872_v27 = vpop.f32.mrf.mxu1  ;;  %v1152_v29 = vpop.f32.mrf.mxu0  ;;  %v1131_v63 = vadd.f32 %v1130_v3, %v1101_v22 }
 0x12d   : > { %v873_v30 = vadd.f32 %v872_v27, %v844_v36  ;;  %v1153_v31 = vadd.f32 %v1152_v29, %v1124_v56 }
 0x12f   : > { %v1199_v34 = vadd.f32 %v1191_v33, %v873_v30  ;;  %v1215_v35 = vrot.slane %v1153_v31, 1 }
 0x131   : > { %v1232_v37 = vsel %vm1227_vm1, %v1215_v35, 0.0 }
 0x132   : > { %v1240_v38 = vadd.f32 %v1232_v37, %v1199_v34 }
 0x133   : > { %v1157_v39 = vpop.f32.mrf.mxu2 }
 0x134   : > { %1250 = vst [vmem:[%s2681_s13 + $0x20] sm:$0xff] %v1240_v38  ;;  %v874_v40 = vpop.f32.mrf.mxu1  ;;  %v1154_v41 = vpop.f32.mrf.mxu0  ;;  %v1158_v28 = vadd.f32 %v1157_v39, %v1129_v47 }
 0x135   : > { %v875_v43 = vadd.f32 %v874_v40, %v846_v42  ;;  %v1155_v45 = vadd.f32 %v1154_v41, %v1126_v62 }
 0x136   : > { %v1217_v55 = vrot.slane %v1158_v28, 1 }
 0x137   : > { %v1200_v51 = vadd.f32 %v1192_v49, %v875_v43  ;;  %v1216_v46 = vrot.slane %v1155_v45, 1 }
 0x138   : > { %v1234_v4 = vsel %vm1227_vm1, %v1217_v55, 0.0 }
 0x139   : > { %v1233_v6 = vsel %vm1227_vm1, %v1216_v46, 0.0 }
 0x13a   : > { %v1241_v53 = vadd.f32 %v1233_v6, %v1200_v51 }
 0x13b   : > { %v1159_v59 = vpop.f32.mrf.mxu2 }
 0x13c   : > { %1251 = vst [vmem:[%s2681_s13 + $0x28] sm:$0xff] %v1241_v53  ;;  %v877_v57 = vpop.f32.mrf.mxu1  ;;  %v1160_v5 = vadd.f32 %v1159_v59, %v1131_v63 }
 0x13d   : > { %v878_v61 = vadd.f32 %v877_v57, %v849_v48 }
 0x13e   : > { %v1218_v9 = vrot.slane %v1160_v5, 1 }
 0x13f   : > { %v1201_v2 = vadd.f32 %v1193_v1, %v878_v61 }
 0x140   : > { %v1235_v50 = vsel %vm1227_vm1, %v1218_v9, 0.0 }
 0x141   : > { %v1242_v12 = vadd.f32 %v1234_v4, %v1201_v2 }
 0x143   : > { %1252 = vst [vmem:[%s2681_s13 + $0x30] sm:$0xff] %v1242_v12 }
 0x144   : > { %v879_v8 = vpop.f32.mrf.mxu1 }
 0x145   : > { %v880_v52 = vadd.f32 %v879_v8, %v851_v54 }
 0x147   : > { %v1202_v32 = vadd.f32 %v1194_v10, %v880_v52  ;;  %1257 = sbr.rel (%p2027_p7) target bundleno = 994 (0x3e2), region = 48 }
 0x149   : > { %v1243_v11 = vadd.f32 %v1235_v50, %v1202_v32 }
 0x14b   : > { %1253 = vst [vmem:[%s2681_s13 + $0x38] sm:$0xff] %v1243_v11 }
 0x14c   : > { %v1310_v17 = vld [vmem:[%s2924_s4 + $0x78] sm:$0xff]  ;;  %v1309_v60 = vld [vmem:[%s2924_s4 + $0x70] sm:$0xff]  ;;  %v1308_v15 = vld [vmem:[%s2924_s4 + $0x68] sm:$0xff]  ;;  %vm1336_vm2 = vcmask 261120  }
 0x14d   : > { %1311 = vmatpush.msra.mxu0 %v1310_v17  ;;  %1414 = vmatpush.msra.mxu2 %v1310_v17  ;;  %v1307_v13 = vld [vmem:[%s2924_s4 + $0x60] sm:$0xff]  ;;  %v1306_v18 = vld [vmem:[%s2924_s4 + $0x58] sm:$0xff]  ;;  %v1305_v23 = vld [vmem:[%s2924_s4 + $0x50] sm:$0xff] }
 0x14e   : > { %v1304_v26 = vld [vmem:[%s2924_s4 + $0x48] sm:$0xff]  ;;  %v1303_v22 = vld [vmem:[%s2924_s4 + $0x40] sm:$0xff]  ;;  %v1302_v30 = vld [vmem:[%s2924_s4 + $0x38] sm:$0xff] }
 0x14f   : > { %1312 = vmatpush.msra.mxu0 %v1309_v60  ;;  %1415 = vmatpush.msra.mxu2 %v1309_v60  ;;  %v1301_v34 = vld [vmem:[%s2924_s4 + $0x30] sm:$0xff]  ;;  %v1335_v24 = vld [vmem:[%s2925_s5 + $0x18] sm:$0xff]  ;;  %v1300_v38 = vld [vmem:[%s2924_s4 + $0x28] sm:$0xff] }
 0x150   : > { %v1334_v37 = vld [vmem:[%s2925_s5 + $0x10] sm:$0xff]  ;;  %1352 = vmatpush.msra.mxu1 %v1335_v24  ;;  %1450 = vmatpush.msra.mxu3 %v1335_v24  ;;  %v1299_v39 = vld [vmem:[%s2924_s4 + $0x20] sm:$0xff]  ;;  %v1298_v43 = vld [vmem:[%s2924_s4 + $0x18] sm:$0xff] }
 0x151   : > { %1313 = vmatpush.msra.mxu0 %v1308_v15  ;;  %1416 = vmatpush.msra.mxu2 %v1308_v15  ;;  %v1297_v49 = vld [vmem:[%s2924_s4 + $0x10] sm:$0xff]  ;;  %v1296_v28 = vld [vmem:[%s2924_s4 + $0x8] sm:$0xff]  ;;  %v1295_v53 = vld [vmem:[%s2924_s4] sm:$0xff] }
 0x152   : > { %v2736_v14 = vld [vmem:[#allocation2] sm:$0xff]  ;;  %v2738_v16 = vld [vmem:[#allocation2 + $0x8] sm:$0xff]  ;;  %v2743_v20 = vld [vmem:[#allocation2 + $0x10] sm:$0xff]  ;;  %1353 = vmatpush.msra.mxu1 %v1334_v37  ;;  %1451 = vmatpush.msra.mxu3 %v1334_v37 }
 0x153   : > { %v1274_v21 = vadd.f32 %v2738_v16, %v2736_v14  ;;  %1314 = vmatpush.msra.mxu0 %v1307_v13  ;;  %v2747_v19 = vld [vmem:[#allocation2 + $0x18] sm:$0xff]  ;;  %1417 = vmatpush.msra.mxu2 %v1307_v13  ;;  %v2753_v58 = vld [vmem:[#allocation2 + $0x20] sm:$0xff]  ;;  %v2759_v56 = vld [vmem:[#allocation2 + $0x28] sm:$0xff] }
 0x154   : > { %v2765_v29 = vld [vmem:[#allocation2 + $0x30] sm:$0xff]  ;;  %v2771_v33 = vld [vmem:[#allocation2 + $0x38] sm:$0xff]  ;;  %v2783_v0 = vld [vmem:[#allocation2 + $0x40] sm:$0xff] }
 0x155   : > { %v1275_v25 = vadd.f32 %v1274_v21, %v2743_v20  ;;  %1315 = vmatpush.msra.mxu0 %v1306_v18  ;;  %1418 = vmatpush.msra.mxu2 %v1306_v18  ;;  %v2789_v62 = vld [vmem:[#allocation2 + $0x48] sm:$0xff]  ;;  %v2795_v41 = vld [vmem:[#allocation2 + $0x50] sm:$0xff]  ;;  %v2801_v47 = vld [vmem:[#allocation2 + $0x58] sm:$0xff] }
 0x156   : > { %v2807_v46 = vld [vmem:[#allocation2 + $0x60] sm:$0xff]  ;;  %v2813_v44 = vld [vmem:[#allocation2 + $0x68] sm:$0xff]  ;;  %v2819_v3 = vld [vmem:[#allocation2 + $0x70] sm:$0xff] }
 0x157   : > { %v1276_v36 = vadd.f32 %v1275_v25, %v2747_v19  ;;  %1316 = vmatpush.msra.mxu0 %v1305_v23  ;;  %1419 = vmatpush.msra.mxu2 %v1305_v23  ;;  %v1273_v57 = vld [vmem:[#allocation2 + $0x78] sm:$0xff]  ;;  %v1333_v7 = vld [vmem:[%s2925_s5 + $0x8] sm:$0xff]  ;;  %v1332_v54 = vld [vmem:[%s2925_s5] sm:$0xff] }
 0x158   : > { %1354 = vmatpush.msra.mxu1 %v1333_v7  ;;  %1452 = vmatpush.msra.mxu3 %v1333_v7 }
 0x159   : > { %v1277_v27 = vadd.f32 %v1276_v36, %v2753_v58  ;;  %1317 = vmatpush.msra.mxu0 %v1304_v26  ;;  %1420 = vmatpush.msra.mxu2 %v1304_v26 }
 0x15a   : > { %1355 = vmatpush.msra.mxu1 %v1332_v54  ;;  %1453 = vmatpush.msra.mxu3 %v1332_v54 }
 0x15b   : > { %v1278_v31 = vadd.f32 %v1277_v27, %v2759_v56  ;;  %1318 = vmatpush.msra.mxu0 %v1303_v22  ;;  %1421 = vmatpush.msra.mxu2 %v1303_v22 }
 0x15d   : > { %v1279_v35 = vadd.f32 %v1278_v31, %v2765_v29  ;;  %1319 = vmatpush.msra.mxu0 %v1302_v30  ;;  %1422 = vmatpush.msra.mxu2 %v1302_v30 }
 0x15f   : > { %v1280_v42 = vadd.f32 %v1279_v35, %v2771_v33  ;;  %1320 = vmatpush.msra.mxu0 %v1301_v34  ;;  %1423 = vmatpush.msra.mxu2 %v1301_v34 }
 0x161   : > { %v1281_v40 = vadd.f32 %v1280_v42, %v2783_v0  ;;  %1321 = vmatpush.msra.mxu0 %v1300_v38  ;;  %1424 = vmatpush.msra.mxu2 %v1300_v38 }
 0x163   : > { %v1282_v45 = vadd.f32 %v1281_v40, %v2789_v62  ;;  %1322 = vmatpush.msra.mxu0 %v1299_v39  ;;  %1425 = vmatpush.msra.mxu2 %v1299_v39 }
 0x165   : > { %v1283_v51 = vadd.f32 %v1282_v45, %v2795_v41  ;;  %1323 = vmatpush.msra.mxu0 %v1298_v43  ;;  %1426 = vmatpush.msra.mxu2 %v1298_v43 }
 0x167   : > { %v1284_v6 = vadd.f32 %v1283_v51, %v2801_v47  ;;  %1324 = vmatpush.msra.mxu0 %v1297_v49  ;;  %1427 = vmatpush.msra.mxu2 %v1297_v49 }
 0x169   : > { %v1285_v48 = vadd.f32 %v1284_v6, %v2807_v46  ;;  %1325 = vmatpush.msra.mxu0 %v1296_v28  ;;  %1428 = vmatpush.msra.mxu2 %v1296_v28 }
 0x16b   : > { %v1286_v55 = vadd.f32 %v1285_v48, %v2813_v44  ;;  %1326 = vmatpush.msra.mxu0 %v1295_v53  ;;  %1429 = vmatpush.msra.mxu2 %v1295_v53 }
 0x16d   : > { %v1287_v59 = vadd.f32 %v1286_v55, %v2819_v3 }
 0x16f   : > { %v1288_v61 = vadd.f32 %v1287_v59, %v1273_v57 }
 0x171   : > { %v1289_v63 = vrot.slane %v1288_v61, 4 }
 0x173   : > { %v1290_v1 = vadd.f32 %v1289_v63, %v1288_v61 }
 0x175   : > { %v1291_v2 = vrot.slane %v1290_v1, 2 }
 0x177   : > { %v1292_v4 = vadd.f32 %v1291_v2, %v1290_v1 }
 0x179   : > { %v1293_v5 = vrot.slane %v1292_v4, 1 }
 0x17b   : > { %v1294_v12 = vadd.f32 %v1293_v5, %v1292_v4 }
 0x17d   : > { %1327 = vmatmul.f32.vlgmr.msra.gmra.mxu0 %v1294_v12 }
 0x1fa   : > { %v1328_v9 = vpop.f32.mrf.mxu0 }
 0x1fb   : > { %v1331_v8 = vmul.f32 0.001953125, %v1328_v9 }
 0x1fd   : > { %2028 = vmatmul.msk.f32.vlgmr.msra.gmra.mxu1 %vm1336_vm2, %v1331_v8 }
 0x27a   : > { %v1357_v52 = vpop.f32.mrf.mxu1 }
 0x27b   : > { %v1360_v10 = vperm.slane %v1357_v52, 0 }
 0x27d   : > { %v2831_v32 = vsub.f32 %v2736_v14, %v1360_v10  ;;  %v2834_v50 = vsub.f32 %v2738_v16, %v1360_v10  ;;  %v2837_v11 = vsub.f32 %v2743_v20, %v1360_v10  ;;  %v2844_v15 = vsub.f32 %v2747_v19, %v1360_v10 }
 0x27e   : > { %v2847_v13 = vsub.f32 %v2753_v58, %v1360_v10  ;;  %v2852_v18 = vsub.f32 %v2759_v56, %v1360_v10  ;;  %v2857_v23 = vsub.f32 %v2765_v29, %v1360_v10  ;;  %v2862_v58 = vsub.f32 %v2771_v33, %v1360_v10 }
 0x27f   : > { %v1377_v17 = vmul.f32 %v2831_v32, %v2831_v32  ;;  %v1378_v60 = vmul.f32 %v2834_v50, %v2834_v50  ;;  %v1379_v14 = vmul.f32 %v2837_v11, %v2837_v11  ;;  %v1380_v20 = vmul.f32 %v2844_v15, %v2844_v15 }
 0x280   : > { %v1381_v19 = vmul.f32 %v2847_v13, %v2847_v13  ;;  %v1382_v26 = vmul.f32 %v2852_v18, %v2852_v18  ;;  %v2867_v56 = vsub.f32 %v2783_v0, %v1360_v10  ;;  %v1383_v22 = vmul.f32 %v2857_v23, %v2857_v23 }
 0x281   : > { %v1393_v16 = vadd.f32 %v1378_v60, %v1377_v17  ;;  %v1370_v29 = vsub.f32 %v2789_v62, %v1360_v10  ;;  %v1384_v30 = vmul.f32 %v2862_v58, %v2862_v58  ;;  %v1371_v33 = vsub.f32 %v2795_v41, %v1360_v10 }
 0x282   : > { %v1385_v34 = vmul.f32 %v2867_v56, %v2867_v56  ;;  %v1372_v24 = vsub.f32 %v2801_v47, %v1360_v10  ;;  %v1373_v38 = vsub.f32 %v2807_v46, %v1360_v10  ;;  %v1374_v62 = vsub.f32 %v2813_v44, %v1360_v10 }
 0x283   : > { %v1394_v21 = vadd.f32 %v1393_v16, %v1379_v14  ;;  %v1386_v37 = vmul.f32 %v1370_v29, %v1370_v29  ;;  %v1387_v42 = vmul.f32 %v1371_v33, %v1371_v33  ;;  %v1375_v45 = vsub.f32 %v2819_v3, %v1360_v10 }
 0x284   : > { %v1388_v40 = vmul.f32 %v1372_v24, %v1372_v24  ;;  %v1389_v49 = vmul.f32 %v1373_v38, %v1373_v38  ;;  %v1376_v51 = vsub.f32 %v1273_v57, %v1360_v10  ;;  %v1390_v28 = vmul.f32 %v1374_v62, %v1374_v62  ;;  %v1468_v10 = vld [vmem:[%s2922_s2] sm:$0x1] }
 0x285   : > { %v1395_v25 = vadd.f32 %v1394_v21, %v1380_v20  ;;  %v1391_v53 = vmul.f32 %v1375_v45, %v1375_v45 }
 0x286   : > { %v1392_v47 = vmul.f32 %v1376_v51, %v1376_v51 }
 0x287   : > { %v1396_v36 = vadd.f32 %v1395_v25, %v1381_v19  ;;  %v2249_v25 = vld [vmem:[%s2923_s3] ss:$0 sm:$0xff] }
 0x289   : > { %v1397_v27 = vadd.f32 %v1396_v36, %v1382_v26 }
 0x28b   : > { %v1398_v31 = vadd.f32 %v1397_v27, %v1383_v22 }
 0x28d   : > { %v1399_v35 = vadd.f32 %v1398_v31, %v1384_v30 }
 0x28f   : > { %v1400_v0 = vadd.f32 %v1399_v35, %v1385_v34 }
 0x291   : > { %v1401_v39 = vadd.f32 %v1400_v0, %v1386_v37 }
 0x293   : > { %v1402_v43 = vadd.f32 %v1401_v39, %v1387_v42 }
 0x295   : > { %v1403_v41 = vadd.f32 %v1402_v43, %v1388_v40 }
 0x297   : > { %v1404_v6 = vadd.f32 %v1403_v41, %v1389_v49 }
 0x299   : > { %v1405_v48 = vadd.f32 %v1404_v6, %v1390_v28 }
 0x29b   : > { %v1406_v55 = vadd.f32 %v1405_v48, %v1391_v53 }
 0x29d   : > { %v1407_v59 = vadd.f32 %v1406_v55, %v1392_v47 }
 0x29f   : > { %v1408_v61 = vrot.slane %v1407_v59, 4 }
 0x2a1   : > { %v1409_v46 = vadd.f32 %v1408_v61, %v1407_v59 }
 0x2a3   : > { %v1410_v63 = vrot.slane %v1409_v46, 2 }
 0x2a5   : > { %v1411_v1 = vadd.f32 %v1410_v63, %v1409_v46 }
 0x2a7   : > { %v1412_v2 = vrot.slane %v1411_v1, 1 }
 0x2a9   : > { %v1413_v44 = vadd.f32 %v1412_v2, %v1411_v1 }
 0x2ab   : > { %1430 = vmatmul.f32.vlgmr.msra.gmra.mxu2 %v1413_v44 }
 0x32e   : > { %v1431_v4 = vpop.f32.mrf.mxu2 }
 0x32f   : > { %v1434_v5 = vmul.f32 0.001953125, %v1431_v4 }
 0x331   : > { %2029 = vmatmul.msk.f32.vlgmr.msra.gmra.mxu3 %vm1336_vm2, %v1434_v5 }
 0x3b4   : > { %v1455_v3 = vpop.f32.mrf.mxu3 }
 0x3b5   : > { %v1456_v57 = vadd.f32 1e-05, %v1455_v3 }
 0x3b7   : > { %2250 = vrsqrt.f32 %v1456_v57  ;;  %vm1464_vm4 = vweird.f32 %v1456_v57 }
 0x3bd   : > { %v2251_v12 = vpop.eup %2250 }
 0x3be   : > { %v1459_v7 = vmul.f32 %v2251_v12, %v1456_v57  ;;  %vm1465_vm3 = vweird.f32 %v2251_v12 }
 0x3bf   : > { %vm1466_vm5 = vmor %vm1464_vm4, %vm1465_vm3 }
 0x3c0   : > { %v1460_v54 = vmul.f32 %v2251_v12, %v1459_v7 }
 0x3c2   : > { %v1461_v9 = vmul.f32 0.5, %v1460_v54 }
 0x3c4   : > { %v1462_v8 = vsub.f32 1.5, %v1461_v9 }
 0x3c6   : > { %v1463_v52 = vmul.f32 %v2251_v12, %v1462_v8 }
 0x3c8   : > { %v1467_v17 = vsel %vm1466_vm5, %v2251_v12, %v1463_v52 }
 0x3c9   : > { %v1469_v60 = vmul.f32 %v1468_v10, %v1467_v17 }
 0x3cb   : > { %v1470_v14 = vperm.slane %v1469_v60, 0 }
 0x3cd   : > { %v1471_v16 = vmul.f32 %v1470_v14, %v2831_v32  ;;  %v1472_v20 = vmul.f32 %v1470_v14, %v2834_v50  ;;  %v1473_v21 = vmul.f32 %v1470_v14, %v2837_v11  ;;  %v1474_v19 = vmul.f32 %v1470_v14, %v2844_v15 }
 0x3ce   : > { %v1475_v26 = vmul.f32 %v1470_v14, %v2847_v13  ;;  %v1476_v36 = vmul.f32 %v1470_v14, %v2852_v18  ;;  %v1477_v22 = vmul.f32 %v1470_v14, %v2857_v23  ;;  %v1478_v27 = vmul.f32 %v1470_v14, %v2862_v58 }
 0x3cf   : > { %v1479_v32 = vmul.f32 %v1470_v14, %v2867_v56  ;;  %v1480_v30 = vmul.f32 %v1470_v14, %v1370_v29  ;;  %v1481_v50 = vmul.f32 %v1470_v14, %v1371_v33  ;;  %v1482_v31 = vmul.f32 %v1470_v14, %v1372_v24 }
 0x3d0   : > { %v1483_v11 = vmul.f32 %v1470_v14, %v1373_v38  ;;  %v1484_v34 = vmul.f32 %v1470_v14, %v1374_v62  ;;  %v1485_v15 = vmul.f32 %v1470_v14, %v1375_v45  ;;  %v1486_v35 = vmul.f32 %v1470_v14, %v1376_v51 }
 0x3d1   : > { %v1491_v37 = vadd.f32 %v2249_v25, %v1471_v16  ;;  %v1492_v0 = vadd.f32 %v2249_v25, %v1472_v20  ;;  %v1493_v42 = vadd.f32 %v2249_v25, %v1473_v21  ;;  %v1494_v39 = vadd.f32 %v2249_v25, %v1474_v19 }
 0x3d2   : > { %v1495_v13 = vadd.f32 %v2249_v25, %v1475_v26  ;;  %v1496_v40 = vadd.f32 %v2249_v25, %v1476_v36  ;;  %v1497_v18 = vadd.f32 %v2249_v25, %v1477_v22  ;;  %v1498_v43 = vadd.f32 %v2249_v25, %v1478_v27 }
 0x3d3   : > { %v1499_v23 = vadd.f32 %v2249_v25, %v1479_v32  ;;  %v1500_v49 = vadd.f32 %v2249_v25, %v1480_v30  ;;  %v1501_v58 = vadd.f32 %v2249_v25, %v1481_v50  ;;  %v1502_v41 = vadd.f32 %v2249_v25, %v1482_v31 }
 0x3d4   : > { %v1503_v56 = vadd.f32 %v2249_v25, %v1483_v11  ;;  %v1504_v29 = vadd.f32 %v2249_v25, %v1484_v34  ;;  %v1505_v33 = vadd.f32 %v2249_v25, %v1485_v15  ;;  %v1506_v24 = vadd.f32 %v2249_v25, %v1486_v35 }
 0x3d5   : > { %v1507_v38 = vmax.f32 %v1491_v37, 0.0  ;;  %v1508_v62 = vmax.f32 %v1492_v0, 0.0  ;;  %v1509_v45 = vmax.f32 %v1493_v42, 0.0  ;;  %v1510_v51 = vmax.f32 %v1494_v39, 0.0 }
 0x3d6   : > { %v1511_v28 = vmax.f32 %v1495_v13, 0.0  ;;  %v1512_v6 = vmax.f32 %v1496_v40, 0.0  ;;  %v1513_v53 = vmax.f32 %v1497_v18, 0.0  ;;  %v1514_v48 = vmax.f32 %v1498_v43, 0.0 }
 0x3d7   : > { %v1515_v47 = vmax.f32 %v1499_v23, 0.0  ;;  %v1516_v55 = vmax.f32 %v1500_v49, 0.0  ;;  %v1517_v59 = vmax.f32 %v1501_v58, 0.0  ;;  %v1518_v61 = vmax.f32 %v1502_v41, 0.0 }
 0x3d8   : > { %v1519_v46 = vmax.f32 %v1503_v56, 0.0  ;;  %v1520_v63 = vmax.f32 %v1504_v29, 0.0  ;;  %v2124_v1 = vpack.c.bf16 %v1508_v62, %v1507_v38  ;;  %v2129_v2 = vpack.c.bf16 %v1510_v51, %v1509_v45 }
 0x3d9   : > { %v2134_v44 = vpack.c.bf16 %v1512_v6, %v1511_v28  ;;  %v1521_v4 = vmax.f32 %v1505_v33, 0.0  ;;  %v1522_v5 = vmax.f32 %v1506_v24, 0.0  ;;  %v2139_v3 = vpack.c.bf16 %v1514_v48, %v1513_v53 }
 0x3da   : > { %2125 = vst [vmem:[%s2382_s19] sm:$0xff] %v2124_v1   ;;  %v2144_v57 = vpack.c.bf16 %v1516_v55, %v1515_v47  ;;  %v2149_v12 = vpack.c.bf16 %v1518_v61, %v1517_v59  ;;  %v2154_v7 = vpack.c.bf16 %v1520_v63, %v1519_v46 }
 0x3db   : > { %2164 = vst [vmem:[%s2382_s19 + $0x8] sm:$0xff] %v2129_v2   ;;  %v2159_v54 = vpack.c.bf16 %v1522_v5, %v1521_v4 }
 0x3dc   : > { %2165 = vst [vmem:[%s2382_s19 + $0x10] sm:$0xff] %v2134_v44  }
 0x3dd   : > { %2166 = vst [vmem:[%s2382_s19 + $0x18] sm:$0xff] %v2139_v3  }
 0x3de   : > { %2167 = vst [vmem:[%s2382_s19 + $0x20] sm:$0xff] %v2144_v57  }
 0x3df   : > { %2168 = vst [vmem:[%s2382_s19 + $0x28] sm:$0xff] %v2149_v12  }
 0x3e0   : > { %2169 = vst [vmem:[%s2382_s19 + $0x30] sm:$0xff] %v2154_v7  }
 0x3e1   : > { %2170 = vst [vmem:[%s2382_s19 + $0x38] sm:$0xff] %v2159_v54  }
 0x3e2 PF: > { %s16_s25 = sadd.s32 1, %s2290_s25   ;;  %s2927_s21 = smov %s2282_s23 }
 0x3e3   : > { %p13_p8 = scmp.ge.s32.totalorder %s16_s25, 6   ;;  %s2928_s22 = smov %s2286_s24 }
 0x3e4   : > { %s2929_s23 = smov %s2932_s26  ;;  %s2930_s24 = smov %s2936_s27 }
 0x3e5   :  { %15 = sbr.rel (!%p13_p8) target bundleno = 3 (0x3), region = 81 }

// kernel: sfe_forward.15
= control target key start
LH: loop header
LB: loop body
LE: loop exit
PB: predicated region body
PF: predicated region fallthrough
CT: control target
= control target key end

     0   :  { %s5557_s21 = smov 0   ;;  %s5559_s22 = smov 0   ;;  %s7564_s0 = inlined_call_operand.vmem [shape: bf16[2,2,16,16,128], index: 0, kind: input, shape index: {}]   ;;  %s7565_s1 = inlined_call_operand.vmem [shape: bf16[3,768,128], index: 1, kind: input, shape index: {}]   ;;  %s7566_s2 = inlined_call_operand.vmem [shape: f32[1,128], index: 2, kind: input, shape index: {}]   ;;  %s7567_s3 = inlined_call_operand.vmem [shape: f32[1,128], index: 3, kind: input, shape index: {}]   ;;  %s7568_s4 = inlined_call_operand.vmem [shape: f32[128,32], index: 4, kind: input, shape index: {}]   ;;  %s7569_s5 = inlined_call_operand.vmem [shape: f32[32,128], index: 5, kind: input, shape index: {}]   ;;  %s7570_s6 = inlined_call_operand.vmem [shape: bf16[2,256,128], index: 6, kind: output, shape index: {}]  }
   0x1   :  { %s5561_s23 = smov 0  }
   0x2 LB: > { %s28_s24 = sadd.s32 1, %s5515_s22  ;;  %p4196_p0 = scmp.ge.s32.totalorder %s5519_s23, 1  ;;  %s5519_s23 = sphi %s5561_s23, %s16_s23   ;;  %s5515_s22 = sphi %s5559_s22, %s7763_s22   ;;  %s5511_s21 = sphi %s5557_s21, %s7762_s21  }
   0x3   : > { %p30_p1 = scmp.ge.s32.totalorder %s28_s24, 2  ;;  %p232_p2 = scmp.lt.s32.totalorder %s5519_s23, 3 }
   0x5   : > { %s7765_s24 = smov (%p30_p1, %s28_s24), 0  ;;  %p233_p3 = pnand %p4196_p0, %p232_p2 }
   0x7   : > { %236 = sbr.rel (%p233_p3) target bundleno = 2027 (0x7eb), region = 44 }
   0xc   : > { %v5174_v0 = vld [vmem:[%s7565_s1 + $0x38] sm:$0xff]  ;;  %v5173_v2 = vld [vmem:[%s7565_s1 + $0x30] sm:$0xff]  ;;  %v5172_v4 = vld [vmem:[%s7565_s1 + $0x28] sm:$0xff]  ;;  %p268_p4 = scmp.lt.s32.totalorder %s5511_s21, 1  ;;  %v7571_v25 = vmov 0   ;;  %vm3333_vm0 = vcmask 1040384  }
   0xd   : > { %v5182_v1 = vld [vmem:[%s7565_s1 + $0x78] sm:$0xff]  ;;  %929 = vmatpush.bf16.msra.mxu0 %v5174_v0  ;;  %v5181_v3 = vld [vmem:[%s7565_s1 + $0x70] sm:$0xff]  ;;  %5406 = vmatpush.bf16.msra.mxu3 %v5174_v0  ;;  %v5180_v5 = vld [vmem:[%s7565_s1 + $0x68] sm:$0xff]  ;;  %vm3494_vm1 = vcmask 1046528   ;;  %vm3771_vm2 = vcmask 261120  }
   0xe   : > { %1018 = vmatpush.bf16.msra.mxu1 %v5182_v1  ;;  %5414 = vmatpush.bf16.msra.mxu2 %v5182_v1  ;;  %v5171_v6 = vld [vmem:[%s7565_s1 + $0x20] sm:$0xff]  ;;  %v5170_v8 = vld [vmem:[%s7565_s1 + $0x18] sm:$0xff]  ;;  %v5169_v10 = vld [vmem:[%s7565_s1 + $0x10] sm:$0xff]  ;;  %s7767_s21 = smov (!%p268_p4, %s5511_s21), 1 }
   0xf   : > { %v5179_v7 = vld [vmem:[%s7565_s1 + $0x60] sm:$0xff]  ;;  %v5178_v9 = vld [vmem:[%s7565_s1 + $0x58] sm:$0xff]  ;;  %v5177_v11 = vld [vmem:[%s7565_s1 + $0x50] sm:$0xff]  ;;  %s5133_s9 = sshll.u32 %s7767_s21, 8  ;;  %s5134_s10 = sshll.u32 %s7767_s21, 7 }
  0x10   : > { %v5168_v12 = vld [vmem:[%s7565_s1 + $0x8] sm:$0xff]  ;;  %v5167_v14 = vld [vmem:[%s7565_s1] sm:$0xff]  ;;  %s5633_s16 = scalar_lea.vmem %s7564_s0, %s5133_s9  ;;  %v5206_v16 = vld [vmem:[%s7565_s1 + $0x138] sm:$0xff]  ;;  %s7530_s21 = scalar_lea.vmem %s7570_s6, %s5134_s10 }
  0x11   : > { %930 = vmatpush.bf16.msra.mxu0 %v5173_v2  ;;  %5407 = vmatpush.bf16.msra.mxu3 %v5173_v2  ;;  %v5176_v13 = vld [vmem:[%s7565_s1 + $0x48] sm:$0xff]  ;;  %v5175_v15 = vld [vmem:[%s7565_s1 + $0x40] sm:$0xff]  ;;  %v5214_v17 = vld [vmem:[%s7565_s1 + $0x178] sm:$0xff] }
  0x12   : > { %1019 = vmatpush.bf16.msra.mxu1 %v5181_v3  ;;  %5415 = vmatpush.bf16.msra.mxu2 %v5181_v3  ;;  %v5642_v18 = vld [vmem:[%s5633_s16] sm:$0xff]  ;;  %v5645_v19 = vld [vmem:[%s5633_s16 + $0x48] sm:$0xff]  ;;  %v5190_v21 = vld [vmem:[%s7565_s1 + $0xb8] sm:$0xff] }
  0x13   : > { %v5648_v20 = vld [vmem:[%s5633_s16 + $0x40] sm:$0xff]  ;;  %v5198_v22 = vld [vmem:[%s7565_s1 + $0xf8] sm:$0xff]  ;;  %v5205_v23 = vld [vmem:[%s7565_s1 + $0x130] sm:$0xff] }
  0x14   : > { %v5213_v24 = vld [vmem:[%s7565_s1 + $0x170] sm:$0xff]  ;;  %v5204_v28 = vld [vmem:[%s7565_s1 + $0x128] sm:$0xff]  ;;  %v5203_v34 = vld [vmem:[%s7565_s1 + $0x120] sm:$0xff] }
  0x15   : > { %931 = vmatpush.bf16.msra.mxu0 %v5172_v4  ;;  %5408 = vmatpush.bf16.msra.mxu3 %v5172_v4  ;;  %v5189_v26 = vld [vmem:[%s7565_s1 + $0xb0] sm:$0xff]  ;;  %v5212_v29 = vld [vmem:[%s7565_s1 + $0x168] sm:$0xff]  ;;  %v5211_v35 = vld [vmem:[%s7565_s1 + $0x160] sm:$0xff] }
  0x16   : > { %1020 = vmatpush.bf16.msra.mxu1 %v5180_v5  ;;  %5416 = vmatpush.bf16.msra.mxu2 %v5180_v5  ;;  %v5197_v27 = vld [vmem:[%s7565_s1 + $0xf0] sm:$0xff]  ;;  %v5679_v30 = vld [vmem:[%s5633_s16 + $0x8] sm:$0xff]  ;;  %v5704_v37 = vld [vmem:[%s5633_s16 + $0x58] sm:$0xff] }
  0x17   : > { %v5682_v31 = vld [vmem:[%s5633_s16 + $0x50] sm:$0xff]  ;;  %v5188_v32 = vld [vmem:[%s7565_s1 + $0xa8] sm:$0xff]  ;;  %v5187_v38 = vld [vmem:[%s7565_s1 + $0xa0] sm:$0xff] }
  0x18   : > { %v5196_v33 = vld [vmem:[%s7565_s1 + $0xe8] sm:$0xff]  ;;  %v5701_v36 = vld [vmem:[%s5633_s16 + $0x10] sm:$0xff]  ;;  %v5195_v39 = vld [vmem:[%s7565_s1 + $0xe0] sm:$0xff] }
  0x19   : > { %932 = vmatpush.bf16.msra.mxu0 %v5171_v6  ;;  %5409 = vmatpush.bf16.msra.mxu3 %v5171_v6  ;;  %v5202_v40 = vld [vmem:[%s7565_s1 + $0x118] sm:$0xff]  ;;  %v5729_v44 = vld [vmem:[%s5633_s16 + $0x60] sm:$0xff]  ;;  %v5201_v46 = vld [vmem:[%s7565_s1 + $0x110] sm:$0xff] }
  0x1a   : > { %1021 = vmatpush.bf16.msra.mxu1 %v5179_v7  ;;  %5417 = vmatpush.bf16.msra.mxu2 %v5179_v7  ;;  %v5210_v41 = vld [vmem:[%s7565_s1 + $0x158] sm:$0xff]  ;;  %v5185_v47 = vld [vmem:[%s7565_s1 + $0x90] sm:$0xff]  ;;  %v5751_v50 = vld [vmem:[%s5633_s16 + $0x20] sm:$0xff] }
  0x1b   : > { %v5186_v42 = vld [vmem:[%s7565_s1 + $0x98] sm:$0xff]  ;;  %v5209_v48 = vld [vmem:[%s7565_s1 + $0x150] sm:$0xff]  ;;  %v5754_v51 = vld [vmem:[%s5633_s16 + $0x68] sm:$0xff] }
  0x1c   : > { %v5726_v43 = vld [vmem:[%s5633_s16 + $0x18] sm:$0xff]  ;;  %v5193_v49 = vld [vmem:[%s7565_s1 + $0xd0] sm:$0xff]  ;;  %v5184_v52 = vld [vmem:[%s7565_s1 + $0x88] sm:$0xff] }
  0x1d   : > { %933 = vmatpush.bf16.msra.mxu0 %v5170_v8  ;;  %5410 = vmatpush.bf16.msra.mxu3 %v5170_v8  ;;  %v5194_v45 = vld [vmem:[%s7565_s1 + $0xd8] sm:$0xff]  ;;  %v5192_v53 = vld [vmem:[%s7565_s1 + $0xc8] sm:$0xff]  ;;  %v5183_v56 = vld [vmem:[%s7565_s1 + $0x80] sm:$0xff] }
  0x1e   : > { %1022 = vmatpush.bf16.msra.mxu1 %v5178_v9  ;;  %5418 = vmatpush.bf16.msra.mxu2 %v5178_v9  ;;  %v5200_v54 = vld [vmem:[%s7565_s1 + $0x108] sm:$0xff]  ;;  %v5191_v57 = vld [vmem:[%s7565_s1 + $0xc0] sm:$0xff]  ;;  %v5782_v59 = vld [vmem:[%s5633_s16 + $0x70] sm:$0xff] }
  0x1f   : > { %v5208_v55 = vld [vmem:[%s7565_s1 + $0x148] sm:$0xff]  ;;  %v5789_v60 = vld [vmem:[%s5633_s16 + $0x30] sm:$0xff]  ;;  %v5792_v61 = vld [vmem:[%s5633_s16 + $0x78] sm:$0xff] }
  0x20   : > { %v5779_v58 = vld [vmem:[%s5633_s16 + $0x28] sm:$0xff]  ;;  %v5199_v62 = vld [vmem:[%s7565_s1 + $0x100] sm:$0xff]  ;;  %v5222_v0 = vld [vmem:[%s7565_s1 + $0x1b8] sm:$0xff] }
  0x21   : > { %934 = vmatpush.bf16.msra.mxu0 %v5169_v10  ;;  %5411 = vmatpush.bf16.msra.mxu3 %v5169_v10  ;;  %v5207_v63 = vld [vmem:[%s7565_s1 + $0x140] sm:$0xff]  ;;  %v5230_v1 = vld [vmem:[%s7565_s1 + $0x1f8] sm:$0xff] }
  0x22   : > { %1023 = vmatpush.bf16.msra.mxu1 %v5177_v11  ;;  %5419 = vmatpush.bf16.msra.mxu2 %v5177_v11  ;;  %v5811_v2 = vld [vmem:[%s5633_s16 + $0x38] sm:$0xff]  ;;  %v5824_v7 = vld [vmem:[%s5633_s16 + $0x80] sm:$0xff] }
  0x23   : > { %v5238_v3 = vld [vmem:[%s7565_s1 + $0x238] sm:$0xff] }
  0x24   : > { %v5246_v4 = vld [vmem:[%s7565_s1 + $0x278] sm:$0xff] }
  0x25   : > { %935 = vmatpush.bf16.msra.mxu0 %v5168_v12  ;;  %5412 = vmatpush.bf16.msra.mxu3 %v5168_v12 }
  0x26   : > { %1024 = vmatpush.bf16.msra.mxu1 %v5176_v13  ;;  %5420 = vmatpush.bf16.msra.mxu2 %v5176_v13 }
  0x29   : > { %936 = vmatpush.bf16.msra.mxu0 %v5167_v14  ;;  %5413 = vmatpush.bf16.msra.mxu3 %v5167_v14 }
  0x2a   : > { %1025 = vmatpush.bf16.msra.mxu1 %v5175_v15  ;;  %5421 = vmatpush.bf16.msra.mxu2 %v5175_v15  ;;  %v5221_v15 = vld [vmem:[%s7565_s1 + $0x1b0] sm:$0xff] }
  0x2c   : > { %937 = vmatmul.bf16.vlgmr.msra.gmra.mxu0 %v7571_v25  ;;  %982 = vmatmul.bf16.vlgmr.msra.gmra.mxu3 %v5648_v20 }
  0x2d   : > { %1285 = vmatpush.bf16.msrb.mxu0 %v5206_v16  ;;  %1026 = vmatmul.bf16.vlgmr.msra.gmra.mxu1 %v5642_v18  ;;  %v5229_v16 = vld [vmem:[%s7565_s1 + $0x1f0] sm:$0xff] }
  0x2e   : > { %1374 = vmatpush.bf16.msrb.mxu1 %v5214_v17  ;;  %1071 = vmatmul.bf16.vlgmr.msra.gmra.mxu2 %v5645_v19 }
  0x2f   : > { %1107 = vmatpush.bf16.msrb.mxu2 %v5190_v21  ;;  %1196 = vmatpush.bf16.msrb.mxu3 %v5198_v22  ;;  %v5843_v22 = vld [vmem:[%s5633_s16 + $0x88] sm:$0xff] }
  0x31   : > { %1286 = vmatpush.bf16.msrb.mxu0 %v5205_v23 }
  0x32   : > { %1375 = vmatpush.bf16.msrb.mxu1 %v5213_v24 }
  0x33   : > { %1108 = vmatpush.bf16.msrb.mxu2 %v5189_v26  ;;  %1197 = vmatpush.bf16.msrb.mxu3 %v5197_v27 }
  0x35   : > { %1287 = vmatpush.bf16.msrb.mxu0 %v5204_v28  ;;  %v5237_v28 = vld [vmem:[%s7565_s1 + $0x230] sm:$0xff] }
  0x36   : > { %1376 = vmatpush.bf16.msrb.mxu1 %v5212_v29  ;;  %v5245_v29 = vld [vmem:[%s7565_s1 + $0x270] sm:$0xff] }
  0x37   : > { %1109 = vmatpush.bf16.msrb.mxu2 %v5188_v32  ;;  %1198 = vmatpush.bf16.msrb.mxu3 %v5196_v33 }
  0x39   : > { %1288 = vmatpush.bf16.msrb.mxu0 %v5203_v34 }
  0x3a   : > { %1377 = vmatpush.bf16.msrb.mxu1 %v5211_v35 }
  0x3b   : > { %1110 = vmatpush.bf16.msrb.mxu2 %v5187_v38  ;;  %1199 = vmatpush.bf16.msrb.mxu3 %v5195_v39 }
  0x3c   : > { %942 = vmatmul.bf16.gmra.mxu0 %v5642_v18  ;;  %987 = vmatmul.bf16.gmra.mxu3 %v5645_v19 }
  0x3d   : > { %1031 = vmatmul.bf16.gmra.mxu1 %v5679_v30  ;;  %1289 = vmatpush.bf16.msrb.mxu0 %v5202_v40 }
  0x3e   : > { %1076 = vmatmul.bf16.gmra.mxu2 %v5682_v31  ;;  %1378 = vmatpush.bf16.msrb.mxu1 %v5210_v41 }
  0x3f   : > { %1111 = vmatpush.bf16.msrb.mxu2 %v5186_v42  ;;  %1200 = vmatpush.bf16.msrb.mxu3 %v5194_v45  ;;  %v5864_v42 = vld [vmem:[%s5633_s16 + $0x90] sm:$0xff] }
  0x41   : > { %1290 = vmatpush.bf16.msrb.mxu0 %v5201_v46 }
  0x42   : > { %1379 = vmatpush.bf16.msrb.mxu1 %v5209_v48 }
  0x43   : > { %1112 = vmatpush.bf16.msrb.mxu2 %v5185_v47  ;;  %1201 = vmatpush.bf16.msrb.mxu3 %v5193_v49 }
  0x45   : > { %1291 = vmatpush.bf16.msrb.mxu0 %v5200_v54 }
  0x46   : > { %1380 = vmatpush.bf16.msrb.mxu1 %v5208_v55 }
  0x47   : > { %1113 = vmatpush.bf16.msrb.mxu2 %v5184_v52  ;;  %1202 = vmatpush.bf16.msrb.mxu3 %v5192_v53 }
  0x49   : > { %1292 = vmatpush.bf16.msrb.mxu0 %v5199_v62 }
  0x4a   : > { %1381 = vmatpush.bf16.msrb.mxu1 %v5207_v63  ;;  %v5885_v63 = vld [vmem:[%s5633_s16 + $0x98] sm:$0xff] }
  0x4b   : > { %1114 = vmatpush.bf16.msrb.mxu2 %v5183_v56  ;;  %1203 = vmatpush.bf16.msrb.mxu3 %v5191_v57  ;;  %v5220_v56 = vld [vmem:[%s7565_s1 + $0x1a8] sm:$0xff] }
  0x4c   : > { %947 = vmatmul.bf16.gmra.mxu0 %v5679_v30  ;;  %992 = vmatmul.bf16.gmra.mxu3 %v5682_v31  ;;  %v5228_v57 = vld [vmem:[%s7565_s1 + $0x1e8] sm:$0xff] }
  0x4d   : > { %1036 = vmatmul.bf16.gmra.mxu1 %v5701_v36  ;;  %2026 = vmatpush.bf16.msra.mxu0 %v5238_v3 }
  0x4e   : > { %1081 = vmatmul.bf16.gmra.mxu2 %v5704_v37  ;;  %2115 = vmatpush.bf16.msra.mxu1 %v5246_v4 }
  0x4f   : > { %1848 = vmatpush.bf16.msra.mxu2 %v5222_v0  ;;  %1937 = vmatpush.bf16.msra.mxu3 %v5230_v1 }
  0x51   : > { %2027 = vmatpush.bf16.msra.mxu0 %v5237_v28 }
  0x52   : > { %2116 = vmatpush.bf16.msra.mxu1 %v5245_v29 }
  0x53   : > { %1849 = vmatpush.bf16.msra.mxu2 %v5221_v15  ;;  %1938 = vmatpush.bf16.msra.mxu3 %v5229_v16 }
  0x57   : > { %1850 = vmatpush.bf16.msra.mxu2 %v5220_v56  ;;  %1939 = vmatpush.bf16.msra.mxu3 %v5228_v57 }
  0x5c   : > { %952 = vmatmul.bf16.gmra.mxu0 %v5701_v36  ;;  %997 = vmatmul.bf16.gmra.mxu3 %v5704_v37 }
  0x5d   : > { %1041 = vmatmul.bf16.gmra.mxu1 %v5726_v43 }
  0x5e   : > { %1086 = vmatmul.bf16.gmra.mxu2 %v5729_v44 }
  0x6c   : > { %957 = vmatmul.bf16.gmra.mxu0 %v5726_v43  ;;  %1002 = vmatmul.bf16.gmra.mxu3 %v5729_v44 }
  0x6d   : > { %1046 = vmatmul.bf16.gmra.mxu1 %v5751_v50 }
  0x6e   : > { %1091 = vmatmul.bf16.gmra.mxu2 %v5754_v51 }
  0x7c   : > { %962 = vmatmul.bf16.gmra.mxu0 %v5751_v50  ;;  %1007 = vmatmul.bf16.gmra.mxu3 %v5754_v51 }
  0x7d   : > { %1051 = vmatmul.bf16.gmra.mxu1 %v5779_v58 }
  0x7e   : > { %1096 = vmatmul.bf16.gmra.mxu2 %v5782_v59 }
  0x8c   : > { %967 = vmatmul.bf16.gmra.mxu0 %v5779_v58  ;;  %1012 = vmatmul.bf16.gmra.mxu3 %v5782_v59 }
  0x8d   : > { %1056 = vmatmul.bf16.gmra.mxu1 %v5789_v60 }
  0x8e   : > { %1101 = vmatmul.bf16.gmra.mxu2 %v5792_v61 }
  0x9c   : > { %972 = vmatmul.bf16.gmra.mxu0 %v5789_v60  ;;  %1204 = vmatmul.bf16.vlgmr.msrb.gmra.mxu3 %v7571_v25  ;;  %v6026_v25 = vld [vmem:[%s5633_s16 + $0xd0] sm:$0xff] }
  0x9d   : > { %1061 = vmatmul.bf16.gmra.mxu1 %v5811_v2 }
  0x9e   : > { %1115 = vmatmul.bf16.vlgmr.msrb.gmra.mxu2 %v5679_v30 }
  0xa9   : > { %v938_v5 = vpop.f32.mrf.mxu0 }
  0xaa   : > { %v1027_v6 = vpop.f32.mrf.mxu1 }
  0xab   : > { %v5826_v8 = vadd.f32 %v1027_v6, %v938_v5  ;;  %v5236_v5 = vld [vmem:[%s7565_s1 + $0x228] sm:$0xff] }
  0xac   : > { %977 = vmatmul.bf16.gmra.mxu0 %v5811_v2  ;;  %1209 = vmatmul.bf16.gmra.mxu3 %v5824_v7  ;;  %v5244_v6 = vld [vmem:[%s7565_s1 + $0x268] sm:$0xff] }
  0xad   : > { %1066 = vmatmul.bf16.gmra.mxu1 %v5648_v20  ;;  %2028 = vmatpush.bf16.msra.mxu0 %v5236_v5 }
  0xae   : > { %1120 = vmatmul.bf16.gmra.mxu2 %v5701_v36  ;;  %2117 = vmatpush.bf16.msra.mxu1 %v5244_v6 }
  0xaf   : > { %v983_v10 = vpop.f32.mrf.mxu3 }
  0xb1   : > { %v1072_v9 = vpop.f32.mrf.mxu2  ;;  %v940_v11 = vpop.f32.mrf.mxu0 }
  0xb2   : > { %v5832_v12 = vadd.f32 %v1072_v9, %v983_v10  ;;  %v1029_v13 = vpop.f32.mrf.mxu1 }
  0xb3   : > { %v5834_v14 = vadd.f32 %v1029_v13, %v940_v11 }
  0xb7   : > { %v985_v21 = vpop.f32.mrf.mxu3 }
  0xb9   : > { %v1074_v17 = vpop.f32.mrf.mxu2  ;;  %v943_v23 = vpop.f32.mrf.mxu0 }
  0xba   : > { %v5845_v24 = vadd.f32 %v1074_v17, %v985_v21  ;;  %v1032_v26 = vpop.f32.mrf.mxu1  ;;  %v5906_v21 = vld [vmem:[%s5633_s16 + $0xa0] sm:$0xff] }
  0xbb   : > { %v5847_v27 = vadd.f32 %v1032_v26, %v943_v23 }
  0xbc   : > { %1293 = vmatmul.bf16.vlgmr.msrb.gmra.mxu0 %v5824_v7  ;;  %1214 = vmatmul.bf16.gmra.mxu3 %v5843_v22 }
  0xbd   : > { %1382 = vmatmul.bf16.vlgmr.msrb.gmra.mxu1 %v5843_v22 }
  0xbe   : > { %1125 = vmatmul.bf16.gmra.mxu2 %v5726_v43 }
  0xbf   : > { %v988_v33 = vpop.f32.mrf.mxu3 }
  0xc1   : > { %v1077_v32 = vpop.f32.mrf.mxu2  ;;  %v945_v34 = vpop.f32.mrf.mxu0 }
  0xc2   : > { %v5859_v35 = vadd.f32 %v1077_v32, %v988_v33  ;;  %v1034_v38 = vpop.f32.mrf.mxu1 }
  0xc3   : > { %v5861_v39 = vadd.f32 %v1034_v38, %v945_v34 }
  0xc7   : > { %v990_v41 = vpop.f32.mrf.mxu3 }
  0xc9   : > { %v1079_v40 = vpop.f32.mrf.mxu2  ;;  %v948_v43 = vpop.f32.mrf.mxu0 }
  0xca   : > { %v5866_v45 = vadd.f32 %v1079_v40, %v990_v41  ;;  %v1037_v46 = vpop.f32.mrf.mxu1 }
  0xcb   : > { %v5868_v47 = vadd.f32 %v1037_v46, %v948_v43  ;;  %v5219_v43 = vld [vmem:[%s7565_s1 + $0x1a0] sm:$0xff] }
  0xcc   : > { %1298 = vmatmul.bf16.gmra.mxu0 %v5843_v22  ;;  %1219 = vmatmul.bf16.gmra.mxu3 %v5864_v42  ;;  %v5227_v46 = vld [vmem:[%s7565_s1 + $0x1e0] sm:$0xff] }
  0xcd   : > { %1387 = vmatmul.bf16.gmra.mxu1 %v5864_v42  ;;  %1851 = vmatpush.bf16.msra.mxu2 %v5219_v43 }
  0xce   : > { %1130 = vmatmul.bf16.gmra.mxu2 %v5751_v50  ;;  %1940 = vmatpush.bf16.msra.mxu3 %v5227_v46 }
  0xcf   : > { %v993_v49 = vpop.f32.mrf.mxu3 }
  0xd1   : > { %v1082_v48 = vpop.f32.mrf.mxu2  ;;  %v950_v52 = vpop.f32.mrf.mxu0 }
  0xd2   : > { %v5874_v53 = vadd.f32 %v1082_v48, %v993_v49  ;;  %v1039_v54 = vpop.f32.mrf.mxu1  ;;  %v5927_v49 = vld [vmem:[%s5633_s16 + $0xa8] sm:$0xff] }
  0xd3   : > { %v5876_v55 = vadd.f32 %v1039_v54, %v950_v52 }
  0xd7   : > { %v995_v62 = vpop.f32.mrf.mxu3 }
  0xd9   : > { %v1084_v50 = vpop.f32.mrf.mxu2  ;;  %v953_v0 = vpop.f32.mrf.mxu0 }
  0xda   : > { %v5887_v1 = vadd.f32 %v1084_v50, %v995_v62  ;;  %v1042_v3 = vpop.f32.mrf.mxu1  ;;  %v5235_v50 = vld [vmem:[%s7565_s1 + $0x220] sm:$0xff] }
  0xdb   : > { %v5889_v4 = vadd.f32 %v1042_v3, %v953_v0  ;;  %v5243_v62 = vld [vmem:[%s7565_s1 + $0x260] sm:$0xff]  ;;  %2029 = vmatpush.bf16.msra.mxu0 %v5235_v50 }
  0xdc   : > { %1303 = vmatmul.bf16.gmra.mxu0 %v5864_v42  ;;  %1224 = vmatmul.bf16.gmra.mxu3 %v5885_v63 }
  0xdd   : > { %1392 = vmatmul.bf16.gmra.mxu1 %v5885_v63 }
  0xde   : > { %1135 = vmatmul.bf16.gmra.mxu2 %v5779_v58  ;;  %2118 = vmatpush.bf16.msra.mxu1 %v5243_v62 }
  0xdf   : > { %v998_v10 = vpop.f32.mrf.mxu3 }
  0xe1   : > { %v1087_v9 = vpop.f32.mrf.mxu2  ;;  %v955_v11 = vpop.f32.mrf.mxu0 }
  0xe2   : > { %v5901_v13 = vadd.f32 %v1087_v9, %v998_v10  ;;  %v1044_v15 = vpop.f32.mrf.mxu1 }
  0xe3   : > { %v5903_v16 = vadd.f32 %v1044_v15, %v955_v11  ;;  %v5948_v15 = vld [vmem:[%s5633_s16 + $0xb0] sm:$0xff] }
  0xe7   : > { %v1000_v17 = vpop.f32.mrf.mxu3 }
  0xe9   : > { %v1089_v58 = vpop.f32.mrf.mxu2  ;;  %v958_v23 = vpop.f32.mrf.mxu0 }
  0xea   : > { %v5908_v26 = vadd.f32 %v1089_v58, %v1000_v17  ;;  %v1047_v28 = vpop.f32.mrf.mxu1 }
  0xeb   : > { %v5910_v29 = vadd.f32 %v1047_v28, %v958_v23 }
  0xec   : > { %1308 = vmatmul.bf16.gmra.mxu0 %v5885_v63  ;;  %1229 = vmatmul.bf16.gmra.mxu3 %v5906_v21 }
  0xed   : > { %1397 = vmatmul.bf16.gmra.mxu1 %v5906_v21 }
  0xee   : > { %1140 = vmatmul.bf16.gmra.mxu2 %v5789_v60 }
  0xef   : > { %v1003_v33 = vpop.f32.mrf.mxu3 }
  0xf1   : > { %v1092_v32 = vpop.f32.mrf.mxu2  ;;  %v960_v34 = vpop.f32.mrf.mxu0 }
  0xf2   : > { %v5916_v38 = vadd.f32 %v1092_v32, %v1003_v33  ;;  %v1049_v40 = vpop.f32.mrf.mxu1 }
  0xf3   : > { %v5918_v41 = vadd.f32 %v1049_v40, %v960_v34 }
  0xf7   : > { %v1005_v48 = vpop.f32.mrf.mxu3 }
  0xf9   : > { %v1094_v60 = vpop.f32.mrf.mxu2  ;;  %v963_v52 = vpop.f32.mrf.mxu0 }
  0xfa   : > { %v5929_v54 = vadd.f32 %v1094_v60, %v1005_v48  ;;  %v1052_v56 = vpop.f32.mrf.mxu1  ;;  %v5218_v60 = vld [vmem:[%s7565_s1 + $0x198] sm:$0xff] }
  0xfb   : > { %v5931_v57 = vadd.f32 %v1052_v56, %v963_v52  ;;  %v5226_v48 = vld [vmem:[%s7565_s1 + $0x1d8] sm:$0xff]  ;;  %1852 = vmatpush.bf16.msra.mxu2 %v5218_v60  ;;  %v5989_v60 = vld [vmem:[%s5633_s16 + $0xc0] sm:$0xff] }
  0xfc   : > { %1313 = vmatmul.bf16.gmra.mxu0 %v5906_v21  ;;  %1234 = vmatmul.bf16.gmra.mxu3 %v5927_v49  ;;  %v5969_v56 = vld [vmem:[%s5633_s16 + $0xb8] sm:$0xff]  ;;  %7618 = vst [vmem:[#allocation3_spill] sm:$0xff] %v5989_v60 }
  0xfd   : > { %1402 = vmatmul.bf16.gmra.mxu1 %v5927_v49  ;;  %1941 = vmatpush.bf16.msra.mxu3 %v5226_v48 }
  0xfe   : > { %1145 = vmatmul.bf16.gmra.mxu2 %v5811_v2 }
  0xff   : > { %v1008_v3 = vpop.f32.mrf.mxu3 }
 0x101   : > { %v1097_v0 = vpop.f32.mrf.mxu2  ;;  %v965_v5 = vpop.f32.mrf.mxu0 }
 0x102   : > { %v5943_v6 = vadd.f32 %v1097_v0, %v1008_v3  ;;  %v1054_v9 = vpop.f32.mrf.mxu1 }
 0x103   : > { %v5945_v10 = vadd.f32 %v1054_v9, %v965_v5 }
 0x107   : > { %v1010_v11 = vpop.f32.mrf.mxu3 }
 0x109   : > { %v1099_v2 = vpop.f32.mrf.mxu2  ;;  %v968_v58 = vpop.f32.mrf.mxu0 }
 0x10a   : > { %v5950_v17 = vadd.f32 %v1099_v2, %v1010_v11  ;;  %v1057_v23 = vpop.f32.mrf.mxu1  ;;  %v5234_v2 = vld [vmem:[%s7565_s1 + $0x218] sm:$0xff] }
 0x10b   : > { %v5952_v28 = vadd.f32 %v1057_v23, %v968_v58  ;;  %v5242_v11 = vld [vmem:[%s7565_s1 + $0x258] sm:$0xff]  ;;  %2030 = vmatpush.bf16.msra.mxu0 %v5234_v2 }
 0x10c   : > { %1318 = vmatmul.bf16.gmra.mxu0 %v5927_v49  ;;  %1239 = vmatmul.bf16.gmra.mxu3 %v5948_v15 }
 0x10d   : > { %1407 = vmatmul.bf16.gmra.mxu1 %v5948_v15 }
 0x10e   : > { %1150 = vmatmul.bf16.gmra.mxu2 %v5648_v20  ;;  %2119 = vmatpush.bf16.msra.mxu1 %v5242_v11 }
 0x10f   : > { %v1013_v33 = vpop.f32.mrf.mxu3 }
 0x111   : > { %v1102_v32 = vpop.f32.mrf.mxu2  ;;  %v970_v34 = vpop.f32.mrf.mxu0 }
 0x112   : > { %v5958_v40 = vadd.f32 %v1102_v32, %v1013_v33  ;;  %v1059_v43 = vpop.f32.mrf.mxu1 }
 0x113   : > { %v5960_v46 = vadd.f32 %v1059_v43, %v970_v34 }
 0x117   : > { %v1015_v52 = vpop.f32.mrf.mxu3 }
 0x119   : > { %v1104_v20 = vpop.f32.mrf.mxu2  ;;  %v973_v50 = vpop.f32.mrf.mxu0 }
 0x11a   : > { %v5971_v62 = vadd.f32 %v1104_v20, %v1015_v52  ;;  %v1062_v0 = vpop.f32.mrf.mxu1 }
 0x11b   : > { %v5973_v3 = vadd.f32 %v1062_v0, %v973_v50 }
 0x11c   : > { %1323 = vmatmul.bf16.gmra.mxu0 %v5948_v15  ;;  %1244 = vmatmul.bf16.gmra.mxu3 %v5969_v56 }
 0x11d   : > { %1412 = vmatmul.bf16.gmra.mxu1 %v5969_v56 }
 0x11e   : > { %1155 = vmatmul.bf16.gmra.mxu2 %v5645_v19 }
 0x11f   : > { %v1205_v9 = vpop.f32.mrf.mxu3 }
 0x121   : > { %v1116_v5 = vpop.f32.mrf.mxu2  ;;  %v975_v23 = vpop.f32.mrf.mxu0 }
 0x122   : > { %v1117_v58 = vadd.f32 %v1116_v5, %v5826_v8  ;;  %v1064_v32 = vpop.f32.mrf.mxu1 }
 0x123   : > { %v5986_v33 = vadd.f32 %v1064_v32, %v975_v23  ;;  %v5217_v23 = vld [vmem:[%s7565_s1 + $0x190] sm:$0xff] }
 0x124   : > { %v1206_v19 = vadd.f32 %v1205_v9, %v1117_v58  ;;  %v5225_v32 = vld [vmem:[%s7565_s1 + $0x1d0] sm:$0xff]  ;;  %1853 = vmatpush.bf16.msra.mxu2 %v5217_v23 }
 0x125   : > { %1942 = vmatpush.bf16.msra.mxu3 %v5225_v32 }
 0x127   : > { %v1207_v43 = vpop.f32.mrf.mxu3 }
 0x129   : > { %v1118_v34 = vpop.f32.mrf.mxu2  ;;  %v978_v20 = vpop.f32.mrf.mxu0 }
 0x12a   : > { %v1119_v48 = vadd.f32 %v1118_v34, %v5834_v14  ;;  %v1067_v52 = vpop.f32.mrf.mxu1 }
 0x12b   : > { %v5992_v50 = vadd.f32 %v1067_v52, %v978_v20 }
 0x12c   : > { %v1208_v0 = vadd.f32 %v1207_v43, %v1119_v48  ;;  %1328 = vmatmul.bf16.gmra.mxu0 %v5969_v56  ;;  %1249 = vmatmul.bf16.gmra.mxu3 %v5989_v60  ;;  %v6008_v43 = vld [vmem:[%s5633_s16 + $0xc8] sm:$0xff] }
 0x12d   : > { %1417 = vmatmul.bf16.gmra.mxu1 %v5989_v60 }
 0x12e   : > { %1160 = vmatmul.bf16.gmra.mxu2 %v5682_v31 }
 0x12f   : > { %v1210_v5 = vpop.f32.mrf.mxu3 }
 0x131   : > { %v1121_v8 = vpop.f32.mrf.mxu2  ;;  %v980_v2 = vpop.f32.mrf.mxu0 }
 0x132   : > { %v1122_v9 = vadd.f32 %v1121_v8, %v5847_v27  ;;  %v1069_v14 = vpop.f32.mrf.mxu1 }
 0x133   : > { %v5999_v11 = vadd.f32 %v1069_v14, %v980_v2 }
 0x134   : > { %v1211_v58 = vadd.f32 %v1210_v5, %v1122_v9 }
 0x137   : > { %v1212_v34 = vpop.f32.mrf.mxu3 }
 0x139   : > { %v1123_v31 = vpop.f32.mrf.mxu2  ;;  %v1294_v48 = vpop.f32.mrf.mxu0 }
 0x13a   : > { %v1124_v27 = vadd.f32 %v1123_v31, %v5861_v39  ;;  %v1383_v20 = vpop.f32.mrf.mxu1  ;;  %v1295_v52 = vadd.f32 %v1294_v48, %v1206_v19  ;;  %v5233_v39 = vld [vmem:[%s7565_s1 + $0x210] sm:$0xff] }
 0x13b   : > { %v5241_v19 = vld [vmem:[%s7565_s1 + $0x250] sm:$0xff]  ;;  %2031 = vmatpush.bf16.msra.mxu0 %v5233_v39 }
 0x13c   : > { %v1213_v8 = vadd.f32 %v1212_v34, %v1124_v27  ;;  %v6011_v5 = vadd.f32 %v1383_v20, %v1295_v52  ;;  %1333 = vmatmul.bf16.gmra.mxu0 %v5989_v60  ;;  %1254 = vmatmul.bf16.gmra.mxu3 %v6008_v43 }
 0x13d   : > { %1422 = vmatmul.bf16.gmra.mxu1 %v6008_v43 }
 0x13e   : > { %1165 = vmatmul.bf16.gmra.mxu2 %v5704_v37  ;;  %2120 = vmatpush.bf16.msra.mxu1 %v5241_v19  ;;  %v7575_v27 = vrot.slane %v6011_v5, 7 }
 0x13f   : > { %v1215_v2 = vpop.f32.mrf.mxu3 }
 0x141   : > { %v1126_v9 = vpop.f32.mrf.mxu2  ;;  %v1296_v23 = vpop.f32.mrf.mxu0 }
 0x142   : > { %v1127_v14 = vadd.f32 %v1126_v9, %v5868_v47  ;;  %v1385_v32 = vpop.f32.mrf.mxu1  ;;  %v1297_v31 = vadd.f32 %v1296_v23, %v1208_v0 }
 0x144   : > { %v1216_v37 = vadd.f32 %v1215_v2, %v1127_v14  ;;  %v1386_v34 = vadd.f32 %v1385_v32, %v1297_v31 }
 0x146   : > { %v3335_v48 = vrot.slane %v1386_v34, 7 }
 0x147   : > { %v1217_v52 = vpop.f32.mrf.mxu3 }
 0x148   : > { %v6031_v60 = vsel %vm3333_vm0, %v7575_v27, %v3335_v48 }
 0x149   : > { %v1128_v20 = vpop.f32.mrf.mxu2  ;;  %v1299_v0 = vpop.f32.mrf.mxu0 }
 0x14a   : > { %v1129_v47 = vadd.f32 %v1128_v20, %v5876_v55  ;;  %v1388_v9 = vpop.f32.mrf.mxu1  ;;  %v1300_v39 = vadd.f32 %v1299_v0, %v1211_v58 }
 0x14c   : > { %v1218_v2 = vadd.f32 %v1217_v52, %v1129_v47  ;;  %v6034_v19 = vadd.f32 %v1388_v9, %v1300_v39  ;;  %1338 = vmatmul.bf16.gmra.mxu0 %v6008_v43  ;;  %1259 = vmatmul.bf16.gmra.mxu3 %v6026_v25  ;;  %v5216_v47 = vld [vmem:[%s7565_s1 + $0x188] sm:$0xff]  ;;  %v6049_v39 = vld [vmem:[%s5633_s16 + $0xd8] sm:$0xff] }
 0x14d   : > { %1427 = vmatmul.bf16.gmra.mxu1 %v6026_v25  ;;  %1854 = vmatpush.bf16.msra.mxu2 %v5216_v47 }
 0x14e   : > { %1170 = vmatmul.bf16.gmra.mxu2 %v5729_v44  ;;  %v7574_v20 = vrot.slane %v6034_v19, 7  ;;  %v5224_v44 = vld [vmem:[%s7565_s1 + $0x1c8] sm:$0xff] }
 0x14f   : > { %v1220_v23 = vpop.f32.mrf.mxu3  ;;  %1943 = vmatpush.bf16.msra.mxu3 %v5224_v44 }
 0x151   : > { %v1131_v14 = vpop.f32.mrf.mxu2  ;;  %v1301_v55 = vpop.f32.mrf.mxu0 }
 0x152   : > { %v1132_v32 = vadd.f32 %v1131_v14, %v5889_v4  ;;  %v1390_v31 = vpop.f32.mrf.mxu1  ;;  %v1302_v34 = vadd.f32 %v1301_v55, %v1213_v8 }
 0x154   : > { %v1221_v58 = vadd.f32 %v1220_v23, %v1132_v32  ;;  %v1391_v48 = vadd.f32 %v1390_v31, %v1302_v34 }
 0x156   : > { %v3338_v52 = vrot.slane %v1391_v48, 7 }
 0x157   : > { %v1222_v9 = vpop.f32.mrf.mxu3 }
 0x158   : > { %v6054_v4 = vsel %vm3333_vm0, %v7574_v20, %v3338_v52  ;;  %v6072_v20 = vld [vmem:[%s5633_s16 + $0xe0] sm:$0xff] }
 0x159   : > { %v1133_v0 = vpop.f32.mrf.mxu2  ;;  %v1304_v14 = vpop.f32.mrf.mxu0 }
 0x15a   : > { %v1134_v8 = vadd.f32 %v1133_v0, %v5903_v16  ;;  %v1393_v23 = vpop.f32.mrf.mxu1  ;;  %v1305_v32 = vadd.f32 %v1304_v14, %v1216_v37  ;;  %v5232_v16 = vld [vmem:[%s7565_s1 + $0x208] sm:$0xff] }
 0x15b   : > { %v5240_v37 = vld [vmem:[%s7565_s1 + $0x248] sm:$0xff]  ;;  %2032 = vmatpush.bf16.msra.mxu0 %v5232_v16 }
 0x15c   : > { %v1223_v55 = vadd.f32 %v1222_v9, %v1134_v8  ;;  %v6057_v31 = vadd.f32 %v1393_v23, %v1305_v32  ;;  %1343 = vmatmul.bf16.gmra.mxu0 %v6026_v25  ;;  %1264 = vmatmul.bf16.gmra.mxu3 %v6049_v39 }
 0x15d   : > { %1432 = vmatmul.bf16.gmra.mxu1 %v6049_v39 }
 0x15e   : > { %1175 = vmatmul.bf16.gmra.mxu2 %v5754_v51  ;;  %2121 = vmatpush.bf16.msra.mxu1 %v5240_v37  ;;  %v7577_v8 = vrot.slane %v6057_v31, 7 }
 0x15f   : > { %v1225_v48 = vpop.f32.mrf.mxu3 }
 0x161   : > { %v1136_v34 = vpop.f32.mrf.mxu2  ;;  %v1306_v47 = vpop.f32.mrf.mxu0 }
 0x162   : > { %v1137_v52 = vadd.f32 %v1136_v34, %v5910_v29  ;;  %v1395_v44 = vpop.f32.mrf.mxu1  ;;  %v1307_v0 = vadd.f32 %v1306_v47, %v1218_v2 }
 0x164   : > { %v1226_v51 = vadd.f32 %v1225_v48, %v1137_v52  ;;  %v1396_v9 = vadd.f32 %v1395_v44, %v1307_v0 }
 0x166   : > { %v3341_v14 = vrot.slane %v1396_v9, 7 }
 0x167   : > { %v1227_v32 = vpop.f32.mrf.mxu3 }
 0x168   : > { %v6077_v27 = vsel %vm3333_vm0, %v7577_v8, %v3341_v14 }
 0x169   : > { %v1138_v23 = vpop.f32.mrf.mxu2  ;;  %v1309_v34 = vpop.f32.mrf.mxu0 }
 0x16a   : > { %v1139_v29 = vadd.f32 %v1138_v23, %v5918_v41  ;;  %v1398_v2 = vpop.f32.mrf.mxu1  ;;  %v1310_v16 = vadd.f32 %v1309_v34, %v1221_v58 }
 0x16c   : > { %v1228_v37 = vadd.f32 %v1227_v32, %v1139_v29  ;;  %v6080_v48 = vadd.f32 %v1398_v2, %v1310_v16  ;;  %1348 = vmatmul.bf16.gmra.mxu0 %v6049_v39  ;;  %1269 = vmatmul.bf16.gmra.mxu3 %v6072_v20  ;;  %v5215_v29 = vld [vmem:[%s7565_s1 + $0x180] sm:$0xff]  ;;  %v6095_v16 = vld [vmem:[%s5633_s16 + $0xe8] sm:$0xff] }
 0x16d   : > { %1437 = vmatmul.bf16.gmra.mxu1 %v6072_v20  ;;  %1855 = vmatpush.bf16.msra.mxu2 %v5215_v29 }
 0x16e   : > { %1180 = vmatmul.bf16.gmra.mxu2 %v5782_v59  ;;  %v7576_v23 = vrot.slane %v6080_v48, 7  ;;  %v5223_v59 = vld [vmem:[%s7565_s1 + $0x1c0] sm:$0xff] }
 0x16f   : > { %v1230_v47 = vpop.f32.mrf.mxu3  ;;  %1944 = vmatpush.bf16.msra.mxu3 %v5223_v59 }
 0x171   : > { %v1141_v52 = vpop.f32.mrf.mxu2  ;;  %v1311_v41 = vpop.f32.mrf.mxu0 }
 0x172   : > { %v1142_v44 = vadd.f32 %v1141_v52, %v5931_v57  ;;  %v1400_v0 = vpop.f32.mrf.mxu1  ;;  %v1312_v9 = vadd.f32 %v1311_v41, %v1223_v55 }
 0x174   : > { %v1231_v58 = vadd.f32 %v1230_v47, %v1142_v44  ;;  %v1401_v14 = vadd.f32 %v1400_v0, %v1312_v9 }
 0x176   : > { %v3344_v32 = vrot.slane %v1401_v14, 7 }
 0x177   : > { %v1232_v2 = vpop.f32.mrf.mxu3 }
 0x178   : > { %v6100_v57 = vsel %vm3333_vm0, %v7576_v23, %v3344_v32 }
 0x179   : > { %v1143_v34 = vpop.f32.mrf.mxu2  ;;  %7619 = vst [vmem:[#allocation4_spill] sm:$0xff] %v6100_v57  ;;  %v1314_v52 = vpop.f32.mrf.mxu0  ;;  %v6119_v57 = vld [vmem:[%s5633_s16 + $0xf0] sm:$0xff] }
 0x17a   : > { %v1144_v55 = vadd.f32 %v1143_v34, %v5945_v10  ;;  %v1403_v47 = vpop.f32.mrf.mxu1  ;;  %v1315_v44 = vadd.f32 %v1314_v52, %v1226_v51  ;;  %v5231_v10 = vld [vmem:[%s7565_s1 + $0x200] sm:$0xff] }
 0x17b   : > { %v5239_v51 = vld [vmem:[%s7565_s1 + $0x240] sm:$0xff]  ;;  %2033 = vmatpush.bf16.msra.mxu0 %v5231_v10 }
 0x17c   : > { %v1233_v41 = vadd.f32 %v1232_v2, %v1144_v55  ;;  %v6103_v0 = vadd.f32 %v1403_v47, %v1315_v44  ;;  %1353 = vmatmul.bf16.gmra.mxu0 %v6072_v20  ;;  %1274 = vmatmul.bf16.gmra.mxu3 %v6095_v16  ;;  %v7620_v55 = vmov 0  }
 0x17d   : > { %1442 = vmatmul.bf16.gmra.mxu1 %v6095_v16  ;;  %v536_v52 = vunpack.c.l.b16 %v7620_v55 }
 0x17e   : > { %1185 = vmatmul.bf16.gmra.mxu2 %v5792_v61  ;;  %2122 = vmatpush.bf16.msra.mxu1 %v5239_v51  ;;  %v7578_v47 = vrot.slane %v6103_v0, 7 }
 0x17f   : > { %v1235_v14 = vpop.f32.mrf.mxu3 }
 0x181   : > { %v1146_v9 = vpop.f32.mrf.mxu2  ;;  %v1316_v29 = vpop.f32.mrf.mxu0 }
 0x182   : > { %v1147_v32 = vadd.f32 %v1146_v9, %v5952_v28  ;;  %v1405_v59 = vpop.f32.mrf.mxu1  ;;  %v1317_v34 = vadd.f32 %v1316_v29, %v1228_v37 }
 0x184   : > { %v1236_v61 = vadd.f32 %v1235_v14, %v1147_v32  ;;  %v1406_v2 = vadd.f32 %v1405_v59, %v1317_v34  ;;  %v6127_v14 = vpack.c.b16 %v536_v52, %v536_v52 }
 0x186   : > { %v3347_v44 = vrot.slane %v1406_v2, 7 }
 0x187   : > { %v1237_v8 = vpop.f32.mrf.mxu3 }
 0x188   : > { %v6124_v28 = vsel %vm3333_vm0, %v7578_v47, %v3347_v44 }
 0x189   : > { %v1148_v23 = vpop.f32.mrf.mxu2  ;;  %7621 = vst [vmem:[#allocation5_spill] sm:$0xff] %v6124_v28  ;;  %v1319_v9 = vpop.f32.mrf.mxu0  ;;  %v5166_v28 = vld [vmem:[%s5633_s16 + $0xf8] sm:$0xff] }
 0x18a   : > { %v1149_v37 = vadd.f32 %v1148_v23, %v5960_v46  ;;  %v1408_v10 = vpop.f32.mrf.mxu1  ;;  %v1320_v51 = vadd.f32 %v1319_v9, %v1231_v58  ;;  %v5254_v9 = vld [vmem:[%s7565_s1 + $0x2b8] sm:$0xff] }
 0x18b   : > { %2204 = vmatpush.bf16.msrb.mxu2 %v5254_v9 }
 0x18c   : > { %v1238_v32 = vadd.f32 %v1237_v8, %v1149_v37  ;;  %v6129_v29 = vadd.f32 %v1408_v10, %v1320_v51  ;;  %1358 = vmatmul.bf16.gmra.mxu0 %v6095_v16  ;;  %1279 = vmatmul.bf16.gmra.mxu3 %v6119_v57  ;;  %v5262_v10 = vld [vmem:[%s7565_s1 + $0x2f8] sm:$0xff] }
 0x18d   : > { %1447 = vmatmul.bf16.gmra.mxu1 %v6119_v57  ;;  %2293 = vmatpush.bf16.msrb.mxu3 %v5262_v10 }
 0x18e   : > { %1190 = vmatmul.bf16.gmra.mxu2 %v6127_v14  ;;  %v7579_v44 = vrot.slane %v6129_v29, 7 }
 0x18f   : > { %v1240_v34 = vpop.f32.mrf.mxu3 }
 0x191   : > { %v1151_v59 = vpop.f32.mrf.mxu2  ;;  %v1321_v23 = vpop.f32.mrf.mxu0 }
 0x192   : > { %v1152_v46 = vadd.f32 %v1151_v59, %v5973_v3  ;;  %v1410_v2 = vpop.f32.mrf.mxu1  ;;  %v1322_v52 = vadd.f32 %v1321_v23, %v1233_v41 }
 0x194   : > { %v1241_v58 = vadd.f32 %v1240_v34, %v1152_v46  ;;  %v1411_v8 = vadd.f32 %v1410_v2, %v1322_v52 }
 0x196   : > { %v3350_v37 = vrot.slane %v1411_v8, 7 }
 0x197   : > { %v1242_v47 = vpop.f32.mrf.mxu3 }
 0x198   : > { %v6147_v3 = vsel %vm3333_vm0, %v7579_v44, %v3350_v37  ;;  %v5270_v37 = vld [vmem:[%s7565_s1 + $0x338] sm:$0xff] }
 0x199   : > { %v1153_v51 = vpop.f32.mrf.mxu2  ;;  %7622 = vst [vmem:[#allocation6_spill] sm:$0xff] %v6147_v3  ;;  %v1324_v59 = vpop.f32.mrf.mxu0  ;;  %2767 = vmatpush.bf16.msrb.mxu0 %v5270_v37 }
 0x19a   : > { %v1154_v41 = vadd.f32 %v1153_v51, %v5986_v33  ;;  %v1413_v34 = vpop.f32.mrf.mxu1  ;;  %v1325_v46 = vadd.f32 %v1324_v59, %v1236_v61  ;;  %v5278_v33 = vld [vmem:[%s7565_s1 + $0x378] sm:$0xff] }
 0x19b   : > { %2856 = vmatpush.bf16.msrb.mxu1 %v5278_v33 }
 0x19c   : > { %v1243_v23 = vadd.f32 %v1242_v47, %v1154_v41  ;;  %v6150_v2 = vadd.f32 %v1413_v34, %v1325_v46  ;;  %1363 = vmatmul.bf16.gmra.mxu0 %v6119_v57  ;;  %1945 = vmatmul.bf16.vlgmr.msra.gmra.mxu3 %v5642_v18 }
 0x19d   : > { %1452 = vmatmul.bf16.gmra.mxu1 %v5166_v28 }
 0x19e   : > { %1856 = vmatmul.bf16.vlgmr.msra.gmra.mxu2 %v7620_v55  ;;  %v7583_v41 = vrot.slane %v6150_v2, 7 }
 0x19f   : > { %v1245_v8 = vpop.f32.mrf.mxu3 }
 0x1a1   : > { %v1156_v52 = vpop.f32.mrf.mxu2  ;;  %v1326_v47 = vpop.f32.mrf.mxu0 }
 0x1a2   : > { %v1157_v61 = vadd.f32 %v1156_v52, %v5992_v50  ;;  %v1415_v9 = vpop.f32.mrf.mxu1  ;;  %v1327_v10 = vadd.f32 %v1326_v47, %v1238_v32 }
 0x1a4   : > { %v1246_v51 = vadd.f32 %v1245_v8, %v1157_v61  ;;  %v1416_v18 = vadd.f32 %v1415_v9, %v1327_v10  ;;  %v6173_v8 = vld [vmem:[%s5633_s16] sm:$0xff] }
 0x1a6   : > { %v3353_v59 = vrot.slane %v1416_v18, 7 }
 0x1a7   : > { %v1247_v46 = vpop.f32.mrf.mxu3 }
 0x1a8   : > { %v6166_v44 = vsel %vm3333_vm0, %v7583_v41, %v3353_v59 }
 0x1a9   : > { %v1158_v34 = vpop.f32.mrf.mxu2  ;;  %v1329_v52 = vpop.f32.mrf.mxu0 }
 0x1aa   : > { %v1159_v50 = vadd.f32 %v1158_v34, %v5999_v11  ;;  %v1418_v3 = vpop.f32.mrf.mxu1  ;;  %v1330_v32 = vadd.f32 %v1329_v52, %v1241_v58  ;;  %v5253_v34 = vld [vmem:[%s7565_s1 + $0x2b0] sm:$0xff] }
 0x1ab   : > { %2205 = vmatpush.bf16.msrb.mxu2 %v5253_v34 }
 0x1ac   : > { %v1248_v37 = vadd.f32 %v1247_v46, %v1159_v50  ;;  %v6169_v33 = vadd.f32 %v1418_v3, %v1330_v32  ;;  %1368 = vmatmul.bf16.gmra.mxu0 %v5166_v28  ;;  %1950 = vmatmul.bf16.gmra.mxu3 %v5679_v30  ;;  %v5261_v30 = vld [vmem:[%s7565_s1 + $0x2f0] sm:$0xff] }
 0x1ad   : > { %1457 = vmatmul.bf16.gmra.mxu1 %v6127_v14  ;;  %2294 = vmatpush.bf16.msrb.mxu3 %v5261_v30 }
 0x1ae   : > { %1861 = vmatmul.bf16.gmra.mxu2 %v6173_v8  ;;  %v7582_v28 = vrot.slane %v6169_v33, 7 }
 0x1af   : > { %v1250_v47 = vpop.f32.mrf.mxu3 }
 0x1b1   : > { %v1161_v61 = vpop.f32.mrf.mxu2  ;;  %v1331_v11 = vpop.f32.mrf.mxu0 }
 0x1b2   : > { %v1162_v9 = vadd.f32 %v1161_v61, %v5832_v12  ;;  %v1420_v10 = vpop.f32.mrf.mxu1  ;;  %v1332_v18 = vadd.f32 %v1331_v11, %v1243_v23  ;;  %v6194_v11 = vld [vmem:[%s5633_s16 + $0x8] sm:$0xff] }
 0x1b4   : > { %v1251_v58 = vadd.f32 %v1250_v47, %v1162_v9  ;;  %v1421_v59 = vadd.f32 %v1420_v10, %v1332_v18 }
 0x1b6   : > { %v3356_v3 = vrot.slane %v1421_v59, 7 }
 0x1b7   : > { %v1252_v50 = vpop.f32.mrf.mxu3 }
 0x1b8   : > { %v6188_v12 = vsel %vm3333_vm0, %v7582_v28, %v3356_v3 }
 0x1b9   : > { %v1163_v46 = vpop.f32.mrf.mxu2  ;;  %7623 = vst [vmem:[#allocation7_spill] sm:$0xff] %v6188_v12  ;;  %v1334_v52 = vpop.f32.mrf.mxu0 }
 0x1ba   : > { %v1164_v23 = vadd.f32 %v1163_v46, %v5845_v24  ;;  %v1423_v32 = vpop.f32.mrf.mxu1  ;;  %v1335_v61 = vadd.f32 %v1334_v52, %v1246_v51  ;;  %v5269_v24 = vld [vmem:[%s7565_s1 + $0x330] sm:$0xff] }
 0x1bb   : > { %v5277_v51 = vld [vmem:[%s7565_s1 + $0x370] sm:$0xff]  ;;  %2768 = vmatpush.bf16.msrb.mxu0 %v5269_v24 }
 0x1bc   : > { %v1253_v47 = vadd.f32 %v1252_v50, %v1164_v23  ;;  %v6191_v9 = vadd.f32 %v1423_v32, %v1335_v61  ;;  %2034 = vmatmul.bf16.vlgmr.msra.gmra.mxu0 %v6194_v11  ;;  %1955 = vmatmul.bf16.gmra.mxu3 %v5701_v36 }
 0x1bd   : > { %2123 = vmatmul.bf16.vlgmr.msra.gmra.mxu1 %v7620_v55 }
 0x1be   : > { %7624 = vst [vmem:[#allocation8_spill] sm:$0xff] %v6191_v9  ;;  %1866 = vmatmul.bf16.gmra.mxu2 %v6194_v11  ;;  %2857 = vmatpush.bf16.msrb.mxu1 %v5277_v51  ;;  %v7580_v50 = vrot.slane %v6191_v9, 7 }
 0x1bf   : > { %v1255_v18 = vpop.f32.mrf.mxu3 }
 0x1c1   : > { %v1166_v10 = vpop.f32.mrf.mxu2  ;;  %v1336_v3 = vpop.f32.mrf.mxu0 }
 0x1c2   : > { %v1167_v59 = vadd.f32 %v1166_v10, %v5859_v35  ;;  %v1425_v34 = vpop.f32.mrf.mxu1  ;;  %v1337_v30 = vadd.f32 %v1336_v3, %v1248_v37 }
 0x1c4   : > { %v1256_v46 = vadd.f32 %v1255_v18, %v1167_v59  ;;  %v1426_v36 = vadd.f32 %v1425_v34, %v1337_v30  ;;  %v6217_v18 = vld [vmem:[%s5633_s16 + $0x10] sm:$0xff]  ;;  %v6223_v59 = vld [vmem:[%s5633_s16 + $0x18] sm:$0xff] }
 0x1c6   : > { %v3359_v23 = vrot.slane %v1426_v36, 7 }
 0x1c7   : > { %v1257_v32 = vpop.f32.mrf.mxu3 }
 0x1c8   : > { %v6211_v61 = vsel %vm3333_vm0, %v7580_v50, %v3359_v23 }
 0x1c9   : > { %v1168_v52 = vpop.f32.mrf.mxu2  ;;  %7625 = vst [vmem:[#allocation9_spill] sm:$0xff] %v6211_v61  ;;  %v1339_v10 = vpop.f32.mrf.mxu0 }
 0x1ca   : > { %v1169_v35 = vadd.f32 %v1168_v52, %v5866_v45  ;;  %v1428_v37 = vpop.f32.mrf.mxu1  ;;  %v1340_v3 = vadd.f32 %v1339_v10, %v1251_v58 }
 0x1cc   : > { %v1258_v24 = vadd.f32 %v1257_v32, %v1169_v35  ;;  %v6214_v51 = vadd.f32 %v1428_v37, %v1340_v3  ;;  %2039 = vmatmul.bf16.gmra.mxu0 %v6217_v18  ;;  %1960 = vmatmul.bf16.gmra.mxu3 %v6223_v59  ;;  %v5260_v37 = vld [vmem:[%s7565_s1 + $0x2e8] sm:$0xff] }
 0x1cd   : > { %2128 = vmatmul.bf16.gmra.mxu1 %v5824_v7  ;;  %v5252_v7 = vld [vmem:[%s7565_s1 + $0x2a8] sm:$0xff]  ;;  %2295 = vmatpush.bf16.msrb.mxu3 %v5260_v37 }
 0x1ce   : > { %7626 = vst [vmem:[#allocation10_spill] sm:$0xff] %v6214_v51  ;;  %1871 = vmatmul.bf16.gmra.mxu2 %v6217_v18  ;;  %v7581_v35 = vrot.slane %v6214_v51, 7 }
 0x1cf   : > { %v1260_v45 = vpop.f32.mrf.mxu3  ;;  %2206 = vmatpush.bf16.msrb.mxu2 %v5252_v7 }
 0x1d1   : > { %v1171_v34 = vpop.f32.mrf.mxu2  ;;  %v1341_v58 = vpop.f32.mrf.mxu0 }
 0x1d2   : > { %v1172_v30 = vadd.f32 %v1171_v34, %v5874_v53  ;;  %v1430_v36 = vpop.f32.mrf.mxu1  ;;  %v1342_v23 = vadd.f32 %v1341_v58, %v1253_v47 }
 0x1d4   : > { %v1261_v52 = vadd.f32 %v1260_v45, %v1172_v30  ;;  %v1431_v32 = vadd.f32 %v1430_v36, %v1342_v23  ;;  %v6246_v23 = vld [vmem:[%s5633_s16 + $0x20] sm:$0xff] }
 0x1d6   : > { %v3362_v10 = vrot.slane %v1431_v32, 7 }
 0x1d7   : > { %v1262_v50 = vpop.f32.mrf.mxu3 }
 0x1d8   : > { %v6237_v53 = vsel %vm3333_vm0, %v7581_v35, %v3362_v10 }
 0x1d9   : > { %v1173_v3 = vpop.f32.mrf.mxu2  ;;  %7627 = vst [vmem:[#allocation11_spill] sm:$0xff] %v6237_v53  ;;  %v1344_v34 = vpop.f32.mrf.mxu0 }
 0x1da   : > { %v1174_v47 = vadd.f32 %v1173_v3, %v5887_v1  ;;  %v1433_v45 = vpop.f32.mrf.mxu1  ;;  %v1345_v30 = vadd.f32 %v1344_v34, %v1256_v46  ;;  %v5268_v1 = vld [vmem:[%s7565_s1 + $0x328] sm:$0xff] }
 0x1db   : > { %v5276_v46 = vld [vmem:[%s7565_s1 + $0x368] sm:$0xff]  ;;  %2769 = vmatpush.bf16.msrb.mxu0 %v5268_v1 }
 0x1dc   : > { %v1263_v58 = vadd.f32 %v1262_v50, %v1174_v47  ;;  %v6240_v36 = vadd.f32 %v1433_v45, %v1345_v30  ;;  %2044 = vmatmul.bf16.gmra.mxu0 %v6223_v59  ;;  %1965 = vmatmul.bf16.gmra.mxu3 %v6246_v23 }
 0x1dd   : > { %2133 = vmatmul.bf16.gmra.mxu1 %v5843_v22 }
 0x1de   : > { %7628 = vst [vmem:[#allocation12_spill] sm:$0xff] %v6240_v36  ;;  %1876 = vmatmul.bf16.gmra.mxu2 %v6223_v59  ;;  %2858 = vmatpush.bf16.msrb.mxu1 %v5276_v46  ;;  %v7585_v34 = vrot.slane %v6240_v36, 7 }
 0x1df   : > { %v1265_v10 = vpop.f32.mrf.mxu3 }
 0x1e1   : > { %v1176_v32 = vpop.f32.mrf.mxu2  ;;  %v1346_v7 = vpop.f32.mrf.mxu0 }
 0x1e2   : > { %v1177_v50 = vadd.f32 %v1176_v32, %v5901_v13  ;;  %v1435_v22 = vpop.f32.mrf.mxu1  ;;  %v1347_v37 = vadd.f32 %v1346_v7, %v1258_v24 }
 0x1e4   : > { %v1266_v3 = vadd.f32 %v1265_v10, %v1177_v50  ;;  %v1436_v47 = vadd.f32 %v1435_v22, %v1347_v37  ;;  %v6269_v10 = vld [vmem:[%s5633_s16 + $0x28] sm:$0xff] }
 0x1e6   : > { %v3365_v45 = vrot.slane %v1436_v47, 7 }
 0x1e7   : > { %v1267_v35 = vpop.f32.mrf.mxu3 }
 0x1e8   : > { %v6260_v28 = vsel %vm3333_vm0, %v7585_v34, %v3365_v45 }
 0x1e9   : > { %v1178_v30 = vpop.f32.mrf.mxu2  ;;  %7629 = vst [vmem:[#allocation13_spill] sm:$0xff] %v6260_v28  ;;  %v1349_v32 = vpop.f32.mrf.mxu0 }
 0x1ea   : > { %v1179_v13 = vadd.f32 %v1178_v30, %v5908_v26  ;;  %v1438_v41 = vpop.f32.mrf.mxu1  ;;  %v1350_v24 = vadd.f32 %v1349_v32, %v1261_v52  ;;  %v5259_v30 = vld [vmem:[%s7565_s1 + $0x2e0] sm:$0xff] }
 0x1eb   : > { %2296 = vmatpush.bf16.msrb.mxu3 %v5259_v30 }
 0x1ec   : > { %v1268_v1 = vadd.f32 %v1267_v35, %v1179_v13  ;;  %v6263_v46 = vadd.f32 %v1438_v41, %v1350_v24  ;;  %2049 = vmatmul.bf16.gmra.mxu0 %v6246_v23  ;;  %1970 = vmatmul.bf16.gmra.mxu3 %v6269_v10 }
 0x1ed   : > { %2138 = vmatmul.bf16.gmra.mxu1 %v5864_v42  ;;  %v5251_v42 = vld [vmem:[%s7565_s1 + $0x2a0] sm:$0xff] }
 0x1ee   : > { %7630 = vst [vmem:[#allocation14_spill] sm:$0xff] %v6263_v46  ;;  %1881 = vmatmul.bf16.gmra.mxu2 %v6246_v23  ;;  %v7584_v47 = vrot.slane %v6263_v46, 7 }
 0x1ef   : > { %v1270_v7 = vpop.f32.mrf.mxu3  ;;  %2207 = vmatpush.bf16.msrb.mxu2 %v5251_v42 }
 0x1f1   : > { %v1181_v50 = vpop.f32.mrf.mxu2  ;;  %v1351_v22 = vpop.f32.mrf.mxu0 }
 0x1f2   : > { %v1182_v26 = vadd.f32 %v1181_v50, %v5916_v38  ;;  %v1440_v37 = vpop.f32.mrf.mxu1  ;;  %v1352_v52 = vadd.f32 %v1351_v22, %v1263_v58 }
 0x1f4   : > { %v1271_v35 = vadd.f32 %v1270_v7, %v1182_v26  ;;  %v1441_v41 = vadd.f32 %v1440_v37, %v1352_v52  ;;  %v6292_v37 = vld [vmem:[%s5633_s16 + $0x30] sm:$0xff] }
 0x1f6   : > { %v3368_v45 = vrot.slane %v1441_v41, 7 }
 0x1f7   : > { %v1272_v32 = vpop.f32.mrf.mxu3 }
 0x1f8   : > { %v6283_v38 = vsel %vm3333_vm0, %v7584_v47, %v3368_v45 }
 0x1f9   : > { %v1183_v13 = vpop.f32.mrf.mxu2  ;;  %7631 = vst [vmem:[#allocation15_spill] sm:$0xff] %v6283_v38  ;;  %v1354_v24 = vpop.f32.mrf.mxu0 }
 0x1fa   : > { %v1184_v58 = vadd.f32 %v1183_v13, %v5929_v54  ;;  %v1443_v50 = vpop.f32.mrf.mxu1  ;;  %v1355_v7 = vadd.f32 %v1354_v24, %v1266_v3  ;;  %v5267_v54 = vld [vmem:[%s7565_s1 + $0x320] sm:$0xff] }
 0x1fb   : > { %v5275_v3 = vld [vmem:[%s7565_s1 + $0x360] sm:$0xff]  ;;  %2770 = vmatpush.bf16.msrb.mxu0 %v5267_v54 }
 0x1fc   : > { %v1273_v26 = vadd.f32 %v1272_v32, %v1184_v58  ;;  %v6286_v22 = vadd.f32 %v1443_v50, %v1355_v7  ;;  %2054 = vmatmul.bf16.gmra.mxu0 %v6269_v10  ;;  %1975 = vmatmul.bf16.gmra.mxu3 %v6292_v37 }
 0x1fd   : > { %2143 = vmatmul.bf16.gmra.mxu1 %v5885_v63 }
 0x1fe   : > { %7632 = vst [vmem:[#allocation16_spill] sm:$0xff] %v6286_v22  ;;  %1886 = vmatmul.bf16.gmra.mxu2 %v6269_v10  ;;  %2859 = vmatpush.bf16.msrb.mxu1 %v5275_v3  ;;  %v7587_v58 = vrot.slane %v6286_v22, 7 }
 0x1ff   : > { %v1275_v41 = vpop.f32.mrf.mxu3 }
 0x201   : > { %v1186_v52 = vpop.f32.mrf.mxu2  ;;  %v1356_v42 = vpop.f32.mrf.mxu0 }
 0x202   : > { %v1187_v45 = vadd.f32 %v1186_v52, %v5943_v6  ;;  %v1445_v63 = vpop.f32.mrf.mxu1  ;;  %v1357_v30 = vadd.f32 %v1356_v42, %v1268_v1 }
 0x204   : > { %v1276_v13 = vadd.f32 %v1275_v41, %v1187_v45  ;;  %v1446_v32 = vadd.f32 %v1445_v63, %v1357_v30  ;;  %v6315_v41 = vld [vmem:[%s5633_s16 + $0x38] sm:$0xff] }
 0x206   : > { %v3371_v24 = vrot.slane %v1446_v32, 7 }
 0x207   : > { %v1277_v7 = vpop.f32.mrf.mxu3 }
 0x208   : > { %v6306_v47 = vsel %vm3333_vm0, %v7587_v58, %v3371_v24 }
 0x209   : > { %v1188_v50 = vpop.f32.mrf.mxu2  ;;  %7633 = vst [vmem:[#allocation17_spill] sm:$0xff] %v6306_v47  ;;  %v1359_v52 = vpop.f32.mrf.mxu0 }
 0x20a   : > { %v1189_v6 = vadd.f32 %v1188_v50, %v5950_v17  ;;  %v1448_v34 = vpop.f32.mrf.mxu1  ;;  %v1360_v1 = vadd.f32 %v1359_v52, %v1271_v35 }
 0x20c   : > { %v1278_v54 = vadd.f32 %v1277_v7, %v1189_v6  ;;  %v6309_v3 = vadd.f32 %v1448_v34, %v1360_v1  ;;  %2059 = vmatmul.bf16.gmra.mxu0 %v6292_v37  ;;  %1980 = vmatmul.bf16.gmra.mxu3 %v6315_v41  ;;  %v5258_v7 = vld [vmem:[%s7565_s1 + $0x2d8] sm:$0xff] }
 0x20d   : > { %2148 = vmatmul.bf16.gmra.mxu1 %v5906_v21  ;;  %v5250_v21 = vld [vmem:[%s7565_s1 + $0x298] sm:$0xff]  ;;  %2297 = vmatpush.bf16.msrb.mxu3 %v5258_v7 }
 0x20e   : > { %7634 = vst [vmem:[#allocation18_spill] sm:$0xff] %v6309_v3  ;;  %1891 = vmatmul.bf16.gmra.mxu2 %v6292_v37  ;;  %v7586_v24 = vrot.slane %v6309_v3, 7 }
 0x20f   : > { %v1280_v42 = vpop.f32.mrf.mxu3  ;;  %2208 = vmatpush.bf16.msrb.mxu2 %v5250_v21 }
 0x211   : > { %v1191_v45 = vpop.f32.mrf.mxu2  ;;  %v1361_v63 = vpop.f32.mrf.mxu0 }
 0x212   : > { %v1192_v17 = vadd.f32 %v1191_v45, %v5958_v40  ;;  %v1450_v30 = vpop.f32.mrf.mxu1  ;;  %v1362_v35 = vadd.f32 %v1361_v63, %v1273_v26 }
 0x214   : > { %v1281_v32 = vadd.f32 %v1280_v42, %v1192_v17  ;;  %v1451_v34 = vadd.f32 %v1450_v30, %v1362_v35  ;;  %v6338_v30 = vld [vmem:[%s5633_s16 + $0x40] sm:$0xff] }
 0x216   : > { %v3374_v50 = vrot.slane %v1451_v34, 7 }
 0x217   : > { %v1282_v52 = vpop.f32.mrf.mxu3 }
 0x218   : > { %v6329_v40 = vsel %vm3333_vm0, %v7586_v24, %v3374_v50 }
 0x219   : > { %v1193_v6 = vpop.f32.mrf.mxu2  ;;  %7635 = vst [vmem:[#allocation19_spill] sm:$0xff] %v6329_v40  ;;  %v1364_v1 = vpop.f32.mrf.mxu0 }
 0x21a   : > { %v1194_v26 = vadd.f32 %v1193_v6, %v5971_v62  ;;  %v1453_v45 = vpop.f32.mrf.mxu1  ;;  %v1365_v42 = vadd.f32 %v1364_v1, %v1276_v13  ;;  %v5266_v62 = vld [vmem:[%s7565_s1 + $0x318] sm:$0xff] }
 0x21b   : > { %v5274_v13 = vld [vmem:[%s7565_s1 + $0x358] sm:$0xff]  ;;  %2771 = vmatpush.bf16.msrb.mxu0 %v5266_v62 }
 0x21c   : > { %v1283_v17 = vadd.f32 %v1282_v52, %v1194_v26  ;;  %v6332_v63 = vadd.f32 %v1453_v45, %v1365_v42  ;;  %2064 = vmatmul.bf16.gmra.mxu0 %v6315_v41  ;;  %1985 = vmatmul.bf16.gmra.mxu3 %v6338_v30 }
 0x21d   : > { %2153 = vmatmul.bf16.gmra.mxu1 %v5927_v49 }
 0x21e   : > { %7636 = vst [vmem:[#allocation20_spill] sm:$0xff] %v6332_v63  ;;  %1896 = vmatmul.bf16.gmra.mxu2 %v6315_v41  ;;  %2860 = vmatpush.bf16.msrb.mxu1 %v5274_v13  ;;  %v7589_v52 = vrot.slane %v6332_v63, 7 }
 0x21f   : > { %v1946_v34 = vpop.f32.mrf.mxu3 }
 0x221   : > { %v1857_v35 = vpop.f32.mrf.mxu2  ;;  %v1366_v50 = vpop.f32.mrf.mxu0 }
 0x222   : > { %v1455_v49 = vpop.f32.mrf.mxu1  ;;  %v1947_v21 = vadd.f32 %v1946_v34, %v1857_v35  ;;  %v1367_v7 = vadd.f32 %v1366_v50, %v1278_v54  ;;  %v6359_v54 = vld [vmem:[%s5633_s16 + $0x48] sm:$0xff] }
 0x224   : > { %v1456_v6 = vadd.f32 %v1455_v49, %v1367_v7 }
 0x226   : > { %v3377_v26 = vrot.slane %v1456_v6, 7 }
 0x227   : > { %v1948_v45 = vpop.f32.mrf.mxu3 }
 0x228   : > { %v6351_v42 = vsel %vm3333_vm0, %v7589_v52, %v3377_v26 }
 0x229   : > { %v1859_v1 = vpop.f32.mrf.mxu2  ;;  %7637 = vst [vmem:[#allocation21_spill] sm:$0xff] %v6351_v42  ;;  %v1369_v62 = vpop.f32.mrf.mxu0 }
 0x22a   : > { %v1458_v13 = vpop.f32.mrf.mxu1  ;;  %v1949_v24 = vadd.f32 %v1948_v45, %v1859_v1  ;;  %v1370_v58 = vadd.f32 %v1369_v62, %v1281_v32 }
 0x22c   : > { %v6353_v40 = vadd.f32 %v1458_v13, %v1370_v58  ;;  %2069 = vmatmul.bf16.gmra.mxu0 %v6338_v30  ;;  %1990 = vmatmul.bf16.gmra.mxu3 %v6359_v54  ;;  %v5249_v58 = vld [vmem:[%s7565_s1 + $0x290] sm:$0xff] }
 0x22d   : > { %2158 = vmatmul.bf16.gmra.mxu1 %v5948_v15  ;;  %v5257_v15 = vld [vmem:[%s7565_s1 + $0x2d0] sm:$0xff]  ;;  %2209 = vmatpush.bf16.msrb.mxu2 %v5249_v58 }
 0x22e   : > { %7638 = vst [vmem:[#allocation22_spill] sm:$0xff] %v6353_v40  ;;  %1901 = vmatmul.bf16.gmra.mxu2 %v6338_v30  ;;  %v7588_v32 = vrot.slane %v6353_v40, 7  ;;  %2298 = vmatpush.bf16.msrb.mxu3 %v5257_v15 }
 0x22f   : > { %v1951_v34 = vpop.f32.mrf.mxu3 }
 0x231   : > { %v1862_v35 = vpop.f32.mrf.mxu2  ;;  %v1371_v50 = vpop.f32.mrf.mxu0 }
 0x232   : > { %v1460_v49 = vpop.f32.mrf.mxu1  ;;  %v1952_v7 = vadd.f32 %v1951_v34, %v1862_v35  ;;  %v1372_v6 = vadd.f32 %v1371_v50, %v1283_v17 }
 0x234   : > { %v1461_v26 = vadd.f32 %v1460_v49, %v1372_v6  ;;  %v6380_v6 = vld [vmem:[%s5633_s16 + $0x50] sm:$0xff] }
 0x236   : > { %v3380_v1 = vrot.slane %v1461_v26, 7  ;;  %v5265_v26 = vld [vmem:[%s7565_s1 + $0x310] sm:$0xff] }
 0x237   : > { %v1953_v62 = vpop.f32.mrf.mxu3  ;;  %2772 = vmatpush.bf16.msrb.mxu0 %v5265_v26  ;;  %v7640_v26 = vld [vmem:[#allocation3_spill] sm:$0xff] }
 0x238   : > { %v6372_v17 = vsel %vm3333_vm0, %v7588_v32, %v3380_v1 }
 0x239   : > { %v1864_v45 = vpop.f32.mrf.mxu2  ;;  %7639 = vst [vmem:[#allocation23_spill] sm:$0xff] %v6372_v17  ;;  %v2035_v35 = vpop.f32.mrf.mxu0 }
 0x23a   : > { %v1954_v13 = vadd.f32 %v1953_v62, %v1864_v45  ;;  %v2124_v34 = vpop.f32.mrf.mxu1  ;;  %v2036_v50 = vadd.f32 %v2035_v35, %v1947_v21  ;;  %v5273_v21 = vld [vmem:[%s7565_s1 + $0x350] sm:$0xff] }
 0x23b   : > { %2861 = vmatpush.bf16.msrb.mxu1 %v5273_v21  ;;  %v6397_v21 = vld [vmem:[%s5633_s16 + $0x58] sm:$0xff] }
 0x23c   : > { %v6374_v49 = vadd.f32 %v2124_v34, %v2036_v50  ;;  %2074 = vmatmul.bf16.gmra.mxu0 %v6359_v54  ;;  %1995 = vmatmul.bf16.gmra.mxu3 %v6380_v6 }
 0x23d   : > { %2163 = vmatmul.bf16.gmra.mxu1 %v5969_v56 }
 0x23e   : > { %1906 = vmatmul.bf16.gmra.mxu2 %v6359_v54 }
 0x23f   : > { %v1956_v15 = vpop.f32.mrf.mxu3 }
 0x241   : > { %v1867_v58 = vpop.f32.mrf.mxu2  ;;  %v2037_v1 = vpop.f32.mrf.mxu0 }
 0x242   : > { %v1957_v56 = vadd.f32 %v1956_v15, %v1867_v58  ;;  %v2126_v45 = vpop.f32.mrf.mxu1  ;;  %v2038_v62 = vadd.f32 %v2037_v1, %v1949_v24 }
 0x244   : > { %v6389_v35 = vadd.f32 %v2126_v45, %v2038_v62 }
 0x247   : > { %v1958_v50 = vpop.f32.mrf.mxu3 }
 0x249   : > { %v1869_v34 = vpop.f32.mrf.mxu2  ;;  %v2040_v52 = vpop.f32.mrf.mxu0 }
 0x24a   : > { %v1959_v32 = vadd.f32 %v1958_v50, %v1869_v34  ;;  %v2129_v17 = vpop.f32.mrf.mxu1  ;;  %v2041_v40 = vadd.f32 %v2040_v52, %v1952_v7  ;;  %v5256_v7 = vld [vmem:[%s7565_s1 + $0x2c8] sm:$0xff] }
 0x24b   : > { %2299 = vmatpush.bf16.msrb.mxu3 %v5256_v7 }
 0x24c   : > { %v6391_v42 = vadd.f32 %v2129_v17, %v2041_v40  ;;  %2079 = vmatmul.bf16.gmra.mxu0 %v6380_v6  ;;  %2000 = vmatmul.bf16.gmra.mxu3 %v6397_v21  ;;  %v5248_v40 = vld [vmem:[%s7565_s1 + $0x288] sm:$0xff] }
 0x24d   : > { %2168 = vmatmul.bf16.gmra.mxu1 %v7640_v26  ;;  %2210 = vmatpush.bf16.msrb.mxu2 %v5248_v40 }
 0x24e   : > { %1911 = vmatmul.bf16.gmra.mxu2 %v6380_v6 }
 0x24f   : > { %v1961_v58 = vpop.f32.mrf.mxu3 }
 0x251   : > { %v1872_v24 = vpop.f32.mrf.mxu2  ;;  %v2042_v1 = vpop.f32.mrf.mxu0 }
 0x252   : > { %v1962_v15 = vadd.f32 %v1961_v58, %v1872_v24  ;;  %v2131_v45 = vpop.f32.mrf.mxu1  ;;  %v2043_v62 = vadd.f32 %v2042_v1, %v1954_v13  ;;  %v6414_v1 = vld [vmem:[%s5633_s16 + $0x60] sm:$0xff] }
 0x254   : > { %v6400_v52 = vadd.f32 %v2131_v45, %v2043_v62  ;;  %v5264_v45 = vld [vmem:[%s7565_s1 + $0x308] sm:$0xff] }
 0x255   : > { %2773 = vmatpush.bf16.msrb.mxu0 %v5264_v45  ;;  %v6431_v45 = vld [vmem:[%s5633_s16 + $0x68] sm:$0xff] }
 0x257   : > { %v1963_v34 = vpop.f32.mrf.mxu3 }
 0x259   : > { %v1874_v17 = vpop.f32.mrf.mxu2  ;;  %v2045_v26 = vpop.f32.mrf.mxu0 }
 0x25a   : > { %v1964_v50 = vadd.f32 %v1963_v34, %v1874_v17  ;;  %v2134_v24 = vpop.f32.mrf.mxu1  ;;  %v2046_v58 = vadd.f32 %v2045_v26, %v1957_v56  ;;  %v5272_v56 = vld [vmem:[%s7565_s1 + $0x348] sm:$0xff] }
 0x25b   : > { %2862 = vmatpush.bf16.msrb.mxu1 %v5272_v56 }
 0x25c   : > { %v6408_v13 = vadd.f32 %v2134_v24, %v2046_v58  ;;  %2084 = vmatmul.bf16.gmra.mxu0 %v6397_v21  ;;  %2005 = vmatmul.bf16.gmra.mxu3 %v6414_v1 }
 0x25d   : > { %2173 = vmatmul.bf16.gmra.mxu1 %v6008_v43 }
 0x25e   : > { %1916 = vmatmul.bf16.gmra.mxu2 %v6397_v21 }
 0x25f   : > { %v1966_v40 = vpop.f32.mrf.mxu3 }
 0x261   : > { %v1877_v62 = vpop.f32.mrf.mxu2  ;;  %v2047_v7 = vpop.f32.mrf.mxu0 }
 0x262   : > { %v1967_v43 = vadd.f32 %v1966_v40, %v1877_v62  ;;  %v2136_v17 = vpop.f32.mrf.mxu1  ;;  %v2048_v34 = vadd.f32 %v2047_v7, %v1959_v32 }
 0x264   : > { %v6423_v26 = vadd.f32 %v2136_v17, %v2048_v34 }
 0x267   : > { %v1968_v58 = vpop.f32.mrf.mxu3 }
 0x269   : > { %v1879_v24 = vpop.f32.mrf.mxu2  ;;  %v2050_v3 = vpop.f32.mrf.mxu0 }
 0x26a   : > { %v1969_v63 = vadd.f32 %v1968_v58, %v1879_v24  ;;  %v2139_v47 = vpop.f32.mrf.mxu1  ;;  %v2051_v22 = vadd.f32 %v2050_v3, %v1962_v15 }
 0x26c   : > { %v6425_v38 = vadd.f32 %v2139_v47, %v2051_v22  ;;  %2089 = vmatmul.bf16.gmra.mxu0 %v6414_v1  ;;  %2010 = vmatmul.bf16.gmra.mxu3 %v6431_v45  ;;  %v5247_v47 = vld [vmem:[%s7565_s1 + $0x280] sm:$0xff] }
 0x26d   : > { %2178 = vmatmul.bf16.gmra.mxu1 %v6026_v25  ;;  %v5255_v25 = vld [vmem:[%s7565_s1 + $0x2c0] sm:$0xff]  ;;  %2211 = vmatpush.bf16.msrb.mxu2 %v5247_v47 }
 0x26e   : > { %1921 = vmatmul.bf16.gmra.mxu2 %v6414_v1  ;;  %2300 = vmatpush.bf16.msrb.mxu3 %v5255_v25 }
 0x26f   : > { %v1971_v56 = vpop.f32.mrf.mxu3 }
 0x271   : > { %v1882_v32 = vpop.f32.mrf.mxu2  ;;  %v2052_v40 = vpop.f32.mrf.mxu0 }
 0x272   : > { %v1972_v62 = vadd.f32 %v1971_v56, %v1882_v32  ;;  %v2141_v7 = vpop.f32.mrf.mxu1  ;;  %v2053_v17 = vadd.f32 %v2052_v40, %v1964_v50  ;;  %v6448_v56 = vld [vmem:[%s5633_s16 + $0x70] sm:$0xff]  ;;  %v5263_v40 = vld [vmem:[%s7565_s1 + $0x300] sm:$0xff] }
 0x273   : > { %2774 = vmatpush.bf16.msrb.mxu0 %v5263_v40  ;;  %v6465_v40 = vld [vmem:[%s5633_s16 + $0x78] sm:$0xff] }
 0x274   : > { %v6434_v3 = vadd.f32 %v2141_v7, %v2053_v17  ;;  %7641 = vst [vmem:[#allocation3_spill] sm:$0xff] %v6465_v40 }
 0x277   : > { %v1973_v15 = vpop.f32.mrf.mxu3 }
 0x279   : > { %v1884_v22 = vpop.f32.mrf.mxu2  ;;  %v2055_v24 = vpop.f32.mrf.mxu0 }
 0x27a   : > { %v1974_v34 = vadd.f32 %v1973_v15, %v1884_v22  ;;  %v2144_v58 = vpop.f32.mrf.mxu1  ;;  %v2056_v32 = vadd.f32 %v2055_v24, %v1967_v43  ;;  %v5271_v43 = vld [vmem:[%s7565_s1 + $0x340] sm:$0xff] }
 0x27b   : > { %2863 = vmatpush.bf16.msrb.mxu1 %v5271_v43 }
 0x27c   : > { %v6442_v50 = vadd.f32 %v2144_v58, %v2056_v32  ;;  %2094 = vmatmul.bf16.gmra.mxu0 %v6431_v45  ;;  %2015 = vmatmul.bf16.gmra.mxu3 %v6448_v56 }
 0x27d   : > { %2183 = vmatmul.bf16.gmra.mxu1 %v6049_v39 }
 0x27e   : > { %1926 = vmatmul.bf16.gmra.mxu2 %v6431_v45 }
 0x27f   : > { %v1976_v17 = vpop.f32.mrf.mxu3 }
 0x281   : > { %v1887_v7 = vpop.f32.mrf.mxu2  ;;  %v2057_v47 = vpop.f32.mrf.mxu0 }
 0x282   : > { %v1977_v39 = vadd.f32 %v1976_v17, %v1887_v7  ;;  %v2146_v25 = vpop.f32.mrf.mxu1  ;;  %v2058_v22 = vadd.f32 %v2057_v47, %v1969_v63 }
 0x284   : > { %v6457_v15 = vadd.f32 %v2146_v25, %v2058_v22 }
 0x287   : > { %v1978_v58 = vpop.f32.mrf.mxu3 }
 0x289   : > { %v1889_v24 = vpop.f32.mrf.mxu2  ;;  %v2060_v46 = vpop.f32.mrf.mxu0 }
 0x28a   : > { %v1979_v32 = vadd.f32 %v1978_v58, %v1889_v24  ;;  %v2149_v28 = vpop.f32.mrf.mxu1  ;;  %v2061_v36 = vadd.f32 %v2060_v46, %v1972_v62 }
 0x28c   : > { %v6459_v53 = vadd.f32 %v2149_v28, %v2061_v36  ;;  %2099 = vmatmul.bf16.gmra.mxu0 %v6448_v56  ;;  %2020 = vmatmul.bf16.gmra.mxu3 %v6465_v40  ;;  %v5294_v28 = vld [vmem:[%s7565_s1 + $0x3f8] sm:$0xff] }
 0x28d   : > { %2188 = vmatmul.bf16.gmra.mxu1 %v6072_v20  ;;  %v5286_v20 = vld [vmem:[%s7565_s1 + $0x3b8] sm:$0xff]  ;;  %3034 = vmatpush.bf16.msra.mxu3 %v5294_v28 }
 0x28e   : > { %1931 = vmatmul.bf16.gmra.mxu2 %v6448_v56 }
 0x28f   : > { %v1981_v43 = vpop.f32.mrf.mxu3  ;;  %2945 = vmatpush.bf16.msra.mxu2 %v5286_v20 }
 0x291   : > { %v1892_v63 = vpop.f32.mrf.mxu2  ;;  %v2062_v17 = vpop.f32.mrf.mxu0 }
 0x292   : > { %v1982_v7 = vadd.f32 %v1981_v43, %v1892_v63  ;;  %v2151_v47 = vpop.f32.mrf.mxu1  ;;  %v2063_v25 = vadd.f32 %v2062_v17, %v1974_v34  ;;  %v6481_v43 = vld [vmem:[%s5633_s16 + $0x80] sm:$0xff]  ;;  %v6485_v17 = vld [vmem:[%s5633_s16 + $0x88] sm:$0xff] }
 0x293   : > { %7642 = vst [vmem:[#allocation24_spill] sm:$0xff] %v6481_v43 }
 0x294   : > { %v6468_v46 = vadd.f32 %v2151_v47, %v2063_v25  ;;  %7643 = vst [vmem:[#allocation25_spill] sm:$0xff] %v6485_v17  ;;  %v5302_v47 = vld [vmem:[%s7565_s1 + $0x438] sm:$0xff] }
 0x295   : > { %3123 = vmatpush.bf16.msra.mxu0 %v5302_v47  ;;  %v6502_v47 = vld [vmem:[%s5633_s16 + $0x90] sm:$0xff] }
 0x296   : > { %7644 = vst [vmem:[#allocation26_spill] sm:$0xff] %v6502_v47 }
 0x297   : > { %v1983_v62 = vpop.f32.mrf.mxu3 }
 0x299   : > { %v1894_v36 = vpop.f32.mrf.mxu2  ;;  %v2065_v24 = vpop.f32.mrf.mxu0 }
 0x29a   : > { %v1984_v22 = vadd.f32 %v1983_v62, %v1894_v36  ;;  %v2154_v58 = vpop.f32.mrf.mxu1  ;;  %v2066_v63 = vadd.f32 %v2065_v24, %v1977_v39  ;;  %v5310_v39 = vld [vmem:[%s7565_s1 + $0x478] sm:$0xff] }
 0x29b   : > { %3212 = vmatpush.bf16.msra.mxu1 %v5310_v39 }
 0x29c   : > { %v6476_v34 = vadd.f32 %v2154_v58, %v2066_v63  ;;  %2104 = vmatmul.bf16.gmra.mxu0 %v6465_v40  ;;  %2301 = vmatmul.bf16.vlgmr.msrb.gmra.mxu3 %v6485_v17 }
 0x29d   : > { %2193 = vmatmul.bf16.gmra.mxu1 %v6095_v16 }
 0x29e   : > { %2212 = vmatmul.bf16.vlgmr.msrb.gmra.mxu2 %v6481_v43 }
 0x29f   : > { %v1986_v16 = vpop.f32.mrf.mxu3 }
 0x2a1   : > { %v1897_v25 = vpop.f32.mrf.mxu2  ;;  %v2067_v28 = vpop.f32.mrf.mxu0 }
 0x2a2   : > { %v1987_v20 = vadd.f32 %v1986_v16, %v1897_v25  ;;  %v2156_v36 = vpop.f32.mrf.mxu1  ;;  %v2068_v62 = vadd.f32 %v2067_v28, %v1979_v32 }
 0x2a4   : > { %v6494_v24 = vadd.f32 %v2156_v36, %v2068_v62 }
 0x2a7   : > { %v1988_v63 = vpop.f32.mrf.mxu3 }
 0x2a9   : > { %v1899_v58 = vpop.f32.mrf.mxu2  ;;  %v2070_v43 = vpop.f32.mrf.mxu0 }
 0x2aa   : > { %v1989_v51 = vadd.f32 %v1988_v63, %v1899_v58  ;;  %v2159_v61 = vpop.f32.mrf.mxu1  ;;  %v2071_v40 = vadd.f32 %v2070_v43, %v1982_v7 }
 0x2ac   : > { %v6496_v9 = vadd.f32 %v2159_v61, %v2071_v40  ;;  %2109 = vmatmul.bf16.gmra.mxu0 %v6127_v14  ;;  %2306 = vmatmul.bf16.gmra.mxu3 %v6502_v47  ;;  %v5285_v61 = vld [vmem:[%s7565_s1 + $0x3b0] sm:$0xff] }
 0x2ad   : > { %2198 = vmatmul.bf16.gmra.mxu1 %v6119_v57  ;;  %v5293_v57 = vld [vmem:[%s7565_s1 + $0x3f0] sm:$0xff]  ;;  %2946 = vmatpush.bf16.msra.mxu2 %v5285_v61 }
 0x2ae   : > { %2217 = vmatmul.bf16.gmra.mxu2 %v6485_v17  ;;  %3035 = vmatpush.bf16.msra.mxu3 %v5293_v57 }
 0x2af   : > { %v1991_v39 = vpop.f32.mrf.mxu3 }
 0x2b1   : > { %v1902_v32 = vpop.f32.mrf.mxu2  ;;  %v2072_v16 = vpop.f32.mrf.mxu0 }
 0x2b2   : > { %v1992_v25 = vadd.f32 %v1991_v39, %v1902_v32  ;;  %v2161_v28 = vpop.f32.mrf.mxu1  ;;  %v2073_v36 = vadd.f32 %v2072_v16, %v1984_v22  ;;  %v6519_v39 = vld [vmem:[%s5633_s16 + $0x98] sm:$0xff]  ;;  %v5301_v16 = vld [vmem:[%s7565_s1 + $0x430] sm:$0xff] }
 0x2b3   : > { %7646 = vst [vmem:[#allocation28_spill] sm:$0xff] %v6519_v39  ;;  %3124 = vmatpush.bf16.msra.mxu0 %v5301_v16  ;;  %v6536_v16 = vld [vmem:[%s5633_s16 + $0xa0] sm:$0xff] }
 0x2b4   : > { %v6505_v7 = vadd.f32 %v2161_v28, %v2073_v36  ;;  %7647 = vst [vmem:[#allocation29_spill] sm:$0xff] %v6536_v16 }
 0x2b7   : > { %v1993_v43 = vpop.f32.mrf.mxu3 }
 0x2b9   : > { %v1904_v40 = vpop.f32.mrf.mxu2  ;;  %v2075_v58 = vpop.f32.mrf.mxu0 }
 0x2ba   : > { %v1994_v62 = vadd.f32 %v1993_v43, %v1904_v40  ;;  %v2164_v63 = vpop.f32.mrf.mxu1  ;;  %v2076_v32 = vadd.f32 %v2075_v58, %v1987_v20  ;;  %v5309_v20 = vld [vmem:[%s7565_s1 + $0x470] sm:$0xff] }
 0x2bb   : > { %3213 = vmatpush.bf16.msra.mxu1 %v5309_v20 }
 0x2bc   : > { %v6513_v22 = vadd.f32 %v2164_v63, %v2076_v32  ;;  %2775 = vmatmul.bf16.vlgmr.msrb.gmra.mxu0 %v7620_v55  ;;  %2311 = vmatmul.bf16.gmra.mxu3 %v6519_v39 }
 0x2bd   : > { %2864 = vmatmul.bf16.vlgmr.msrb.gmra.mxu1 %v6173_v8 }
 0x2be   : > { %7645 = vst [vmem:[#allocation27_spill] sm:$0xff] %v6513_v22  ;;  %2222 = vmatmul.bf16.gmra.mxu2 %v6502_v47 }
 0x2bf   : > { %v1996_v36 = vpop.f32.mrf.mxu3 }
 0x2c1   : > { %v1907_v28 = vpop.f32.mrf.mxu2  ;;  %v2077_v57 = vpop.f32.mrf.mxu0 }
 0x2c2   : > { %v1997_v61 = vadd.f32 %v1996_v36, %v1907_v28  ;;  %v2166_v40 = vpop.f32.mrf.mxu1  ;;  %v2078_v43 = vadd.f32 %v2077_v57, %v1989_v51 }
 0x2c4   : > { %v6528_v58 = vadd.f32 %v2166_v40, %v2078_v43 }
 0x2c7   : > { %v1998_v32 = vpop.f32.mrf.mxu3 }
 0x2c9   : > { %v1909_v63 = vpop.f32.mrf.mxu2  ;;  %v2080_v17 = vpop.f32.mrf.mxu0 }
 0x2ca   : > { %v1999_v47 = vadd.f32 %v1998_v32, %v1909_v63  ;;  %v2169_v22 = vpop.f32.mrf.mxu1  ;;  %v2081_v55 = vadd.f32 %v2080_v17, %v1992_v25 }
 0x2cc   : > { %v6530_v12 = vadd.f32 %v2169_v22, %v2081_v55  ;;  %2780 = vmatmul.bf16.gmra.mxu0 %v6173_v8  ;;  %2316 = vmatmul.bf16.gmra.mxu3 %v6536_v16  ;;  %v5284_v55 = vld [vmem:[%s7565_s1 + $0x3a8] sm:$0xff] }
 0x2cd   : > { %2869 = vmatmul.bf16.gmra.mxu1 %v6194_v11  ;;  %v5292_v8 = vld [vmem:[%s7565_s1 + $0x3e8] sm:$0xff]  ;;  %2947 = vmatpush.bf16.msra.mxu2 %v5284_v55 }
 0x2ce   : > { %2227 = vmatmul.bf16.gmra.mxu2 %v6519_v39  ;;  %3036 = vmatpush.bf16.msra.mxu3 %v5292_v8 }
 0x2cf   : > { %v2001_v20 = vpop.f32.mrf.mxu3 }
 0x2d1   : > { %v1912_v51 = vpop.f32.mrf.mxu2  ;;  %v2082_v36 = vpop.f32.mrf.mxu0 }
 0x2d2   : > { %v2002_v28 = vadd.f32 %v2001_v20, %v1912_v51  ;;  %v2171_v57 = vpop.f32.mrf.mxu1  ;;  %v2083_v40 = vadd.f32 %v2082_v36, %v1994_v62  ;;  %v6553_v20 = vld [vmem:[%s5633_s16 + $0xa8] sm:$0xff] }
 0x2d3   : > { %7650 = vst [vmem:[#allocation32_spill] sm:$0xff] %v6553_v20  ;;  %v5300_v36 = vld [vmem:[%s7565_s1 + $0x428] sm:$0xff] }
 0x2d4   : > { %v6539_v17 = vadd.f32 %v2171_v57, %v2083_v40  ;;  %3125 = vmatpush.bf16.msra.mxu0 %v5300_v36  ;;  %v6570_v36 = vld [vmem:[%s5633_s16 + $0xb0] sm:$0xff] }
 0x2d5   : > { %7651 = vst [vmem:[#allocation33_spill] sm:$0xff] %v6570_v36 }
 0x2d6   : > { %7648 = vst [vmem:[#allocation30_spill] sm:$0xff] %v6539_v17 }
 0x2d7   : > { %v2003_v22 = vpop.f32.mrf.mxu3 }
 0x2d9   : > { %v1914_v25 = vpop.f32.mrf.mxu2  ;;  %v2085_v63 = vpop.f32.mrf.mxu0 }
 0x2da   : > { %v2004_v43 = vadd.f32 %v2003_v22, %v1914_v25  ;;  %v2174_v32 = vpop.f32.mrf.mxu1  ;;  %v2086_v51 = vadd.f32 %v2085_v63, %v1997_v61  ;;  %v5308_v61 = vld [vmem:[%s7565_s1 + $0x468] sm:$0xff] }
 0x2db   : > { %3214 = vmatpush.bf16.msra.mxu1 %v5308_v61 }
 0x2dc   : > { %v6547_v62 = vadd.f32 %v2174_v32, %v2086_v51  ;;  %2785 = vmatmul.bf16.gmra.mxu0 %v6194_v11  ;;  %2321 = vmatmul.bf16.gmra.mxu3 %v6553_v20 }
 0x2dd   : > { %2874 = vmatmul.bf16.gmra.mxu1 %v6217_v18 }
 0x2de   : > { %7649 = vst [vmem:[#allocation31_spill] sm:$0xff] %v6547_v62  ;;  %2232 = vmatmul.bf16.gmra.mxu2 %v6536_v16 }
 0x2df   : > { %v2006_v11 = vpop.f32.mrf.mxu3 }
 0x2e1   : > { %v1917_v57 = vpop.f32.mrf.mxu2  ;;  %v2087_v55 = vpop.f32.mrf.mxu0 }
 0x2e2   : > { %v2007_v40 = vadd.f32 %v2006_v11, %v1917_v57  ;;  %v2176_v8 = vpop.f32.mrf.mxu1  ;;  %v2088_v25 = vadd.f32 %v2087_v55, %v1999_v47 }
 0x2e4   : > { %v6562_v22 = vadd.f32 %v2176_v8, %v2088_v25 }
 0x2e7   : > { %v2008_v32 = vpop.f32.mrf.mxu3 }
 0x2e9   : > { %v1919_v63 = vpop.f32.mrf.mxu2  ;;  %v2090_v16 = vpop.f32.mrf.mxu0 }
 0x2ea   : > { %v2009_v51 = vadd.f32 %v2008_v32, %v1919_v63  ;;  %v2179_v39 = vpop.f32.mrf.mxu1  ;;  %v2091_v62 = vadd.f32 %v2090_v16, %v2002_v28 }
 0x2ec   : > { %v6564_v17 = vadd.f32 %v2179_v39, %v2091_v62  ;;  %2790 = vmatmul.bf16.gmra.mxu0 %v6217_v18  ;;  %2326 = vmatmul.bf16.gmra.mxu3 %v6570_v36  ;;  %v5283_v18 = vld [vmem:[%s7565_s1 + $0x3a0] sm:$0xff] }
 0x2ed   : > { %2879 = vmatmul.bf16.gmra.mxu1 %v6223_v59  ;;  %v5291_v39 = vld [vmem:[%s7565_s1 + $0x3e0] sm:$0xff]  ;;  %2948 = vmatpush.bf16.msra.mxu2 %v5283_v18 }
 0x2ee   : > { %2237 = vmatmul.bf16.gmra.mxu2 %v6553_v20  ;;  %3037 = vmatpush.bf16.msra.mxu3 %v5291_v39 }
 0x2ef   : > { %v2011_v61 = vpop.f32.mrf.mxu3 }
 0x2f1   : > { %v1922_v47 = vpop.f32.mrf.mxu2  ;;  %v2092_v11 = vpop.f32.mrf.mxu0 }
 0x2f2   : > { %v2012_v57 = vadd.f32 %v2011_v61, %v1922_v47  ;;  %v2181_v55 = vpop.f32.mrf.mxu1  ;;  %v2093_v8 = vadd.f32 %v2092_v11, %v2004_v43  ;;  %v6587_v61 = vld [vmem:[%s5633_s16 + $0xb8] sm:$0xff]  ;;  %v5299_v11 = vld [vmem:[%s7565_s1 + $0x420] sm:$0xff] }
 0x2f3   : > { %7654 = vst [vmem:[#allocation36_spill] sm:$0xff] %v6587_v61  ;;  %3126 = vmatpush.bf16.msra.mxu0 %v5299_v11  ;;  %v6604_v11 = vld [vmem:[%s5633_s16 + $0xc0] sm:$0xff] }
 0x2f4   : > { %v6573_v16 = vadd.f32 %v2181_v55, %v2093_v8  ;;  %7656 = vst [vmem:[#allocation38_spill] sm:$0xff] %v6604_v11 }
 0x2f6   : > { %7652 = vst [vmem:[#allocation34_spill] sm:$0xff] %v6573_v16 }
 0x2f7   : > { %v2013_v62 = vpop.f32.mrf.mxu3 }
 0x2f9   : > { %v1924_v28 = vpop.f32.mrf.mxu2  ;;  %v2095_v63 = vpop.f32.mrf.mxu0 }
 0x2fa   : > { %v2014_v25 = vadd.f32 %v2013_v62, %v1924_v28  ;;  %v2184_v32 = vpop.f32.mrf.mxu1  ;;  %v2096_v47 = vadd.f32 %v2095_v63, %v2007_v40  ;;  %v5307_v40 = vld [vmem:[%s7565_s1 + $0x460] sm:$0xff] }
 0x2fb   : > { %3215 = vmatpush.bf16.msra.mxu1 %v5307_v40 }
 0x2fc   : > { %v6581_v43 = vadd.f32 %v2184_v32, %v2096_v47  ;;  %2795 = vmatmul.bf16.gmra.mxu0 %v6223_v59  ;;  %2331 = vmatmul.bf16.gmra.mxu3 %v6587_v61 }
 0x2fd   : > { %2884 = vmatmul.bf16.gmra.mxu1 %v6246_v23 }
 0x2fe   : > { %7653 = vst [vmem:[#allocation35_spill] sm:$0xff] %v6581_v43  ;;  %2242 = vmatmul.bf16.gmra.mxu2 %v6570_v36 }
 0x2ff   : > { %v2016_v59 = vpop.f32.mrf.mxu3 }
 0x301   : > { %v1927_v55 = vpop.f32.mrf.mxu2  ;;  %v2097_v18 = vpop.f32.mrf.mxu0 }
 0x302   : > { %v2017_v8 = vadd.f32 %v2016_v59, %v1927_v55  ;;  %v2186_v39 = vpop.f32.mrf.mxu1  ;;  %v2098_v28 = vadd.f32 %v2097_v18, %v2009_v51 }
 0x304   : > { %v6596_v62 = vadd.f32 %v2186_v39, %v2098_v28 }
 0x307   : > { %v2018_v32 = vpop.f32.mrf.mxu3 }
 0x309   : > { %v1929_v63 = vpop.f32.mrf.mxu2  ;;  %v2100_v36 = vpop.f32.mrf.mxu0 }
 0x30a   : > { %v2019_v47 = vadd.f32 %v2018_v32, %v1929_v63  ;;  %v2189_v20 = vpop.f32.mrf.mxu1  ;;  %v2101_v43 = vadd.f32 %v2100_v36, %v2012_v57 }
 0x30c   : > { %v6598_v16 = vadd.f32 %v2189_v20, %v2101_v43  ;;  %2800 = vmatmul.bf16.gmra.mxu0 %v6246_v23  ;;  %2336 = vmatmul.bf16.gmra.mxu3 %v6604_v11  ;;  %v5282_v23 = vld [vmem:[%s7565_s1 + $0x398] sm:$0xff] }
 0x30d   : > { %2889 = vmatmul.bf16.gmra.mxu1 %v6269_v10  ;;  %v5290_v20 = vld [vmem:[%s7565_s1 + $0x3d8] sm:$0xff]  ;;  %2949 = vmatpush.bf16.msra.mxu2 %v5282_v23 }
 0x30e   : > { %7655 = vst [vmem:[#allocation37_spill] sm:$0xff] %v6598_v16  ;;  %2247 = vmatmul.bf16.gmra.mxu2 %v6587_v61  ;;  %3038 = vmatpush.bf16.msra.mxu3 %v5290_v20 }
 0x30f   : > { %v2021_v40 = vpop.f32.mrf.mxu3 }
 0x311   : > { %v1932_v51 = vpop.f32.mrf.mxu2  ;;  %v2102_v59 = vpop.f32.mrf.mxu0 }
 0x312   : > { %v2022_v55 = vadd.f32 %v2021_v40, %v1932_v51  ;;  %v2191_v18 = vpop.f32.mrf.mxu1  ;;  %v2103_v39 = vadd.f32 %v2102_v59, %v2014_v25  ;;  %v6621_v40 = vld [vmem:[%s5633_s16 + $0xc8] sm:$0xff]  ;;  %v5298_v59 = vld [vmem:[%s7565_s1 + $0x418] sm:$0xff] }
 0x313   : > { %3127 = vmatpush.bf16.msra.mxu0 %v5298_v59 }
 0x314   : > { %v6607_v36 = vadd.f32 %v2191_v18, %v2103_v39 }
 0x316   : > { %7657 = vst [vmem:[#allocation39_spill] sm:$0xff] %v6607_v36 }
 0x317   : > { %v2023_v43 = vpop.f32.mrf.mxu3 }
 0x319   : > { %v1934_v57 = vpop.f32.mrf.mxu2  ;;  %v2105_v63 = vpop.f32.mrf.mxu0 }
 0x31a   : > { %v2024_v28 = vadd.f32 %v2023_v43, %v1934_v57  ;;  %v2194_v32 = vpop.f32.mrf.mxu1  ;;  %v2106_v51 = vadd.f32 %v2105_v63, %v2017_v8  ;;  %v5306_v8 = vld [vmem:[%s7565_s1 + $0x458] sm:$0xff]  ;;  %v7659_v63 = vrot.slane %v6011_v5, 7 }
 0x31b   : > { %3216 = vmatpush.bf16.msra.mxu1 %v5306_v8 }
 0x31c   : > { %v6615_v25 = vadd.f32 %v2194_v32, %v2106_v51  ;;  %2805 = vmatmul.bf16.gmra.mxu0 %v6269_v10  ;;  %2341 = vmatmul.bf16.gmra.mxu3 %v6621_v40  ;;  %v3414_v32 = vsel %vm3333_vm0, 0.0, %v7659_v63 }
 0x31d   : > { %2894 = vmatmul.bf16.gmra.mxu1 %v6292_v37 }
 0x31e   : > { %7658 = vst [vmem:[#allocation40_spill] sm:$0xff] %v6615_v25  ;;  %2252 = vmatmul.bf16.gmra.mxu2 %v6604_v11 }
 0x31f   : > { %v2302_v10 = vpop.f32.mrf.mxu3 }
 0x321   : > { %v2213_v18 = vpop.f32.mrf.mxu2  ;;  %v2107_v23 = vpop.f32.mrf.mxu0 }
 0x322   : > { %v2214_v39 = vadd.f32 %v2213_v18, %v6374_v49  ;;  %v2196_v20 = vpop.f32.mrf.mxu1  ;;  %v2108_v57 = vadd.f32 %v2107_v23, %v2019_v47  ;;  %v6648_v47 = vld [vmem:[%s5633_s16 + $0xd0] sm:$0xff] }
 0x324   : > { %v2303_v43 = vadd.f32 %v2302_v10, %v2214_v39  ;;  %v6634_v51 = vadd.f32 %v2196_v20, %v2108_v57  ;;  %v5281_v57 = vld [vmem:[%s7565_s1 + $0x390] sm:$0xff] }
 0x325   : > { %2950 = vmatpush.bf16.msra.mxu2 %v5281_v57 }
 0x326   : > { %v6636_v11 = vadd.f32 %v3414_v32, %v2303_v43 }
 0x327   : > { %v2304_v59 = vpop.f32.mrf.mxu3 }
 0x329   : > { %v2215_v61 = vpop.f32.mrf.mxu2  ;;  %v2110_v25 = vpop.f32.mrf.mxu0 }
 0x32a   : > { %v2216_v8 = vadd.f32 %v2215_v61, %v6389_v35  ;;  %v2199_v36 = vpop.f32.mrf.mxu1  ;;  %v2111_v49 = vadd.f32 %v2110_v25, %v2022_v55 }
 0x32c   : > { %v2305_v18 = vadd.f32 %v2304_v59, %v2216_v8  ;;  %v6639_v16 = vadd.f32 %v2199_v36, %v2111_v49  ;;  %2810 = vmatmul.bf16.gmra.mxu0 %v6292_v37  ;;  %2346 = vmatmul.bf16.gmra.mxu3 %v6648_v47  ;;  %v7660_v37 = vrot.slane %v6034_v19, 7 }
 0x32d   : > { %2899 = vmatmul.bf16.gmra.mxu1 %v6315_v41 }
 0x32e   : > { %v6644_v5 = vadd.f32 %v6031_v60, %v2305_v18  ;;  %2257 = vmatmul.bf16.gmra.mxu2 %v6621_v40  ;;  %v3415_v23 = vsel %vm3333_vm0, 0.0, %v7660_v37  ;;  %v6675_v18 = vld [vmem:[%s5633_s16 + $0xd8] sm:$0xff] }
 0x32f   : > { %v2307_v61 = vpop.f32.mrf.mxu3 }
 0x331   : > { %v2218_v35 = vpop.f32.mrf.mxu2  ;;  %v2112_v25 = vpop.f32.mrf.mxu0 }
 0x332   : > { %v2219_v55 = vadd.f32 %v2218_v35, %v6391_v42  ;;  %v2201_v36 = vpop.f32.mrf.mxu1  ;;  %v2113_v10 = vadd.f32 %v2112_v25, %v2024_v28  ;;  %v5289_v42 = vld [vmem:[%s7565_s1 + $0x3d0] sm:$0xff] }
 0x333   : > { %3039 = vmatpush.bf16.msra.mxu3 %v5289_v42  ;;  %v5305_v35 = vld [vmem:[%s7565_s1 + $0x450] sm:$0xff] }
 0x334   : > { %v2308_v39 = vadd.f32 %v2307_v61, %v2219_v55  ;;  %v6655_v60 = vadd.f32 %v2201_v36, %v2113_v10  ;;  %3217 = vmatpush.bf16.msra.mxu1 %v5305_v35 }
 0x336   : > { %v6657_v20 = vadd.f32 %v3415_v23, %v2308_v39  ;;  %v7661_v39 = vrot.slane %v6057_v31, 7  ;;  %v6702_v31 = vld [vmem:[%s5633_s16 + $0xe0] sm:$0xff] }
 0x337   : > { %v2309_v43 = vpop.f32.mrf.mxu3 }
 0x338   : > { %v3416_v37 = vsel %vm3333_vm0, 0.0, %v7661_v39 }
 0x339   : > { %v2220_v28 = vpop.f32.mrf.mxu2  ;;  %v2776_v63 = vpop.f32.mrf.mxu0 }
 0x33a   : > { %v2221_v19 = vadd.f32 %v2220_v28, %v6400_v52  ;;  %v2865_v32 = vpop.f32.mrf.mxu1  ;;  %v5297_v52 = vld [vmem:[%s7565_s1 + $0x410] sm:$0xff] }
 0x33b   : > { %v6666_v59 = vadd.f32 %v2865_v32, %v2776_v63  ;;  %3128 = vmatpush.bf16.msra.mxu0 %v5297_v52 }
 0x33c   : > { %v2310_v8 = vadd.f32 %v2309_v43, %v2221_v19  ;;  %2815 = vmatmul.bf16.gmra.mxu0 %v6315_v41  ;;  %2351 = vmatmul.bf16.gmra.mxu3 %v6675_v18 }
 0x33d   : > { %2904 = vmatmul.bf16.gmra.mxu1 %v6338_v30 }
 0x33e   : > { %v6671_v49 = vadd.f32 %v6054_v4, %v2310_v8  ;;  %2262 = vmatmul.bf16.gmra.mxu2 %v6648_v47 }
 0x33f   : > { %v2312_v61 = vpop.f32.mrf.mxu3 }
 0x341   : > { %v2223_v41 = vpop.f32.mrf.mxu2  ;;  %v2778_v55 = vpop.f32.mrf.mxu0 }
 0x342   : > { %v2224_v4 = vadd.f32 %v2223_v41, %v6408_v13  ;;  %v2867_v25 = vpop.f32.mrf.mxu1 }
 0x343   : > { %v6685_v36 = vadd.f32 %v2867_v25, %v2778_v55  ;;  %v5280_v25 = vld [vmem:[%s7565_s1 + $0x388] sm:$0xff] }
 0x344   : > { %v2313_v10 = vadd.f32 %v2312_v61, %v2224_v4  ;;  %v7662_v4 = vrot.slane %v6080_v48, 7  ;;  %2951 = vmatpush.bf16.msra.mxu2 %v5280_v25 }
 0x346   : > { %v6690_v23 = vadd.f32 %v3416_v37, %v2313_v10 }
 0x347   : > { %v2314_v42 = vpop.f32.mrf.mxu3 }
 0x349   : > { %v2225_v57 = vpop.f32.mrf.mxu2  ;;  %v2781_v43 = vpop.f32.mrf.mxu0 }
 0x34a   : > { %v2226_v28 = vadd.f32 %v2225_v57, %v6423_v26  ;;  %v2870_v19 = vpop.f32.mrf.mxu1 }
 0x34b   : > { %v6693_v63 = vadd.f32 %v2870_v19, %v2781_v43  ;;  %v7663_v43 = vld [vmem:[#allocation4_spill] sm:$0xff] }
 0x34c   : > { %v2315_v13 = vadd.f32 %v2314_v42, %v2226_v28  ;;  %2820 = vmatmul.bf16.gmra.mxu0 %v6338_v30  ;;  %2356 = vmatmul.bf16.gmra.mxu3 %v6702_v31 }
 0x34d   : > { %2909 = vmatmul.bf16.gmra.mxu1 %v6359_v54 }
 0x34e   : > { %v6698_v32 = vadd.f32 %v6077_v27, %v2315_v13  ;;  %2267 = vmatmul.bf16.gmra.mxu2 %v6675_v18  ;;  %v3417_v27 = vsel %vm3333_vm0, 0.0, %v7662_v4  ;;  %v6729_v13 = vld [vmem:[%s5633_s16 + $0xe8] sm:$0xff] }
 0x34f   : > { %v2317_v26 = vpop.f32.mrf.mxu3 }
 0x351   : > { %v2228_v8 = vpop.f32.mrf.mxu2  ;;  %v2783_v35 = vpop.f32.mrf.mxu0 }
 0x352   : > { %v2229_v52 = vadd.f32 %v2228_v8, %v6425_v38  ;;  %v2872_v41 = vpop.f32.mrf.mxu1  ;;  %v5288_v38 = vld [vmem:[%s7565_s1 + $0x3c8] sm:$0xff] }
 0x353   : > { %v6706_v61 = vadd.f32 %v2872_v41, %v2783_v35  ;;  %3040 = vmatpush.bf16.msra.mxu3 %v5288_v38  ;;  %v5304_v8 = vld [vmem:[%s7565_s1 + $0x448] sm:$0xff] }
 0x354   : > { %v2318_v30 = vadd.f32 %v2317_v26, %v2229_v52  ;;  %3218 = vmatpush.bf16.msra.mxu1 %v5304_v8 }
 0x356   : > { %v6711_v55 = vadd.f32 %v3417_v27, %v2318_v30  ;;  %v7664_v27 = vrot.slane %v6103_v0, 7  ;;  %v6756_v0 = vld [vmem:[%s5633_s16 + $0xf0] sm:$0xff] }
 0x357   : > { %v2319_v39 = vpop.f32.mrf.mxu3 }
 0x358   : > { %v3418_v25 = vsel %vm3333_vm0, 0.0, %v7664_v27 }
 0x359   : > { %v2230_v10 = vpop.f32.mrf.mxu2  ;;  %v2786_v48 = vpop.f32.mrf.mxu0 }
 0x35a   : > { %v2231_v37 = vadd.f32 %v2230_v10, %v6434_v3  ;;  %v2875_v57 = vpop.f32.mrf.mxu1  ;;  %v5296_v3 = vld [vmem:[%s7565_s1 + $0x408] sm:$0xff] }
 0x35b   : > { %v6720_v42 = vadd.f32 %v2875_v57, %v2786_v48  ;;  %3129 = vmatpush.bf16.msra.mxu0 %v5296_v3 }
 0x35c   : > { %v2320_v28 = vadd.f32 %v2319_v39, %v2231_v37  ;;  %2825 = vmatmul.bf16.gmra.mxu0 %v6359_v54  ;;  %2361 = vmatmul.bf16.gmra.mxu3 %v6729_v13 }
 0x35d   : > { %2914 = vmatmul.bf16.gmra.mxu1 %v6380_v6 }
 0x35e   : > { %v6725_v19 = vadd.f32 %v7663_v43, %v2320_v28  ;;  %2272 = vmatmul.bf16.gmra.mxu2 %v6702_v31  ;;  %v7665_v43 = vld [vmem:[#allocation5_spill] sm:$0xff] }
 0x35f   : > { %v2322_v26 = vpop.f32.mrf.mxu3 }
 0x361   : > { %v2233_v54 = vpop.f32.mrf.mxu2  ;;  %v2788_v35 = vpop.f32.mrf.mxu0 }
 0x362   : > { %v2234_v52 = vadd.f32 %v2233_v54, %v6442_v50  ;;  %v2877_v41 = vpop.f32.mrf.mxu1 }
 0x363   : > { %v6739_v30 = vadd.f32 %v2877_v41, %v2788_v35  ;;  %v7666_v41 = vrot.slane %v6129_v29, 7 }
 0x364   : > { %v2323_v4 = vadd.f32 %v2322_v26, %v2234_v52 }
 0x366   : > { %v6744_v38 = vadd.f32 %v3418_v25, %v2323_v4  ;;  %v3419_v4 = vsel %vm3333_vm0, 0.0, %v7666_v41  ;;  %v5279_v25 = vld [vmem:[%s7565_s1 + $0x380] sm:$0xff] }
 0x367   : > { %v2324_v39 = vpop.f32.mrf.mxu3  ;;  %2952 = vmatpush.bf16.msra.mxu2 %v5279_v25 }
 0x369   : > { %v2235_v10 = vpop.f32.mrf.mxu2  ;;  %v2791_v48 = vpop.f32.mrf.mxu0 }
 0x36a   : > { %v2236_v37 = vadd.f32 %v2235_v10, %v6457_v15  ;;  %v2880_v57 = vpop.f32.mrf.mxu1 }
 0x36b   : > { %v6747_v28 = vadd.f32 %v2880_v57, %v2791_v48 }
 0x36c   : > { %v2325_v50 = vadd.f32 %v2324_v39, %v2236_v37  ;;  %2830 = vmatmul.bf16.gmra.mxu0 %v6380_v6  ;;  %2366 = vmatmul.bf16.gmra.mxu3 %v6756_v0 }
 0x36d   : > { %2919 = vmatmul.bf16.gmra.mxu1 %v6397_v21 }
 0x36e   : > { %v6752_v3 = vadd.f32 %v7665_v43, %v2325_v50  ;;  %2277 = vmatmul.bf16.gmra.mxu2 %v6729_v13  ;;  %v7667_v43 = vld [vmem:[#allocation6_spill] sm:$0xff] }
 0x36f   : > { %v2327_v15 = vpop.f32.mrf.mxu3 }
 0x371   : > { %v2238_v8 = vpop.f32.mrf.mxu2  ;;  %v2793_v26 = vpop.f32.mrf.mxu0 }
 0x372   : > { %v2239_v54 = vadd.f32 %v2238_v8, %v6459_v53  ;;  %v2882_v52 = vpop.f32.mrf.mxu1  ;;  %v5287_v53 = vld [vmem:[%s7565_s1 + $0x3c0] sm:$0xff] }
 0x373   : > { %v6760_v35 = vadd.f32 %v2882_v52, %v2793_v26  ;;  %3041 = vmatpush.bf16.msra.mxu3 %v5287_v53  ;;  %v7668_v53 = vrot.slane %v6150_v2, 7 }
 0x374   : > { %v2328_v6 = vadd.f32 %v2327_v15, %v2239_v54  ;;  %v6783_v15 = vld [vmem:[%s5633_s16 + $0xf8] sm:$0xff]  ;;  %v5303_v54 = vld [vmem:[%s7565_s1 + $0x440] sm:$0xff] }
 0x375   : > { %3219 = vmatpush.bf16.msra.mxu1 %v5303_v54 }
 0x376   : > { %v6765_v27 = vadd.f32 %v3419_v4, %v2328_v6 }
 0x377   : > { %v2329_v39 = vpop.f32.mrf.mxu3 }
 0x379   : > { %v2240_v10 = vpop.f32.mrf.mxu2  ;;  %v2796_v29 = vpop.f32.mrf.mxu0 }
 0x37a   : > { %v2241_v37 = vadd.f32 %v2240_v10, %v6468_v46  ;;  %v2885_v48 = vpop.f32.mrf.mxu1  ;;  %v5295_v46 = vld [vmem:[%s7565_s1 + $0x400] sm:$0xff]  ;;  %v3420_v10 = vsel %vm3333_vm0, 0.0, %v7668_v53 }
 0x37b   : > { %v6774_v57 = vadd.f32 %v2885_v48, %v2796_v29  ;;  %3130 = vmatpush.bf16.msra.mxu0 %v5295_v46 }
 0x37c   : > { %v2330_v50 = vadd.f32 %v2329_v39, %v2241_v37  ;;  %2835 = vmatmul.bf16.gmra.mxu0 %v6397_v21  ;;  %2371 = vmatmul.bf16.gmra.mxu3 %v6783_v15 }
 0x37d   : > { %2924 = vmatmul.bf16.gmra.mxu1 %v6414_v1 }
 0x37e   : > { %v6779_v8 = vadd.f32 %v7667_v43, %v2330_v50  ;;  %2282 = vmatmul.bf16.gmra.mxu2 %v6756_v0 }
 0x37f   : > { %v2332_v26 = vpop.f32.mrf.mxu3 }
 0x381   : > { %v2243_v21 = vpop.f32.mrf.mxu2  ;;  %v2798_v6 = vpop.f32.mrf.mxu0 }
 0x382   : > { %v2244_v52 = vadd.f32 %v2243_v21, %v6476_v34  ;;  %v2887_v41 = vpop.f32.mrf.mxu1 }
 0x383   : > { %v6793_v4 = vadd.f32 %v2887_v41, %v2798_v6 }
 0x384   : > { %v2333_v25 = vadd.f32 %v2332_v26, %v2244_v52 }
 0x386   : > { %v6798_v39 = vadd.f32 %v3420_v10, %v2333_v25 }
 0x387   : > { %v2334_v29 = vpop.f32.mrf.mxu3 }
 0x389   : > { %v2245_v37 = vpop.f32.mrf.mxu2  ;;  %v2801_v50 = vpop.f32.mrf.mxu0 }
 0x38a   : > { %v2246_v48 = vadd.f32 %v2245_v37, %v6494_v24  ;;  %v2890_v43 = vpop.f32.mrf.mxu1 }
 0x38b   : > { %v6801_v46 = vadd.f32 %v2890_v43, %v2801_v50  ;;  %v7671_v43 = vld [vmem:[#allocation7_spill] sm:$0xff] }
 0x38c   : > { %v2335_v34 = vadd.f32 %v2334_v29, %v2246_v48  ;;  %2840 = vmatmul.bf16.gmra.mxu0 %v6414_v1  ;;  %2376 = vmatmul.bf16.gmra.mxu3 %v6127_v14  ;;  %v7669_v1 = vrot.slane %v6169_v33, 7  ;;  %v5482_v33 = vld [vmem:[%s5633_s16 + $0x8] sm:$0xff] }
 0x38d   : > { %2929 = vmatmul.bf16.gmra.mxu1 %v6431_v45 }
 0x38e   : > { %v6806_v54 = vadd.f32 %v6166_v44, %v2335_v34  ;;  %2287 = vmatmul.bf16.gmra.mxu2 %v6783_v15  ;;  %v3421_v25 = vsel %vm3333_vm0, 0.0, %v7669_v1 }
 0x38f   : > { %v2337_v21 = vpop.f32.mrf.mxu3 }
 0x391   : > { %v2248_v2 = vpop.f32.mrf.mxu2  ;;  %v2803_v26 = vpop.f32.mrf.mxu0 }
 0x392   : > { %v2249_v24 = vadd.f32 %v2248_v2, %v6496_v9  ;;  %v2892_v52 = vpop.f32.mrf.mxu1  ;;  %v7673_v2 = vmov 0  }
 0x393   : > { %v6811_v6 = vadd.f32 %v2892_v52, %v2803_v26  ;;  %v7674_v26 = vld [vmem:[#allocation27_spill] sm:$0xff] }
 0x394   : > { %v2338_v41 = vadd.f32 %v2337_v21, %v2249_v24 }
 0x396   : > { %v6816_v44 = vadd.f32 %v3421_v25, %v2338_v41 }
 0x397   : > { %v2339_v10 = vpop.f32.mrf.mxu3 }
 0x398   : > { %7670 = vst [vmem:[#allocation4_spill] sm:$0xff] %v6816_v44 }
 0x399   : > { %v2250_v53 = vpop.f32.mrf.mxu2  ;;  %v2806_v29 = vpop.f32.mrf.mxu0 }
 0x39a   : > { %v2251_v37 = vadd.f32 %v2250_v53, %v6505_v7  ;;  %v2895_v48 = vpop.f32.mrf.mxu1 }
 0x39b   : > { %v6819_v50 = vadd.f32 %v2895_v48, %v2806_v29 }
 0x39c   : > { %v2340_v9 = vadd.f32 %v2339_v10, %v2251_v37  ;;  %2845 = vmatmul.bf16.gmra.mxu0 %v6431_v45  ;;  %3042 = vmatmul.bf16.vlgmr.msra.gmra.mxu3 %v7673_v2  ;;  %v7675_v45 = vld [vmem:[#allocation8_spill] sm:$0xff] }
 0x39d   : > { %2934 = vmatmul.bf16.gmra.mxu1 %v6448_v56  ;;  %v7676_v53 = vrot.slane %v7675_v45, 7 }
 0x39e   : > { %v6824_v34 = vadd.f32 %v7671_v43, %v2340_v9  ;;  %2953 = vmatmul.bf16.vlgmr.msra.gmra.mxu2 %v5482_v33 }
 0x39f   : > { %v2342_v24 = vpop.f32.mrf.mxu3  ;;  %v3422_v10 = vsel %vm3333_vm0, 0.0, %v7676_v53 }
 0x3a0   : > { %7672 = vst [vmem:[#allocation5_spill] sm:$0xff] %v6824_v34 }
 0x3a1   : > { %v2253_v21 = vpop.f32.mrf.mxu2  ;;  %v2808_v52 = vpop.f32.mrf.mxu0 }
 0x3a2   : > { %v2254_v7 = vadd.f32 %v2253_v21, %v7674_v26  ;;  %v2897_v41 = vpop.f32.mrf.mxu1  ;;  %v7678_v26 = vld [vmem:[#allocation3_spill] sm:$0xff] }
 0x3a3   : > { %v6829_v1 = vadd.f32 %v2897_v41, %v2808_v52  ;;  %v5483_v52 = vld [vmem:[%s5633_s16 + $0x10] sm:$0xff]  ;;  %v7681_v41 = vld [vmem:[#allocation24_spill] sm:$0xff] }
 0x3a4   : > { %v2343_v25 = vadd.f32 %v2342_v24, %v2254_v7  ;;  %v7679_v24 = vld [vmem:[#allocation9_spill] sm:$0xff] }
 0x3a6   : > { %v6834_v37 = vadd.f32 %v3422_v10, %v2343_v25 }
 0x3a7   : > { %v2344_v48 = vpop.f32.mrf.mxu3 }
 0x3a8   : > { %7677 = vst [vmem:[#allocation6_spill] sm:$0xff] %v6834_v37 }
 0x3a9   : > { %v2255_v29 = vpop.f32.mrf.mxu2  ;;  %v2811_v43 = vpop.f32.mrf.mxu0 }
 0x3aa   : > { %v2256_v9 = vadd.f32 %v2255_v29, %v6528_v58  ;;  %v2900_v33 = vpop.f32.mrf.mxu1 }
 0x3ab   : > { %v6837_v2 = vadd.f32 %v2900_v33, %v2811_v43 }
 0x3ac   : > { %v2345_v21 = vadd.f32 %v2344_v48, %v2256_v9  ;;  %2850 = vmatmul.bf16.gmra.mxu0 %v6448_v56  ;;  %3047 = vmatmul.bf16.gmra.mxu3 %v7681_v41  ;;  %v7682_v56 = vld [vmem:[#allocation10_spill] sm:$0xff] }
 0x3ad   : > { %2939 = vmatmul.bf16.gmra.mxu1 %v7678_v26  ;;  %v7683_v9 = vrot.slane %v7682_v56, 7  ;;  %v7689_v56 = vld [vmem:[#allocation31_spill] sm:$0xff] }
 0x3ae   : > { %v6842_v7 = vadd.f32 %v7679_v24, %v2345_v21  ;;  %2958 = vmatmul.bf16.gmra.mxu2 %v5483_v52  ;;  %v7685_v24 = vld [vmem:[#allocation30_spill] sm:$0xff] }
 0x3af   : > { %v2347_v45 = vpop.f32.mrf.mxu3  ;;  %v3423_v43 = vsel %vm3333_vm0, 0.0, %v7683_v9 }
 0x3b0   : > { %7680 = vst [vmem:[#allocation7_spill] sm:$0xff] %v6842_v7 }
 0x3b1   : > { %v2258_v25 = vpop.f32.mrf.mxu2  ;;  %v2813_v53 = vpop.f32.mrf.mxu0 }
 0x3b2   : > { %v2259_v58 = vadd.f32 %v2258_v25, %v6530_v12  ;;  %v2902_v10 = vpop.f32.mrf.mxu1  ;;  %v7686_v25 = vld [vmem:[#allocation25_spill] sm:$0xff] }
 0x3b3   : > { %v6847_v29 = vadd.f32 %v2902_v10, %v2813_v53  ;;  %v5484_v53 = vld [vmem:[%s5633_s16 + $0x18] sm:$0xff] }
 0x3b4   : > { %v2348_v48 = vadd.f32 %v2347_v45, %v2259_v58  ;;  %v7687_v45 = vld [vmem:[#allocation11_spill] sm:$0xff] }
 0x3b6   : > { %v6852_v33 = vadd.f32 %v3423_v43, %v2348_v48 }
 0x3b7   : > { %v2349_v26 = vpop.f32.mrf.mxu3 }
 0x3b8   : > { %7684 = vst [vmem:[#allocation27_spill] sm:$0xff] %v6852_v33 }
 0x3b9   : > { %v2260_v21 = vpop.f32.mrf.mxu2  ;;  %v2816_v7 = vpop.f32.mrf.mxu0 }
 0x3ba   : > { %v2261_v52 = vadd.f32 %v2260_v21, %v7685_v24  ;;  %v2905_v37 = vpop.f32.mrf.mxu1 }
 0x3bb   : > { %v6855_v34 = vadd.f32 %v2905_v37, %v2816_v7 }
 0x3bc   : > { %v2350_v12 = vadd.f32 %v2349_v26, %v2261_v52  ;;  %3131 = vmatmul.bf16.vlgmr.msra.gmra.mxu0 %v7681_v41  ;;  %3052 = vmatmul.bf16.gmra.mxu3 %v7686_v25  ;;  %v7690_v41 = vld [vmem:[#allocation12_spill] sm:$0xff] }
 0x3bd   : > { %3220 = vmatmul.bf16.vlgmr.msra.gmra.mxu1 %v7686_v25  ;;  %v7691_v26 = vrot.slane %v7690_v41, 7 }
 0x3be   : > { %v6860_v58 = vadd.f32 %v7687_v45, %v2350_v12  ;;  %2963 = vmatmul.bf16.gmra.mxu2 %v5484_v53 }
 0x3bf   : > { %v2352_v48 = vpop.f32.mrf.mxu3  ;;  %v3424_v24 = vsel %vm3333_vm0, 0.0, %v7691_v26 }
 0x3c0   : > { %7688 = vst [vmem:[#allocation8_spill] sm:$0xff] %v6860_v58 }
 0x3c1   : > { %v2263_v10 = vpop.f32.mrf.mxu2  ;;  %v2818_v43 = vpop.f32.mrf.mxu0 }
 0x3c2   : > { %v2264_v9 = vadd.f32 %v2263_v10, %v7689_v56  ;;  %v2907_v37 = vpop.f32.mrf.mxu1  ;;  %v7694_v56 = vld [vmem:[#allocation26_spill] sm:$0xff] }
 0x3c3   : > { %v6865_v7 = vadd.f32 %v2907_v37, %v2818_v43  ;;  %v5485_v43 = vld [vmem:[%s5633_s16 + $0x20] sm:$0xff] }
 0x3c4   : > { %v2353_v21 = vadd.f32 %v2352_v48, %v2264_v9  ;;  %v7695_v48 = vld [vmem:[#allocation13_spill] sm:$0xff] }
 0x3c6   : > { %v6870_v52 = vadd.f32 %v3424_v24, %v2353_v21 }
 0x3c7   : > { %v2354_v45 = vpop.f32.mrf.mxu3 }
 0x3c8   : > { %7692 = vst [vmem:[#allocation3_spill] sm:$0xff] %v6870_v52 }
 0x3c9   : > { %v2265_v12 = vpop.f32.mrf.mxu2  ;;  %v2821_v58 = vpop.f32.mrf.mxu0 }
 0x3ca   : > { %v2266_v53 = vadd.f32 %v2265_v12, %v6562_v22  ;;  %v2910_v33 = vpop.f32.mrf.mxu1 }
 0x3cb   : > { %v6873_v44 = vadd.f32 %v2910_v33, %v2821_v58 }
 0x3cc   : > { %v2355_v10 = vadd.f32 %v2354_v45, %v2266_v53  ;;  %3136 = vmatmul.bf16.gmra.mxu0 %v7686_v25  ;;  %3057 = vmatmul.bf16.gmra.mxu3 %v7694_v56  ;;  %v7697_v25 = vld [vmem:[#allocation14_spill] sm:$0xff] }
 0x3cd   : > { %7693 = vst [vmem:[#allocation9_spill] sm:$0xff] %v6873_v44  ;;  %3225 = vmatmul.bf16.gmra.mxu1 %v7694_v56  ;;  %v7698_v24 = vrot.slane %v7697_v25, 7  ;;  %v7705_v25 = vld [vmem:[#allocation35_spill] sm:$0xff] }
 0x3ce   : > { %v6878_v9 = vadd.f32 %v7695_v48, %v2355_v10  ;;  %2968 = vmatmul.bf16.gmra.mxu2 %v5485_v43  ;;  %v7700_v48 = vld [vmem:[#allocation34_spill] sm:$0xff] }
 0x3cf   : > { %v2357_v21 = vpop.f32.mrf.mxu3  ;;  %v3425_v12 = vsel %vm3333_vm0, 0.0, %v7698_v24 }
 0x3d0   : > { %7696 = vst [vmem:[#allocation24_spill] sm:$0xff] %v6878_v9 }
 0x3d1   : > { %v2268_v37 = vpop.f32.mrf.mxu2  ;;  %v2823_v41 = vpop.f32.mrf.mxu0 }
 0x3d2   : > { %v2269_v22 = vadd.f32 %v2268_v37, %v6564_v17  ;;  %v2912_v33 = vpop.f32.mrf.mxu1  ;;  %v7702_v37 = vld [vmem:[#allocation28_spill] sm:$0xff] }
 0x3d3   : > { %v6883_v58 = vadd.f32 %v2912_v33, %v2823_v41  ;;  %v5486_v41 = vld [vmem:[%s5633_s16 + $0x28] sm:$0xff] }
 0x3d4   : > { %v2358_v26 = vadd.f32 %v2357_v21, %v2269_v22  ;;  %v7703_v21 = vld [vmem:[#allocation15_spill] sm:$0xff] }
 0x3d6   : > { %v6888_v45 = vadd.f32 %v3425_v12, %v2358_v26 }
 0x3d7   : > { %v2359_v10 = vpop.f32.mrf.mxu3 }
 0x3d8   : > { %7699 = vst [vmem:[#allocation10_spill] sm:$0xff] %v6888_v45 }
 0x3d9   : > { %v2270_v53 = vpop.f32.mrf.mxu2  ;;  %v2826_v9 = vpop.f32.mrf.mxu0 }
 0x3da   : > { %v2271_v43 = vadd.f32 %v2270_v53, %v7700_v48  ;;  %v2915_v52 = vpop.f32.mrf.mxu1 }
 0x3db   : > { %v6891_v44 = vadd.f32 %v2915_v52, %v2826_v9 }
 0x3dc   : > { %v2360_v17 = vadd.f32 %v2359_v10, %v2271_v43  ;;  %3141 = vmatmul.bf16.gmra.mxu0 %v7694_v56  ;;  %3062 = vmatmul.bf16.gmra.mxu3 %v7702_v37  ;;  %v7707_v56 = vld [vmem:[#allocation16_spill] sm:$0xff] }
 0x3dd   : > { %7701 = vst [vmem:[#allocation30_spill] sm:$0xff] %v6891_v44  ;;  %3230 = vmatmul.bf16.gmra.mxu1 %v7702_v37  ;;  %v7708_v10 = vrot.slane %v7707_v56, 7  ;;  %v7714_v56 = vld [vmem:[#allocation37_spill] sm:$0xff] }
 0x3de   : > { %v6896_v22 = vadd.f32 %v7703_v21, %v2360_v17  ;;  %2973 = vmatmul.bf16.gmra.mxu2 %v5486_v41 }
 0x3df   : > { %v2362_v26 = vpop.f32.mrf.mxu3  ;;  %v3426_v48 = vsel %vm3333_vm0, 0.0, %v7708_v10 }
 0x3e0   : > { %7704 = vst [vmem:[#allocation25_spill] sm:$0xff] %v6896_v22 }
 0x3e1   : > { %v2273_v33 = vpop.f32.mrf.mxu2  ;;  %v2828_v12 = vpop.f32.mrf.mxu0 }
 0x3e2   : > { %v2274_v24 = vadd.f32 %v2273_v33, %v7705_v25  ;;  %v2917_v52 = vpop.f32.mrf.mxu1  ;;  %v7711_v25 = vld [vmem:[#allocation29_spill] sm:$0xff] }
 0x3e3   : > { %v6901_v9 = vadd.f32 %v2917_v52, %v2828_v12  ;;  %v5487_v12 = vld [vmem:[%s5633_s16 + $0x30] sm:$0xff] }
 0x3e4   : > { %v2363_v53 = vadd.f32 %v2362_v26, %v2274_v24  ;;  %v7712_v26 = vld [vmem:[#allocation17_spill] sm:$0xff] }
 0x3e5   : > { %7706 = vst [vmem:[#allocation11_spill] sm:$0xff] %v6901_v9 }
 0x3e6   : > { %v6906_v43 = vadd.f32 %v3426_v48, %v2363_v53 }
 0x3e7   : > { %v2364_v21 = vpop.f32.mrf.mxu3 }
 0x3e8   : > { %7709 = vst [vmem:[#allocation31_spill] sm:$0xff] %v6906_v43 }
 0x3e9   : > { %v2275_v17 = vpop.f32.mrf.mxu2  ;;  %v2831_v22 = vpop.f32.mrf.mxu0 }
 0x3ea   : > { %v2276_v41 = vadd.f32 %v2275_v17, %v6596_v62  ;;  %v2920_v45 = vpop.f32.mrf.mxu1 }
 0x3eb   : > { %v6909_v44 = vadd.f32 %v2920_v45, %v2831_v22 }
 0x3ec   : > { %v2365_v33 = vadd.f32 %v2364_v21, %v2276_v41  ;;  %3146 = vmatmul.bf16.gmra.mxu0 %v7702_v37  ;;  %3067 = vmatmul.bf16.gmra.mxu3 %v7711_v25  ;;  %v7715_v37 = vld [vmem:[#allocation18_spill] sm:$0xff] }
 0x3ed   : > { %7710 = vst [vmem:[#allocation12_spill] sm:$0xff] %v6909_v44  ;;  %3235 = vmatmul.bf16.gmra.mxu1 %v7711_v25  ;;  %v7716_v17 = vrot.slane %v7715_v37, 7  ;;  %v7723_v37 = vld [vmem:[#allocation40_spill] sm:$0xff] }
 0x3ee   : > { %v6914_v24 = vadd.f32 %v7712_v26, %v2365_v33  ;;  %2978 = vmatmul.bf16.gmra.mxu2 %v5487_v12  ;;  %v7718_v12 = vld [vmem:[#allocation39_spill] sm:$0xff] }
 0x3ef   : > { %v2367_v53 = vpop.f32.mrf.mxu3  ;;  %v3427_v21 = vsel %vm3333_vm0, 0.0, %v7716_v17 }
 0x3f0   : > { %7713 = vst [vmem:[#allocation26_spill] sm:$0xff] %v6914_v24 }
 0x3f1   : > { %v2278_v52 = vpop.f32.mrf.mxu2  ;;  %v2833_v10 = vpop.f32.mrf.mxu0 }
 0x3f2   : > { %v2279_v62 = vadd.f32 %v2278_v52, %v7714_v56  ;;  %v2922_v45 = vpop.f32.mrf.mxu1  ;;  %v7720_v56 = vld [vmem:[#allocation32_spill] sm:$0xff] }
 0x3f3   : > { %v6919_v22 = vadd.f32 %v2922_v45, %v2833_v10  ;;  %v5488_v10 = vld [vmem:[%s5633_s16 + $0x38] sm:$0xff] }
 0x3f4   : > { %v2368_v48 = vadd.f32 %v2367_v53, %v2279_v62  ;;  %v7721_v53 = vld [vmem:[#allocation19_spill] sm:$0xff] }
 0x3f6   : > { %v6924_v41 = vadd.f32 %v3427_v21, %v2368_v48 }
 0x3f7   : > { %v2369_v26 = vpop.f32.mrf.mxu3 }
 0x3f8   : > { %7717 = vst [vmem:[#allocation13_spill] sm:$0xff] %v6924_v41 }
 0x3f9   : > { %v2280_v33 = vpop.f32.mrf.mxu2  ;;  %v2836_v43 = vpop.f32.mrf.mxu0 }
 0x3fa   : > { %v2281_v24 = vadd.f32 %v2280_v33, %v7718_v12  ;;  %v2925_v44 = vpop.f32.mrf.mxu1 }
 0x3fb   : > { %v6927_v9 = vadd.f32 %v2925_v44, %v2836_v43 }
 0x3fc   : > { %v2370_v52 = vadd.f32 %v2369_v26, %v2281_v24  ;;  %3151 = vmatmul.bf16.gmra.mxu0 %v7711_v25  ;;  %3072 = vmatmul.bf16.gmra.mxu3 %v7720_v56  ;;  %v7724_v25 = vld [vmem:[#allocation20_spill] sm:$0xff] }
 0x3fd   : > { %7719 = vst [vmem:[#allocation14_spill] sm:$0xff] %v6927_v9  ;;  %3240 = vmatmul.bf16.gmra.mxu1 %v7720_v56  ;;  %v7725_v33 = vrot.slane %v7724_v25, 7 }
 0x3fe   : > { %v6932_v62 = vadd.f32 %v7721_v53, %v2370_v52  ;;  %2983 = vmatmul.bf16.gmra.mxu2 %v5488_v10 }
 0x3ff   : > { %v2372_v48 = vpop.f32.mrf.mxu3  ;;  %v3428_v26 = vsel %vm3333_vm0, 0.0, %v7725_v33 }
 0x400   : > { %7722 = vst [vmem:[#allocation34_spill] sm:$0xff] %v6932_v62 }
 0x401   : > { %v2283_v45 = vpop.f32.mrf.mxu2  ;;  %v2838_v21 = vpop.f32.mrf.mxu0 }
 0x402   : > { %v2284_v17 = vadd.f32 %v2283_v45, %v7723_v37  ;;  %v2927_v44 = vpop.f32.mrf.mxu1  ;;  %v7727_v37 = vld [vmem:[#allocation33_spill] sm:$0xff] }
 0x403   : > { %v6937_v43 = vadd.f32 %v2927_v44, %v2838_v21  ;;  %v5489_v21 = vld [vmem:[%s5633_s16 + $0x40] sm:$0xff] }
 0x404   : > { %v2373_v24 = vadd.f32 %v2372_v48, %v2284_v17  ;;  %v7728_v48 = vld [vmem:[#allocation21_spill] sm:$0xff] }
 0x406   : > { %v6942_v12 = vadd.f32 %v3428_v26, %v2373_v24 }
 0x407   : > { %v2374_v53 = vpop.f32.mrf.mxu3 }
 0x408   : > { %7726 = vst [vmem:[#allocation28_spill] sm:$0xff] %v6942_v12 }
 0x409   : > { %v2285_v52 = vpop.f32.mrf.mxu2  ;;  %v2841_v62 = vpop.f32.mrf.mxu0 }
 0x40a   : > { %v2286_v10 = vadd.f32 %v2285_v52, %v6634_v51  ;;  %v2930_v41 = vpop.f32.mrf.mxu1 }
 0x40b   : > { %v6945_v9 = vadd.f32 %v2930_v41, %v2841_v62 }
 0x40c   : > { %v2375_v45 = vadd.f32 %v2374_v53, %v2286_v10  ;;  %3156 = vmatmul.bf16.gmra.mxu0 %v7720_v56  ;;  %3077 = vmatmul.bf16.gmra.mxu3 %v7727_v37  ;;  %v7730_v56 = vld [vmem:[#allocation22_spill] sm:$0xff] }
 0x40d   : > { %3245 = vmatmul.bf16.gmra.mxu1 %v7727_v37  ;;  %v7731_v26 = vrot.slane %v7730_v56, 7 }
 0x40e   : > { %v6950_v17 = vadd.f32 %v7728_v48, %v2375_v45  ;;  %2988 = vmatmul.bf16.gmra.mxu2 %v5489_v21 }
 0x40f   : > { %v2377_v24 = vpop.f32.mrf.mxu3  ;;  %v3429_v52 = vsel %vm3333_vm0, 0.0, %v7731_v26 }
 0x410   : > { %7729 = vst [vmem:[#allocation15_spill] sm:$0xff] %v6950_v17 }
 0x411   : > { %v2288_v44 = vpop.f32.mrf.mxu2  ;;  %v2843_v25 = vpop.f32.mrf.mxu0 }
 0x412   : > { %v2289_v51 = vadd.f32 %v2288_v44, %v6639_v16  ;;  %v2932_v41 = vpop.f32.mrf.mxu1  ;;  %v7733_v44 = vld [vmem:[#allocation36_spill] sm:$0xff] }
 0x413   : > { %v6955_v62 = vadd.f32 %v2932_v41, %v2843_v25  ;;  %v5490_v25 = vld [vmem:[%s5633_s16 + $0x48] sm:$0xff] }
 0x414   : > { %v2378_v33 = vadd.f32 %v2377_v24, %v2289_v51  ;;  %v7734_v24 = vld [vmem:[#allocation23_spill] sm:$0xff] }
 0x416   : > { %v6960_v53 = vadd.f32 %v3429_v52, %v2378_v33 }
 0x417   : > { %v2379_v45 = vpop.f32.mrf.mxu3 }
 0x418   : > { %7732 = vst [vmem:[#allocation35_spill] sm:$0xff] %v6960_v53 }
 0x419   : > { %v2290_v10 = vpop.f32.mrf.mxu2  ;;  %v2846_v21 = vpop.f32.mrf.mxu0 }
 0x41a   : > { %v2291_v48 = vadd.f32 %v2290_v10, %v6655_v60  ;;  %v2935_v17 = vpop.f32.mrf.mxu1 }
 0x41b   : > { %v6963_v12 = vadd.f32 %v2935_v17, %v2846_v21 }
 0x41c   : > { %v2380_v16 = vadd.f32 %v2379_v45, %v2291_v48  ;;  %3161 = vmatmul.bf16.gmra.mxu0 %v7727_v37  ;;  %3082 = vmatmul.bf16.gmra.mxu3 %v7733_v44 }
 0x41d   : > { %3250 = vmatmul.bf16.gmra.mxu1 %v7733_v44 }
 0x41e   : > { %v6968_v51 = vadd.f32 %v7734_v24, %v2380_v16  ;;  %2993 = vmatmul.bf16.gmra.mxu2 %v5490_v25  ;;  %v7737_v25 = vld [vmem:[#allocation38_spill] sm:$0xff] }
 0x41f   : > { %v3043_v33 = vpop.f32.mrf.mxu3 }
 0x420   : > { %7735 = vst [vmem:[#allocation16_spill] sm:$0xff] %v6968_v51  ;;  %v5491_v51 = vld [vmem:[%s5633_s16 + $0x50] sm:$0xff] }
 0x421   : > { %v2954_v41 = vpop.f32.mrf.mxu2  ;;  %v2848_v56 = vpop.f32.mrf.mxu0 }
 0x422   : > { %v2955_v60 = vadd.f32 %v2954_v41, %v6666_v59  ;;  %v2937_v17 = vpop.f32.mrf.mxu1  ;;  %v3745_v59 = vld [vmem:[%s7568_s4 + $0x78] sm:$0xff] }
 0x423   : > { %v6973_v26 = vadd.f32 %v2937_v17, %v2848_v56  ;;  %3746 = vmatpush.msrb.mxu3 %v3745_v59  ;;  %3897 = vmatpush.msrb.mxu2 %v3745_v59  ;;  %v5492_v59 = vld [vmem:[%s5633_s16 + $0x58] sm:$0xff] }
 0x424   : > { %v3044_v52 = vadd.f32 %v3043_v33, %v2955_v60 }
 0x427   : > { %v3045_v10 = vpop.f32.mrf.mxu3 }
 0x429   : > { %v2956_v37 = vpop.f32.mrf.mxu2  ;;  %v2851_v48 = vpop.f32.mrf.mxu0 }
 0x42a   : > { %v2957_v45 = vadd.f32 %v2956_v37, %v6685_v36  ;;  %v2940_v21 = vpop.f32.mrf.mxu1 }
 0x42b   : > { %v6976_v16 = vadd.f32 %v2940_v21, %v2851_v48 }
 0x42c   : > { %v3046_v24 = vadd.f32 %v3045_v10, %v2957_v45  ;;  %3166 = vmatmul.bf16.gmra.mxu0 %v7733_v44  ;;  %3087 = vmatmul.bf16.gmra.mxu3 %v7737_v25 }
 0x42d   : > { %7736 = vst [vmem:[#allocation29_spill] sm:$0xff] %v6976_v16  ;;  %3255 = vmatmul.bf16.gmra.mxu1 %v7737_v25 }
 0x42e   : > { %2998 = vmatmul.bf16.gmra.mxu2 %v5491_v51 }
 0x42f   : > { %v3048_v41 = vpop.f32.mrf.mxu3 }
 0x431   : > { %v2959_v36 = vpop.f32.mrf.mxu2  ;;  %v2853_v60 = vpop.f32.mrf.mxu0 }
 0x432   : > { %v2960_v33 = vadd.f32 %v2959_v36, %v6693_v63  ;;  %v2942_v56 = vpop.f32.mrf.mxu1  ;;  %v3744_v63 = vld [vmem:[%s7568_s4 + $0x70] sm:$0xff] }
 0x433   : > { %v6986_v44 = vadd.f32 %v2942_v56, %v2853_v60  ;;  %3747 = vmatpush.msrb.mxu3 %v3744_v63  ;;  %3898 = vmatpush.msrb.mxu2 %v3744_v63 }
 0x434   : > { %v3049_v17 = vadd.f32 %v3048_v41, %v2960_v33 }
 0x437   : > { %v3050_v51 = vpop.f32.mrf.mxu3 }
 0x439   : > { %v2961_v37 = vpop.f32.mrf.mxu2  ;;  %v3132_v45 = vpop.f32.mrf.mxu0 }
 0x43a   : > { %v2962_v10 = vadd.f32 %v2961_v37, %v6706_v61  ;;  %v3221_v48 = vpop.f32.mrf.mxu1  ;;  %v3133_v21 = vadd.f32 %v3132_v45, %v3044_v52 }
 0x43c   : > { %v3051_v53 = vadd.f32 %v3050_v51, %v2962_v10  ;;  %v3222_v16 = vadd.f32 %v3221_v48, %v3133_v21  ;;  %3171 = vmatmul.bf16.gmra.mxu0 %v7737_v25  ;;  %3092 = vmatmul.bf16.gmra.mxu3 %v6621_v40 }
 0x43d   : > { %3260 = vmatmul.bf16.gmra.mxu1 %v6621_v40 }
 0x43e   : > { %3003 = vmatmul.bf16.gmra.mxu2 %v5492_v59  ;;  %v3495_v37 = vrot.slane %v3222_v16, 1 }
 0x43f   : > { %v3053_v36 = vpop.f32.mrf.mxu3 }
 0x441   : > { %v2964_v61 = vpop.f32.mrf.mxu2  ;;  %v3134_v41 = vpop.f32.mrf.mxu0 }
 0x442   : > { %v2965_v52 = vadd.f32 %v2964_v61, %v6720_v42  ;;  %v3223_v33 = vpop.f32.mrf.mxu1  ;;  %v3135_v60 = vadd.f32 %v3134_v41, %v3046_v24  ;;  %v5493_v41 = vld [vmem:[%s5633_s16 + $0x60] sm:$0xff] }
 0x444   : > { %v3054_v25 = vadd.f32 %v3053_v36, %v2965_v52  ;;  %v3224_v56 = vadd.f32 %v3223_v33, %v3135_v60 }
 0x446   : > { %v3496_v51 = vrot.slane %v3224_v56, 1 }
 0x447   : > { %v3055_v21 = vpop.f32.mrf.mxu3 }
 0x448   : > { %v3497_v10 = vsel %vm3494_vm1, %v3495_v37, %v3496_v51  ;;  %v3575_v45 = vsel %vm3494_vm1, %v3496_v51, 0.0 }
 0x449   : > { %v2966_v48 = vpop.f32.mrf.mxu2  ;;  %v7000_v59 = vadd.f32 %v3497_v10, %v6636_v11  ;;  %v7003_v42 = vadd.f32 %v3575_v45, %v6644_v5  ;;  %v3137_v63 = vpop.f32.mrf.mxu0  ;;  %v3743_v11 = vld [vmem:[%s7568_s4 + $0x68] sm:$0xff] }
 0x44a   : > { %v2967_v24 = vadd.f32 %v2966_v48, %v6739_v30  ;;  %v3226_v61 = vpop.f32.mrf.mxu1  ;;  %v3138_v36 = vadd.f32 %v3137_v63, %v3049_v17  ;;  %3748 = vmatpush.msrb.mxu3 %v3743_v11  ;;  %3899 = vmatpush.msrb.mxu2 %v3743_v11 }
 0x44c   : > { %v3056_v16 = vadd.f32 %v3055_v21, %v2967_v24  ;;  %v3227_v52 = vadd.f32 %v3226_v61, %v3138_v36  ;;  %3176 = vmatmul.bf16.gmra.mxu0 %v6621_v40  ;;  %3097 = vmatmul.bf16.gmra.mxu3 %v6648_v47 }
 0x44d   : > { %3265 = vmatmul.bf16.gmra.mxu1 %v6648_v47 }
 0x44e   : > { %3008 = vmatmul.bf16.gmra.mxu2 %v5493_v41  ;;  %v3498_v51 = vrot.slane %v3227_v52, 1 }
 0x44f   : > { %v3058_v30 = vpop.f32.mrf.mxu3 }
 0x451   : > { %v2969_v5 = vpop.f32.mrf.mxu2  ;;  %v3139_v33 = vpop.f32.mrf.mxu0 }
 0x452   : > { %v2970_v17 = vadd.f32 %v2969_v5, %v6747_v28  ;;  %v3228_v60 = vpop.f32.mrf.mxu1  ;;  %v3140_v56 = vadd.f32 %v3139_v33, %v3051_v53  ;;  %v5494_v5 = vld [vmem:[%s5633_s16 + $0x68] sm:$0xff] }
 0x454   : > { %v3059_v40 = vadd.f32 %v3058_v30, %v2970_v17  ;;  %v3229_v37 = vadd.f32 %v3228_v60, %v3140_v56 }
 0x456   : > { %v3499_v10 = vrot.slane %v3229_v37, 1 }
 0x457   : > { %v3060_v24 = vpop.f32.mrf.mxu3 }
 0x458   : > { %v3500_v45 = vsel %vm3494_vm1, %v3498_v51, %v3499_v10  ;;  %v3576_v48 = vsel %vm3494_vm1, %v3499_v10, 0.0 }
 0x459   : > { %v2971_v21 = vpop.f32.mrf.mxu2  ;;  %v7017_v63 = vadd.f32 %v3500_v45, %v6657_v20  ;;  %v7020_v61 = vadd.f32 %v3576_v48, %v6671_v49  ;;  %v3142_v53 = vpop.f32.mrf.mxu0  ;;  %v3742_v20 = vld [vmem:[%s7568_s4 + $0x60] sm:$0xff] }
 0x45a   : > { %v2972_v28 = vadd.f32 %v2971_v21, %v6760_v35  ;;  %v3231_v36 = vpop.f32.mrf.mxu1  ;;  %v3143_v41 = vadd.f32 %v3142_v53, %v3054_v25  ;;  %3749 = vmatpush.msrb.mxu3 %v3742_v20  ;;  %3900 = vmatpush.msrb.mxu2 %v3742_v20 }
 0x45c   : > { %v3061_v52 = vadd.f32 %v3060_v24, %v2972_v28  ;;  %v3232_v11 = vadd.f32 %v3231_v36, %v3143_v41  ;;  %3181 = vmatmul.bf16.gmra.mxu0 %v6648_v47  ;;  %3102 = vmatmul.bf16.gmra.mxu3 %v6675_v18  ;;  %v5495_v36 = vld [vmem:[%s5633_s16 + $0x70] sm:$0xff] }
 0x45d   : > { %3270 = vmatmul.bf16.gmra.mxu1 %v6675_v18 }
 0x45e   : > { %3013 = vmatmul.bf16.gmra.mxu2 %v5494_v5  ;;  %v3501_v47 = vrot.slane %v3232_v11, 1 }
 0x45f   : > { %v3063_v35 = vpop.f32.mrf.mxu3 }
 0x461   : > { %v2974_v49 = vpop.f32.mrf.mxu2  ;;  %v3144_v30 = vpop.f32.mrf.mxu0 }
 0x462   : > { %v3233_v25 = vpop.f32.mrf.mxu1  ;;  %v3145_v17 = vadd.f32 %v3144_v30, %v3056_v16 }
 0x464   : > { %v3234_v33 = vadd.f32 %v3233_v25, %v3145_v17 }
 0x466   : > { %v3502_v60 = vrot.slane %v3234_v33, 1 }
 0x467   : > { %v3065_v10 = vpop.f32.mrf.mxu3 }
 0x468   : > { %v3503_v56 = vsel %vm3494_vm1, %v3501_v47, %v3502_v60  ;;  %v3577_v37 = vsel %vm3494_vm1, %v3502_v60, 0.0 }
 0x469   : > { %v2976_v51 = vpop.f32.mrf.mxu2  ;;  %v7033_v45 = vadd.f32 %v3503_v56, %v6690_v23  ;;  %v7036_v48 = vadd.f32 %v3577_v37, %v6698_v32  ;;  %v3147_v24 = vpop.f32.mrf.mxu0  ;;  %v3741_v23 = vld [vmem:[%s7568_s4 + $0x58] sm:$0xff] }
 0x46a   : > { %v2977_v21 = vadd.f32 %v2976_v51, %v6793_v4  ;;  %v3236_v16 = vpop.f32.mrf.mxu1  ;;  %v3148_v28 = vadd.f32 %v3147_v24, %v3059_v40  ;;  %3750 = vmatpush.msrb.mxu3 %v3741_v23  ;;  %3901 = vmatpush.msrb.mxu2 %v3741_v23 }
 0x46c   : > { %v3237_v53 = vadd.f32 %v3236_v16, %v3148_v28  ;;  %3186 = vmatmul.bf16.gmra.mxu0 %v6675_v18  ;;  %3107 = vmatmul.bf16.gmra.mxu3 %v6702_v31  ;;  %v2975_v18 = vadd.f32 %v2974_v49, %v6774_v57 }
 0x46d   : > { %3275 = vmatmul.bf16.gmra.mxu1 %v6702_v31 }
 0x46e   : > { %3018 = vmatmul.bf16.gmra.mxu2 %v5495_v36  ;;  %v3504_v30 = vrot.slane %v3237_v53, 1  ;;  %v3064_v17 = vadd.f32 %v3063_v35, %v2975_v18  ;;  %v5496_v35 = vld [vmem:[%s5633_s16 + $0x78] sm:$0xff] }
 0x46f   : > { %v3068_v4 = vpop.f32.mrf.mxu3 }
 0x471   : > { %v2979_v32 = vpop.f32.mrf.mxu2  ;;  %v3149_v40 = vpop.f32.mrf.mxu0 }
 0x472   : > { %v2980_v41 = vadd.f32 %v2979_v32, %v6801_v46  ;;  %v3238_v11 = vpop.f32.mrf.mxu1  ;;  %v3150_v5 = vadd.f32 %v3149_v40, %v3061_v52 }
 0x474   : > { %v3239_v20 = vadd.f32 %v3238_v11, %v3150_v5  ;;  %v3069_v18 = vadd.f32 %v3068_v4, %v2980_v41 }
 0x476   : > { %v3505_v25 = vrot.slane %v3239_v20, 1 }
 0x477   : > { %v3070_v56 = vpop.f32.mrf.mxu3 }
 0x478   : > { %v3506_v33 = vsel %vm3494_vm1, %v3504_v30, %v3505_v25  ;;  %v3578_v47 = vsel %vm3494_vm1, %v3505_v25, 0.0 }
 0x479   : > { %v2981_v60 = vpop.f32.mrf.mxu2  ;;  %v7051_v37 = vadd.f32 %v3506_v33, %v6711_v55  ;;  %v7054_v46 = vadd.f32 %v3578_v47, %v6725_v19  ;;  %v3152_v57 = vpop.f32.mrf.mxu0  ;;  %v3740_v55 = vld [vmem:[%s7568_s4 + $0x50] sm:$0xff]  ;;  %v3066_v19 = vadd.f32 %v3065_v10, %v2977_v21 }
 0x47a   : > { %v2982_v52 = vadd.f32 %v2981_v60, %v6811_v6  ;;  %v3241_v49 = vpop.f32.mrf.mxu1  ;;  %v3153_v51 = vadd.f32 %v3152_v57, %v3064_v17  ;;  %3751 = vmatpush.msrb.mxu3 %v3740_v55  ;;  %3902 = vmatpush.msrb.mxu2 %v3740_v55 }
 0x47c   : > { %v3071_v24 = vadd.f32 %v3070_v56, %v2982_v52  ;;  %v3242_v16 = vadd.f32 %v3241_v49, %v3153_v51  ;;  %3191 = vmatmul.bf16.gmra.mxu0 %v6702_v31  ;;  %3112 = vmatmul.bf16.gmra.mxu3 %v6729_v13 }
 0x47d   : > { %3280 = vmatmul.bf16.gmra.mxu1 %v6729_v13 }
 0x47e   : > { %3023 = vmatmul.bf16.gmra.mxu2 %v5496_v35  ;;  %v3507_v11 = vrot.slane %v3242_v16, 1 }
 0x47f   : > { %v3073_v28 = vpop.f32.mrf.mxu3 }
 0x481   : > { %v2984_v6 = vpop.f32.mrf.mxu2  ;;  %v3154_v36 = vpop.f32.mrf.mxu0 }
 0x482   : > { %v2985_v53 = vadd.f32 %v2984_v6, %v6819_v50  ;;  %v3243_v23 = vpop.f32.mrf.mxu1  ;;  %v3155_v31 = vadd.f32 %v3154_v36, %v3066_v19 }
 0x484   : > { %v3074_v32 = vadd.f32 %v3073_v28, %v2985_v53  ;;  %v3244_v40 = vadd.f32 %v3243_v23, %v3155_v31 }
 0x486   : > { %v3508_v5 = vrot.slane %v3244_v40, 1 }
 0x487   : > { %v3075_v17 = vpop.f32.mrf.mxu3 }
 0x488   : > { %v3509_v20 = vsel %vm3494_vm1, %v3507_v11, %v3508_v5  ;;  %v3579_v30 = vsel %vm3494_vm1, %v3508_v5, 0.0  ;;  %v3738_v5 = vld [vmem:[%s7568_s4 + $0x40] sm:$0xff] }
 0x489   : > { %v2986_v25 = vpop.f32.mrf.mxu2  ;;  %v7068_v10 = vadd.f32 %v3509_v20, %v6744_v38  ;;  %v7071_v21 = vadd.f32 %v3579_v30, %v6752_v3  ;;  %v3157_v33 = vpop.f32.mrf.mxu0  ;;  %v3739_v38 = vld [vmem:[%s7568_s4 + $0x48] sm:$0xff] }
 0x48a   : > { %v2987_v50 = vadd.f32 %v2986_v25, %v6829_v1  ;;  %v3246_v47 = vpop.f32.mrf.mxu1  ;;  %v3158_v60 = vadd.f32 %v3157_v33, %v3069_v18  ;;  %3752 = vmatpush.msrb.mxu3 %v3739_v38  ;;  %3903 = vmatpush.msrb.mxu2 %v3739_v38 }
 0x48c   : > { %v3076_v56 = vadd.f32 %v3075_v17, %v2987_v50  ;;  %v3247_v52 = vadd.f32 %v3246_v47, %v3158_v60  ;;  %3196 = vmatmul.bf16.gmra.mxu0 %v6729_v13  ;;  %3117 = vmatmul.bf16.gmra.mxu3 %v6756_v0 }
 0x48d   : > { %3285 = vmatmul.bf16.gmra.mxu1 %v6756_v0  ;;  %3753 = vmatpush.msrb.mxu3 %v3738_v5 }
 0x48e   : > { %3028 = vmatmul.bf16.gmra.mxu2 %v6127_v14  ;;  %v3510_v16 = vrot.slane %v3247_v52, 1 }
 0x48f   : > { %v3078_v1 = vpop.f32.mrf.mxu3  ;;  %3904 = vmatpush.msrb.mxu2 %v3738_v5 }
 0x491   : > { %v2989_v3 = vpop.f32.mrf.mxu2  ;;  %v3159_v41 = vpop.f32.mrf.mxu0 }
 0x492   : > { %v2990_v4 = vadd.f32 %v2989_v3, %v6837_v2  ;;  %v3248_v57 = vpop.f32.mrf.mxu1  ;;  %v3160_v49 = vadd.f32 %v3159_v41, %v3071_v24 }
 0x494   : > { %v3079_v13 = vadd.f32 %v3078_v1, %v2990_v4  ;;  %v3249_v51 = vadd.f32 %v3248_v57, %v3160_v49  ;;  %v3737_v57 = vld [vmem:[%s7568_s4 + $0x38] sm:$0xff]  ;;  %v7738_v49 = vld [vmem:[#allocation9_spill] sm:$0xff] }
 0x495   : > { %3754 = vmatpush.msrb.mxu3 %v3737_v57  ;;  %3905 = vmatpush.msrb.mxu2 %v3737_v57  ;;  %v7742_v57 = vld [vmem:[#allocation6_spill] sm:$0xff] }
 0x496   : > { %v3511_v35 = vrot.slane %v3249_v51, 1 }
 0x497   : > { %v3080_v28 = vpop.f32.mrf.mxu3 }
 0x498   : > { %v3512_v55 = vsel %vm3494_vm1, %v3510_v16, %v3511_v35  ;;  %v3580_v19 = vsel %vm3494_vm1, %v3511_v35, 0.0 }
 0x499   : > { %v2991_v6 = vpop.f32.mrf.mxu2  ;;  %v7085_v53 = vadd.f32 %v3512_v55, %v6765_v27  ;;  %v7088_v36 = vadd.f32 %v3580_v19, %v6779_v8  ;;  %v3162_v23 = vpop.f32.mrf.mxu0 }
 0x49a   : > { %v2992_v2 = vadd.f32 %v2991_v6, %v6847_v29  ;;  %v3251_v24 = vpop.f32.mrf.mxu1  ;;  %v3163_v31 = vadd.f32 %v3162_v23, %v3074_v32  ;;  %v7739_v23 = vld [vmem:[#allocation4_spill] sm:$0xff] }
 0x49c   : > { %v3081_v40 = vadd.f32 %v3080_v28, %v2992_v2  ;;  %v3252_v11 = vadd.f32 %v3251_v24, %v3163_v31  ;;  %3201 = vmatmul.bf16.gmra.mxu0 %v6756_v0  ;;  %v7740_v31 = vld [vmem:[#allocation5_spill] sm:$0xff] }
 0x49d   : > { %3290 = vmatmul.bf16.gmra.mxu1 %v6783_v15 }
 0x49e   : > { %v3513_v17 = vrot.slane %v3252_v11, 1 }
 0x49f   : > { %v3083_v8 = vpop.f32.mrf.mxu3 }
 0x4a1   : > { %v2994_v27 = vpop.f32.mrf.mxu2  ;;  %v3164_v29 = vpop.f32.mrf.mxu0 }
 0x4a2   : > { %v2995_v18 = vadd.f32 %v2994_v27, %v6855_v34  ;;  %v3253_v20 = vpop.f32.mrf.mxu1  ;;  %v3165_v30 = vadd.f32 %v3164_v29, %v3076_v56 }
 0x4a4   : > { %v3084_v32 = vadd.f32 %v3083_v8, %v2995_v18  ;;  %v3254_v25 = vadd.f32 %v3253_v20, %v3165_v30  ;;  %v3736_v20 = vld [vmem:[%s7568_s4 + $0x30] sm:$0xff] }
 0x4a5   : > { %3755 = vmatpush.msrb.mxu3 %v3736_v20  ;;  %3906 = vmatpush.msrb.mxu2 %v3736_v20 }
 0x4a6   : > { %v3514_v50 = vrot.slane %v3254_v25, 1 }
 0x4a7   : > { %v3085_v60 = vpop.f32.mrf.mxu3 }
 0x4a8   : > { %v3515_v0 = vsel %vm3494_vm1, %v3513_v17, %v3514_v50  ;;  %v3581_v33 = vsel %vm3494_vm1, %v3514_v50, 0.0  ;;  %v7741_v17 = vld [vmem:[#allocation30_spill] sm:$0xff] }
 0x4a9   : > { %v2996_v47 = vpop.f32.mrf.mxu2  ;;  %v7100_v52 = vadd.f32 %v3515_v0, %v6798_v39  ;;  %v7103_v38 = vadd.f32 %v3581_v33, %v6806_v54  ;;  %v3167_v3 = vpop.f32.mrf.mxu0 }
 0x4aa   : > { %v2997_v34 = vadd.f32 %v2996_v47, %v6865_v7  ;;  %v3256_v56 = vpop.f32.mrf.mxu1  ;;  %v3168_v1 = vadd.f32 %v3167_v3, %v3079_v13 }
 0x4ac   : > { %v3086_v4 = vadd.f32 %v3085_v60, %v2997_v34  ;;  %v3257_v41 = vadd.f32 %v3256_v56, %v3168_v1  ;;  %3206 = vmatmul.bf16.gmra.mxu0 %v6783_v15 }
 0x4ad   : > { %3295 = vmatmul.bf16.gmra.mxu1 %v6127_v14 }
 0x4ae   : > { %v3516_v19 = vrot.slane %v3257_v41, 1 }
 0x4af   : > { %v3088_v54 = vpop.f32.mrf.mxu3 }
 0x4b1   : > { %v2999_v39 = vpop.f32.mrf.mxu2  ;;  %v3169_v7 = vpop.f32.mrf.mxu0 }
 0x4b2   : > { %v3000_v51 = vadd.f32 %v2999_v39, %v7738_v49  ;;  %v3258_v16 = vpop.f32.mrf.mxu1  ;;  %v3170_v35 = vadd.f32 %v3169_v7, %v3081_v40 }
 0x4b4   : > { %v3089_v13 = vadd.f32 %v3088_v54, %v3000_v51  ;;  %v3259_v55 = vadd.f32 %v3258_v16, %v3170_v35  ;;  %v7743_v54 = vld [vmem:[#allocation7_spill] sm:$0xff]  ;;  %v3735_v35 = vld [vmem:[%s7568_s4 + $0x28] sm:$0xff] }
 0x4b5   : > { %3756 = vmatpush.msrb.mxu3 %v3735_v35  ;;  %3907 = vmatpush.msrb.mxu2 %v3735_v35 }
 0x4b6   : > { %v3517_v6 = vrot.slane %v3259_v55, 1 }
 0x4b7   : > { %v3090_v2 = vpop.f32.mrf.mxu3 }
 0x4b8   : > { %v3518_v15 = vsel %vm3494_vm1, %v3516_v19, %v3517_v6  ;;  %v3582_v14 = vsel %vm3494_vm1, %v3517_v6, 0.0 }
 0x4b9   : > { %v3001_v28 = vpop.f32.mrf.mxu2  ;;  %v7115_v24 = vadd.f32 %v3518_v15, %v7739_v23  ;;  %v7118_v11 = vadd.f32 %v3582_v14, %v7740_v31  ;;  %v3172_v27 = vpop.f32.mrf.mxu0 }
 0x4ba   : > { %v3002_v5 = vadd.f32 %v3001_v28, %v6883_v58  ;;  %v3261_v40 = vpop.f32.mrf.mxu1  ;;  %v3173_v8 = vadd.f32 %v3172_v27, %v3084_v32  ;;  %v7744_v27 = vld [vmem:[#allocation27_spill] sm:$0xff] }
 0x4bc   : > { %v3091_v18 = vadd.f32 %v3090_v2, %v3002_v5  ;;  %v3262_v29 = vadd.f32 %v3261_v40, %v3173_v8  ;;  %v7745_v8 = vld [vmem:[#allocation8_spill] sm:$0xff] }
 0x4be   : > { %v3519_v34 = vrot.slane %v3262_v29, 1 }
 0x4bf   : > { %v3093_v25 = vpop.f32.mrf.mxu3 }
 0x4c1   : > { %v3004_v30 = vpop.f32.mrf.mxu2  ;;  %v3174_v0 = vpop.f32.mrf.mxu0 }
 0x4c2   : > { %v3005_v50 = vadd.f32 %v3004_v30, %v7741_v17  ;;  %v3263_v33 = vpop.f32.mrf.mxu1  ;;  %v3175_v47 = vadd.f32 %v3174_v0, %v3086_v4  ;;  %v7746_v17 = vld [vmem:[#allocation11_spill] sm:$0xff] }
 0x4c4   : > { %v3094_v60 = vadd.f32 %v3093_v25, %v3005_v50  ;;  %v3264_v58 = vadd.f32 %v3263_v33, %v3175_v47  ;;  %v3734_v33 = vld [vmem:[%s7568_s4 + $0x20] sm:$0xff] }
 0x4c5   : > { %3757 = vmatpush.msrb.mxu3 %v3734_v33  ;;  %3908 = vmatpush.msrb.mxu2 %v3734_v33 }
 0x4c6   : > { %v3520_v3 = vrot.slane %v3264_v58, 1 }
 0x4c7   : > { %v3095_v41 = vpop.f32.mrf.mxu3 }
 0x4c8   : > { %v3521_v32 = vsel %vm3494_vm1, %v3519_v34, %v3520_v3  ;;  %v3583_v56 = vsel %vm3494_vm1, %v3520_v3, 0.0 }
 0x4c9   : > { %v3006_v1 = vpop.f32.mrf.mxu2  ;;  %v7128_v39 = vadd.f32 %v3521_v32, %v7742_v57  ;;  %v7131_v49 = vadd.f32 %v3583_v56, %v7743_v54  ;;  %v3177_v51 = vpop.f32.mrf.mxu0  ;;  %v3693_v57 = vadd.f32 %v7003_v42, %v7000_v59 }
 0x4ca   : > { %v3266_v7 = vpop.f32.mrf.mxu1  ;;  %v3178_v16 = vadd.f32 %v3177_v51, %v3089_v13  ;;  %v3007_v50 = vadd.f32 %v3006_v1, %v7746_v17 }
 0x4cb   : > { %v3694_v51 = vadd.f32 %v3693_v57, %v7017_v63 }
 0x4cc   : > { %v3267_v4 = vadd.f32 %v3266_v7, %v3178_v16  ;;  %v3096_v47 = vadd.f32 %v3095_v41, %v3007_v50  ;;  %v7747_v7 = vld [vmem:[#allocation12_spill] sm:$0xff]  ;;  %v7748_v41 = vld [vmem:[#allocation3_spill] sm:$0xff] }
 0x4ce   : > { %v3522_v2 = vrot.slane %v3267_v4, 1 }
 0x4cf   : > { %v3098_v15 = vpop.f32.mrf.mxu3 }
 0x4d1   : > { %v3009_v55 = vpop.f32.mrf.mxu2  ;;  %v3179_v19 = vpop.f32.mrf.mxu0 }
 0x4d2   : > { %v3268_v6 = vpop.f32.mrf.mxu1  ;;  %v3180_v14 = vadd.f32 %v3179_v19, %v3091_v18  ;;  %v3010_v16 = vadd.f32 %v3009_v55, %v7747_v7 }
 0x4d4   : > { %v3269_v28 = vadd.f32 %v3268_v6, %v3180_v14  ;;  %v7749_v6 = vld [vmem:[#allocation24_spill] sm:$0xff] }
 0x4d6   : > { %v3523_v23 = vrot.slane %v3269_v28, 1 }
 0x4d7   : > { %v3100_v18 = vpop.f32.mrf.mxu3 }
 0x4d8   : > { %v3524_v31 = vsel %vm3494_vm1, %v3522_v2, %v3523_v23  ;;  %v3584_v5 = vsel %vm3494_vm1, %v3523_v23, 0.0  ;;  %v3695_v23 = vadd.f32 %v3694_v51, %v7020_v61  ;;  %v7751_v51 = vld [vmem:[#allocation10_spill] sm:$0xff] }
 0x4d9   : > { %v3011_v13 = vpop.f32.mrf.mxu2  ;;  %v7139_v40 = vadd.f32 %v3524_v31, %v7744_v27  ;;  %v7142_v29 = vadd.f32 %v3584_v5, %v7745_v8  ;;  %v3182_v20 = vpop.f32.mrf.mxu0  ;;  %v3099_v31 = vadd.f32 %v3098_v15, %v3010_v16  ;;  %v7752_v16 = vld [vmem:[#allocation25_spill] sm:$0xff] }
 0x4da   : > { %v3271_v30 = vpop.f32.mrf.mxu1  ;;  %v3183_v25 = vadd.f32 %v3182_v20, %v3094_v60  ;;  %v3012_v5 = vadd.f32 %v3011_v13, %v6919_v22  ;;  %v3696_v55 = vadd.f32 %v3695_v23, %v7033_v45  ;;  %v3733_v20 = vld [vmem:[%s7568_s4 + $0x18] sm:$0xff] }
 0x4db   : > { %3758 = vmatpush.msrb.mxu3 %v3733_v20  ;;  %3909 = vmatpush.msrb.mxu2 %v3733_v20 }
 0x4dc   : > { %v3272_v0 = vadd.f32 %v3271_v30, %v3183_v25  ;;  %v3101_v30 = vadd.f32 %v3100_v18, %v3012_v5  ;;  %v3697_v17 = vadd.f32 %v3696_v55, %v7036_v48 }
 0x4de   : > { %v3525_v60 = vrot.slane %v3272_v0, 1  ;;  %v3698_v22 = vadd.f32 %v3697_v17, %v7051_v37 }
 0x4df   : > { %v3103_v54 = vpop.f32.mrf.mxu3 }
 0x4e1   : > { %v3184_v58 = vpop.f32.mrf.mxu0  ;;  %v3014_v3 = vpop.f32.mrf.mxu2 }
 0x4e2   : > { %v3273_v34 = vpop.f32.mrf.mxu1  ;;  %v3185_v32 = vadd.f32 %v3184_v58, %v3096_v47 }
 0x4e4   : > { %v3274_v56 = vadd.f32 %v3273_v34, %v3185_v32  ;;  %v3699_v32 = vadd.f32 %v3698_v22, %v7054_v46 }
 0x4e6   : > { %v3526_v1 = vrot.slane %v3274_v56, 1  ;;  %v7750_v56 = vld [vmem:[#allocation14_spill] sm:$0xff] }
 0x4e7   : > { %v3105_v25 = vpop.f32.mrf.mxu3  ;;  %v3015_v57 = vadd.f32 %v3014_v3, %v7750_v56  ;;  %v7754_v56 = vld [vmem:[#allocation26_spill] sm:$0xff] }
 0x4e8   : > { %v3527_v4 = vsel %vm3494_vm1, %v3525_v60, %v3526_v1  ;;  %v3585_v35 = vsel %vm3494_vm1, %v3526_v1, 0.0  ;;  %v3700_v1 = vadd.f32 %v3699_v32, %v7068_v10 }
 0x4e9   : > { %v7155_v19 = vadd.f32 %v3527_v4, %v7748_v41  ;;  %v7158_v14 = vadd.f32 %v3585_v35, %v7749_v6  ;;  %v3187_v28 = vpop.f32.mrf.mxu0  ;;  %v3016_v27 = vpop.f32.mrf.mxu2 }
 0x4ea   : > { %v3276_v2 = vpop.f32.mrf.mxu1  ;;  %v3188_v8 = vadd.f32 %v3187_v28, %v3099_v31  ;;  %v3104_v28 = vadd.f32 %v3103_v54, %v3015_v57  ;;  %v3701_v3 = vadd.f32 %v3700_v1, %v7071_v21  ;;  %v3732_v31 = vld [vmem:[%s7568_s4 + $0x10] sm:$0xff] }
 0x4eb   : > { %3759 = vmatpush.msrb.mxu3 %v3732_v31  ;;  %3910 = vmatpush.msrb.mxu2 %v3732_v31 }
 0x4ec   : > { %v3277_v33 = vadd.f32 %v3276_v2, %v3188_v8  ;;  %v3017_v2 = vadd.f32 %v3016_v27, %v6937_v43  ;;  %v3702_v5 = vadd.f32 %v3701_v3, %v7085_v53 }
 0x4ee   : > { %v3528_v47 = vrot.slane %v3277_v33, 1  ;;  %v3106_v55 = vadd.f32 %v3105_v25, %v3017_v2  ;;  %v3703_v54 = vadd.f32 %v3702_v5, %v7088_v36 }
 0x4ef   : > { %v3108_v6 = vpop.f32.mrf.mxu3 }
 0x4f1   : > { %v3189_v50 = vpop.f32.mrf.mxu0  ;;  %v3019_v58 = vpop.f32.mrf.mxu2 }
 0x4f2   : > { %v3278_v0 = vpop.f32.mrf.mxu1  ;;  %v3190_v15 = vadd.f32 %v3189_v50, %v3101_v30  ;;  %v3020_v22 = vadd.f32 %v3019_v58, %v6945_v9 }
 0x4f4   : > { %v3279_v13 = vadd.f32 %v3278_v0, %v3190_v15  ;;  %v3704_v0 = vadd.f32 %v3703_v54, %v7100_v52 }
 0x4f6   : > { %v3529_v34 = vrot.slane %v3279_v13, 1  ;;  %v3705_v25 = vadd.f32 %v3704_v0, %v7103_v38  ;;  %v7755_v0 = vld [vmem:[#allocation13_spill] sm:$0xff] }
 0x4f7   : > { %v3110_v43 = vpop.f32.mrf.mxu3 }
 0x4f8   : > { %v3530_v60 = vsel %vm3494_vm1, %v3528_v47, %v3529_v34  ;;  %v3586_v18 = vsel %vm3494_vm1, %v3529_v34, 0.0  ;;  %v7753_v34 = vld [vmem:[#allocation31_spill] sm:$0xff] }
 0x4f9   : > { %v7174_v7 = vadd.f32 %v3530_v60, %v7751_v51  ;;  %v7177_v4 = vadd.f32 %v3586_v18, %v7752_v16  ;;  %v3192_v35 = vpop.f32.mrf.mxu0  ;;  %v3021_v8 = vpop.f32.mrf.mxu2  ;;  %v3706_v51 = vadd.f32 %v3705_v25, %v7115_v24  ;;  %v3109_v16 = vadd.f32 %v3108_v6, %v3020_v22 }
 0x4fa   : > { %v3281_v41 = vpop.f32.mrf.mxu1  ;;  %v3193_v23 = vadd.f32 %v3192_v35, %v3104_v28  ;;  %v3022_v9 = vadd.f32 %v3021_v8, %v6955_v62 }
 0x4fb   : > { %v3707_v28 = vadd.f32 %v3706_v51, %v7118_v11 }
 0x4fc   : > { %v3282_v17 = vadd.f32 %v3281_v41, %v3193_v23  ;;  %v3731_v41 = vld [vmem:[%s7568_s4 + $0x8] sm:$0xff]  ;;  %v3111_v2 = vadd.f32 %v3110_v43, %v3022_v9 }
 0x4fd   : > { %3760 = vmatpush.msrb.mxu3 %v3731_v41  ;;  %3911 = vmatpush.msrb.mxu2 %v3731_v41  ;;  %v3708_v3 = vadd.f32 %v3707_v28, %v7128_v39 }
 0x4fe   : > { %v3531_v33 = vrot.slane %v3282_v17, 1 }
 0x4ff   : > { %v3113_v58 = vpop.f32.mrf.mxu3  ;;  %v3709_v62 = vadd.f32 %v3708_v3, %v7131_v49 }
 0x501   : > { %v3194_v20 = vpop.f32.mrf.mxu0  ;;  %v3024_v1 = vpop.f32.mrf.mxu2  ;;  %v3710_v17 = vadd.f32 %v3709_v62, %v7139_v40 }
 0x502   : > { %v3283_v30 = vpop.f32.mrf.mxu1  ;;  %v3195_v50 = vadd.f32 %v3194_v20, %v3106_v55 }
 0x503   : > { %v3711_v25 = vadd.f32 %v3710_v17, %v7142_v29 }
 0x504   : > { %v3284_v27 = vadd.f32 %v3283_v30, %v3195_v50  ;;  %v3025_v50 = vadd.f32 %v3024_v1, %v6963_v12 }
 0x505   : > { %v3712_v12 = vadd.f32 %v3711_v25, %v7155_v19 }
 0x506   : > { %v3532_v15 = vrot.slane %v3284_v27, 1 }
 0x507   : > { %v3115_v54 = vpop.f32.mrf.mxu3  ;;  %v3713_v51 = vadd.f32 %v3712_v12, %v7158_v14 }
 0x508   : > { %v3533_v13 = vsel %vm3494_vm1, %v3531_v33, %v3532_v15  ;;  %v3587_v47 = vsel %vm3494_vm1, %v3532_v15, 0.0  ;;  %v7756_v15 = vld [vmem:[#allocation34_spill] sm:$0xff] }
 0x509   : > { %v7192_v32 = vadd.f32 %v3533_v13, %v7753_v34  ;;  %v7195_v57 = vadd.f32 %v3587_v47, %v7754_v56  ;;  %v3197_v60 = vpop.f32.mrf.mxu0  ;;  %v3026_v6 = vpop.f32.mrf.mxu2  ;;  %v3114_v34 = vadd.f32 %v3113_v58, %v3025_v50  ;;  %v3714_v28 = vadd.f32 %v3713_v51, %v7174_v7  ;;  %v7759_v50 = vld [vmem:[#allocation15_spill] sm:$0xff] }
 0x50a   : > { %v3286_v18 = vpop.f32.mrf.mxu1  ;;  %v3198_v35 = vadd.f32 %v3197_v60, %v3109_v16  ;;  %v3027_v56 = vadd.f32 %v3026_v6, %v6973_v26  ;;  %v3730_v26 = vld [vmem:[%s7568_s4] sm:$0xff] }
 0x50b   : > { %v3715_v58 = vadd.f32 %v3714_v28, %v7177_v4  ;;  %3761 = vmatpush.msrb.mxu3 %v3730_v26  ;;  %3912 = vmatpush.msrb.mxu2 %v3730_v26 }
 0x50c   : > { %v3287_v5 = vadd.f32 %v3286_v18, %v3198_v35  ;;  %v3116_v1 = vadd.f32 %v3115_v54, %v3027_v56  ;;  %v3768_v56 = vld [vmem:[%s7569_s5 + $0x8] sm:$0xff] }
 0x50e   : > { %v3534_v8 = vrot.slane %v3287_v5, 1  ;;  %v7757_v5 = vld [vmem:[#allocation29_spill] sm:$0xff] }
 0x511   : > { %v3199_v23 = vpop.f32.mrf.mxu0  ;;  %v3029_v60 = vpop.f32.mrf.mxu2 }
 0x512   : > { %v3288_v31 = vpop.f32.mrf.mxu1  ;;  %v3200_v55 = vadd.f32 %v3199_v23, %v3111_v2  ;;  %v3118_v2 = vpop.f32.mrf.mxu3 }
 0x514   : > { %v3289_v20 = vadd.f32 %v3288_v31, %v3200_v55  ;;  %v3030_v55 = vadd.f32 %v3029_v60, %v7757_v5  ;;  %v7761_v5 = vld [vmem:[#allocation16_spill] sm:$0xff] }
 0x516   : > { %v3535_v30 = vrot.slane %v3289_v20, 1 }
 0x518   : > { %v3536_v27 = vsel %vm3494_vm1, %v3534_v8, %v3535_v30  ;;  %v3588_v43 = vsel %vm3494_vm1, %v3535_v30, 0.0  ;;  %v3716_v8 = vadd.f32 %v3715_v58, %v7192_v32  ;;  %v7758_v30 = vld [vmem:[#allocation28_spill] sm:$0xff]  ;;  %v7760_v58 = vld [vmem:[#allocation35_spill] sm:$0xff] }
 0x519   : > { %v7210_v33 = vadd.f32 %v3536_v27, %v7755_v0  ;;  %v7213_v22 = vadd.f32 %v3588_v43, %v7756_v15  ;;  %v3202_v13 = vpop.f32.mrf.mxu0  ;;  %v3031_v6 = vpop.f32.mrf.mxu2  ;;  %v3770_v0 = vld [vmem:[%s7569_s5 + $0x18] sm:$0xff]  ;;  %v3769_v15 = vld [vmem:[%s7569_s5 + $0x10] sm:$0xff] }
 0x51a   : > { %v3291_v47 = vpop.f32.mrf.mxu1  ;;  %v3203_v18 = vadd.f32 %v3202_v13, %v3114_v34  ;;  %v3119_v13 = vadd.f32 %v3118_v2, %v3030_v55  ;;  %3787 = vmatpush.msra.mxu3 %v3770_v0  ;;  %v3717_v25 = vadd.f32 %v3716_v8, %v7195_v57  ;;  %v3120_v34 = vpop.f32.mrf.mxu3 }
 0x51c   : > { %v3292_v35 = vadd.f32 %v3291_v47, %v3203_v18  ;;  %v3032_v47 = vadd.f32 %v3031_v6, %v6986_v44  ;;  %3788 = vmatpush.msra.mxu3 %v3769_v15  ;;  %v3718_v60 = vadd.f32 %v3717_v25, %v7210_v33 }
 0x51e   : > { %v3537_v23 = vrot.slane %v3292_v35, 1  ;;  %v3121_v18 = vadd.f32 %v3120_v34, %v3032_v47  ;;  %3789 = vmatpush.msra.mxu3 %v3768_v56 }
 0x521   : > { %v3204_v16 = vpop.f32.mrf.mxu0 }
 0x522   : > { %v3293_v9 = vpop.f32.mrf.mxu1  ;;  %v3205_v41 = vadd.f32 %v3204_v16, %v3116_v1 }
 0x524   : > { %v3294_v3 = vadd.f32 %v3293_v9, %v3205_v41  ;;  %v3719_v9 = vadd.f32 %v3718_v60, %v7213_v22 }
 0x526   : > { %v3538_v31 = vrot.slane %v3294_v3, 1 }
 0x528   : > { %v3539_v20 = vsel %vm3494_vm1, %v3537_v23, %v3538_v31  ;;  %v3589_v62 = vsel %vm3494_vm1, %v3538_v31, 0.0 }
 0x529   : > { %v7229_v17 = vadd.f32 %v3539_v20, %v7758_v30  ;;  %v7232_v54 = vadd.f32 %v3589_v62, %v7759_v50  ;;  %v3207_v27 = vpop.f32.mrf.mxu0 }
 0x52a   : > { %v3296_v43 = vpop.f32.mrf.mxu1  ;;  %v3208_v12 = vadd.f32 %v3207_v27, %v3119_v13  ;;  %v3767_v13 = vld [vmem:[%s7569_s5] sm:$0xff] }
 0x52b   : > { %v3720_v41 = vadd.f32 %v3719_v9, %v7229_v17  ;;  %3790 = vmatpush.msra.mxu3 %v3767_v13 }
 0x52c   : > { %v3297_v51 = vadd.f32 %v3296_v43, %v3208_v12 }
 0x52d   : > { %v3721_v31 = vadd.f32 %v3720_v41, %v7232_v54 }
 0x52e   : > { %v3540_v28 = vrot.slane %v3297_v51, 1 }
 0x531   : > { %v3209_v1 = vpop.f32.mrf.mxu0 }
 0x532   : > { %v3210_v16 = vadd.f32 %v3209_v1, %v3121_v18  ;;  %v3298_v44 = vpop.f32.mrf.mxu1 }
 0x534   : > { %v3299_v35 = vadd.f32 %v3298_v44, %v3210_v16 }
 0x536   : > { %v3541_v2 = vrot.slane %v3299_v35, 1 }
 0x538   : > { %v3542_v3 = vsel %vm3494_vm1, %v3540_v28, %v3541_v2  ;;  %v3590_v23 = vsel %vm3494_vm1, %v3541_v2, 0.0 }
 0x539   : > { %v7252_v26 = vadd.f32 %v3542_v3, %v7760_v58  ;;  %v7255_v55 = vadd.f32 %v3590_v23, %v7761_v5 }
 0x53b   : > { %v3722_v6 = vadd.f32 %v3721_v31, %v7252_v26 }
 0x53d   : > { %v3723_v20 = vadd.f32 %v3722_v6, %v7255_v55 }
 0x53f   : > { %v3724_v62 = vrot.slane %v3723_v20, 4 }
 0x541   : > { %v3725_v8 = vadd.f32 %v3724_v62, %v3723_v20 }
 0x543   : > { %v3726_v30 = vrot.slane %v3725_v8, 2 }
 0x545   : > { %v3727_v50 = vadd.f32 %v3726_v30, %v3725_v8 }
 0x547   : > { %v3728_v27 = vrot.slane %v3727_v50, 1 }
 0x549   : > { %v3729_v43 = vadd.f32 %v3728_v27, %v3727_v50 }
 0x54b   : > { %3762 = vmatmul.f32.vlgmr.msrb.gmra.mxu3 %v3729_v43 }
 0x54c   : > { %3933 = vmatpush.msrb.mxu3 %v3770_v0 }
 0x54e   : > { %3934 = vmatpush.msrb.mxu3 %v3769_v15 }
 0x550   : > { %3935 = vmatpush.msrb.mxu3 %v3768_v56 }
 0x552   : > { %3936 = vmatpush.msrb.mxu3 %v3767_v13 }
 0x5ce   : > { %v3763_v47 = vpop.f32.mrf.mxu3 }
 0x5cf   : > { %v3766_v25 = vmul.f32 0.0009765625, %v3763_v47 }
 0x5d1   : > { %5129 = vmatmul.msk.f32.vlgmr.msra.gmra.mxu3 %vm3771_vm2, %v3766_v25 }
 0x654   : > { %v3792_v34 = vpop.f32.mrf.mxu3 }
 0x655   : > { %v7263_v12 = vperm.slane %v3792_v34, 0 }
 0x657   : > { %v7267_v60 = vsub.f32 %v7000_v59, %v7263_v12  ;;  %v7271_v18 = vsub.f32 %v7003_v42, %v7263_v12  ;;  %v7275_v0 = vsub.f32 %v7017_v63, %v7263_v12  ;;  %v7283_v1 = vsub.f32 %v7020_v61, %v7263_v12 }
 0x658   : > { %v7287_v59 = vsub.f32 %v7033_v45, %v7263_v12  ;;  %v7293_v63 = vsub.f32 %v7036_v48, %v7263_v12  ;;  %v7299_v61 = vsub.f32 %v7051_v37, %v7263_v12  ;;  %v7305_v35 = vsub.f32 %v7054_v46, %v7263_v12 }
 0x659   : > { %v3828_v15 = vmul.f32 %v7267_v60, %v7267_v60  ;;  %v3829_v56 = vmul.f32 %v7271_v18, %v7271_v18  ;;  %v3830_v42 = vmul.f32 %v7275_v0, %v7275_v0  ;;  %v3831_v16 = vmul.f32 %v7283_v1, %v7283_v1 }
 0x65a   : > { %v3832_v45 = vmul.f32 %v7287_v59, %v7287_v59  ;;  %v3833_v48 = vmul.f32 %v7293_v63, %v7293_v63  ;;  %v7311_v28 = vsub.f32 %v7068_v10, %v7263_v12  ;;  %v3834_v37 = vmul.f32 %v7299_v61, %v7299_v61 }
 0x65b   : > { %v3860_v51 = vadd.f32 %v3829_v56, %v3828_v15  ;;  %v7317_v3 = vsub.f32 %v7071_v21, %v7263_v12  ;;  %v3835_v46 = vmul.f32 %v7305_v35, %v7305_v35  ;;  %v7323_v31 = vsub.f32 %v7085_v53, %v7263_v12 }
 0x65c   : > { %v3836_v10 = vmul.f32 %v7311_v28, %v7311_v28  ;;  %v7329_v5 = vsub.f32 %v7088_v36, %v7263_v12  ;;  %v7335_v20 = vsub.f32 %v7100_v52, %v7263_v12  ;;  %v7341_v8 = vsub.f32 %v7103_v38, %v7263_v12 }
 0x65d   : > { %v3861_v9 = vadd.f32 %v3860_v51, %v3830_v42  ;;  %v3837_v21 = vmul.f32 %v7317_v3, %v7317_v3  ;;  %v3838_v53 = vmul.f32 %v7323_v31, %v7323_v31  ;;  %v7347_v50 = vsub.f32 %v7115_v24, %v7263_v12 }
 0x65e   : > { %v3839_v36 = vmul.f32 %v7329_v5, %v7329_v5  ;;  %v3840_v52 = vmul.f32 %v7335_v20, %v7335_v20  ;;  %v7353_v43 = vsub.f32 %v7118_v11, %v7263_v12  ;;  %v3841_v38 = vmul.f32 %v7341_v8, %v7341_v8 }
 0x65f   : > { %v3862_v44 = vadd.f32 %v3861_v9, %v3831_v16  ;;  %v7359_v47 = vsub.f32 %v7128_v39, %v7263_v12  ;;  %v3842_v24 = vmul.f32 %v7347_v50, %v7347_v50  ;;  %v7365_v34 = vsub.f32 %v7131_v49, %v7263_v12 }
 0x660   : > { %v3843_v11 = vmul.f32 %v7353_v43, %v7353_v43  ;;  %v7371_v56 = vsub.f32 %v7139_v40, %v7263_v12  ;;  %v7377_v51 = vsub.f32 %v7142_v29, %v7263_v12  ;;  %v7383_v9 = vsub.f32 %v7155_v19, %v7263_v12 }
 0x661   : > { %v3863_v41 = vadd.f32 %v3862_v44, %v3832_v45  ;;  %v3844_v39 = vmul.f32 %v7359_v47, %v7359_v47  ;;  %v3845_v49 = vmul.f32 %v7365_v34, %v7365_v34  ;;  %v7389_v44 = vsub.f32 %v7158_v14, %v7263_v12 }
 0x662   : > { %v3846_v40 = vmul.f32 %v7371_v56, %v7371_v56  ;;  %v3847_v29 = vmul.f32 %v7377_v51, %v7377_v51  ;;  %v3848_v19 = vmul.f32 %v7383_v9, %v7383_v9 }
 0x663   : > { %v3864_v2 = vadd.f32 %v3863_v41, %v3833_v48  ;;  %v7395_v41 = vsub.f32 %v7174_v7, %v7263_v12  ;;  %v3849_v14 = vmul.f32 %v7389_v44, %v7389_v44 }
 0x665   : > { %v3865_v23 = vadd.f32 %v3864_v2, %v3834_v37  ;;  %v7401_v2 = vsub.f32 %v7177_v4, %v7263_v12  ;;  %v3850_v7 = vmul.f32 %v7395_v41, %v7395_v41 }
 0x667   : > { %v3866_v58 = vadd.f32 %v3865_v23, %v3835_v46  ;;  %v7407_v23 = vsub.f32 %v7192_v32, %v7263_v12  ;;  %v3851_v4 = vmul.f32 %v7401_v2, %v7401_v2 }
 0x669   : > { %v3867_v6 = vadd.f32 %v3866_v58, %v3836_v10  ;;  %v7413_v58 = vsub.f32 %v7195_v57, %v7263_v12  ;;  %v3852_v32 = vmul.f32 %v7407_v23, %v7407_v23 }
 0x66b   : > { %v3868_v62 = vadd.f32 %v3867_v6, %v3837_v21  ;;  %v7419_v6 = vsub.f32 %v7210_v33, %v7263_v12  ;;  %v3853_v57 = vmul.f32 %v7413_v58, %v7413_v58 }
 0x66d   : > { %v3869_v30 = vadd.f32 %v3868_v62, %v3838_v53  ;;  %v7425_v62 = vsub.f32 %v7213_v22, %v7263_v12  ;;  %v3854_v33 = vmul.f32 %v7419_v6, %v7419_v6 }
 0x66f   : > { %v3870_v27 = vadd.f32 %v3869_v30, %v3839_v36  ;;  %v7431_v30 = vsub.f32 %v7229_v17, %v7263_v12  ;;  %v3855_v22 = vmul.f32 %v7425_v62, %v7425_v62 }
 0x671   : > { %v3871_v13 = vadd.f32 %v3870_v27, %v3840_v52  ;;  %v7437_v27 = vsub.f32 %v7232_v54, %v7263_v12  ;;  %v3856_v17 = vmul.f32 %v7431_v30, %v7431_v30 }
 0x673   : > { %v3872_v25 = vadd.f32 %v3871_v13, %v3841_v38  ;;  %v7443_v13 = vsub.f32 %v7252_v26, %v7263_v12  ;;  %v3857_v54 = vmul.f32 %v7437_v27, %v7437_v27 }
 0x675   : > { %v3873_v15 = vadd.f32 %v3872_v25, %v3842_v24  ;;  %v7449_v25 = vsub.f32 %v7255_v55, %v7263_v12 }
 0x677   : > { %v3874_v42 = vadd.f32 %v3873_v15, %v3843_v11  ;;  %v3858_v15 = vmul.f32 %v7443_v13, %v7443_v13  ;;  %v3859_v26 = vmul.f32 %v7449_v25, %v7449_v25 }
 0x679   : > { %v3875_v16 = vadd.f32 %v3874_v42, %v3844_v39 }
 0x67b   : > { %v3876_v45 = vadd.f32 %v3875_v16, %v3845_v49 }
 0x67d   : > { %v3877_v48 = vadd.f32 %v3876_v45, %v3846_v40 }
 0x67f   : > { %v3878_v37 = vadd.f32 %v3877_v48, %v3847_v29 }
 0x681   : > { %v3879_v46 = vadd.f32 %v3878_v37, %v3848_v19 }
 0x683   : > { %v3880_v10 = vadd.f32 %v3879_v46, %v3849_v14 }
 0x685   : > { %v3881_v21 = vadd.f32 %v3880_v10, %v3850_v7 }
 0x687   : > { %v3882_v53 = vadd.f32 %v3881_v21, %v3851_v4 }
 0x689   : > { %v3883_v36 = vadd.f32 %v3882_v53, %v3852_v32 }
 0x68b   : > { %v3884_v52 = vadd.f32 %v3883_v36, %v3853_v57  ;;  %v3951_v57 = vld [vmem:[%s7566_s2] sm:$0x1] }
 0x68d   : > { %v3885_v38 = vadd.f32 %v3884_v52, %v3854_v33 }
 0x68f   : > { %v3886_v24 = vadd.f32 %v3885_v38, %v3855_v22 }
 0x691   : > { %v3887_v11 = vadd.f32 %v3886_v24, %v3856_v17 }
 0x693   : > { %v3888_v39 = vadd.f32 %v3887_v11, %v3857_v54 }
 0x695   : > { %v3889_v42 = vadd.f32 %v3888_v39, %v3858_v15 }
 0x697   : > { %v3890_v49 = vadd.f32 %v3889_v42, %v3859_v26 }
 0x699   : > { %v3891_v16 = vrot.slane %v3890_v49, 4 }
 0x69b   : > { %v3892_v40 = vadd.f32 %v3891_v16, %v3890_v49 }
 0x69d   : > { %v3893_v45 = vrot.slane %v3892_v40, 2 }
 0x69f   : > { %v3894_v29 = vadd.f32 %v3893_v45, %v3892_v40 }
 0x6a1   : > { %v3895_v48 = vrot.slane %v3894_v29, 1 }
 0x6a3   : > { %v3896_v55 = vadd.f32 %v3895_v48, %v3894_v29 }
 0x6a5   : > { %3913 = vmatmul.f32.vlgmr.msrb.gmra.mxu2 %v3896_v55 }
 0x728   : > { %v3914_v12 = vpop.f32.mrf.mxu2 }
 0x729   : > { %v3917_v19 = vmul.f32 0.0009765625, %v3914_v12 }
 0x72b   : > { %5130 = vmatmul.msk.f32.vlgmr.msrb.gmra.mxu3 %vm3771_vm2, %v3917_v19 }
 0x7ae   : > { %v3938_v37 = vpop.f32.mrf.mxu3 }
 0x7af   : > { %v3939_v14 = vadd.f32 1e-05, %v3938_v37 }
 0x7b1   : > { %5448 = vrsqrt.f32 %v3939_v14  ;;  %vm3947_vm4 = vweird.f32 %v3939_v14 }
 0x7b7   : > { %v5449_v46 = vpop.eup %5448 }
 0x7b8   : > { %v3942_v7 = vmul.f32 %v5449_v46, %v3939_v14  ;;  %vm3948_vm3 = vweird.f32 %v5449_v46 }
 0x7b9   : > { %vm3949_vm5 = vmor %vm3947_vm4, %vm3948_vm3 }
 0x7ba   : > { %v3943_v10 = vmul.f32 %v5449_v46, %v3942_v7 }
 0x7bc   : > { %v3944_v4 = vmul.f32 0.5, %v3943_v10 }
 0x7be   : > { %v3945_v21 = vsub.f32 1.5, %v3944_v4 }
 0x7c0   : > { %v3946_v32 = vmul.f32 %v5449_v46, %v3945_v21 }
 0x7c2   : > { %v3950_v53 = vsel %vm3949_vm5, %v5449_v46, %v3946_v32 }
 0x7c3   : > { %v3952_v36 = vmul.f32 %v3951_v57, %v3950_v53 }
 0x7c5   : > { %v3953_v33 = vperm.slane %v3952_v36, 0 }
 0x7c7   : > { %v3954_v52 = vmul.f32 %v3953_v33, %v7267_v60  ;;  %v3955_v22 = vmul.f32 %v3953_v33, %v7271_v18  ;;  %v3956_v38 = vmul.f32 %v3953_v33, %v7275_v0  ;;  %v3957_v17 = vmul.f32 %v3953_v33, %v7283_v1 }
 0x7c8   : > { %v3958_v24 = vmul.f32 %v3953_v33, %v7287_v59  ;;  %v3959_v54 = vmul.f32 %v3953_v33, %v7293_v63  ;;  %v3960_v11 = vmul.f32 %v3953_v33, %v7299_v61  ;;  %v3961_v15 = vmul.f32 %v3953_v33, %v7305_v35 }
 0x7c9   : > { %v3962_v39 = vmul.f32 %v3953_v33, %v7311_v28  ;;  %v3963_v26 = vmul.f32 %v3953_v33, %v7317_v3  ;;  %v3964_v60 = vmul.f32 %v3953_v33, %v7323_v31  ;;  %v3965_v18 = vmul.f32 %v3953_v33, %v7329_v5  ;;  %v7484_v31 = vld [vmem:[%s7567_s3] ss:$0 sm:$0xff] }
 0x7ca   : > { %v3966_v0 = vmul.f32 %v3953_v33, %v7335_v20  ;;  %v3967_v1 = vmul.f32 %v3953_v33, %v7341_v8  ;;  %v3968_v59 = vmul.f32 %v3953_v33, %v7347_v50  ;;  %v3969_v63 = vmul.f32 %v3953_v33, %v7353_v43 }
 0x7cb   : > { %v3970_v61 = vmul.f32 %v3953_v33, %v7359_v47  ;;  %v3971_v35 = vmul.f32 %v3953_v33, %v7365_v34  ;;  %v3972_v28 = vmul.f32 %v3953_v33, %v7371_v56  ;;  %v3973_v3 = vmul.f32 %v3953_v33, %v7377_v51 }
 0x7cc   : > { %v3974_v5 = vmul.f32 %v3953_v33, %v7383_v9  ;;  %v3975_v20 = vmul.f32 %v3953_v33, %v7389_v44  ;;  %v3976_v8 = vmul.f32 %v3953_v33, %v7395_v41  ;;  %v3977_v50 = vmul.f32 %v3953_v33, %v7401_v2 }
 0x7cd   : > { %v3978_v43 = vmul.f32 %v3953_v33, %v7407_v23  ;;  %v3979_v47 = vmul.f32 %v3953_v33, %v7413_v58  ;;  %v3980_v34 = vmul.f32 %v3953_v33, %v7419_v6  ;;  %v3981_v56 = vmul.f32 %v3953_v33, %v7425_v62 }
 0x7ce   : > { %v3982_v51 = vmul.f32 %v3953_v33, %v7431_v30  ;;  %v3983_v42 = vmul.f32 %v3953_v33, %v7437_v27  ;;  %v3984_v9 = vmul.f32 %v3953_v33, %v7443_v13  ;;  %v7498_v44 = vmul.f32 %v3953_v33, %v7449_v25 }
 0x7cf   : > { %v3990_v41 = vadd.f32 %v7484_v31, %v3954_v52  ;;  %v3991_v2 = vadd.f32 %v7484_v31, %v3955_v22  ;;  %v3992_v23 = vadd.f32 %v7484_v31, %v3956_v38  ;;  %v3993_v58 = vadd.f32 %v7484_v31, %v3957_v17 }
 0x7d0   : > { %v3994_v6 = vadd.f32 %v7484_v31, %v3958_v24  ;;  %v3995_v62 = vadd.f32 %v7484_v31, %v3959_v54  ;;  %v3996_v30 = vadd.f32 %v7484_v31, %v3960_v11  ;;  %v3997_v27 = vadd.f32 %v7484_v31, %v3961_v15 }
 0x7d1   : > { %v3998_v13 = vadd.f32 %v7484_v31, %v3962_v39  ;;  %v3999_v25 = vadd.f32 %v7484_v31, %v3963_v26  ;;  %v4000_v49 = vadd.f32 %v7484_v31, %v3964_v60  ;;  %v4001_v16 = vadd.f32 %v7484_v31, %v3965_v18 }
 0x7d2   : > { %v4002_v40 = vadd.f32 %v7484_v31, %v3966_v0  ;;  %v4003_v45 = vadd.f32 %v7484_v31, %v3967_v1  ;;  %v4004_v29 = vadd.f32 %v7484_v31, %v3968_v59  ;;  %v4005_v48 = vadd.f32 %v7484_v31, %v3969_v63 }
 0x7d3   : > { %v4006_v55 = vadd.f32 %v7484_v31, %v3970_v61  ;;  %v4007_v12 = vadd.f32 %v7484_v31, %v3971_v35  ;;  %v4008_v19 = vadd.f32 %v7484_v31, %v3972_v28  ;;  %v4009_v37 = vadd.f32 %v7484_v31, %v3973_v3 }
 0x7d4   : > { %v4010_v14 = vadd.f32 %v7484_v31, %v3974_v5  ;;  %v4011_v46 = vadd.f32 %v7484_v31, %v3975_v20  ;;  %v4022_v7 = vmax.f32 %v3990_v41, 0.0  ;;  %v4023_v10 = vmax.f32 %v3991_v2, 0.0 }
 0x7d5   : > { %v4024_v4 = vmax.f32 %v3992_v23, 0.0  ;;  %v4025_v21 = vmax.f32 %v3993_v58, 0.0  ;;  %v4026_v32 = vmax.f32 %v3994_v6, 0.0  ;;  %v4027_v53 = vmax.f32 %v3995_v62, 0.0 }
 0x7d6   : > { %v4012_v57 = vadd.f32 %v7484_v31, %v3976_v8  ;;  %v4013_v36 = vadd.f32 %v7484_v31, %v3977_v50  ;;  %v4028_v33 = vmax.f32 %v3996_v30, 0.0  ;;  %v4029_v52 = vmax.f32 %v3997_v27, 0.0 }
 0x7d7   : > { %v4014_v22 = vadd.f32 %v7484_v31, %v3978_v43  ;;  %v4015_v38 = vadd.f32 %v7484_v31, %v3979_v47  ;;  %v4030_v17 = vmax.f32 %v3998_v13, 0.0  ;;  %v4031_v24 = vmax.f32 %v3999_v25, 0.0 }
 0x7d8   : > { %v4016_v54 = vadd.f32 %v7484_v31, %v3980_v34  ;;  %v4032_v11 = vmax.f32 %v4000_v49, 0.0  ;;  %v4033_v15 = vmax.f32 %v4001_v16, 0.0  ;;  %v4034_v39 = vmax.f32 %v4002_v40, 0.0 }
 0x7d9   : > { %v4035_v26 = vmax.f32 %v4003_v45, 0.0  ;;  %v5314_v60 = vpack.c.bf16 %v4023_v10, %v4022_v7  ;;  %v5319_v18 = vpack.c.bf16 %v4025_v21, %v4024_v4  ;;  %v5324_v0 = vpack.c.bf16 %v4027_v53, %v4026_v32 }
 0x7da   : > { %v4017_v1 = vadd.f32 %v7484_v31, %v3981_v56  ;;  %v4036_v59 = vmax.f32 %v4004_v29, 0.0  ;;  %v4037_v63 = vmax.f32 %v4005_v48, 0.0  ;;  %v5329_v61 = vpack.c.bf16 %v4029_v52, %v4028_v33 }
 0x7db   : > { %v4018_v35 = vadd.f32 %v7484_v31, %v3982_v51  ;;  %v4038_v28 = vmax.f32 %v4006_v55, 0.0  ;;  %v4039_v3 = vmax.f32 %v4007_v12, 0.0  ;;  %5315 = vst [vmem:[%s7530_s21] sm:$0xff] %v5314_v60   ;;  %v5334_v5 = vpack.c.bf16 %v4031_v24, %v4030_v17 }
 0x7dc   : > { %v4019_v20 = vadd.f32 %v7484_v31, %v3983_v42  ;;  %v4040_v8 = vmax.f32 %v4008_v19, 0.0  ;;  %v4041_v50 = vmax.f32 %v4009_v37, 0.0  ;;  %5391 = vst [vmem:[%s7530_s21 + $0x8] sm:$0xff] %v5319_v18   ;;  %v5339_v43 = vpack.c.bf16 %v4033_v15, %v4032_v11 }
 0x7dd   : > { %v4020_v47 = vadd.f32 %v7484_v31, %v3984_v9  ;;  %v4042_v34 = vmax.f32 %v4010_v14, 0.0  ;;  %v4043_v56 = vmax.f32 %v4011_v46, 0.0  ;;  %5392 = vst [vmem:[%s7530_s21 + $0x10] sm:$0xff] %v5324_v0   ;;  %v5344_v41 = vpack.c.bf16 %v4035_v26, %v4034_v39 }
 0x7de   : > { %v4021_v51 = vadd.f32 %v7484_v31, %v7498_v44  ;;  %v4044_v2 = vmax.f32 %v4012_v57, 0.0  ;;  %v4045_v23 = vmax.f32 %v4013_v36, 0.0  ;;  %5393 = vst [vmem:[%s7530_s21 + $0x18] sm:$0xff] %v5329_v61   ;;  %v5349_v42 = vpack.c.bf16 %v4037_v63, %v4036_v59 }
 0x7df   : > { %v4046_v58 = vmax.f32 %v4014_v22, 0.0  ;;  %v4047_v6 = vmax.f32 %v4015_v38, 0.0  ;;  %5394 = vst [vmem:[%s7530_s21 + $0x20] sm:$0xff] %v5334_v5   ;;  %v5354_v9 = vpack.c.bf16 %v4039_v3, %v4038_v28  ;;  %v4048_v62 = vmax.f32 %v4016_v54, 0.0 }
 0x7e0   : > { %v4049_v30 = vmax.f32 %v4017_v1, 0.0  ;;  %5395 = vst [vmem:[%s7530_s21 + $0x28] sm:$0xff] %v5339_v43   ;;  %v5359_v27 = vpack.c.bf16 %v4041_v50, %v4040_v8  ;;  %v4050_v13 = vmax.f32 %v4018_v35, 0.0  ;;  %v4051_v31 = vmax.f32 %v4019_v20, 0.0 }
 0x7e1   : > { %5396 = vst [vmem:[%s7530_s21 + $0x30] sm:$0xff] %v5344_v41   ;;  %v5364_v44 = vpack.c.bf16 %v4043_v56, %v4042_v34  ;;  %v4052_v25 = vmax.f32 %v4020_v47, 0.0  ;;  %v4053_v49 = vmax.f32 %v4021_v51, 0.0  ;;  %v5369_v16 = vpack.c.bf16 %v4045_v23, %v4044_v2 }
 0x7e2   : > { %5397 = vst [vmem:[%s7530_s21 + $0x38] sm:$0xff] %v5349_v42   ;;  %v5374_v40 = vpack.c.bf16 %v4047_v6, %v4046_v58  ;;  %v5379_v45 = vpack.c.bf16 %v4049_v30, %v4048_v62  ;;  %v5384_v29 = vpack.c.bf16 %v4051_v31, %v4050_v13 }
 0x7e3   : > { %5398 = vst [vmem:[%s7530_s21 + $0x40] sm:$0xff] %v5354_v9   ;;  %v5389_v48 = vpack.c.bf16 %v4053_v49, %v4052_v25 }
 0x7e4   : > { %5399 = vst [vmem:[%s7530_s21 + $0x48] sm:$0xff] %v5359_v27  }
 0x7e5   : > { %5400 = vst [vmem:[%s7530_s21 + $0x50] sm:$0xff] %v5364_v44  }
 0x7e6   : > { %5401 = vst [vmem:[%s7530_s21 + $0x58] sm:$0xff] %v5369_v16  }
 0x7e7   : > { %5402 = vst [vmem:[%s7530_s21 + $0x60] sm:$0xff] %v5374_v40  }
 0x7e8   : > { %5403 = vst [vmem:[%s7530_s21 + $0x68] sm:$0xff] %v5379_v45  }
 0x7e9   : > { %5404 = vst [vmem:[%s7530_s21 + $0x70] sm:$0xff] %v5384_v29  }
 0x7ea   : > { %5405 = vst [vmem:[%s7530_s21 + $0x78] sm:$0xff] %v5389_v48  }
 0x7eb PF: > { %s16_s23 = sadd.s32 1, %s5519_s23   ;;  %s7762_s21 = smov %s5515_s22 }
 0x7ec   : > { %p13_p5 = scmp.ge.s32.totalorder %s16_s23, 4   ;;  %s7763_s22 = smov %s7765_s24 }
 0x7ee   :  { %15 = sbr.rel (!%p13_p5) target bundleno = 2 (0x2), region = 82 }

</bundles_post_ra>
